<compile_context>
chip_gen: v6e
topology: v6e:2x2x1
jax: 0.10.0
libtpu: 0.0.40
codegen_flags: <defaults>
</compile_context>

<pallas_src>
import functools

import jax
import jax.numpy as jnp
from jax.experimental import pallas as pl
from jax.experimental.pallas import tpu as pltpu

BN_EPS = 1e-5
C_PAD = 8                       # input channels padded 3 -> 8 (sublane/lane friendly)
MAX_TILE = 2048                 # max points per grid step
VMEM_LIMIT = 48 * 1024 * 1024   # explicit scoped-VMEM budget (fits v7x 64 MiB physical)


def _round_up(x, m):
    return (x + m - 1) // m * m


# --------------------------------------------------------------------------
# Pallas kernels
# --------------------------------------------------------------------------
def _ppmlp_pool_kernel(*refs, n_layers):
    """Fused per-point MLP (linear+ReLU stack) + global max-pool over the tile.

    refs = (x, w0, b0, ..., w{L-1}, b{L-1}, out).  Weights may be 2-D (shared)
    or 3-D (per-batch folded weight, leading axis indexed by the batch grid axis).
    """
    x_ref = refs[0]
    out_ref = refs[-1]
    h = x_ref[0]                                            # (tn, C_in) bf16
    for i in range(n_layers):
        w_ref = refs[1 + 2 * i]
        b_ref = refs[2 + 2 * i]
        w = w_ref[0] if len(w_ref.shape) == 3 else w_ref[...]
        y = jnp.dot(h, w, preferred_element_type=jnp.float32) + b_ref[...]
        h = jnp.maximum(y, 0.0).astype(jnp.bfloat16)        # bf16 everywhere: max commutes
    tile_max = jnp.max(h, axis=0, keepdims=True)[None]      # (1, 1, C_out) bf16

    @pl.when(pl.program_id(1) == 0)
    def _():
        out_ref[...] = tile_max

    @pl.when(pl.program_id(1) > 0)
    def _():
        out_ref[...] = jnp.maximum(out_ref[...], tile_max)


def _fc_head_kernel(g_ref, w1_ref, b1_ref, w2_ref, b2_ref, w3_ref, b3_ref, o_ref):
    """Fused Linear->ReLU->Linear->ReLU->Linear head on a tiny (B, K) input."""
    h = jnp.dot(g_ref[...], w1_ref[...], preferred_element_type=jnp.float32) + b1_ref[...]
    h = jnp.maximum(h, 0.0).astype(jnp.bfloat16)
    h = jnp.dot(h, w2_ref[...], preferred_element_type=jnp.float32) + b2_ref[...]
    h = jnp.maximum(h, 0.0).astype(jnp.bfloat16)
    o_ref[...] = jnp.dot(h, w3_ref[...], preferred_element_type=jnp.float32) + b3_ref[...]


# --------------------------------------------------------------------------
# Pallas wrappers
# --------------------------------------------------------------------------
def _layer_specs(layers):
    """In-specs + args for a layer stack; 3-D weights are per-batch folded."""
    in_specs, args = [], []
    for w, b in layers:
        if w.ndim == 3:
            # (B, C_in, C_out): indexed by the batch grid axis.
            in_specs.append(
                pl.BlockSpec((1,) + tuple(w.shape[1:]), lambda bi, ni: (bi, 0, 0)))
        else:
            # Shared 2-D weight, resident block.
            in_specs.append(pl.BlockSpec(tuple(w.shape), lambda bi, ni: (0, 0)))
        args.append(w)
        in_specs.append(pl.BlockSpec(tuple(b.shape), lambda bi, ni: (0, 0)))
        args.append(b)
    return in_specs, args


def ppmlp_pool(x, layers, tn):
    """x: (B, N, C_in) -> max over points of the per-point MLP: (B, C_out) bf16."""
    B, N, C_in = x.shape
    c_out = layers[-1][0].shape[-1]
    layer_specs, layer_args = _layer_specs(layers)
    out = pl.pallas_call(
        functools.partial(_ppmlp_pool_kernel, n_layers=len(layers)),
        out_shape=jax.ShapeDtypeStruct((B, 1, c_out), jnp.bfloat16),
        grid=(B, N // tn),
        in_specs=[pl.BlockSpec((1, tn, C_in), lambda bi, ni: (bi, ni, 0))] + layer_specs,
        out_specs=pl.BlockSpec((1, 1, c_out), lambda bi, ni: (bi, 0, 0)),
        compiler_params=pltpu.CompilerParams(
            dimension_semantics=("parallel", "arbitrary"),
            vmem_limit_bytes=VMEM_LIMIT),
    )(x, *layer_args)
    return out[:, 0, :]


def fc_head(g, layers):
    """g: (B, K) bf16 -> Linear/ReLU x2 + Linear, fused; lane-dense padded output."""
    (w1, b1), (w2, b2), (w3, b3) = layers
    B = g.shape[0]
    out_dim = w3.shape[1]
    out_pad = _round_up(out_dim, 128)
    if out_pad != out_dim:     # keep the output lane-dense; slice outside
        w3 = jnp.pad(w3, ((0, 0), (0, out_pad - out_dim)))
        b3 = jnp.pad(b3, ((0, 0), (0, out_pad - out_dim)))
    args = (g, w1, b1, w2, b2, w3, b3)
    in_specs = [pl.BlockSpec(tuple(a.shape), lambda i: (0, 0)) for a in args]  # all 2-D
    out = pl.pallas_call(
        _fc_head_kernel,
        out_shape=jax.ShapeDtypeStruct((B, out_pad), jnp.float32),
        grid=(1,),
        in_specs=in_specs,
        out_specs=pl.BlockSpec((B, out_pad), lambda i: (0, 0)),
        compiler_params=pltpu.CompilerParams(
            dimension_semantics=("arbitrary",),
            vmem_limit_bytes=VMEM_LIMIT),
    )(*args)
    return out[:, :out_dim]


# --------------------------------------------------------------------------
# Parameter initialization (deterministic, PyTorch-default-like, eval-mode BN)
# --------------------------------------------------------------------------
def _init_linear(key, in_dim, out_dim):
    k1, k2 = jax.random.split(key)
    bound = 1.0 / jnp.sqrt(jnp.float32(in_dim))
    w = jax.random.uniform(k1, (in_dim, out_dim), jnp.float32, -bound, bound)
    b = jax.random.uniform(k2, (out_dim,), jnp.float32, -bound, bound)
    return w, b


def _bn_affine(c):
    gamma = jnp.ones((c,), jnp.float32)
    beta = jnp.zeros((c,), jnp.float32)
    mean = jnp.zeros((c,), jnp.float32)
    var = jnp.ones((c,), jnp.float32)
    scale = gamma / jnp.sqrt(var + BN_EPS)
    shift = beta - mean * scale
    return scale, shift


def _fold_bn_after(w, b, scale, shift):
    # y = (x @ w + b) * scale + shift
    return w * scale[None, :], b * scale + shift


def _fold_bn_before(w, b, scale, shift):
    # y = (x * scale + shift) @ w + b
    return w * scale[:, None], b + shift @ w


def _pack(w, b):
    """bf16 weight, f32 (1, C) bias."""
    return w.astype(jnp.bfloat16), b.reshape(1, -1).astype(jnp.float32)


def init_tnet(key, dim, in_pad=None):
    ks = jax.random.split(key, 6)
    w0, b0 = _fold_bn_after(*_init_linear(ks[0], dim, 64), *_bn_affine(64))
    if in_pad is not None and in_pad > dim:
        # Zero rows for the zero-padded input channels (exact).
        w0 = jnp.pad(w0, ((0, in_pad - dim), (0, 0)))
    return {
        "conv": [
            _pack(w0, b0),
            _pack(*_fold_bn_after(*_init_linear(ks[1], 64, 128), *_bn_affine(128))),
            _pack(*_fold_bn_after(*_init_linear(ks[2], 128, 1024), *_bn_affine(1024))),
        ],
        "fc": [
            _pack(*_fold_bn_after(*_init_linear(ks[3], 1024, 512), *_bn_affine(512))),
            _pack(*_fold_bn_after(*_init_linear(ks[4], 512, 256), *_bn_affine(256))),
            _pack(*_init_linear(ks[5], 256, dim * dim)),
        ],
    }


def init_ppmlp(key, in_dim, out_dims):
    ks = jax.random.split(key, len(out_dims))
    layers, d = [], in_dim
    for kk, out in zip(ks, out_dims):
        layers.append(_pack(*_fold_bn_after(*_init_linear(kk, d, out), *_bn_affine(out))))
        d = out
    return layers


def init_cls_model(key, num_classes=3):
    ks = jax.random.split(key, 7)
    p = {
        "t_net": init_tnet(ks[0], 3, in_pad=C_PAD),
        "mlp64_64": init_ppmlp(ks[1], 3, [64, 64]),
        "feature_transform": init_tnet(ks[2], 64),
        "mlp64_128_1024": init_ppmlp(ks[3], 64, [64, 128, 1024]),
    }
    w1, b1 = _init_linear(ks[4], 1024, 512)
    w2, b2 = _init_linear(ks[5], 512, 256)
    w3, b3 = _init_linear(ks[6], 256, num_classes)
    # Classifier order is Linear -> ReLU -> BN -> Dropout (matches the PyTorch
    # spec); fold eval-mode BN into the *next* linear (exact in eval mode).
    # Dropout = identity (eval).
    w2, b2 = _fold_bn_before(w2, b2, *_bn_affine(512))
    w3, b3 = _fold_bn_before(w3, b3, *_bn_affine(256))
    p["cls"] = [_pack(w1, b1), _pack(w2, b2), _pack(w3, b3)]
    return p


# --------------------------------------------------------------------------
# Forward pass
# --------------------------------------------------------------------------
def _fold_transform(t, w):
    """(x @ t.T) @ w == x @ (t.T @ w); returns per-batch folded weight (B, D, C)."""
    return jnp.einsum("bji,jk->bik", t, w.astype(jnp.float32)).astype(jnp.bfloat16)


def cls_model_forward(params, points, with_smax=False):
    """points: (B, N, 3) -> class scores (B, num_classes)."""
    B, N, C = points.shape
    # Row tiling: largest tile (multiple of 16, capped at MAX_TILE) such that
    # tn * k covers N with minimal padding; for N <= MAX_TILE the max-pool
    # reduction collapses to a single grid step per batch.
    n16 = _round_up(N, 16)
    k = -(-n16 // MAX_TILE)
    tn = _round_up(-(-n16 // k), 16)
    n_pad = tn * k
    if n_pad != N:
        # Pad by duplicating the last point: exact, since every reduction over
        # points downstream is a max (duplicates never change the result).
        pad = jnp.broadcast_to(points[:, -1:, :], (B, n_pad - N, C))
        points = jnp.concatenate([points, pad], axis=1)
    # Channel pad 3 -> 8 with zeros (lane/DMA friendly; matching zero weight rows).
    pts = jnp.pad(points, ((0, 0), (0, 0), (0, C_PAD - C))).astype(jnp.bfloat16)

    eye3 = jnp.eye(3, dtype=jnp.float32)[None]
    eye64 = jnp.eye(64, dtype=jnp.float32)[None]

    # Input transform (T-Net, dim=3): fused conv stack + max-pool, fused FC head.
    g3 = ppmlp_pool(pts, params["t_net"]["conv"], tn)                  # (B, 1024) bf16
    t3 = fc_head(g3, params["t_net"]["fc"]).reshape(B, 3, 3) + eye3    # (B, 3, 3)

    # Fold t3 into the first mlp64_64 weight (rows padded to the padded channels).
    (w1, b1), (w2, b2) = params["mlp64_64"]
    w1_b = _fold_transform(t3, w1)                                     # (B, 3, 64)
    w1_b = jnp.pad(w1_b, ((0, 0), (0, C_PAD - 3), (0, 0)))             # (B, 8, 64)
    prefix = [(w1_b, b1), (w2, b2)]

    # Feature transform (T-Net, dim=64): the 3->64->64 MLP is recomputed per tile
    # as prefix layers of the pool kernel, so n64 never hits HBM.
    g64 = ppmlp_pool(pts, prefix + params["feature_transform"]["conv"], tn)
    t64 = fc_head(g64, params["feature_transform"]["fc"]).reshape(B, 64, 64) + eye64

    # Final per-point stack (prefix + 64->64->128->1024 with t64 folded) + max-pool.
    layers = list(params["mlp64_128_1024"])
    wa, ba = layers[0]
    wa_b = _fold_transform(t64, wa)                                    # (B, 64, 64)
    g = ppmlp_pool(pts, prefix + [(wa_b, ba)] + layers[1:], tn)        # (B, 1024) bf16

    # Fused classifier head 1024 -> 512 -> 256 -> num_classes.
    out = fc_head(g, params["cls"])                                    # (B, num_classes)
    if with_smax:
        out = jax.nn.softmax(out, axis=-1)
    return out


# --------------------------------------------------------------------------
if __name__ == "__main__":
    B, N, NUM_CLASSES = 2, 16, 3
    key = jax.random.PRNGKey(0)
    k_param, k_data = jax.random.split(key)

    params = init_cls_model(k_param, num_classes=NUM_CLASSES)
    points = jax.random.normal(k_data, (B, N, 3), dtype=jnp.float32)

    fwd = jax.jit(cls_model_forward, static_argnames=("with_smax",))
    scores = fwd(params, points, with_smax=False)
    scores = jax.block_until_ready(scores)
    assert scores.shape == (B, NUM_CLASSES), scores.shape
    assert bool(jnp.all(jnp.isfinite(scores)))
    print("KERNEL_OK")
</pallas_src>

<mosaic_0001>
module attributes {stable_mosaic.version = 11 : i64} {
  func.func @_ppmlp_pool_kernel(%arg0: i32, %arg1: i32, %arg2: memref<1x16x8xbf16, #tpu.memory_space<vmem>>, %arg3: memref<8x64xbf16, #tpu.memory_space<vmem>>, %arg4: memref<1x64xf32, #tpu.memory_space<vmem>>, %arg5: memref<64x128xbf16, #tpu.memory_space<vmem>>, %arg6: memref<1x128xf32, #tpu.memory_space<vmem>>, %arg7: memref<128x1024xbf16, #tpu.memory_space<vmem>>, %arg8: memref<1x1024xf32, #tpu.memory_space<vmem>>, %arg9: memref<1x1x1024xbf16, #tpu.memory_space<vmem>>) attributes {dimension_semantics = [#tpu.dimension_semantics<parallel>, #tpu.dimension_semantics<arbitrary>], iteration_bounds = array<i64: 2, 1>, scalar_prefetch = 0 : i64, scratch_operands = 0 : i64, tpu.core_type = #tpu.core_type<tc>, window_params = [{transform_indices = @transform_0, window_bounds = array<i64: 1, 16, 8>}, {pipeline_mode = #tpu.pipeline_mode<synchronous>, transform_indices = @transform_1, window_bounds = array<i64: 8, 64>}, {pipeline_mode = #tpu.pipeline_mode<synchronous>, transform_indices = @transform_2, window_bounds = array<i64: 1, 64>}, {pipeline_mode = #tpu.pipeline_mode<synchronous>, transform_indices = @transform_3, window_bounds = array<i64: 64, 128>}, {pipeline_mode = #tpu.pipeline_mode<synchronous>, transform_indices = @transform_4, window_bounds = array<i64: 1, 128>}, {pipeline_mode = #tpu.pipeline_mode<synchronous>, transform_indices = @transform_5, window_bounds = array<i64: 128, 1024>}, {pipeline_mode = #tpu.pipeline_mode<synchronous>, transform_indices = @transform_6, window_bounds = array<i64: 1, 1024>}, {transform_indices = @transform_7, window_bounds = array<i64: 1, 1, 1024>}]} {
    %c0 = arith.constant 0 : index
    %c0_0 = arith.constant 0 : index
    %c0_1 = arith.constant 0 : index
    %0 = vector.load %arg2[%c0, %c0_0, %c0_1] : memref<1x16x8xbf16, #tpu.memory_space<vmem>>, vector<1x16x8xbf16>
    %1 = vector.shape_cast %0 : vector<1x16x8xbf16> to vector<16x8xbf16>
    %c0_2 = arith.constant 0 : index
    %c0_3 = arith.constant 0 : index
    %2 = vector.load %arg3[%c0_2, %c0_3] : memref<8x64xbf16, #tpu.memory_space<vmem>>, vector<8x64xbf16>
    %cst = arith.constant dense<0.000000e+00> : vector<16x64xf32>
    %3 = tpu.matmul %1, %2, %cst {dimension_numbers = #tpu.dot_dimension_numbers<[1], [0], [0], [1], [0, 0, 1, 1], [], []>} : vector<16x8xbf16>, vector<8x64xbf16>, vector<16x64xf32> -> vector<16x64xf32>
    %c0_4 = arith.constant 0 : index
    %c0_5 = arith.constant 0 : index
    %4 = vector.load %arg4[%c0_4, %c0_5] : memref<1x64xf32, #tpu.memory_space<vmem>>, vector<1x64xf32>
    %5 = vector.broadcast %4 : vector<1x64xf32> to vector<16x64xf32>
    %6 = arith.addf %3, %5 : vector<16x64xf32>
    %cst_6 = arith.constant 0.000000e+00 : f32
    %7 = vector.broadcast %cst_6 : f32 to vector<16x64xf32>
    %8 = arith.maximumf %6, %7 : vector<16x64xf32>
    %9 = arith.truncf %8 : vector<16x64xf32> to vector<16x64xbf16>
    %c0_7 = arith.constant 0 : index
    %c0_8 = arith.constant 0 : index
    %10 = vector.load %arg5[%c0_7, %c0_8] : memref<64x128xbf16, #tpu.memory_space<vmem>>, vector<64x128xbf16>
    %cst_9 = arith.constant dense<0.000000e+00> : vector<16x128xf32>
    %11 = tpu.matmul %9, %10, %cst_9 {dimension_numbers = #tpu.dot_dimension_numbers<[1], [0], [0], [1], [0, 0, 1, 1], [], []>} : vector<16x64xbf16>, vector<64x128xbf16>, vector<16x128xf32> -> vector<16x128xf32>
    %c0_10 = arith.constant 0 : index
    %c0_11 = arith.constant 0 : index
    %12 = vector.load %arg6[%c0_10, %c0_11] : memref<1x128xf32, #tpu.memory_space<vmem>>, vector<1x128xf32>
    %13 = vector.broadcast %12 : vector<1x128xf32> to vector<16x128xf32>
    %14 = arith.addf %11, %13 : vector<16x128xf32>
    %cst_12 = arith.constant 0.000000e+00 : f32
    %15 = vector.broadcast %cst_12 : f32 to vector<16x128xf32>
    %16 = arith.maximumf %14, %15 : vector<16x128xf32>
    %17 = arith.truncf %16 : vector<16x128xf32> to vector<16x128xbf16>
    %c0_13 = arith.constant 0 : index
    %c0_14 = arith.constant 0 : index
    %18 = vector.load %arg7[%c0_13, %c0_14] : memref<128x1024xbf16, #tpu.memory_space<vmem>>, vector<128x1024xbf16>
    %cst_15 = arith.constant dense<0.000000e+00> : vector<16x1024xf32>
    %19 = tpu.matmul %17, %18, %cst_15 {dimension_numbers = #tpu.dot_dimension_numbers<[1], [0], [0], [1], [0, 0, 1, 1], [], []>} : vector<16x128xbf16>, vector<128x1024xbf16>, vector<16x1024xf32> -> vector<16x1024xf32>
    %c0_16 = arith.constant 0 : index
    %c0_17 = arith.constant 0 : index
    %20 = vector.load %arg8[%c0_16, %c0_17] : memref<1x1024xf32, #tpu.memory_space<vmem>>, vector<1x1024xf32>
    %21 = vector.broadcast %20 : vector<1x1024xf32> to vector<16x1024xf32>
    %22 = arith.addf %19, %21 : vector<16x1024xf32>
    %cst_18 = arith.constant 0.000000e+00 : f32
    %23 = vector.broadcast %cst_18 : f32 to vector<16x1024xf32>
    %24 = arith.maximumf %22, %23 : vector<16x1024xf32>
    %25 = arith.truncf %24 : vector<16x1024xf32> to vector<16x1024xbf16>
    %cst_19 = arith.constant dense<0xFF80> : vector<1024xbf16>
    %26 = vector.multi_reduction <maximumf>, %25, %cst_19 [0] : vector<16x1024xbf16> to vector<1024xbf16>
    %27 = vector.shape_cast %26 : vector<1024xbf16> to vector<1x1024xbf16>
    %28 = vector.shape_cast %27 : vector<1x1024xbf16> to vector<1x1x1024xbf16>
    %c0_i32 = arith.constant 0 : i32
    %29 = arith.cmpi eq, %arg1, %c0_i32 : i32
    %30 = arith.extui %29 : i1 to i32
    %c0_i32_20 = arith.constant 0 : i32
    %31 = arith.cmpi ne, %30, %c0_i32_20 : i32
    scf.if %31 {
      %c0_23 = arith.constant 0 : index
      %c0_24 = arith.constant 0 : index
      %c0_25 = arith.constant 0 : index
      %35 = vector.load %arg9[%c0_23, %c0_24, %c0_25] : memref<1x1x1024xbf16, #tpu.memory_space<vmem>>, vector<1x1x1024xbf16>
      tpu.vector_store %arg9[%c0_23, %c0_24, %c0_25], %28 {strides = array<i32>} : memref<1x1x1024xbf16, #tpu.memory_space<vmem>>, vector<1x1x1024xbf16>,
    } else {
    }
    %c0_i32_21 = arith.constant 0 : i32
    %32 = arith.cmpi sgt, %arg1, %c0_i32_21 : i32
    %33 = arith.extui %32 : i1 to i32
    %c0_i32_22 = arith.constant 0 : i32
    %34 = arith.cmpi ne, %33, %c0_i32_22 : i32
    scf.if %34 {
      %c0_23 = arith.constant 0 : index
      %c0_24 = arith.constant 0 : index
      %c0_25 = arith.constant 0 : index
      %35 = vector.load %arg9[%c0_23, %c0_24, %c0_25] : memref<1x1x1024xbf16, #tpu.memory_space<vmem>>, vector<1x1x1024xbf16>
      %36 = arith.maximumf %35, %28 : vector<1x1x1024xbf16>
      %c0_26 = arith.constant 0 : index
      %c0_27 = arith.constant 0 : index
      %c0_28 = arith.constant 0 : index
      %37 = vector.load %arg9[%c0_26, %c0_27, %c0_28] : memref<1x1x1024xbf16, #tpu.memory_space<vmem>>, vector<1x1x1024xbf16>
      tpu.vector_store %arg9[%c0_26, %c0_27, %c0_28], %36 {strides = array<i32>} : memref<1x1x1024xbf16, #tpu.memory_space<vmem>>, vector<1x1x1024xbf16>,
    } else {
    }
    return
  }
  func.func @transform_0(%arg0: i32, %arg1: i32) -> (i32, i32, i32) {
    %c0_i32 = arith.constant 0 : i32
    %c0_i32_0 = arith.constant 0 : i32
    return %arg0, %arg1, %c0_i32 : i32, i32, i32
  }
  func.func @transform_1(%arg0: i32, %arg1: i32) -> (i32, i32) {
    %c0_i32 = arith.constant 0 : i32
    %c0_i32_0 = arith.constant 0 : i32
    %c0_i32_1 = arith.constant 0 : i32
    return %c0_i32, %c0_i32_0 : i32, i32
  }
  func.func @transform_2(%arg0: i32, %arg1: i32) -> (i32, i32) {
    %c0_i32 = arith.constant 0 : i32
    %c0_i32_0 = arith.constant 0 : i32
    %c0_i32_1 = arith.constant 0 : i32
    return %c0_i32, %c0_i32_0 : i32, i32
  }
  func.func @transform_3(%arg0: i32, %arg1: i32) -> (i32, i32) {
    %c0_i32 = arith.constant 0 : i32
    %c0_i32_0 = arith.constant 0 : i32
    %c0_i32_1 = arith.constant 0 : i32
    return %c0_i32, %c0_i32_0 : i32, i32
  }
  func.func @transform_4(%arg0: i32, %arg1: i32) -> (i32, i32) {
    %c0_i32 = arith.constant 0 : i32
    %c0_i32_0 = arith.constant 0 : i32
    %c0_i32_1 = arith.constant 0 : i32
    return %c0_i32, %c0_i32_0 : i32, i32
  }
  func.func @transform_5(%arg0: i32, %arg1: i32) -> (i32, i32) {
    %c0_i32 = arith.constant 0 : i32
    %c0_i32_0 = arith.constant 0 : i32
    %c0_i32_1 = arith.constant 0 : i32
    return %c0_i32, %c0_i32_0 : i32, i32
  }
  func.func @transform_6(%arg0: i32, %arg1: i32) -> (i32, i32) {
    %c0_i32 = arith.constant 0 : i32
    %c0_i32_0 = arith.constant 0 : i32
    %c0_i32_1 = arith.constant 0 : i32
    return %c0_i32, %c0_i32_0 : i32, i32
  }
  func.func @transform_7(%arg0: i32, %arg1: i32) -> (i32, i32, i32) {
    %c0_i32 = arith.constant 0 : i32
    %c0_i32_0 = arith.constant 0 : i32
    %c0_i32_1 = arith.constant 0 : i32
    return %arg0, %c0_i32, %c0_i32_0 : i32, i32, i32
  }
}

module attributes {stable_mosaic.version = 11 : i64} {
  func.func @_fc_head_kernel(%arg0: i32, %arg1: memref<2x1024xbf16, #tpu.memory_space<vmem>>, %arg2: memref<1024x512xbf16, #tpu.memory_space<vmem>>, %arg3: memref<1x512xf32, #tpu.memory_space<vmem>>, %arg4: memref<512x256xbf16, #tpu.memory_space<vmem>>, %arg5: memref<1x256xf32, #tpu.memory_space<vmem>>, %arg6: memref<256x128xbf16, #tpu.memory_space<vmem>>, %arg7: memref<1x128xf32, #tpu.memory_space<vmem>>, %arg8: memref<2x128xf32, #tpu.memory_space<vmem>>) attributes {dimension_semantics = [#tpu.dimension_semantics<arbitrary>], iteration_bounds = array<i64: 1>, scalar_prefetch = 0 : i64, scratch_operands = 0 : i64, tpu.core_type = #tpu.core_type<tc>, window_params = [{pipeline_mode = #tpu.pipeline_mode<synchronous>, transform_indices = @transform_0, window_bounds = array<i64: 2, 1024>}, {pipeline_mode = #tpu.pipeline_mode<synchronous>, transform_indices = @transform_1, window_bounds = array<i64: 1024, 512>}, {pipeline_mode = #tpu.pipeline_mode<synchronous>, transform_indices = @transform_2, window_bounds = array<i64: 1, 512>}, {pipeline_mode = #tpu.pipeline_mode<synchronous>, transform_indices = @transform_3, window_bounds = array<i64: 512, 256>}, {pipeline_mode = #tpu.pipeline_mode<synchronous>, transform_indices = @transform_4, window_bounds = array<i64: 1, 256>}, {pipeline_mode = #tpu.pipeline_mode<synchronous>, transform_indices = @transform_5, window_bounds = array<i64: 256, 128>}, {pipeline_mode = #tpu.pipeline_mode<synchronous>, transform_indices = @transform_6, window_bounds = array<i64: 1, 128>}, {pipeline_mode = #tpu.pipeline_mode<synchronous>, transform_indices = @transform_7, window_bounds = array<i64: 2, 128>}]} {
    %c0 = arith.constant 0 : index
    %c0_0 = arith.constant 0 : index
    %0 = vector.load %arg1[%c0, %c0_0] : memref<2x1024xbf16, #tpu.memory_space<vmem>>, vector<2x1024xbf16>
    %c0_1 = arith.constant 0 : index
    %c0_2 = arith.constant 0 : index
    %1 = vector.load %arg2[%c0_1, %c0_2] : memref<1024x512xbf16, #tpu.memory_space<vmem>>, vector<1024x512xbf16>
    %cst = arith.constant dense<0.000000e+00> : vector<2x512xf32>
    %2 = tpu.matmul %0, %1, %cst {dimension_numbers = #tpu.dot_dimension_numbers<[1], [0], [0], [1], [0, 0, 1, 1], [], []>} : vector<2x1024xbf16>, vector<1024x512xbf16>, vector<2x512xf32> -> vector<2x512xf32>
    %c0_3 = arith.constant 0 : index
    %c0_4 = arith.constant 0 : index
    %3 = vector.load %arg3[%c0_3, %c0_4] : memref<1x512xf32, #tpu.memory_space<vmem>>, vector<1x512xf32>
    %4 = vector.broadcast %3 : vector<1x512xf32> to vector<2x512xf32>
    %5 = arith.addf %2, %4 : vector<2x512xf32>
    %cst_5 = arith.constant 0.000000e+00 : f32
    %6 = vector.broadcast %cst_5 : f32 to vector<2x512xf32>
    %7 = arith.maximumf %5, %6 : vector<2x512xf32>
    %8 = arith.truncf %7 : vector<2x512xf32> to vector<2x512xbf16>
    %c0_6 = arith.constant 0 : index
    %c0_7 = arith.constant 0 : index
    %9 = vector.load %arg4[%c0_6, %c0_7] : memref<512x256xbf16, #tpu.memory_space<vmem>>, vector<512x256xbf16>
    %cst_8 = arith.constant dense<0.000000e+00> : vector<2x256xf32>
    %10 = tpu.matmul %8, %9, %cst_8 {dimension_numbers = #tpu.dot_dimension_numbers<[1], [0], [0], [1], [0, 0, 1, 1], [], []>} : vector<2x512xbf16>, vector<512x256xbf16>, vector<2x256xf32> -> vector<2x256xf32>
    %c0_9 = arith.constant 0 : index
    %c0_10 = arith.constant 0 : index
    %11 = vector.load %arg5[%c0_9, %c0_10] : memref<1x256xf32, #tpu.memory_space<vmem>>, vector<1x256xf32>
    %12 = vector.broadcast %11 : vector<1x256xf32> to vector<2x256xf32>
    %13 = arith.addf %10, %12 : vector<2x256xf32>
    %cst_11 = arith.constant 0.000000e+00 : f32
    %14 = vector.broadcast %cst_11 : f32 to vector<2x256xf32>
    %15 = arith.maximumf %13, %14 : vector<2x256xf32>
    %16 = arith.truncf %15 : vector<2x256xf32> to vector<2x256xbf16>
    %c0_12 = arith.constant 0 : index
    %c0_13 = arith.constant 0 : index
    %17 = vector.load %arg6[%c0_12, %c0_13] : memref<256x128xbf16, #tpu.memory_space<vmem>>, vector<256x128xbf16>
    %cst_14 = arith.constant dense<0.000000e+00> : vector<2x128xf32>
    %18 = tpu.matmul %16, %17, %cst_14 {dimension_numbers = #tpu.dot_dimension_numbers<[1], [0], [0], [1], [0, 0, 1, 1], [], []>} : vector<2x256xbf16>, vector<256x128xbf16>, vector<2x128xf32> -> vector<2x128xf32>
    %c0_15 = arith.constant 0 : index
    %c0_16 = arith.constant 0 : index
    %19 = vector.load %arg7[%c0_15, %c0_16] : memref<1x128xf32, #tpu.memory_space<vmem>>, vector<1x128xf32>
    %20 = vector.broadcast %19 : vector<1x128xf32> to vector<2x128xf32>
    %21 = arith.addf %18, %20 : vector<2x128xf32>
    %c0_17 = arith.constant 0 : index
    %c0_18 = arith.constant 0 : index
    %22 = vector.load %arg8[%c0_17, %c0_18] : memref<2x128xf32, #tpu.memory_space<vmem>>, vector<2x128xf32>
    tpu.vector_store %arg8[%c0_17, %c0_18], %21 {strides = array<i32>} : memref<2x128xf32, #tpu.memory_space<vmem>>, vector<2x128xf32>,
    return
  }
  func.func @transform_0(%arg0: i32) -> (i32, i32) {
    %c0_i32 = arith.constant 0 : i32
    %c0_i32_0 = arith.constant 0 : i32
    %c0_i32_1 = arith.constant 0 : i32
    return %c0_i32, %c0_i32_0 : i32, i32
  }
  func.func @transform_1(%arg0: i32) -> (i32, i32) {
    %c0_i32 = arith.constant 0 : i32
    %c0_i32_0 = arith.constant 0 : i32
    %c0_i32_1 = arith.constant 0 : i32
    return %c0_i32, %c0_i32_0 : i32, i32
  }
  func.func @transform_2(%arg0: i32) -> (i32, i32) {
    %c0_i32 = arith.constant 0 : i32
    %c0_i32_0 = arith.constant 0 : i32
    %c0_i32_1 = arith.constant 0 : i32
    return %c0_i32, %c0_i32_0 : i32, i32
  }
  func.func @transform_3(%arg0: i32) -> (i32, i32) {
    %c0_i32 = arith.constant 0 : i32
    %c0_i32_0 = arith.constant 0 : i32
    %c0_i32_1 = arith.constant 0 : i32
    return %c0_i32, %c0_i32_0 : i32, i32
  }
  func.func @transform_4(%arg0: i32) -> (i32, i32) {
    %c0_i32 = arith.constant 0 : i32
    %c0_i32_0 = arith.constant 0 : i32
    %c0_i32_1 = arith.constant 0 : i32
    return %c0_i32, %c0_i32_0 : i32, i32
  }
  func.func @transform_5(%arg0: i32) -> (i32, i32) {
    %c0_i32 = arith.constant 0 : i32
    %c0_i32_0 = arith.constant 0 : i32
    %c0_i32_1 = arith.constant 0 : i32
    return %c0_i32, %c0_i32_0 : i32, i32
  }
  func.func @transform_6(%arg0: i32) -> (i32, i32) {
    %c0_i32 = arith.constant 0 : i32
    %c0_i32_0 = arith.constant 0 : i32
    %c0_i32_1 = arith.constant 0 : i32
    return %c0_i32, %c0_i32_0 : i32, i32
  }
  func.func @transform_7(%arg0: i32) -> (i32, i32) {
    %c0_i32 = arith.constant 0 : i32
    %c0_i32_0 = arith.constant 0 : i32
    %c0_i32_1 = arith.constant 0 : i32
    return %c0_i32, %c0_i32_0 : i32, i32
  }
}

module attributes {stable_mosaic.version = 11 : i64} {
  func.func @_fc_head_kernel(%arg0: i32, %arg1: memref<2x1024xbf16, #tpu.memory_space<vmem>>, %arg2: memref<1024x512xbf16, #tpu.memory_space<vmem>>, %arg3: memref<1x512xf32, #tpu.memory_space<vmem>>, %arg4: memref<512x256xbf16, #tpu.memory_space<vmem>>, %arg5: memref<1x256xf32, #tpu.memory_space<vmem>>, %arg6: memref<256x4096xbf16, #tpu.memory_space<vmem>>, %arg7: memref<1x4096xf32, #tpu.memory_space<vmem>>, %arg8: memref<2x4096xf32, #tpu.memory_space<vmem>>) attributes {dimension_semantics = [#tpu.dimension_semantics<arbitrary>], iteration_bounds = array<i64: 1>, scalar_prefetch = 0 : i64, scratch_operands = 0 : i64, tpu.core_type = #tpu.core_type<tc>, window_params = [{pipeline_mode = #tpu.pipeline_mode<synchronous>, transform_indices = @transform_0, window_bounds = array<i64: 2, 1024>}, {pipeline_mode = #tpu.pipeline_mode<synchronous>, transform_indices = @transform_1, window_bounds = array<i64: 1024, 512>}, {pipeline_mode = #tpu.pipeline_mode<synchronous>, transform_indices = @transform_2, window_bounds = array<i64: 1, 512>}, {pipeline_mode = #tpu.pipeline_mode<synchronous>, transform_indices = @transform_3, window_bounds = array<i64: 512, 256>}, {pipeline_mode = #tpu.pipeline_mode<synchronous>, transform_indices = @transform_4, window_bounds = array<i64: 1, 256>}, {pipeline_mode = #tpu.pipeline_mode<synchronous>, transform_indices = @transform_5, window_bounds = array<i64: 256, 4096>}, {pipeline_mode = #tpu.pipeline_mode<synchronous>, transform_indices = @transform_6, window_bounds = array<i64: 1, 4096>}, {pipeline_mode = #tpu.pipeline_mode<synchronous>, transform_indices = @transform_7, window_bounds = array<i64: 2, 4096>}]} {
    %c0 = arith.constant 0 : index
    %c0_0 = arith.constant 0 : index
    %0 = vector.load %arg1[%c0, %c0_0] : memref<2x1024xbf16, #tpu.memory_space<vmem>>, vector<2x1024xbf16>
    %c0_1 = arith.constant 0 : index
    %c0_2 = arith.constant 0 : index
    %1 = vector.load %arg2[%c0_1, %c0_2] : memref<1024x512xbf16, #tpu.memory_space<vmem>>, vector<1024x512xbf16>
    %cst = arith.constant dense<0.000000e+00> : vector<2x512xf32>
    %2 = tpu.matmul %0, %1, %cst {dimension_numbers = #tpu.dot_dimension_numbers<[1], [0], [0], [1], [0, 0, 1, 1], [], []>} : vector<2x1024xbf16>, vector<1024x512xbf16>, vector<2x512xf32> -> vector<2x512xf32>
    %c0_3 = arith.constant 0 : index
    %c0_4 = arith.constant 0 : index
    %3 = vector.load %arg3[%c0_3, %c0_4] : memref<1x512xf32, #tpu.memory_space<vmem>>, vector<1x512xf32>
    %4 = vector.broadcast %3 : vector<1x512xf32> to vector<2x512xf32>
    %5 = arith.addf %2, %4 : vector<2x512xf32>
    %cst_5 = arith.constant 0.000000e+00 : f32
    %6 = vector.broadcast %cst_5 : f32 to vector<2x512xf32>
    %7 = arith.maximumf %5, %6 : vector<2x512xf32>
    %8 = arith.truncf %7 : vector<2x512xf32> to vector<2x512xbf16>
    %c0_6 = arith.constant 0 : index
    %c0_7 = arith.constant 0 : index
    %9 = vector.load %arg4[%c0_6, %c0_7] : memref<512x256xbf16, #tpu.memory_space<vmem>>, vector<512x256xbf16>
    %cst_8 = arith.constant dense<0.000000e+00> : vector<2x256xf32>
    %10 = tpu.matmul %8, %9, %cst_8 {dimension_numbers = #tpu.dot_dimension_numbers<[1], [0], [0], [1], [0, 0, 1, 1], [], []>} : vector<2x512xbf16>, vector<512x256xbf16>, vector<2x256xf32> -> vector<2x256xf32>
    %c0_9 = arith.constant 0 : index
    %c0_10 = arith.constant 0 : index
    %11 = vector.load %arg5[%c0_9, %c0_10] : memref<1x256xf32, #tpu.memory_space<vmem>>, vector<1x256xf32>
    %12 = vector.broadcast %11 : vector<1x256xf32> to vector<2x256xf32>
    %13 = arith.addf %10, %12 : vector<2x256xf32>
    %cst_11 = arith.constant 0.000000e+00 : f32
    %14 = vector.broadcast %cst_11 : f32 to vector<2x256xf32>
    %15 = arith.maximumf %13, %14 : vector<2x256xf32>
    %16 = arith.truncf %15 : vector<2x256xf32> to vector<2x256xbf16>
    %c0_12 = arith.constant 0 : index
    %c0_13 = arith.constant 0 : index
    %17 = vector.load %arg6[%c0_12, %c0_13] : memref<256x4096xbf16, #tpu.memory_space<vmem>>, vector<256x4096xbf16>
    %cst_14 = arith.constant dense<0.000000e+00> : vector<2x4096xf32>
    %18 = tpu.matmul %16, %17, %cst_14 {dimension_numbers = #tpu.dot_dimension_numbers<[1], [0], [0], [1], [0, 0, 1, 1], [], []>} : vector<2x256xbf16>, vector<256x4096xbf16>, vector<2x4096xf32> -> vector<2x4096xf32>
    %c0_15 = arith.constant 0 : index
    %c0_16 = arith.constant 0 : index
    %19 = vector.load %arg7[%c0_15, %c0_16] : memref<1x4096xf32, #tpu.memory_space<vmem>>, vector<1x4096xf32>
    %20 = vector.broadcast %19 : vector<1x4096xf32> to vector<2x4096xf32>
    %21 = arith.addf %18, %20 : vector<2x4096xf32>
    %c0_17 = arith.constant 0 : index
    %c0_18 = arith.constant 0 : index
    %22 = vector.load %arg8[%c0_17, %c0_18] : memref<2x4096xf32, #tpu.memory_space<vmem>>, vector<2x4096xf32>
    tpu.vector_store %arg8[%c0_17, %c0_18], %21 {strides = array<i32>} : memref<2x4096xf32, #tpu.memory_space<vmem>>, vector<2x4096xf32>,
    return
  }
  func.func @transform_0(%arg0: i32) -> (i32, i32) {
    %c0_i32 = arith.constant 0 : i32
    %c0_i32_0 = arith.constant 0 : i32
    %c0_i32_1 = arith.constant 0 : i32
    return %c0_i32, %c0_i32_0 : i32, i32
  }
  func.func @transform_1(%arg0: i32) -> (i32, i32) {
    %c0_i32 = arith.constant 0 : i32
    %c0_i32_0 = arith.constant 0 : i32
    %c0_i32_1 = arith.constant 0 : i32
    return %c0_i32, %c0_i32_0 : i32, i32
  }
  func.func @transform_2(%arg0: i32) -> (i32, i32) {
    %c0_i32 = arith.constant 0 : i32
    %c0_i32_0 = arith.constant 0 : i32
    %c0_i32_1 = arith.constant 0 : i32
    return %c0_i32, %c0_i32_0 : i32, i32
  }
  func.func @transform_3(%arg0: i32) -> (i32, i32) {
    %c0_i32 = arith.constant 0 : i32
    %c0_i32_0 = arith.constant 0 : i32
    %c0_i32_1 = arith.constant 0 : i32
    return %c0_i32, %c0_i32_0 : i32, i32
  }
  func.func @transform_4(%arg0: i32) -> (i32, i32) {
    %c0_i32 = arith.constant 0 : i32
    %c0_i32_0 = arith.constant 0 : i32
    %c0_i32_1 = arith.constant 0 : i32
    return %c0_i32, %c0_i32_0 : i32, i32
  }
  func.func @transform_5(%arg0: i32) -> (i32, i32) {
    %c0_i32 = arith.constant 0 : i32
    %c0_i32_0 = arith.constant 0 : i32
    %c0_i32_1 = arith.constant 0 : i32
    return %c0_i32, %c0_i32_0 : i32, i32
  }
  func.func @transform_6(%arg0: i32) -> (i32, i32) {
    %c0_i32 = arith.constant 0 : i32
    %c0_i32_0 = arith.constant 0 : i32
    %c0_i32_1 = arith.constant 0 : i32
    return %c0_i32, %c0_i32_0 : i32, i32
  }
  func.func @transform_7(%arg0: i32) -> (i32, i32) {
    %c0_i32 = arith.constant 0 : i32
    %c0_i32_0 = arith.constant 0 : i32
    %c0_i32_1 = arith.constant 0 : i32
    return %c0_i32, %c0_i32_0 : i32, i32
  }
}

module attributes {stable_mosaic.version = 11 : i64} {
  func.func @_ppmlp_pool_kernel(%arg0: i32, %arg1: i32, %arg2: memref<1x16x8xbf16, #tpu.memory_space<vmem>>, %arg3: memref<1x8x64xbf16, #tpu.memory_space<vmem>>, %arg4: memref<1x64xf32, #tpu.memory_space<vmem>>, %arg5: memref<64x64xbf16, #tpu.memory_space<vmem>>, %arg6: memref<1x64xf32, #tpu.memory_space<vmem>>, %arg7: memref<64x64xbf16, #tpu.memory_space<vmem>>, %arg8: memref<1x64xf32, #tpu.memory_space<vmem>>, %arg9: memref<64x128xbf16, #tpu.memory_space<vmem>>, %arg10: memref<1x128xf32, #tpu.memory_space<vmem>>, %arg11: memref<128x1024xbf16, #tpu.memory_space<vmem>>, %arg12: memref<1x1024xf32, #tpu.memory_space<vmem>>, %arg13: memref<1x1x1024xbf16, #tpu.memory_space<vmem>>) attributes {dimension_semantics = [#tpu.dimension_semantics<parallel>, #tpu.dimension_semantics<arbitrary>], iteration_bounds = array<i64: 2, 1>, scalar_prefetch = 0 : i64, scratch_operands = 0 : i64, tpu.core_type = #tpu.core_type<tc>, window_params = [{transform_indices = @transform_0, window_bounds = array<i64: 1, 16, 8>}, {transform_indices = @transform_1, window_bounds = array<i64: 1, 8, 64>}, {pipeline_mode = #tpu.pipeline_mode<synchronous>, transform_indices = @transform_2, window_bounds = array<i64: 1, 64>}, {pipeline_mode = #tpu.pipeline_mode<synchronous>, transform_indices = @transform_3, window_bounds = array<i64: 64, 64>}, {pipeline_mode = #tpu.pipeline_mode<synchronous>, transform_indices = @transform_4, window_bounds = array<i64: 1, 64>}, {pipeline_mode = #tpu.pipeline_mode<synchronous>, transform_indices = @transform_5, window_bounds = array<i64: 64, 64>}, {pipeline_mode = #tpu.pipeline_mode<synchronous>, transform_indices = @transform_6, window_bounds = array<i64: 1, 64>}, {pipeline_mode = #tpu.pipeline_mode<synchronous>, transform_indices = @transform_7, window_bounds = array<i64: 64, 128>}, {pipeline_mode = #tpu.pipeline_mode<synchronous>, transform_indices = @transform_8, window_bounds = array<i64: 1, 128>}, {pipeline_mode = #tpu.pipeline_mode<synchronous>, transform_indices = @transform_9, window_bounds = array<i64: 128, 1024>}, {pipeline_mode = #tpu.pipeline_mode<synchronous>, transform_indices = @transform_10, window_bounds = array<i64: 1, 1024>}, {transform_indices = @transform_11, window_bounds = array<i64: 1, 1, 1024>}]} {
    %c0 = arith.constant 0 : index
    %c0_0 = arith.constant 0 : index
    %c0_1 = arith.constant 0 : index
    %0 = vector.load %arg2[%c0, %c0_0, %c0_1] : memref<1x16x8xbf16, #tpu.memory_space<vmem>>, vector<1x16x8xbf16>
    %1 = vector.shape_cast %0 : vector<1x16x8xbf16> to vector<16x8xbf16>
    %c0_2 = arith.constant 0 : index
    %c0_3 = arith.constant 0 : index
    %c0_4 = arith.constant 0 : index
    %2 = vector.load %arg3[%c0_2, %c0_3, %c0_4] : memref<1x8x64xbf16, #tpu.memory_space<vmem>>, vector<1x8x64xbf16>
    %3 = vector.shape_cast %2 : vector<1x8x64xbf16> to vector<8x64xbf16>
    %cst = arith.constant dense<0.000000e+00> : vector<16x64xf32>
    %4 = tpu.matmul %1, %3, %cst {dimension_numbers = #tpu.dot_dimension_numbers<[1], [0], [0], [1], [0, 0, 1, 1], [], []>} : vector<16x8xbf16>, vector<8x64xbf16>, vector<16x64xf32> -> vector<16x64xf32>
    %c0_5 = arith.constant 0 : index
    %c0_6 = arith.constant 0 : index
    %5 = vector.load %arg4[%c0_5, %c0_6] : memref<1x64xf32, #tpu.memory_space<vmem>>, vector<1x64xf32>
    %6 = vector.broadcast %5 : vector<1x64xf32> to vector<16x64xf32>
    %7 = arith.addf %4, %6 : vector<16x64xf32>
    %cst_7 = arith.constant 0.000000e+00 : f32
    %8 = vector.broadcast %cst_7 : f32 to vector<16x64xf32>
    %9 = arith.maximumf %7, %8 : vector<16x64xf32>
    %10 = arith.truncf %9 : vector<16x64xf32> to vector<16x64xbf16>
    %c0_8 = arith.constant 0 : index
    %c0_9 = arith.constant 0 : index
    %11 = vector.load %arg5[%c0_8, %c0_9] : memref<64x64xbf16, #tpu.memory_space<vmem>>, vector<64x64xbf16>
    %cst_10 = arith.constant dense<0.000000e+00> : vector<16x64xf32>
    %12 = tpu.matmul %10, %11, %cst_10 {dimension_numbers = #tpu.dot_dimension_numbers<[1], [0], [0], [1], [0, 0, 1, 1], [], []>} : vector<16x64xbf16>, vector<64x64xbf16>, vector<16x64xf32> -> vector<16x64xf32>
    %c0_11 = arith.constant 0 : index
    %c0_12 = arith.constant 0 : index
    %13 = vector.load %arg6[%c0_11, %c0_12] : memref<1x64xf32, #tpu.memory_space<vmem>>, vector<1x64xf32>
    %14 = vector.broadcast %13 : vector<1x64xf32> to vector<16x64xf32>
    %15 = arith.addf %12, %14 : vector<16x64xf32>
    %cst_13 = arith.constant 0.000000e+00 : f32
    %16 = vector.broadcast %cst_13 : f32 to vector<16x64xf32>
    %17 = arith.maximumf %15, %16 : vector<16x64xf32>
    %18 = arith.truncf %17 : vector<16x64xf32> to vector<16x64xbf16>
    %c0_14 = arith.constant 0 : index
    %c0_15 = arith.constant 0 : index
    %19 = vector.load %arg7[%c0_14, %c0_15] : memref<64x64xbf16, #tpu.memory_space<vmem>>, vector<64x64xbf16>
    %cst_16 = arith.constant dense<0.000000e+00> : vector<16x64xf32>
    %20 = tpu.matmul %18, %19, %cst_16 {dimension_numbers = #tpu.dot_dimension_numbers<[1], [0], [0], [1], [0, 0, 1, 1], [], []>} : vector<16x64xbf16>, vector<64x64xbf16>, vector<16x64xf32> -> vector<16x64xf32>
    %c0_17 = arith.constant 0 : index
    %c0_18 = arith.constant 0 : index
    %21 = vector.load %arg8[%c0_17, %c0_18] : memref<1x64xf32, #tpu.memory_space<vmem>>, vector<1x64xf32>
    %22 = vector.broadcast %21 : vector<1x64xf32> to vector<16x64xf32>
    %23 = arith.addf %20, %22 : vector<16x64xf32>
    %cst_19 = arith.constant 0.000000e+00 : f32
    %24 = vector.broadcast %cst_19 : f32 to vector<16x64xf32>
    %25 = arith.maximumf %23, %24 : vector<16x64xf32>
    %26 = arith.truncf %25 : vector<16x64xf32> to vector<16x64xbf16>
    %c0_20 = arith.constant 0 : index
    %c0_21 = arith.constant 0 : index
    %27 = vector.load %arg9[%c0_20, %c0_21] : memref<64x128xbf16, #tpu.memory_space<vmem>>, vector<64x128xbf16>
    %cst_22 = arith.constant dense<0.000000e+00> : vector<16x128xf32>
    %28 = tpu.matmul %26, %27, %cst_22 {dimension_numbers = #tpu.dot_dimension_numbers<[1], [0], [0], [1], [0, 0, 1, 1], [], []>} : vector<16x64xbf16>, vector<64x128xbf16>, vector<16x128xf32> -> vector<16x128xf32>
    %c0_23 = arith.constant 0 : index
    %c0_24 = arith.constant 0 : index
    %29 = vector.load %arg10[%c0_23, %c0_24] : memref<1x128xf32, #tpu.memory_space<vmem>>, vector<1x128xf32>
    %30 = vector.broadcast %29 : vector<1x128xf32> to vector<16x128xf32>
    %31 = arith.addf %28, %30 : vector<16x128xf32>
    %cst_25 = arith.constant 0.000000e+00 : f32
    %32 = vector.broadcast %cst_25 : f32 to vector<16x128xf32>
    %33 = arith.maximumf %31, %32 : vector<16x128xf32>
    %34 = arith.truncf %33 : vector<16x128xf32> to vector<16x128xbf16>
    %c0_26 = arith.constant 0 : index
    %c0_27 = arith.constant 0 : index
    %35 = vector.load %arg11[%c0_26, %c0_27] : memref<128x1024xbf16, #tpu.memory_space<vmem>>, vector<128x1024xbf16>
    %cst_28 = arith.constant dense<0.000000e+00> : vector<16x1024xf32>
    %36 = tpu.matmul %34, %35, %cst_28 {dimension_numbers = #tpu.dot_dimension_numbers<[1], [0], [0], [1], [0, 0, 1, 1], [], []>} : vector<16x128xbf16>, vector<128x1024xbf16>, vector<16x1024xf32> -> vector<16x1024xf32>
    %c0_29 = arith.constant 0 : index
    %c0_30 = arith.constant 0 : index
    %37 = vector.load %arg12[%c0_29, %c0_30] : memref<1x1024xf32, #tpu.memory_space<vmem>>, vector<1x1024xf32>
    %38 = vector.broadcast %37 : vector<1x1024xf32> to vector<16x1024xf32>
    %39 = arith.addf %36, %38 : vector<16x1024xf32>
    %cst_31 = arith.constant 0.000000e+00 : f32
    %40 = vector.broadcast %cst_31 : f32 to vector<16x1024xf32>
    %41 = arith.maximumf %39, %40 : vector<16x1024xf32>
    %42 = arith.truncf %41 : vector<16x1024xf32> to vector<16x1024xbf16>
    %cst_32 = arith.constant dense<0xFF80> : vector<1024xbf16>
    %43 = vector.multi_reduction <maximumf>, %42, %cst_32 [0] : vector<16x1024xbf16> to vector<1024xbf16>
    %44 = vector.shape_cast %43 : vector<1024xbf16> to vector<1x1024xbf16>
    %45 = vector.shape_cast %44 : vector<1x1024xbf16> to vector<1x1x1024xbf16>
    %c0_i32 = arith.constant 0 : i32
    %46 = arith.cmpi eq, %arg1, %c0_i32 : i32
    %47 = arith.extui %46 : i1 to i32
    %c0_i32_33 = arith.constant 0 : i32
    %48 = arith.cmpi ne, %47, %c0_i32_33 : i32
    scf.if %48 {
      %c0_36 = arith.constant 0 : index
      %c0_37 = arith.constant 0 : index
      %c0_38 = arith.constant 0 : index
      %52 = vector.load %arg13[%c0_36, %c0_37, %c0_38] : memref<1x1x1024xbf16, #tpu.memory_space<vmem>>, vector<1x1x1024xbf16>
      tpu.vector_store %arg13[%c0_36, %c0_37, %c0_38], %45 {strides = array<i32>} : memref<1x1x1024xbf16, #tpu.memory_space<vmem>>, vector<1x1x1024xbf16>,
    } else {
    }
    %c0_i32_34 = arith.constant 0 : i32
    %49 = arith.cmpi sgt, %arg1, %c0_i32_34 : i32
    %50 = arith.extui %49 : i1 to i32
    %c0_i32_35 = arith.constant 0 : i32
    %51 = arith.cmpi ne, %50, %c0_i32_35 : i32
    scf.if %51 {
      %c0_36 = arith.constant 0 : index
      %c0_37 = arith.constant 0 : index
      %c0_38 = arith.constant 0 : index
      %52 = vector.load %arg13[%c0_36, %c0_37, %c0_38] : memref<1x1x1024xbf16, #tpu.memory_space<vmem>>, vector<1x1x1024xbf16>
      %53 = arith.maximumf %52, %45 : vector<1x1x1024xbf16>
      %c0_39 = arith.constant 0 : index
      %c0_40 = arith.constant 0 : index
      %c0_41 = arith.constant 0 : index
      %54 = vector.load %arg13[%c0_39, %c0_40, %c0_41] : memref<1x1x1024xbf16, #tpu.memory_space<vmem>>, vector<1x1x1024xbf16>
      tpu.vector_store %arg13[%c0_39, %c0_40, %c0_41], %53 {strides = array<i32>} : memref<1x1x1024xbf16, #tpu.memory_space<vmem>>, vector<1x1x1024xbf16>,
    } else {
    }
    return
  }
  func.func @transform_0(%arg0: i32, %arg1: i32) -> (i32, i32, i32) {
    %c0_i32 = arith.constant 0 : i32
    %c0_i32_0 = arith.constant 0 : i32
    return %arg0, %arg1, %c0_i32 : i32, i32, i32
  }
  func.func @transform_1(%arg0: i32, %arg1: i32) -> (i32, i32, i32) {
    %c0_i32 = arith.constant 0 : i32
    %c0_i32_0 = arith.constant 0 : i32
    %c0_i32_1 = arith.constant 0 : i32
    return %arg0, %c0_i32, %c0_i32_0 : i32, i32, i32
  }
  func.func @transform_2(%arg0: i32, %arg1: i32) -> (i32, i32) {
    %c0_i32 = arith.constant 0 : i32
    %c0_i32_0 = arith.constant 0 : i32
    %c0_i32_1 = arith.constant 0 : i32
    return %c0_i32, %c0_i32_0 : i32, i32
  }
  func.func @transform_3(%arg0: i32, %arg1: i32) -> (i32, i32) {
    %c0_i32 = arith.constant 0 : i32
    %c0_i32_0 = arith.constant 0 : i32
    %c0_i32_1 = arith.constant 0 : i32
    return %c0_i32, %c0_i32_0 : i32, i32
  }
  func.func @transform_4(%arg0: i32, %arg1: i32) -> (i32, i32) {
    %c0_i32 = arith.constant 0 : i32
    %c0_i32_0 = arith.constant 0 : i32
    %c0_i32_1 = arith.constant 0 : i32
    return %c0_i32, %c0_i32_0 : i32, i32
  }
  func.func @transform_5(%arg0: i32, %arg1: i32) -> (i32, i32) {
    %c0_i32 = arith.constant 0 : i32
    %c0_i32_0 = arith.constant 0 : i32
    %c0_i32_1 = arith.constant 0 : i32
    return %c0_i32, %c0_i32_0 : i32, i32
  }
  func.func @transform_6(%arg0: i32, %arg1: i32) -> (i32, i32) {
    %c0_i32 = arith.constant 0 : i32
    %c0_i32_0 = arith.constant 0 : i32
    %c0_i32_1 = arith.constant 0 : i32
    return %c0_i32, %c0_i32_0 : i32, i32
  }
  func.func @transform_7(%arg0: i32, %arg1: i32) -> (i32, i32) {
    %c0_i32 = arith.constant 0 : i32
    %c0_i32_0 = arith.constant 0 : i32
    %c0_i32_1 = arith.constant 0 : i32
    return %c0_i32, %c0_i32_0 : i32, i32
  }
  func.func @transform_8(%arg0: i32, %arg1: i32) -> (i32, i32) {
    %c0_i32 = arith.constant 0 : i32
    %c0_i32_0 = arith.constant 0 : i32
    %c0_i32_1 = arith.constant 0 : i32
    return %c0_i32, %c0_i32_0 : i32, i32
  }
  func.func @transform_9(%arg0: i32, %arg1: i32) -> (i32, i32) {
    %c0_i32 = arith.constant 0 : i32
    %c0_i32_0 = arith.constant 0 : i32
    %c0_i32_1 = arith.constant 0 : i32
    return %c0_i32, %c0_i32_0 : i32, i32
  }
  func.func @transform_10(%arg0: i32, %arg1: i32) -> (i32, i32) {
    %c0_i32 = arith.constant 0 : i32
    %c0_i32_0 = arith.constant 0 : i32
    %c0_i32_1 = arith.constant 0 : i32
    return %c0_i32, %c0_i32_0 : i32, i32
  }
  func.func @transform_11(%arg0: i32, %arg1: i32) -> (i32, i32, i32) {
    %c0_i32 = arith.constant 0 : i32
    %c0_i32_0 = arith.constant 0 : i32
    %c0_i32_1 = arith.constant 0 : i32
    return %arg0, %c0_i32, %c0_i32_0 : i32, i32, i32
  }
}

module attributes {stable_mosaic.version = 11 : i64} {
  func.func @_ppmlp_pool_kernel(%arg0: i32, %arg1: i32, %arg2: memref<1x16x8xbf16, #tpu.memory_space<vmem>>, %arg3: memref<1x8x64xbf16, #tpu.memory_space<vmem>>, %arg4: memref<1x64xf32, #tpu.memory_space<vmem>>, %arg5: memref<64x64xbf16, #tpu.memory_space<vmem>>, %arg6: memref<1x64xf32, #tpu.memory_space<vmem>>, %arg7: memref<1x64x64xbf16, #tpu.memory_space<vmem>>, %arg8: memref<1x64xf32, #tpu.memory_space<vmem>>, %arg9: memref<64x128xbf16, #tpu.memory_space<vmem>>, %arg10: memref<1x128xf32, #tpu.memory_space<vmem>>, %arg11: memref<128x1024xbf16, #tpu.memory_space<vmem>>, %arg12: memref<1x1024xf32, #tpu.memory_space<vmem>>, %arg13: memref<1x1x1024xbf16, #tpu.memory_space<vmem>>) attributes {dimension_semantics = [#tpu.dimension_semantics<parallel>, #tpu.dimension_semantics<arbitrary>], iteration_bounds = array<i64: 2, 1>, scalar_prefetch = 0 : i64, scratch_operands = 0 : i64, tpu.core_type = #tpu.core_type<tc>, window_params = [{transform_indices = @transform_0, window_bounds = array<i64: 1, 16, 8>}, {transform_indices = @transform_1, window_bounds = array<i64: 1, 8, 64>}, {pipeline_mode = #tpu.pipeline_mode<synchronous>, transform_indices = @transform_2, window_bounds = array<i64: 1, 64>}, {pipeline_mode = #tpu.pipeline_mode<synchronous>, transform_indices = @transform_3, window_bounds = array<i64: 64, 64>}, {pipeline_mode = #tpu.pipeline_mode<synchronous>, transform_indices = @transform_4, window_bounds = array<i64: 1, 64>}, {transform_indices = @transform_5, window_bounds = array<i64: 1, 64, 64>}, {pipeline_mode = #tpu.pipeline_mode<synchronous>, transform_indices = @transform_6, window_bounds = array<i64: 1, 64>}, {pipeline_mode = #tpu.pipeline_mode<synchronous>, transform_indices = @transform_7, window_bounds = array<i64: 64, 128>}, {pipeline_mode = #tpu.pipeline_mode<synchronous>, transform_indices = @transform_8, window_bounds = array<i64: 1, 128>}, {pipeline_mode = #tpu.pipeline_mode<synchronous>, transform_indices = @transform_9, window_bounds = array<i64: 128, 1024>}, {pipeline_mode = #tpu.pipeline_mode<synchronous>, transform_indices = @transform_10, window_bounds = array<i64: 1, 1024>}, {transform_indices = @transform_11, window_bounds = array<i64: 1, 1, 1024>}]} {
    %c0 = arith.constant 0 : index
    %c0_0 = arith.constant 0 : index
    %c0_1 = arith.constant 0 : index
    %0 = vector.load %arg2[%c0, %c0_0, %c0_1] : memref<1x16x8xbf16, #tpu.memory_space<vmem>>, vector<1x16x8xbf16>
    %1 = vector.shape_cast %0 : vector<1x16x8xbf16> to vector<16x8xbf16>
    %c0_2 = arith.constant 0 : index
    %c0_3 = arith.constant 0 : index
    %c0_4 = arith.constant 0 : index
    %2 = vector.load %arg3[%c0_2, %c0_3, %c0_4] : memref<1x8x64xbf16, #tpu.memory_space<vmem>>, vector<1x8x64xbf16>
    %3 = vector.shape_cast %2 : vector<1x8x64xbf16> to vector<8x64xbf16>
    %cst = arith.constant dense<0.000000e+00> : vector<16x64xf32>
    %4 = tpu.matmul %1, %3, %cst {dimension_numbers = #tpu.dot_dimension_numbers<[1], [0], [0], [1], [0, 0, 1, 1], [], []>} : vector<16x8xbf16>, vector<8x64xbf16>, vector<16x64xf32> -> vector<16x64xf32>
    %c0_5 = arith.constant 0 : index
    %c0_6 = arith.constant 0 : index
    %5 = vector.load %arg4[%c0_5, %c0_6] : memref<1x64xf32, #tpu.memory_space<vmem>>, vector<1x64xf32>
    %6 = vector.broadcast %5 : vector<1x64xf32> to vector<16x64xf32>
    %7 = arith.addf %4, %6 : vector<16x64xf32>
    %cst_7 = arith.constant 0.000000e+00 : f32
    %8 = vector.broadcast %cst_7 : f32 to vector<16x64xf32>
    %9 = arith.maximumf %7, %8 : vector<16x64xf32>
    %10 = arith.truncf %9 : vector<16x64xf32> to vector<16x64xbf16>
    %c0_8 = arith.constant 0 : index
    %c0_9 = arith.constant 0 : index
    %11 = vector.load %arg5[%c0_8, %c0_9] : memref<64x64xbf16, #tpu.memory_space<vmem>>, vector<64x64xbf16>
    %cst_10 = arith.constant dense<0.000000e+00> : vector<16x64xf32>
    %12 = tpu.matmul %10, %11, %cst_10 {dimension_numbers = #tpu.dot_dimension_numbers<[1], [0], [0], [1], [0, 0, 1, 1], [], []>} : vector<16x64xbf16>, vector<64x64xbf16>, vector<16x64xf32> -> vector<16x64xf32>
    %c0_11 = arith.constant 0 : index
    %c0_12 = arith.constant 0 : index
    %13 = vector.load %arg6[%c0_11, %c0_12] : memref<1x64xf32, #tpu.memory_space<vmem>>, vector<1x64xf32>
    %14 = vector.broadcast %13 : vector<1x64xf32> to vector<16x64xf32>
    %15 = arith.addf %12, %14 : vector<16x64xf32>
    %cst_13 = arith.constant 0.000000e+00 : f32
    %16 = vector.broadcast %cst_13 : f32 to vector<16x64xf32>
    %17 = arith.maximumf %15, %16 : vector<16x64xf32>
    %18 = arith.truncf %17 : vector<16x64xf32> to vector<16x64xbf16>
    %c0_14 = arith.constant 0 : index
    %c0_15 = arith.constant 0 : index
    %c0_16 = arith.constant 0 : index
    %19 = vector.load %arg7[%c0_14, %c0_15, %c0_16] : memref<1x64x64xbf16, #tpu.memory_space<vmem>>, vector<1x64x64xbf16>
    %20 = vector.shape_cast %19 : vector<1x64x64xbf16> to vector<64x64xbf16>
    %cst_17 = arith.constant dense<0.000000e+00> : vector<16x64xf32>
    %21 = tpu.matmul %18, %20, %cst_17 {dimension_numbers = #tpu.dot_dimension_numbers<[1], [0], [0], [1], [0, 0, 1, 1], [], []>} : vector<16x64xbf16>, vector<64x64xbf16>, vector<16x64xf32> -> vector<16x64xf32>
    %c0_18 = arith.constant 0 : index
    %c0_19 = arith.constant 0 : index
    %22 = vector.load %arg8[%c0_18, %c0_19] : memref<1x64xf32, #tpu.memory_space<vmem>>, vector<1x64xf32>
    %23 = vector.broadcast %22 : vector<1x64xf32> to vector<16x64xf32>
    %24 = arith.addf %21, %23 : vector<16x64xf32>
    %cst_20 = arith.constant 0.000000e+00 : f32
    %25 = vector.broadcast %cst_20 : f32 to vector<16x64xf32>
    %26 = arith.maximumf %24, %25 : vector<16x64xf32>
    %27 = arith.truncf %26 : vector<16x64xf32> to vector<16x64xbf16>
    %c0_21 = arith.constant 0 : index
    %c0_22 = arith.constant 0 : index
    %28 = vector.load %arg9[%c0_21, %c0_22] : memref<64x128xbf16, #tpu.memory_space<vmem>>, vector<64x128xbf16>
    %cst_23 = arith.constant dense<0.000000e+00> : vector<16x128xf32>
    %29 = tpu.matmul %27, %28, %cst_23 {dimension_numbers = #tpu.dot_dimension_numbers<[1], [0], [0], [1], [0, 0, 1, 1], [], []>} : vector<16x64xbf16>, vector<64x128xbf16>, vector<16x128xf32> -> vector<16x128xf32>
    %c0_24 = arith.constant 0 : index
    %c0_25 = arith.constant 0 : index
    %30 = vector.load %arg10[%c0_24, %c0_25] : memref<1x128xf32, #tpu.memory_space<vmem>>, vector<1x128xf32>
    %31 = vector.broadcast %30 : vector<1x128xf32> to vector<16x128xf32>
    %32 = arith.addf %29, %31 : vector<16x128xf32>
    %cst_26 = arith.constant 0.000000e+00 : f32
    %33 = vector.broadcast %cst_26 : f32 to vector<16x128xf32>
    %34 = arith.maximumf %32, %33 : vector<16x128xf32>
    %35 = arith.truncf %34 : vector<16x128xf32> to vector<16x128xbf16>
    %c0_27 = arith.constant 0 : index
    %c0_28 = arith.constant 0 : index
    %36 = vector.load %arg11[%c0_27, %c0_28] : memref<128x1024xbf16, #tpu.memory_space<vmem>>, vector<128x1024xbf16>
    %cst_29 = arith.constant dense<0.000000e+00> : vector<16x1024xf32>
    %37 = tpu.matmul %35, %36, %cst_29 {dimension_numbers = #tpu.dot_dimension_numbers<[1], [0], [0], [1], [0, 0, 1, 1], [], []>} : vector<16x128xbf16>, vector<128x1024xbf16>, vector<16x1024xf32> -> vector<16x1024xf32>
    %c0_30 = arith.constant 0 : index
    %c0_31 = arith.constant 0 : index
    %38 = vector.load %arg12[%c0_30, %c0_31] : memref<1x1024xf32, #tpu.memory_space<vmem>>, vector<1x1024xf32>
    %39 = vector.broadcast %38 : vector<1x1024xf32> to vector<16x1024xf32>
    %40 = arith.addf %37, %39 : vector<16x1024xf32>
    %cst_32 = arith.constant 0.000000e+00 : f32
    %41 = vector.broadcast %cst_32 : f32 to vector<16x1024xf32>
    %42 = arith.maximumf %40, %41 : vector<16x1024xf32>
    %43 = arith.truncf %42 : vector<16x1024xf32> to vector<16x1024xbf16>
    %cst_33 = arith.constant dense<0xFF80> : vector<1024xbf16>
    %44 = vector.multi_reduction <maximumf>, %43, %cst_33 [0] : vector<16x1024xbf16> to vector<1024xbf16>
    %45 = vector.shape_cast %44 : vector<1024xbf16> to vector<1x1024xbf16>
    %46 = vector.shape_cast %45 : vector<1x1024xbf16> to vector<1x1x1024xbf16>
    %c0_i32 = arith.constant 0 : i32
    %47 = arith.cmpi eq, %arg1, %c0_i32 : i32
    %48 = arith.extui %47 : i1 to i32
    %c0_i32_34 = arith.constant 0 : i32
    %49 = arith.cmpi ne, %48, %c0_i32_34 : i32
    scf.if %49 {
      %c0_37 = arith.constant 0 : index
      %c0_38 = arith.constant 0 : index
      %c0_39 = arith.constant 0 : index
      %53 = vector.load %arg13[%c0_37, %c0_38, %c0_39] : memref<1x1x1024xbf16, #tpu.memory_space<vmem>>, vector<1x1x1024xbf16>
      tpu.vector_store %arg13[%c0_37, %c0_38, %c0_39], %46 {strides = array<i32>} : memref<1x1x1024xbf16, #tpu.memory_space<vmem>>, vector<1x1x1024xbf16>,
    } else {
    }
    %c0_i32_35 = arith.constant 0 : i32
    %50 = arith.cmpi sgt, %arg1, %c0_i32_35 : i32
    %51 = arith.extui %50 : i1 to i32
    %c0_i32_36 = arith.constant 0 : i32
    %52 = arith.cmpi ne, %51, %c0_i32_36 : i32
    scf.if %52 {
      %c0_37 = arith.constant 0 : index
      %c0_38 = arith.constant 0 : index
      %c0_39 = arith.constant 0 : index
      %53 = vector.load %arg13[%c0_37, %c0_38, %c0_39] : memref<1x1x1024xbf16, #tpu.memory_space<vmem>>, vector<1x1x1024xbf16>
      %54 = arith.maximumf %53, %46 : vector<1x1x1024xbf16>
      %c0_40 = arith.constant 0 : index
      %c0_41 = arith.constant 0 : index
      %c0_42 = arith.constant 0 : index
      %55 = vector.load %arg13[%c0_40, %c0_41, %c0_42] : memref<1x1x1024xbf16, #tpu.memory_space<vmem>>, vector<1x1x1024xbf16>
      tpu.vector_store %arg13[%c0_40, %c0_41, %c0_42], %54 {strides = array<i32>} : memref<1x1x1024xbf16, #tpu.memory_space<vmem>>, vector<1x1x1024xbf16>,
    } else {
    }
    return
  }
  func.func @transform_0(%arg0: i32, %arg1: i32) -> (i32, i32, i32) {
    %c0_i32 = arith.constant 0 : i32
    %c0_i32_0 = arith.constant 0 : i32
    return %arg0, %arg1, %c0_i32 : i32, i32, i32
  }
  func.func @transform_1(%arg0: i32, %arg1: i32) -> (i32, i32, i32) {
    %c0_i32 = arith.constant 0 : i32
    %c0_i32_0 = arith.constant 0 : i32
    %c0_i32_1 = arith.constant 0 : i32
    return %arg0, %c0_i32, %c0_i32_0 : i32, i32, i32
  }
  func.func @transform_2(%arg0: i32, %arg1: i32) -> (i32, i32) {
    %c0_i32 = arith.constant 0 : i32
    %c0_i32_0 = arith.constant 0 : i32
    %c0_i32_1 = arith.constant 0 : i32
    return %c0_i32, %c0_i32_0 : i32, i32
  }
  func.func @transform_3(%arg0: i32, %arg1: i32) -> (i32, i32) {
    %c0_i32 = arith.constant 0 : i32
    %c0_i32_0 = arith.constant 0 : i32
    %c0_i32_1 = arith.constant 0 : i32
    return %c0_i32, %c0_i32_0 : i32, i32
  }
  func.func @transform_4(%arg0: i32, %arg1: i32) -> (i32, i32) {
    %c0_i32 = arith.constant 0 : i32
    %c0_i32_0 = arith.constant 0 : i32
    %c0_i32_1 = arith.constant 0 : i32
    return %c0_i32, %c0_i32_0 : i32, i32
  }
  func.func @transform_5(%arg0: i32, %arg1: i32) -> (i32, i32, i32) {
    %c0_i32 = arith.constant 0 : i32
    %c0_i32_0 = arith.constant 0 : i32
    %c0_i32_1 = arith.constant 0 : i32
    return %arg0, %c0_i32, %c0_i32_0 : i32, i32, i32
  }
  func.func @transform_6(%arg0: i32, %arg1: i32) -> (i32, i32) {
    %c0_i32 = arith.constant 0 : i32
    %c0_i32_0 = arith.constant 0 : i32
    %c0_i32_1 = arith.constant 0 : i32
    return %c0_i32, %c0_i32_0 : i32, i32
  }
  func.func @transform_7(%arg0: i32, %arg1: i32) -> (i32, i32) {
    %c0_i32 = arith.constant 0 : i32
    %c0_i32_0 = arith.constant 0 : i32
    %c0_i32_1 = arith.constant 0 : i32
    return %c0_i32, %c0_i32_0 : i32, i32
  }
  func.func @transform_8(%arg0: i32, %arg1: i32) -> (i32, i32) {
    %c0_i32 = arith.constant 0 : i32
    %c0_i32_0 = arith.constant 0 : i32
    %c0_i32_1 = arith.constant 0 : i32
    return %c0_i32, %c0_i32_0 : i32, i32
  }
  func.func @transform_9(%arg0: i32, %arg1: i32) -> (i32, i32) {
    %c0_i32 = arith.constant 0 : i32
    %c0_i32_0 = arith.constant 0 : i32
    %c0_i32_1 = arith.constant 0 : i32
    return %c0_i32, %c0_i32_0 : i32, i32
  }
  func.func @transform_10(%arg0: i32, %arg1: i32) -> (i32, i32) {
    %c0_i32 = arith.constant 0 : i32
    %c0_i32_0 = arith.constant 0 : i32
    %c0_i32_1 = arith.constant 0 : i32
    return %c0_i32, %c0_i32_0 : i32, i32
  }
  func.func @transform_11(%arg0: i32, %arg1: i32) -> (i32, i32, i32) {
    %c0_i32 = arith.constant 0 : i32
    %c0_i32_0 = arith.constant 0 : i32
    %c0_i32_1 = arith.constant 0 : i32
    return %arg0, %c0_i32, %c0_i32_0 : i32, i32, i32
  }
}

module attributes {stable_mosaic.version = 11 : i64} {
  func.func @_fc_head_kernel(%arg0: i32, %arg1: memref<2x1024xbf16, #tpu.memory_space<vmem>>, %arg2: memref<1024x512xbf16, #tpu.memory_space<vmem>>, %arg3: memref<1x512xf32, #tpu.memory_space<vmem>>, %arg4: memref<512x256xbf16, #tpu.memory_space<vmem>>, %arg5: memref<1x256xf32, #tpu.memory_space<vmem>>, %arg6: memref<256x128xbf16, #tpu.memory_space<vmem>>, %arg7: memref<1x128xf32, #tpu.memory_space<vmem>>, %arg8: memref<2x128xf32, #tpu.memory_space<vmem>>) attributes {dimension_semantics = [#tpu.dimension_semantics<arbitrary>], iteration_bounds = array<i64: 1>, scalar_prefetch = 0 : i64, scratch_operands = 0 : i64, tpu.core_type = #tpu.core_type<tc>, window_params = [{pipeline_mode = #tpu.pipeline_mode<synchronous>, transform_indices = @transform_0, window_bounds = array<i64: 2, 1024>}, {pipeline_mode = #tpu.pipeline_mode<synchronous>, transform_indices = @transform_1, window_bounds = array<i64: 1024, 512>}, {pipeline_mode = #tpu.pipeline_mode<synchronous>, transform_indices = @transform_2, window_bounds = array<i64: 1, 512>}, {pipeline_mode = #tpu.pipeline_mode<synchronous>, transform_indices = @transform_3, window_bounds = array<i64: 512, 256>}, {pipeline_mode = #tpu.pipeline_mode<synchronous>, transform_indices = @transform_4, window_bounds = array<i64: 1, 256>}, {pipeline_mode = #tpu.pipeline_mode<synchronous>, transform_indices = @transform_5, window_bounds = array<i64: 256, 128>}, {pipeline_mode = #tpu.pipeline_mode<synchronous>, transform_indices = @transform_6, window_bounds = array<i64: 1, 128>}, {pipeline_mode = #tpu.pipeline_mode<synchronous>, transform_indices = @transform_7, window_bounds = array<i64: 2, 128>}]} {
    %c0 = arith.constant 0 : index
    %c0_0 = arith.constant 0 : index
    %0 = vector.load %arg1[%c0, %c0_0] : memref<2x1024xbf16, #tpu.memory_space<vmem>>, vector<2x1024xbf16>
    %c0_1 = arith.constant 0 : index
    %c0_2 = arith.constant 0 : index
    %1 = vector.load %arg2[%c0_1, %c0_2] : memref<1024x512xbf16, #tpu.memory_space<vmem>>, vector<1024x512xbf16>
    %cst = arith.constant dense<0.000000e+00> : vector<2x512xf32>
    %2 = tpu.matmul %0, %1, %cst {dimension_numbers = #tpu.dot_dimension_numbers<[1], [0], [0], [1], [0, 0, 1, 1], [], []>} : vector<2x1024xbf16>, vector<1024x512xbf16>, vector<2x512xf32> -> vector<2x512xf32>
    %c0_3 = arith.constant 0 : index
    %c0_4 = arith.constant 0 : index
    %3 = vector.load %arg3[%c0_3, %c0_4] : memref<1x512xf32, #tpu.memory_space<vmem>>, vector<1x512xf32>
    %4 = vector.broadcast %3 : vector<1x512xf32> to vector<2x512xf32>
    %5 = arith.addf %2, %4 : vector<2x512xf32>
    %cst_5 = arith.constant 0.000000e+00 : f32
    %6 = vector.broadcast %cst_5 : f32 to vector<2x512xf32>
    %7 = arith.maximumf %5, %6 : vector<2x512xf32>
    %8 = arith.truncf %7 : vector<2x512xf32> to vector<2x512xbf16>
    %c0_6 = arith.constant 0 : index
    %c0_7 = arith.constant 0 : index
    %9 = vector.load %arg4[%c0_6, %c0_7] : memref<512x256xbf16, #tpu.memory_space<vmem>>, vector<512x256xbf16>
    %cst_8 = arith.constant dense<0.000000e+00> : vector<2x256xf32>
    %10 = tpu.matmul %8, %9, %cst_8 {dimension_numbers = #tpu.dot_dimension_numbers<[1], [0], [0], [1], [0, 0, 1, 1], [], []>} : vector<2x512xbf16>, vector<512x256xbf16>, vector<2x256xf32> -> vector<2x256xf32>
    %c0_9 = arith.constant 0 : index
    %c0_10 = arith.constant 0 : index
    %11 = vector.load %arg5[%c0_9, %c0_10] : memref<1x256xf32, #tpu.memory_space<vmem>>, vector<1x256xf32>
    %12 = vector.broadcast %11 : vector<1x256xf32> to vector<2x256xf32>
    %13 = arith.addf %10, %12 : vector<2x256xf32>
    %cst_11 = arith.constant 0.000000e+00 : f32
    %14 = vector.broadcast %cst_11 : f32 to vector<2x256xf32>
    %15 = arith.maximumf %13, %14 : vector<2x256xf32>
    %16 = arith.truncf %15 : vector<2x256xf32> to vector<2x256xbf16>
    %c0_12 = arith.constant 0 : index
    %c0_13 = arith.constant 0 : index
    %17 = vector.load %arg6[%c0_12, %c0_13] : memref<256x128xbf16, #tpu.memory_space<vmem>>, vector<256x128xbf16>
    %cst_14 = arith.constant dense<0.000000e+00> : vector<2x128xf32>
    %18 = tpu.matmul %16, %17, %cst_14 {dimension_numbers = #tpu.dot_dimension_numbers<[1], [0], [0], [1], [0, 0, 1, 1], [], []>} : vector<2x256xbf16>, vector<256x128xbf16>, vector<2x128xf32> -> vector<2x128xf32>
    %c0_15 = arith.constant 0 : index
    %c0_16 = arith.constant 0 : index
    %19 = vector.load %arg7[%c0_15, %c0_16] : memref<1x128xf32, #tpu.memory_space<vmem>>, vector<1x128xf32>
    %20 = vector.broadcast %19 : vector<1x128xf32> to vector<2x128xf32>
    %21 = arith.addf %18, %20 : vector<2x128xf32>
    %c0_17 = arith.constant 0 : index
    %c0_18 = arith.constant 0 : index
    %22 = vector.load %arg8[%c0_17, %c0_18] : memref<2x128xf32, #tpu.memory_space<vmem>>, vector<2x128xf32>
    tpu.vector_store %arg8[%c0_17, %c0_18], %21 {strides = array<i32>} : memref<2x128xf32, #tpu.memory_space<vmem>>, vector<2x128xf32>,
    return
  }
  func.func @transform_0(%arg0: i32) -> (i32, i32) {
    %c0_i32 = arith.constant 0 : i32
    %c0_i32_0 = arith.constant 0 : i32
    %c0_i32_1 = arith.constant 0 : i32
    return %c0_i32, %c0_i32_0 : i32, i32
  }
  func.func @transform_1(%arg0: i32) -> (i32, i32) {
    %c0_i32 = arith.constant 0 : i32
    %c0_i32_0 = arith.constant 0 : i32
    %c0_i32_1 = arith.constant 0 : i32
    return %c0_i32, %c0_i32_0 : i32, i32
  }
  func.func @transform_2(%arg0: i32) -> (i32, i32) {
    %c0_i32 = arith.constant 0 : i32
    %c0_i32_0 = arith.constant 0 : i32
    %c0_i32_1 = arith.constant 0 : i32
    return %c0_i32, %c0_i32_0 : i32, i32
  }
  func.func @transform_3(%arg0: i32) -> (i32, i32) {
    %c0_i32 = arith.constant 0 : i32
    %c0_i32_0 = arith.constant 0 : i32
    %c0_i32_1 = arith.constant 0 : i32
    return %c0_i32, %c0_i32_0 : i32, i32
  }
  func.func @transform_4(%arg0: i32) -> (i32, i32) {
    %c0_i32 = arith.constant 0 : i32
    %c0_i32_0 = arith.constant 0 : i32
    %c0_i32_1 = arith.constant 0 : i32
    return %c0_i32, %c0_i32_0 : i32, i32
  }
  func.func @transform_5(%arg0: i32) -> (i32, i32) {
    %c0_i32 = arith.constant 0 : i32
    %c0_i32_0 = arith.constant 0 : i32
    %c0_i32_1 = arith.constant 0 : i32
    return %c0_i32, %c0_i32_0 : i32, i32
  }
  func.func @transform_6(%arg0: i32) -> (i32, i32) {
    %c0_i32 = arith.constant 0 : i32
    %c0_i32_0 = arith.constant 0 : i32
    %c0_i32_1 = arith.constant 0 : i32
    return %c0_i32, %c0_i32_0 : i32, i32
  }
  func.func @transform_7(%arg0: i32) -> (i32, i32) {
    %c0_i32 = arith.constant 0 : i32
    %c0_i32_0 = arith.constant 0 : i32
    %c0_i32_1 = arith.constant 0 : i32
    return %c0_i32, %c0_i32_0 : i32, i32
  }
}

</mosaic_0001>

<bundles_post_ra>
// kernel: cls_model_forward.6
= control target key start
LH: loop header
LB: loop body
LE: loop exit
PB: predicated region body
PF: predicated region fallthrough
CT: control target
= control target key end

     0   :  { %12 = vsyncpa [#allocation3], 0  ;;  %s2236_s0 = inlined_call_operand.vmem [shape: bf16[2,16,8], index: 0, kind: input, shape index: {}]   ;;  %s2237_s1 = inlined_call_operand.hbm [shape: bf16[8,64], index: 1, kind: input, shape index: {}]   ;;  %s2238_s2 = inlined_call_operand.hbm [shape: f32[1,64], index: 2, kind: input, shape index: {}]   ;;  %s2239_s3 = inlined_call_operand.hbm [shape: bf16[64,128], index: 3, kind: input, shape index: {}]   ;;  %s2240_s4 = inlined_call_operand.hbm [shape: f32[1,128], index: 4, kind: input, shape index: {}]   ;;  %s2241_s5 = inlined_call_operand.hbm [shape: bf16[128,1024], index: 5, kind: input, shape index: {}]   ;;  %s2242_s6 = inlined_call_operand.hbm [shape: f32[1,1024], index: 6, kind: input, shape index: {}]   ;;  %s2243_s7 = inlined_call_operand.vmem [shape: bf16[2,1,1024], index: 7, kind: output, shape index: {}]  }
   0x1   :  { %13 = vsyncpa [#allocation5], 0 }
   0x2   :  { %14 = vsyncpa [#allocation8], 0 }
   0x3   :  { %15 = vsyncpa [#allocation11], 0  ;;  %s2032_s24 = smov 0   ;;  %s2034_s25 = smov 0  }
   0x4   :  { %s2036_s26 = smov 0  }
   0x5 LB: > { %s1978_s27 = smov [#allocation4]   ;;  %s1563_s29 = sadd.s32 4294967295, %s1976_s26   ;;  %s1976_s26 = sphi %s2036_s26, %s21_s26   ;;  %s1972_s25 = sphi %s2034_s25, %s2268_s25   ;;  %s1968_s24 = sphi %s2032_s24, %s2267_s24  }
   0x6   : > { %s242_s28 = sshll.u32 %s1978_s27, 4  ;;  %p1565_p0 = scmp.ge.s32.totalorder %s1976_s26, 1  ;;  %s243_s28 = int_to_ptr.vmem [resolvable:$true] %s242_s28 }
   0x7   : > { %p218_p1 = scmp.lt.s32.totalorder %s1976_s26, 3  ;;  %p2050_p2 = scmp.eq.s32.totalorder %s1563_s29, 0 }
   0x8   : > { %s1979_s9 = smov [#allocation7]   ;;  %s33_s12 = sadd.s32 1, %s1972_s25 }
   0x9   : > { %s2247_s30 = scalar_select %p2050_p2, 1, 0 }
   0xa   : > { %p2054_p3 = pnand %p1565_p0, %p218_p1  ;;  %s266_s10 = sshll.u32 %s1979_s9, 4  ;;  %s267_s10 = int_to_ptr.vmem [resolvable:$true] %s266_s10 }
   0xb   : > { %p2067_p6 = scmp.ge.s32.totalorder %s33_s12, 2  ;;  %s1793_s15 = scalar_lea.vmem %s243_s28, 16 }
   0xc   : > { %s2248_s8 = scalar_select %p2054_p3, 1, 0 }
   0xd   : > { %p1708_p4 = pneg %p2054_p3  ;;  %p1794_p8 = scmp.ne.s32.totalorder %s243_s28, %s1793_s15 }
   0xe   : > { %s2250_s13 = scalar_select %p2067_p6, 1, 0 }
   0xf   : > { %p2062_p5 = pnand %p2050_p2, %p1708_p4  ;;  %s1800_s16 = scalar_lea.vmem %s243_s28, 32 }
  0x10   : > { %p1801_p11 = scmp.lt.s32.totalorder %s243_s28, %s243_s28  ;;  %p1802_p12 = scmp.lt.s32.totalorder %s1800_s16, %s1793_s15 }
  0x11   : > { %p2073_p7 = pneg %p2062_p5 }
  0x12   : > { %p1803_p13 = por %p1802_p12, %p1801_p11 }
  0x13   : > { %p1796_p9 = pnand %p1794_p8, %p2073_p7 }
  0x15   : > { %p1797_p10 = pneg %p1796_p9 }
  0x17   : > { %p1804_p0 = pnand %p1803_p13, %p1797_p10 }
  0x19   : > { %1807 = shalt.err (!%p1804_p0)
}
  0x1a   : > { %1714 = dma.hbm_to_vmem [thread:$0]  (!%p2062_p5), %s2238_s2, 16, %s243_s28, [#allocation5]  }
  0x1b   : > { %s1819_s19 = scalar_lea.vmem %s267_s10, 16  ;;  %s1826_s20 = scalar_lea.vmem %s267_s10, 32 }
  0x1c   : > { %p1820_p1 = scmp.ne.s32.totalorder %s267_s10, %s1819_s19  ;;  %p1827_p8 = scmp.lt.s32.totalorder %s267_s10, %s267_s10 }
  0x1d   : > { %p1828_p9 = scmp.lt.s32.totalorder %s1826_s20, %s1819_s19 }
  0x1e   : > { %p1822_p4 = pnand %p1820_p1, %p2073_p7 }
  0x1f   : > { %p1829_p3 = por %p1828_p9, %p1827_p8 }
  0x20   : > { %p1823_p2 = pneg %p1822_p4 }
  0x22   : > { %p1830_p6 = pnand %p1829_p3, %p1823_p2 }
  0x24   : > { %1833 = shalt.err (!%p1830_p6)
}
  0x25   : > { %1720 = dma.hbm_to_vmem [thread:$0]  (!%p2062_p5), %s2240_s4, 16, %s267_s10, [#allocation8]  }
  0x26   : > { %p2252_p10 = scmp.ne.s32.totalorder %s2250_s13, 0  ;;  %s1980_s23 = smov [#allocation2]  }
  0x27   : > { %s231_s27 = sshll.u32 %s1980_s23, 4  ;;  %s1981_s28 = smov [#allocation6]   ;;  %s232_s27 = int_to_ptr.vmem [resolvable:$true] %s231_s27 }
  0x28   : > { %s2270_s12 = smov (%p2252_p10, %s33_s12), 0  ;;  %s252_s29 = sshll.u32 %s1981_s28, 4  ;;  %s253_s29 = int_to_ptr.vmem [resolvable:$true] %s252_s29 }
  0x29   : > { %s1845_s9 = scalar_lea.vmem %s232_s27, 64  ;;  %p1853_p6 = scmp.lt.s32.totalorder %s232_s27, %s232_s27 }
  0x2a   : > { %p1846_p11 = scmp.ne.s32.totalorder %s232_s27, %s1845_s9  ;;  %p1854_p12 = scmp.lt.s32.totalorder %s1845_s9, %s1845_s9 }
  0x2c   : > { %p1848_p2 = pnand %p1846_p11, %p2073_p7  ;;  %p1855_p13 = por %p1854_p12, %p1853_p6 }
  0x2e   : > { %p1849_p3 = pneg %p1848_p2 }
  0x30   : > { %p1856_p0 = pnand %p1855_p13, %p1849_p3 }
  0x32   : > { %1859 = shalt.err (!%p1856_p0)
}
  0x33   : > { %1711 = dma.hbm_to_vmem [thread:$0]  (!%p2062_p5), %s2237_s1, 64, %s232_s27, [#allocation3]  }
  0x34   : > { %s1871_s15 = scalar_lea.vmem %s253_s29, 512  ;;  %p1879_p9 = scmp.lt.s32.totalorder %s253_s29, %s253_s29 }
  0x35   : > { %p1872_p1 = scmp.ne.s32.totalorder %s253_s29, %s1871_s15  ;;  %p1880_p10 = scmp.lt.s32.totalorder %s1871_s15, %s1871_s15 }
  0x37   : > { %p1874_p4 = pnand %p1872_p1, %p2073_p7  ;;  %p1881_p11 = por %p1880_p10, %p1879_p9 }
  0x39   : > { %p1875_p8 = pneg %p1874_p4 }
  0x3b   : > { %p1882_p2 = pnand %p1881_p11, %p1875_p8 }
  0x3d   : > { %1885 = shalt.err (!%p1882_p2)
}
  0x3e   : > { %s1982_s16 = smov 64   ;;  %s1983_s17 = smov 4  }
  0x3f   : > { %1717 = dma.hbm_to_vmem [thread:$0]  (!%p2062_p5), %s2239_s3, 512, %s253_s29, [#allocation5], %s1982_s16, %s1982_s16, %s1983_s17  }
  0x40   : > { %s1984_s20 = smov [#allocation9]  }
  0x41   : > { %s276_s21 = sshll.u32 %s1984_s20, 4  ;;  %s277_s21 = int_to_ptr.vmem [resolvable:$true] %s276_s21 }
  0x42   : > { %s1897_s22 = scalar_lea.vmem %s277_s21, 8192  ;;  %p1905_p13 = scmp.lt.s32.totalorder %s277_s21, %s277_s21 }
  0x43   : > { %p1898_p3 = scmp.ne.s32.totalorder %s277_s21, %s1897_s22  ;;  %p1906_p0 = scmp.lt.s32.totalorder %s1897_s22, %s1897_s22 }
  0x45   : > { %p1900_p6 = pnand %p1898_p3, %p2073_p7  ;;  %p1907_p1 = por %p1906_p0, %p1905_p13 }
  0x47   : > { %p1901_p12 = pneg %p1900_p6 }
  0x49   : > { %p1908_p4 = pnand %p1907_p1, %p1901_p12 }
  0x4b   : > { %1911 = shalt.err (!%p1908_p4)
}
  0x4c   : > { %s1985_s23 = smov 512   ;;  %s1986_s27 = smov 32  }
  0x4d   : > { %1723 = dma.hbm_to_vmem [thread:$0]  (!%p2062_p5), %s2241_s5, 8192, %s277_s21, [#allocation8], %s1985_s23, %s1985_s23, %s1986_s27  }
  0x4e   : > { %s1987_s9 = smov [#allocation10]  }
  0x4f   : > { %s290_s10 = sshll.u32 %s1987_s9, 4  ;;  %s291_s10 = int_to_ptr.vmem [resolvable:$true] %s290_s10 }
  0x50   : > { %s1923_s13 = scalar_lea.vmem %s291_s10, 128  ;;  %p1931_p11 = scmp.lt.s32.totalorder %s291_s10, %s291_s10 }
  0x51   : > { %p1924_p8 = scmp.ne.s32.totalorder %s291_s10, %s1923_s13  ;;  %p1932_p2 = scmp.lt.s32.totalorder %s1923_s13, %s1923_s13 }
  0x53   : > { %p1926_p9 = pnand %p1924_p8, %p2073_p7  ;;  %p1933_p3 = por %p1932_p2, %p1931_p11 }
  0x55   : > { %p1927_p10 = pneg %p1926_p9 }
  0x57   : > { %p1934_p6 = pnand %p1933_p3, %p1927_p10 }
  0x59   : > { %1937 = shalt.err (!%p1934_p6)
}
  0x5a   : > { %1726 = dma.hbm_to_vmem [thread:$0]  (!%p2062_p5), %s2242_s6, 128, %s291_s10, [#allocation11]  }
  0x5b   : > { %p2253_p12 = scmp.ne.s32.totalorder %s2248_s8, 0 }
  0x5c   : > { %p2254_p13 = scmp.ne.s32.totalorder (!%p2253_p12), %s2247_s30, 0 }
  0x5d   : > { %316 = sbr.rel (%p2253_p12) target bundleno = 785 (0x311), region = 48 }
  0x62   : > { %1951 = dma.done.wait (%p2254_p13), [#allocation3], 64  }
  0x63   : > { %1953 = vsyncadd (%p2254_p13), [#allocation3], 4294967232 }
  0x64   : > { %1955 = dma.done.wait (%p2254_p13), [#allocation5], 528  }
  0x65   : > { %1957 = vsyncadd (%p2254_p13), [#allocation5], 4294966768 }
  0x66   : > { %1959 = dma.done.wait (%p2254_p13), [#allocation8], 8208  }
  0x67   : > { %1961 = vsyncadd (%p2254_p13), [#allocation8], 4294959088 }
  0x68   : > { %1963 = dma.done.wait (%p2254_p13), [#allocation11], 128  }
  0x69   : > { %1965 = vsyncadd (%p2254_p13), [#allocation11], 4294967168  ;;  %p372_p5 = scmp.lt.s32.totalorder %s1968_s24, 1  ;;  %v1988_v0 = vmov 0.0   ;;  %vm1989_vm0 = vmmov 0   ;;  %vm405_vm1 = vcmask 1043456  }
  0x6a   : > { %1666 = vmatprep.subr.bf16.mxu0 %v1988_v0  ;;  %1668 = vmatprep.mubr.msk.bf16.mxu0 %vm1989_vm0, %v1988_v0  ;;  %v388_v1 = vld [vmem:[#allocation2] sm:$0xf]  ;;  %vm401_vm2 = vcmask 64512   ;;  %v1779_v5 = vld [vmem:[#allocation6 + $0x10] sm:$0xff]   ;;  %v1780_v6 = vld [vmem:[#allocation6 + $0x8] sm:$0xff]   ;;  %vm492_vm3 = vcmask 523264  }
  0x6b   : > { %s2272_s24 = smov (!%p372_p5, %s1968_s24), 1  ;;  %1672 = vmatprep.subr.bf16.mxu1 %v1988_v0  ;;  %1680 = vmatprep.mubr.msk.bf16.mxu1 %vm1989_vm0, %v1988_v0  ;;  %v407_v2 = vsel %vm405_vm1, %v388_v1, 0  ;;  %v1778_v4 = vld [vmem:[#allocation6 + $0x18] sm:$0xff]   ;;  %v1781_v7 = vld [vmem:[#allocation6] sm:$0xff]   ;;  %v597_v10 = vld [vmem:[#allocation9 + $0x1c8] sm:$0xff]  ;;  %vm1304_vm4 = vcmask 1040384  }
  0x6c   : > { %s1658_s8 = sshll.u32 %s2272_s24, 3  ;;  %1667 = vmatpush3.bf16.msra.mxu0 %v407_v2  ;;  %1673 = vmatpush3.bf16.msra.mxu1 %v1778_v4  ;;  %v596_v8 = vld [vmem:[#allocation9 + $0x1c0] sm:$0xff]  ;;  %v601_v13 = vld [vmem:[#allocation9 + $0x1e8] sm:$0xff]  ;;  %v1583_v36 = vld [vmem:[#allocation4] ss:$0 sm:$0xff]  ;;  %vm1307_vm6 = vcmask 1041409  }
  0x6d   : > { %s379_s30 = scalar_lea.vmem %s2236_s0, %s1658_s8  ;;  %1674 = vmatprep.subr.bf16.mxu1 %v1988_v0  ;;  %v600_v9 = vld [vmem:[#allocation9 + $0x1e0] sm:$0xff]  ;;  %v1650_v16 = vcombine.low %v597_v10, %v601_v13  ;;  %v1651_v17 = vcombine.high %v597_v10, %v601_v13  ;;  %v589_v43 = vld [vmem:[#allocation9 + $0x188] sm:$0xff]  ;;  %vm1305_vm5 = vsmask.f32 256  ;;  %vm1308_vm7 = vsmask.f32 1280  ;;  %s384_s19 = scalar_lea.vmem %s2243_s7, %s1658_s8 }
  0x6e   : > { %v1777_v3 = vld [vmem:[%s379_s30] sm:$0xff]   ;;  %v1648_v11 = vcombine.low %v596_v8, %v600_v9  ;;  %v1649_v12 = vcombine.high %v596_v8, %v600_v9  ;;  %v588_v14 = vld [vmem:[#allocation9 + $0x180] sm:$0xff]  ;;  %v593_v44 = vld [vmem:[#allocation9 + $0x1a8] sm:$0xff]  ;;  %vm1311_vm10 = vcmask 1042434   ;;  %vm1312_vm11 = vsmask.f32 2304 }
  0x6f   : > { %1669 = vmatmul.mubr.msk.bf16.vlgmr.msra.gmra.mxu0 %vm401_vm2, %v1777_v3  ;;  %v592_v15 = vld [vmem:[#allocation9 + $0x1a0] sm:$0xff]  ;;  %v1643_v48 = vcombine.high %v589_v43, %v593_v44  ;;  %v581_v49 = vld [vmem:[#allocation9 + $0x148] sm:$0xff]  ;;  %v1642_v51 = vcombine.low %v589_v43, %v593_v44  ;;  %v582_v43 = vld [vmem:[#allocation9 + $0x150] sm:$0xff]  ;;  %vm1315_vm14 = vcmask 1043459   ;;  %vm1316_vm15 = vsmask.f32 3328 }
  0x70   : > { %1675 = vmatpush3.bf16.msra.mxu1 %v1779_v5  ;;  %v1641_v18 = vcombine.high %v588_v14, %v592_v15  ;;  %966 = vmatprep.subr.bf16.mxu0 %v1649_v12  ;;  %v1640_v19 = vcombine.low %v588_v14, %v592_v15  ;;  %v580_v20 = vld [vmem:[#allocation9 + $0x140] sm:$0xff]  ;;  %v585_v50 = vld [vmem:[#allocation9 + $0x168] sm:$0xff]  ;;  %v586_v44 = vld [vmem:[#allocation9 + $0x170] sm:$0xff]  ;;  %vm1319_vm2 = vcmask 1044484  }
  0x71   : > { %1676 = vmatprep.subr.bf16.mxu1 %v1988_v0  ;;  %967 = vmatpush1.bf16.msra.mxu0 %v1648_v11  ;;  %v584_v21 = vld [vmem:[#allocation9 + $0x160] sm:$0xff]  ;;  %v1635_v52 = vcombine.high %v581_v49, %v585_v50  ;;  %v573_v53 = vld [vmem:[#allocation9 + $0x108] sm:$0xff]  ;;  %v1634_v55 = vcombine.low %v581_v49, %v585_v50  ;;  %v1637_v49 = vcombine.high %v582_v43, %v586_v44  ;;  %vm2171_vm8 = vmand %vm1304_vm4, %vm1305_vm5 }
  0x72   : > { %968 = vmatprep.subr.bf16.mxu0 %v1641_v18  ;;  %v1633_v22 = vcombine.high %v580_v20, %v584_v21  ;;  %v1632_v23 = vcombine.low %v580_v20, %v584_v21  ;;  %v572_v24 = vld [vmem:[#allocation9 + $0x100] sm:$0xff]  ;;  %v577_v54 = vld [vmem:[#allocation9 + $0x128] sm:$0xff]  ;;  %v598_v18 = vld [vmem:[#allocation9 + $0x1d0] sm:$0xff] }
  0x73   : > { %v576_v25 = vld [vmem:[#allocation9 + $0x120] sm:$0xff]  ;;  %v1627_v56 = vcombine.high %v573_v53, %v577_v54  ;;  %v565_v57 = vld [vmem:[#allocation9 + $0xc8] sm:$0xff]  ;;  %v1626_v59 = vcombine.low %v573_v53, %v577_v54  ;;  %v599_v20 = vld [vmem:[#allocation9 + $0x1d8] sm:$0xff] }
  0x74   : > { %1677 = vmatpush3.bf16.msra.mxu1 %v1780_v6  ;;  %v1625_v26 = vcombine.high %v572_v24, %v576_v25  ;;  %v1624_v27 = vcombine.low %v572_v24, %v576_v25  ;;  %v564_v28 = vld [vmem:[#allocation9 + $0xc0] sm:$0xff]  ;;  %v569_v58 = vld [vmem:[#allocation9 + $0xe8] sm:$0xff]  ;;  %v575_v53 = vld [vmem:[#allocation9 + $0x118] sm:$0xff] }
  0x75   : > { %1678 = vmatprep.subr.bf16.mxu1 %v1988_v0  ;;  %969 = vmatpush1.bf16.msra.mxu0 %v1640_v19  ;;  %v568_v29 = vld [vmem:[#allocation9 + $0xe0] sm:$0xff]  ;;  %v1619_v60 = vcombine.high %v565_v57, %v569_v58  ;;  %v557_v61 = vld [vmem:[#allocation9 + $0x88] sm:$0xff]  ;;  %v1618_v63 = vcombine.low %v565_v57, %v569_v58  ;;  %v602_v19 = vld [vmem:[#allocation9 + $0x1f0] sm:$0xff] }
  0x76   : > { %970 = vmatprep.subr.bf16.mxu0 %v1633_v22  ;;  %v1617_v30 = vcombine.high %v564_v28, %v568_v29  ;;  %v1616_v31 = vcombine.low %v564_v28, %v568_v29  ;;  %v556_v32 = vld [vmem:[#allocation9 + $0x80] sm:$0xff]  ;;  %v561_v62 = vld [vmem:[#allocation9 + $0xa8] sm:$0xff]  ;;  %v1653_v21 = vcombine.high %v598_v18, %v602_v19  ;;  %v603_v22 = vld [vmem:[#allocation9 + $0x1f8] sm:$0xff] }
  0x77   : > { %v560_v33 = vld [vmem:[#allocation9 + $0xa0] sm:$0xff]  ;;  %v1611_v0 = vcombine.high %v557_v61, %v561_v62  ;;  %v1610_v1 = vcombine.low %v557_v61, %v561_v62  ;;  %v549_v4 = vld [vmem:[#allocation9 + $0x48] sm:$0xff]  ;;  %v1654_v24 = vcombine.low %v599_v20, %v603_v22  ;;  %v1655_v25 = vcombine.high %v599_v20, %v603_v22  ;;  %v579_v54 = vld [vmem:[#allocation9 + $0x138] sm:$0xff] }
  0x78   : > { %1679 = vmatpush3.bf16.msra.mxu1 %v1781_v7  ;;  %v1609_v34 = vcombine.high %v556_v32, %v560_v33  ;;  %v1608_v35 = vcombine.low %v556_v32, %v560_v33  ;;  %v548_v2 = vld [vmem:[#allocation9 + $0x40] sm:$0xff]  ;;  %v553_v6 = vld [vmem:[#allocation9 + $0x68] sm:$0xff]  ;;  %v590_v33 = vld [vmem:[#allocation9 + $0x190] sm:$0xff]  ;;  %v1631_v58 = vcombine.high %v575_v53, %v579_v54 }
  0x79   : > { %1009 = vmatprep.subr.bf16.mxu1 %v1651_v17  ;;  %971 = vmatpush1.bf16.msra.mxu0 %v1632_v23  ;;  %v552_v3 = vld [vmem:[#allocation9 + $0x60] sm:$0xff]  ;;  %v1602_v8 = vcombine.low %v549_v4, %v553_v6  ;;  %v1603_v9 = vcombine.high %v549_v4, %v553_v6  ;;  %v541_v12 = vld [vmem:[#allocation9 + $0x8] sm:$0xff]  ;;  %v1652_v23 = vcombine.low %v598_v18, %v602_v19  ;;  %v567_v61 = vld [vmem:[#allocation9 + $0xd8] sm:$0xff] }
  0x7a   : > { %972 = vmatprep.subr.bf16.mxu0 %v1625_v26  ;;  %v1601_v5 = vcombine.high %v548_v2, %v552_v3  ;;  %v1600_v7 = vcombine.low %v548_v2, %v552_v3  ;;  %v540_v10 = vld [vmem:[#allocation9] sm:$0xff]  ;;  %v545_v14 = vld [vmem:[#allocation9 + $0x28] sm:$0xff]  ;;  %v1990_v26 = vmov 0   ;;  %v571_v62 = vld [vmem:[#allocation9 + $0xf8] sm:$0xff] }
  0x7b   : > { %v544_v11 = vld [vmem:[#allocation9 + $0x20] sm:$0xff]  ;;  %v1595_v17 = vcombine.high %v541_v12, %v545_v14  ;;  %998 = vmatprep.mubr.bf16.mxu0 %v1990_v26  ;;  %v1623_v2 = vcombine.high %v567_v61, %v571_v62  ;;  %v558_v3 = vld [vmem:[#allocation9 + $0x90] sm:$0xff]  ;;  %v563_v6 = vld [vmem:[#allocation9 + $0xb8] sm:$0xff] }
  0x7c   : > { %v1593_v13 = vcombine.high %v540_v10, %v544_v11  ;;  %v1592_v15 = vcombine.low %v540_v10, %v544_v11  ;;  %v562_v4 = vld [vmem:[#allocation9 + $0xb0] sm:$0xff]  ;;  %v547_v22 = vld [vmem:[#allocation9 + $0x38] sm:$0xff]  ;;  %vm2177_vm9 = vmand %vm1307_vm6, %vm1308_vm7  ;;  %vm1323_vm6 = vcmask 1045509   ;;  %vm1324_vm7 = vsmask.f32 5376 }
  0x7d   : > { %973 = vmatpush1.bf16.msra.mxu0 %v1624_v27  ;;  %v1586_v27 = vld [vmem:[#allocation7] ss:$0 sm:$0xff]  ;;  %v550_v11 = vld [vmem:[#allocation9 + $0x50] sm:$0xff]  ;;  %vm1310_vm12 = vmor %vm2177_vm9, %vm2171_vm8 }
  0x7e   : > { %974 = vmatprep.subr.bf16.mxu0 %v1617_v30  ;;  %v542_v19 = vld [vmem:[#allocation9 + $0x10] sm:$0xff]  ;;  %vm1313_vm13 = vmand %vm1311_vm10, %vm1312_vm11  ;;  %vm1327_vm10 = vcmask 1046534   ;;  %vm1328_vm11 = vsmask.f32 6400 }
  0x7f   : > { %v546_v20 = vld [vmem:[#allocation9 + $0x30] sm:$0xff]  ;;  %vm2193_vm0 = vmor %vm1313_vm13, %vm1310_vm12 }
  0x80   : > { %vm2199_vm1 = vmand %vm1315_vm14, %vm1316_vm15  ;;  %vm1331_vm14 = vcmask 1047559   ;;  %vm1332_vm15 = vsmask.f32 7424 }
  0x81   : > { %975 = vmatpush1.bf16.msra.mxu0 %v1616_v31  ;;  %vm1318_vm4 = vmor %vm2199_vm1, %vm2193_vm0 }
  0x82   : > { %976 = vmatprep.subr.bf16.mxu0 %v1609_v34  ;;  %vm2214_vm9 = vmand %vm1323_vm6, %vm1324_vm7 }
  0x83   : > { %vm1329_vm13 = vmand %vm1327_vm10, %vm1328_vm11 }
  0x84   : > { %vm1333_vm1 = vmand %vm1331_vm14, %vm1332_vm15 }
  0x85   : > { %977 = vmatpush1.bf16.msra.mxu0 %v1608_v35  ;;  %v594_v35 = vld [vmem:[#allocation9 + $0x1b0] sm:$0xff] }
  0x86   : > { %978 = vmatprep.subr.bf16.mxu0 %v1601_v5  ;;  %v559_v5 = vld [vmem:[#allocation9 + $0x98] sm:$0xff] }
  0x87   : > { %v1615_v10 = vcombine.high %v559_v5, %v563_v6 }
  0x89   : > { %979 = vmatpush1.bf16.msra.mxu0 %v1600_v7 }
  0x8a   : > { %980 = vmatprep.subr.bf16.mxu0 %v1593_v13  ;;  %v551_v13 = vld [vmem:[#allocation9 + $0x58] sm:$0xff] }
  0x8d   : > { %981 = vmatpush1.bf16.msra.mxu0 %v1592_v15  ;;  %v1612_v15 = vcombine.low %v558_v3, %v562_v4 }
  0x8e   : > { %1052 = vmatprep.subr.bf16.mxu0 %v1653_v21  ;;  %v543_v21 = vld [vmem:[#allocation9 + $0x18] sm:$0xff] }
 0x12f   : > { %v443_v37 = vpop.f32.mrf.mxu0 }
 0x130   : > { %v444_v39 = vadd.f32 %v1583_v36, %v443_v37  ;;  %v595_v37 = vld [vmem:[#allocation9 + $0x1b8] sm:$0xff] }
 0x131   : > { %v1670_v38 = vpop.f32.mrf.mxu0 }
 0x132   : > { %v450_v45 = vmax.f32 %v444_v39, 0.0 }
 0x133   : > { %v446_v40 = vpop.f32.mrf.mxu0 }
 0x134   : > { %v447_v41 = vadd.f32 %v1583_v36, %v446_v40  ;;  %v591_v36 = vld [vmem:[#allocation9 + $0x198] sm:$0xff] }
 0x135   : > { %v1671_v42 = vpop.f32.mrf.mxu0 }
 0x136   : > { %v451_v46 = vmax.f32 %v447_v41, 0.0  ;;  %v1645_v41 = vcombine.high %v590_v33, %v594_v35  ;;  %v1647_v42 = vcombine.high %v591_v36, %v595_v37 }
 0x138   : > { %v452_v47 = vpack.c.bf16 %v451_v46, %v450_v45  ;;  %v583_v45 = vld [vmem:[#allocation9 + $0x158] sm:$0xff] }
 0x139   : > { %v587_v46 = vld [vmem:[#allocation9 + $0x178] sm:$0xff] }
 0x13a   : > { %1681 = vmatmul.mubr.msk.bf16.vlgmr.msra.gmra.mxu1 %vm492_vm3, %v452_v47  ;;  %v1644_v47 = vcombine.low %v590_v33, %v594_v35  ;;  %v1639_v50 = vcombine.high %v583_v45, %v587_v46  ;;  %vm1320_vm3 = vsmask.f32 4352 }
 0x13b   : > { %1010 = vmatpush1.bf16.msra.mxu1 %v1650_v16  ;;  %v1594_v16 = vcombine.low %v541_v12, %v545_v14  ;;  %1041 = vmatprep.mubr.bf16.mxu1 %v1990_v26  ;;  %v554_v12 = vld [vmem:[#allocation9 + $0x70] sm:$0xff]  ;;  %v555_v14 = vld [vmem:[#allocation9 + $0x78] sm:$0xff]  ;;  %vm1321_vm5 = vmand %vm1319_vm2, %vm1320_vm3 }
 0x13c   : > { %1011 = vmatprep.subr.bf16.mxu1 %v1643_v48  ;;  %v1646_v48 = vcombine.low %v591_v36, %v595_v37  ;;  %v1607_v18 = vcombine.high %v551_v13, %v555_v14  ;;  %vm2210_vm8 = vmor %vm1321_vm5, %vm1318_vm4 }
 0x13d   : > { %vm1326_vm12 = vmor %vm2214_vm9, %vm2210_vm8 }
 0x13e   : > { %vm1330_vm0 = vmor %vm1329_vm13, %vm1326_vm12 }
 0x13f   : > { %1012 = vmatpush1.bf16.msra.mxu1 %v1642_v51  ;;  %v574_v51 = vld [vmem:[#allocation9 + $0x110] sm:$0xff]  ;;  %vm1334_vm2 = vmor %vm1333_vm1, %vm1330_vm0 }
 0x140   : > { %1013 = vmatprep.subr.bf16.mxu1 %v1635_v52  ;;  %v578_v52 = vld [vmem:[#allocation9 + $0x130] sm:$0xff] }
 0x141   : > { %v1629_v57 = vcombine.high %v574_v51, %v578_v52 }
 0x143   : > { %1014 = vmatpush1.bf16.msra.mxu1 %v1634_v55  ;;  %v1636_v55 = vcombine.low %v582_v43, %v586_v44 }
 0x144   : > { %1015 = vmatprep.subr.bf16.mxu1 %v1627_v56  ;;  %v1638_v56 = vcombine.low %v583_v45, %v587_v46 }
 0x147   : > { %1016 = vmatpush1.bf16.msra.mxu1 %v1626_v59  ;;  %v566_v59 = vld [vmem:[#allocation9 + $0xd0] sm:$0xff] }
 0x148   : > { %1017 = vmatprep.subr.bf16.mxu1 %v1619_v60  ;;  %v570_v60 = vld [vmem:[#allocation9 + $0xf0] sm:$0xff] }
 0x149   : > { %v1620_v7 = vcombine.low %v566_v59, %v570_v60 }
 0x14b   : > { %1018 = vmatpush1.bf16.msra.mxu1 %v1618_v63  ;;  %v1628_v63 = vcombine.low %v574_v51, %v578_v52 }
 0x14c   : > { %1019 = vmatprep.subr.bf16.mxu1 %v1611_v0  ;;  %v1630_v0 = vcombine.low %v575_v53, %v579_v54 }
 0x14f   : > { %1020 = vmatpush1.bf16.msra.mxu1 %v1610_v1  ;;  %v1621_v1 = vcombine.high %v566_v59, %v570_v60 }
 0x150   : > { %1021 = vmatprep.subr.bf16.mxu1 %v1603_v9  ;;  %v1613_v9 = vcombine.high %v558_v3, %v562_v4 }
 0x153   : > { %1022 = vmatpush1.bf16.msra.mxu1 %v1602_v8  ;;  %v1622_v8 = vcombine.low %v567_v61, %v571_v62 }
 0x154   : > { %1023 = vmatprep.subr.bf16.mxu1 %v1595_v17  ;;  %v1605_v17 = vcombine.high %v550_v11, %v554_v12 }
 0x157   : > { %1024 = vmatpush1.bf16.msra.mxu1 %v1594_v16  ;;  %v1614_v16 = vcombine.low %v559_v5, %v563_v6 }
 0x158   : > { %1095 = vmatprep.subr.bf16.mxu1 %v1655_v25  ;;  %v1597_v25 = vcombine.high %v542_v19, %v546_v20 }
 0x1fa   : > { %v530_v28 = vpop.f32.mrf.mxu1 }
 0x1fb   : > { %v531_v30 = vadd.f32 %v1586_v27, %v530_v28  ;;  %v1598_v28 = vcombine.low %v543_v21, %v547_v22 }
 0x1fc   : > { %v1682_v29 = vpop.f32.mrf.mxu1 }
 0x1fd   : > { %v537_v38 = vmax.f32 %v531_v30, 0.0  ;;  %v606_v29 = vlaneseq }
 0x1fe   : > { %v533_v31 = vpop.f32.mrf.mxu1 }
 0x1ff   : > { %v534_v32 = vadd.f32 %v1586_v27, %v533_v31  ;;  %v1596_v27 = vcombine.low %v542_v19, %v546_v20  ;;  %v2157_v30 = vshrl.u32 %v606_v29, 7 }
 0x200   : > { %v1683_v34 = vpop.f32.mrf.mxu1 }
 0x201   : > { %v538_v39 = vmax.f32 %v534_v32, 0.0  ;;  %v612_v33 = vsub.s32 1, %v2157_v30  ;;  %v620_v35 = vsub.s32 3, %v2157_v30  ;;  %v608_v37 = vsub.s32 0, %v2157_v30 }
 0x203   : > { %v2151_v40 = vpack.c.bf16 %v538_v39, %v537_v38  ;;  %v616_v38 = vsub.s32 2, %v2157_v30  ;;  %v604_v39 = vld [vmem:[#allocation10] sm:$0xff] }
 0x204   : > { %v613_v43 = vrot.slane %v604_v39, %v612_v33  ;;  %v609_v46 = vrot.slane %v604_v39, %v608_v37 }
 0x205   : > { %999 = vmatmul.mubr.bf16.vlgmr.msra.gmra.mxu0 %v2151_v40  ;;  %1042 = vmatmul.mubr.bf16.vlgmr.msra.gmra.mxu1 %v2151_v40 }
 0x206   : > { %1053 = vmatpush1.bf16.msra.mxu0 %v1652_v23  ;;  %1096 = vmatpush1.bf16.msra.mxu1 %v1654_v24  ;;  %v1604_v23 = vcombine.low %v550_v11, %v554_v12  ;;  %v1606_v24 = vcombine.low %v551_v13, %v555_v14 }
 0x207   : > { %1054 = vmatprep.subr.bf16.mxu0 %v1645_v41  ;;  %1097 = vmatprep.subr.bf16.mxu1 %v1647_v42 }
 0x208   : > { %1084 = vmatprep.mubr.bf16.mxu0 %v1990_v26  ;;  %1127 = vmatprep.mubr.bf16.mxu1 %v1990_v26  ;;  %v1599_v26 = vcombine.high %v543_v21, %v547_v22 }
 0x20a   : > { %1055 = vmatpush1.bf16.msra.mxu0 %v1644_v47  ;;  %1098 = vmatpush1.bf16.msra.mxu1 %v1646_v48  ;;  %v617_v47 = vrot.slane %v604_v39, %v616_v38 }
 0x20b   : > { %1056 = vmatprep.subr.bf16.mxu0 %v1637_v49  ;;  %1099 = vmatprep.subr.bf16.mxu1 %v1639_v50 }
 0x20e   : > { %1057 = vmatpush1.bf16.msra.mxu0 %v1636_v55  ;;  %1100 = vmatpush1.bf16.msra.mxu1 %v1638_v56 }
 0x20f   : > { %1058 = vmatprep.subr.bf16.mxu0 %v1629_v57  ;;  %1101 = vmatprep.subr.bf16.mxu1 %v1631_v58 }
 0x212   : > { %1059 = vmatpush1.bf16.msra.mxu0 %v1628_v63  ;;  %1102 = vmatpush1.bf16.msra.mxu1 %v1630_v0 }
 0x213   : > { %1060 = vmatprep.subr.bf16.mxu0 %v1621_v1  ;;  %1103 = vmatprep.subr.bf16.mxu1 %v1623_v2 }
 0x216   : > { %1061 = vmatpush1.bf16.msra.mxu0 %v1620_v7  ;;  %1104 = vmatpush1.bf16.msra.mxu1 %v1622_v8 }
 0x217   : > { %1062 = vmatprep.subr.bf16.mxu0 %v1613_v9  ;;  %1105 = vmatprep.subr.bf16.mxu1 %v1615_v10 }
 0x21a   : > { %1063 = vmatpush1.bf16.msra.mxu0 %v1612_v15  ;;  %1106 = vmatpush1.bf16.msra.mxu1 %v1614_v16  ;;  %v624_v16 = vsub.s32 4, %v2157_v30 }
 0x21b   : > { %1064 = vmatprep.subr.bf16.mxu0 %v1605_v17  ;;  %1107 = vmatprep.subr.bf16.mxu1 %v1607_v18  ;;  %v632_v17 = vsub.s32 6, %v2157_v30 }
 0x21c   : > { %v625_v22 = vrot.slane %v604_v39, %v624_v16 }
 0x21e   : > { %1065 = vmatpush1.bf16.msra.mxu0 %v1604_v23  ;;  %1108 = vmatpush1.bf16.msra.mxu1 %v1606_v24  ;;  %v633_v23 = vrot.slane %v604_v39, %v632_v17  ;;  %v628_v24 = vsub.s32 5, %v2157_v30 }
 0x21f   : > { %1066 = vmatprep.subr.bf16.mxu0 %v1597_v25  ;;  %1109 = vmatprep.subr.bf16.mxu1 %v1599_v26  ;;  %v636_v25 = vsub.s32 7, %v2157_v30 }
 0x221   : > { %v637_v37 = vrot.slane %v604_v39, %v636_v25 }
 0x222   : > { %1067 = vmatpush1.bf16.msra.mxu0 %v1596_v27  ;;  %1110 = vmatpush1.bf16.msra.mxu1 %v1598_v28 }
 0x225   : > { %1085 = vmatmul.mubr.bf16.vlgmr.msra.gmra.mxu0 %v2151_v40  ;;  %1128 = vmatmul.mubr.bf16.vlgmr.msra.gmra.mxu1 %v2151_v40  ;;  %v621_v40 = vrot.slane %v604_v39, %v620_v35  ;;  %v629_v35 = vrot.slane %v604_v39, %v628_v24 }
 0x2c5   : > { %v1000_v31 = vpop.f32.mrf.mxu0  ;;  %v1043_v32 = vpop.f32.mrf.mxu1 }
 0x2c6   : > { %v1001_v54 = vadd.f32 %v1000_v31, %v609_v46  ;;  %v1044_v55 = vadd.f32 %v1043_v32, %v617_v47 }
 0x2c7   : > { %v1002_v34 = vpop.f32.mrf.mxu0  ;;  %v1045_v36 = vpop.f32.mrf.mxu1 }
 0x2c8   : > { %v1003_v52 = vadd.f32 %v1002_v34, %v613_v43  ;;  %v1046_v53 = vadd.f32 %v1045_v36, %v621_v40  ;;  %v1138_v62 = vmax.f32 %v1001_v54, 0.0  ;;  %v1140_v63 = vmax.f32 %v1044_v55, 0.0 }
 0x2c9   : > { %v1004_v41 = vpop.f32.mrf.mxu0  ;;  %v1047_v42 = vpop.f32.mrf.mxu1 }
 0x2ca   : > { %v1005_v50 = vadd.f32 %v1004_v41, %v609_v46  ;;  %v1048_v51 = vadd.f32 %v1047_v42, %v617_v47  ;;  %v1139_v60 = vmax.f32 %v1003_v52, 0.0  ;;  %v1141_v61 = vmax.f32 %v1046_v53, 0.0 }
 0x2cb   : > { %v1006_v44 = vpop.f32.mrf.mxu0  ;;  %v1049_v45 = vpop.f32.mrf.mxu1  ;;  %v1991_v41 = vmov 1966171168  }
 0x2cc   : > { %v1007_v48 = vadd.f32 %v1006_v44, %v613_v43  ;;  %v1050_v49 = vadd.f32 %v1049_v45, %v621_v40  ;;  %v1146_v58 = vmax.f32 %v1005_v50, 0.0  ;;  %v1148_v59 = vmax.f32 %v1048_v51, 0.0 }
 0x2cd   : > { %v2167_v42 = vunpack.c.l.s4 %v1991_v41 }
 0x2ce   : > { %v1147_v56 = vmax.f32 %v1007_v48, 0.0  ;;  %v1149_v57 = vmax.f32 %v1050_v49, 0.0  ;;  %v1154_v2 = vpack.c.bf16 %v1146_v58, %v1138_v62  ;;  %v1156_v3 = vpack.c.bf16 %v1148_v59, %v1140_v63 }
 0x2d0   : > { %v1155_v0 = vpack.c.bf16 %v1147_v56, %v1139_v60  ;;  %v1157_v1 = vpack.c.bf16 %v1149_v57, %v1141_v61  ;;  %v1162_v8 = vunpack.i.l.bf16 %v1154_v2  ;;  %v1163_v9 = vunpack.i.h.bf16 %v1154_v2 }
 0x2d1   : > { %v1182_v10 = vunpack.i.l.bf16 %v1156_v3  ;;  %v1183_v11 = vunpack.i.h.bf16 %v1156_v3 }
 0x2d2   : > { %v1172_v4 = vunpack.i.l.bf16 %v1155_v0  ;;  %v1173_v5 = vunpack.i.h.bf16 %v1155_v0  ;;  %v1192_v6 = vunpack.i.l.bf16 %v1157_v1  ;;  %v1193_v7 = vunpack.i.h.bf16 %v1157_v1 }
 0x2d3   : > { %v1164_v14 = vmax.f32 %v1162_v8, %v1163_v9  ;;  %v1184_v15 = vmax.f32 %v1182_v10, %v1183_v11 }
 0x2d4   : > { %v1174_v12 = vmax.f32 %v1172_v4, %v1173_v5  ;;  %v1194_v13 = vmax.f32 %v1192_v6, %v1193_v7 }
 0x2d5   : > { %v1165_v20 = vrot.slane %v1164_v14, 4  ;;  %v1185_v21 = vrot.slane %v1184_v15, 4 }
 0x2d6   : > { %v1175_v18 = vrot.slane %v1174_v12, 4  ;;  %v1195_v19 = vrot.slane %v1194_v13, 4 }
 0x2d7   : > { %v1166_v31 = vmax.f32 %v1164_v14, %v1165_v20  ;;  %v1186_v32 = vmax.f32 %v1184_v15, %v1185_v21 }
 0x2d8   : > { %v1176_v26 = vmax.f32 %v1174_v12, %v1175_v18  ;;  %v1196_v27 = vmax.f32 %v1194_v13, %v1195_v19 }
 0x2d9   : > { %v1167_v46 = vrot.slane %v1166_v31, 2  ;;  %v1187_v47 = vrot.slane %v1186_v32, 2 }
 0x2da   : > { %v1177_v43 = vrot.slane %v1176_v26, 2  ;;  %v1197_v40 = vrot.slane %v1196_v27, 2 }
 0x2db   : > { %v1168_v1 = vmax.f32 %v1166_v31, %v1167_v46  ;;  %v1188_v2 = vmax.f32 %v1186_v32, %v1187_v47  ;;  %v1260_v32 = vunpack.c.0.s8 %v2167_v42 }
 0x2dc   : > { %v1178_v59 = vmax.f32 %v1176_v26, %v1177_v43  ;;  %v1198_v60 = vmax.f32 %v1196_v27, %v1197_v40 }
 0x2dd   : > { %v1169_v21 = vrot.slane %v1168_v1, 1 }
 0x2de   : > { %v1179_v13 = vrot.slane %v1178_v59, 1  ;;  %v1199_v14 = vrot.slane %v1198_v60, 1 }
 0x2e0   : > { %v1180_v27 = vmax.f32 %v1178_v59, %v1179_v13 }
 0x2e5   : > { %v1086_v28 = vpop.f32.mrf.mxu0  ;;  %v1129_v29 = vpop.f32.mrf.mxu1 }
 0x2e6   : > { %v1087_v33 = vadd.f32 %v1086_v28, %v625_v22  ;;  %v1130_v34 = vadd.f32 %v1129_v29, %v633_v23  ;;  %v1200_v28 = vmax.f32 %v1198_v60, %v1199_v14 }
 0x2e7   : > { %v1088_v36 = vpop.f32.mrf.mxu0  ;;  %v1131_v38 = vpop.f32.mrf.mxu1 }
 0x2e8   : > { %v1142_v50 = vmax.f32 %v1087_v33, 0.0  ;;  %v1144_v51 = vmax.f32 %v1130_v34, 0.0  ;;  %v1089_v52 = vadd.f32 %v1088_v36, %v629_v35  ;;  %v1132_v53 = vadd.f32 %v1131_v38, %v637_v37 }
 0x2e9   : > { %v1090_v44 = vpop.f32.mrf.mxu0  ;;  %v1133_v45 = vpop.f32.mrf.mxu1 }
 0x2ea   : > { %v1091_v48 = vadd.f32 %v1090_v44, %v625_v22  ;;  %v1134_v49 = vadd.f32 %v1133_v45, %v633_v23  ;;  %v1143_v3 = vmax.f32 %v1089_v52, 0.0  ;;  %v1145_v4 = vmax.f32 %v1132_v53, 0.0 }
 0x2eb   : > { %v1092_v54 = vpop.f32.mrf.mxu0  ;;  %v1135_v39 = vpop.f32.mrf.mxu1  ;;  %v1189_v22 = vrot.slane %v1188_v2, 1  ;;  %v1181_v44 = vpack.i.bf16 %v1180_v27, %v1180_v27  ;;  %v1201_v45 = vpack.i.bf16 %v1200_v28, %v1200_v28 }
 0x2ec   : > { %v1150_v55 = vmax.f32 %v1091_v48, 0.0  ;;  %v1152_v56 = vmax.f32 %v1134_v49, 0.0  ;;  %v1093_v57 = vadd.f32 %v1092_v54, %v629_v35  ;;  %v1136_v58 = vadd.f32 %v1135_v39, %v637_v37 }
 0x2ed   : > { %v1170_v35 = vmax.f32 %v1168_v1, %v1169_v21  ;;  %v1190_v36 = vmax.f32 %v1188_v2, %v1189_v22  ;;  %v1263_v54 = vsub.s32 %v1260_v32, %v2157_v30 }
 0x2ee   : > { %v1158_v61 = vpack.c.bf16 %v1150_v55, %v1142_v50  ;;  %v1160_v62 = vpack.c.bf16 %v1152_v56, %v1144_v51  ;;  %v1151_v63 = vmax.f32 %v1093_v57, 0.0  ;;  %v1153_v0 = vmax.f32 %v1136_v58, 0.0 }
 0x2ef   : > { %v1171_v50 = vpack.i.bf16 %v1170_v35, %v1170_v35  ;;  %v1191_v51 = vpack.i.bf16 %v1190_v36, %v1190_v36 }
 0x2f0   : > { %v1202_v5 = vunpack.i.l.bf16 %v1158_v61  ;;  %v1203_v6 = vunpack.i.h.bf16 %v1158_v61  ;;  %v1222_v7 = vunpack.i.l.bf16 %v1160_v62  ;;  %v1223_v8 = vunpack.i.h.bf16 %v1160_v62 }
 0x2f1   : > { %v1159_v10 = vpack.c.bf16 %v1151_v63, %v1143_v3  ;;  %v1161_v11 = vpack.c.bf16 %v1153_v0, %v1145_v4  ;;  %v1254_v56 = vcombine.low %v1171_v50, %v1181_v44  ;;  %v1255_v57 = vcombine.low %v1191_v51, %v1201_v45 }
 0x2f2   : > { %v1204_v15 = vmax.f32 %v1202_v5, %v1203_v6  ;;  %v1224_v16 = vmax.f32 %v1222_v7, %v1223_v8 }
 0x2f3   : > { %v1212_v17 = vunpack.i.l.bf16 %v1159_v10  ;;  %v1213_v18 = vunpack.i.h.bf16 %v1159_v10  ;;  %v1232_v19 = vunpack.i.l.bf16 %v1161_v11  ;;  %v1233_v20 = vunpack.i.h.bf16 %v1161_v11 }
 0x2f4   : > { %v1205_v23 = vrot.slane %v1204_v15, 4  ;;  %v1225_v24 = vrot.slane %v1224_v16, 4  ;;  %v1264_v1 = vrot.slane %v1254_v56, %v1263_v54  ;;  %v1271_v2 = vrot.slane %v1255_v57, %v1263_v54 }
 0x2f5   : > { %v1214_v25 = vmax.f32 %v1212_v17, %v1213_v18  ;;  %v1234_v26 = vmax.f32 %v1232_v19, %v1233_v20 }
 0x2f6   : > { %v1206_v29 = vmax.f32 %v1204_v15, %v1205_v23  ;;  %v1226_v31 = vmax.f32 %v1224_v16, %v1225_v24  ;;  %v1286_v9 = vcombine.low %v1264_v1, %v1271_v2  ;;  %v1335_v15 = vld [vmem:[%s384_s19] sm:$0xff] }
 0x2f7   : > { %v1215_v33 = vrot.slane %v1214_v25, 4  ;;  %v1235_v34 = vrot.slane %v1234_v26, 4 }
 0x2f8   : > { %v1207_v37 = vrot.slane %v1206_v29, 2  ;;  %v1227_v38 = vrot.slane %v1226_v31, 2  ;;  %v1294_v13 = vrot.slane %v1286_v9, %v1263_v54 }
 0x2f9   : > { %v1216_v43 = vmax.f32 %v1214_v25, %v1215_v33  ;;  %v1236_v40 = vmax.f32 %v1234_v26, %v1235_v34 }
 0x2fa   : > { %v1208_v46 = vmax.f32 %v1206_v29, %v1207_v37  ;;  %v1228_v47 = vmax.f32 %v1226_v31, %v1227_v38 }
 0x2fb   : > { %v1217_v48 = vrot.slane %v1216_v43, 2  ;;  %v1237_v49 = vrot.slane %v1236_v40, 2 }
 0x2fc   : > { %v1209_v52 = vrot.slane %v1208_v46, 1  ;;  %v1229_v53 = vrot.slane %v1228_v47, 1 }
 0x2fd   : > { %v1218_v39 = vmax.f32 %v1216_v43, %v1217_v48  ;;  %v1238_v55 = vmax.f32 %v1236_v40, %v1237_v49 }
 0x2fe   : > { %v1210_v58 = vmax.f32 %v1208_v46, %v1209_v52  ;;  %v1230_v59 = vmax.f32 %v1228_v47, %v1229_v53 }
 0x2ff   : > { %v1219_v60 = vrot.slane %v1218_v39, 1  ;;  %v1239_v61 = vrot.slane %v1238_v55, 1 }
 0x300   : > { %v1211_v3 = vpack.i.bf16 %v1210_v58, %v1210_v58  ;;  %v1231_v4 = vpack.i.bf16 %v1230_v59, %v1230_v59 }
 0x301   : > { %v1220_v63 = vmax.f32 %v1218_v39, %v1219_v60  ;;  %v1240_v0 = vmax.f32 %v1238_v55, %v1239_v61 }
 0x303   : > { %v1221_v5 = vpack.i.bf16 %v1220_v63, %v1220_v63  ;;  %v1241_v6 = vpack.i.bf16 %v1240_v0, %v1240_v0 }
 0x305   : > { %v1256_v7 = vcombine.low %v1211_v3, %v1221_v5  ;;  %v1257_v8 = vcombine.low %v1231_v4, %v1241_v6 }
 0x307   : > { %v1278_v10 = vrot.slane %v1256_v7, %v1263_v54  ;;  %v1285_v11 = vrot.slane %v1257_v8, %v1263_v54 }
 0x309   : > { %v1287_v12 = vcombine.low %v1278_v10, %v1285_v11 }
 0x30b   : > { %v1301_v14 = vrot.slane %v1287_v12, %v1263_v54 }
 0x30d   : > { %v1302_v16 = vcombine.low %v1294_v13, %v1301_v14 }
 0x30f   : > { %v1336_v17 = vsel %vm1334_vm2, %v1302_v16, %v1335_v15 }
 0x310   : > { %1337 = vst [vmem:[%s384_s19] sm:$0xff] %v1336_v17 }
 0x311 PF: > { %s21_s26 = sadd.s32 1, %s1976_s26   ;;  %s2267_s24 = smov %s1972_s25 }
 0x312   : > { %p18_p7 = scmp.ge.s32.totalorder %s21_s26, 4   ;;  %s2268_s25 = smov %s2270_s12 }
 0x314   :  { %20 = sbr.rel (!%p18_p7) target bundleno = 5 (0x5), region = 111 }
 0x319   :  { %1454 = vsyncpa [#allocation3], 1 }
 0x31a   :  { %1456 = vsyncpa [#allocation3 + $0x1], 1 }
 0x31b   :  { %1457 = vsyncpa [#allocation5], 1 }
 0x31c   :  { %1458 = vsyncpa [#allocation8], 1 }
 0x31d   :  { %1459 = vsyncpa [#allocation11], 1 }

// kernel: cls_model_forward.8
= control target key start
LH: loop header
LB: loop body
LE: loop exit
PB: predicated region body
PF: predicated region fallthrough
CT: control target
= control target key end

     0   :  { %16 = vsyncpa [#allocation3], 0  ;;  %s2874_s0 = inlined_call_operand.vmem [shape: bf16[2,16,8], index: 0, kind: input, shape index: {}]   ;;  %s2875_s1 = inlined_call_operand.vmem [shape: bf16[2,8,64], index: 1, kind: input, shape index: {}]   ;;  %s2876_s2 = inlined_call_operand.hbm [shape: f32[1,64], index: 2, kind: input, shape index: {}]   ;;  %s2877_s3 = inlined_call_operand.hbm [shape: bf16[64,64], index: 3, kind: input, shape index: {}]   ;;  %s2878_s4 = inlined_call_operand.hbm [shape: f32[1,64], index: 4, kind: input, shape index: {}]   ;;  %s2879_s5 = inlined_call_operand.hbm [shape: bf16[64,64], index: 5, kind: input, shape index: {}]   ;;  %s2880_s6 = inlined_call_operand.hbm [shape: f32[1,64], index: 6, kind: input, shape index: {}]   ;;  %s2881_s7 = inlined_call_operand.hbm [shape: bf16[64,128], index: 7, kind: input, shape index: {}]   ;;  %s2882_s8 = inlined_call_operand.hbm [shape: f32[1,128], index: 8, kind: input, shape index: {}]   ;;  %s2883_s9 = inlined_call_operand.hbm [shape: bf16[128,1024], index: 9, kind: input, shape index: {}]   ;;  %s2884_s10 = inlined_call_operand.hbm [shape: f32[1,1024], index: 10, kind: input, shape index: {}]   ;;  %s2885_s11 = inlined_call_operand.vmem [shape: bf16[2,1,1024], index: 11, kind: output, shape index: {}]  }
   0x1   :  { %17 = vsyncpa [#allocation5], 0 }
   0x2   :  { %18 = vsyncpa [#allocation8], 0 }
   0x3   :  { %19 = vsyncpa [#allocation11], 0 }
   0x4   :  { %20 = vsyncpa [#allocation14], 0  ;;  %s2606_s17 = smov 0   ;;  %s2608_s18 = smov 0  }
   0x5   :  { %s2610_s19 = smov 0  }
   0x6 LB: > { %s2529_s20 = smov [#allocation4]   ;;  %s1941_s22 = sadd.s32 4294967295, %s2527_s19   ;;  %s2527_s19 = sphi %s2610_s19, %s26_s19   ;;  %s2523_s18 = sphi %s2608_s18, %s2908_s18   ;;  %s2519_s17 = sphi %s2606_s17, %s2907_s17  }
   0x7   : > { %s335_s21 = sshll.u32 %s2529_s20, 4  ;;  %p1943_p0 = scmp.ge.s32.totalorder %s2527_s19, 1  ;;  %s336_s21 = int_to_ptr.vmem [resolvable:$true] %s335_s21 }
   0x8   : > { %p312_p1 = scmp.lt.s32.totalorder %s2527_s19, 3  ;;  %p2624_p2 = scmp.eq.s32.totalorder %s1941_s22, 0 }
   0x9   : > { %s2530_s25 = smov [#allocation7]   ;;  %s2531_s28 = smov [#allocation10]  }
   0xa   : > { %s2889_s23 = scalar_select %p2624_p2, 1, 0 }
   0xb   : > { %p2628_p3 = pnand %p1943_p0, %p312_p1  ;;  %s359_s26 = sshll.u32 %s2530_s25, 4  ;;  %s2634_s26 = int_to_ptr.vmem [resolvable:$true] %s359_s26 }
   0xc   : > { %s383_s29 = sshll.u32 %s2531_s28, 4  ;;  %s2532_s30 = smov [#allocation13]   ;;  %s2642_s29 = int_to_ptr.vmem [resolvable:$true] %s383_s29 }
   0xd   : > { %s2890_s24 = scalar_select %p2628_p3, 1, 0 }
   0xe   : > { %p2151_p4 = pneg %p2628_p3  ;;  %s2644_s12 = sshll.u32 %s2532_s30, 4  ;;  %s408_s12 = int_to_ptr.vmem [resolvable:$true] %s2644_s12 }
   0xf   : > { %s2262_s14 = scalar_lea.vmem %s336_s21, 512  ;;  %p2270_p10 = scmp.lt.s32.totalorder %s336_s21, %s336_s21 }
  0x10   : > { %p2638_p5 = pnand %p2624_p2, %p2151_p4  ;;  %p2263_p7 = scmp.ne.s32.totalorder %s336_s21, %s2262_s14 }
  0x11   : > { %p2271_p11 = scmp.lt.s32.totalorder %s2262_s14, %s2262_s14 }
  0x12   : > { %p2648_p6 = pneg %p2638_p5 }
  0x13   : > { %p2272_p12 = por %p2271_p11, %p2270_p10 }
  0x14   : > { %p2265_p8 = pnand %p2263_p7, %p2648_p6 }
  0x16   : > { %p2266_p9 = pneg %p2265_p8 }
  0x18   : > { %p2273_p13 = pnand %p2272_p12, %p2266_p9 }
  0x1a   : > { %2276 = shalt.err (!%p2273_p13)
}
  0x1b   : > { %s2533_s15 = smov 64   ;;  %s2534_s16 = smov 4  }
  0x1c   : > { %2157 = dma.hbm_to_vmem [thread:$0]  (!%p2638_p5), %s2877_s3, 512, %s336_s21, [#allocation5], %s2533_s15, %s2533_s15, %s2534_s16  }
  0x1d   : > { %s2288_s25 = scalar_lea.vmem %s2634_s26, 512  ;;  %p2296_p7 = scmp.lt.s32.totalorder %s2634_s26, %s2634_s26 }
  0x1e   : > { %p2289_p0 = scmp.ne.s32.totalorder %s2634_s26, %s2288_s25  ;;  %p2297_p8 = scmp.lt.s32.totalorder %s2288_s25, %s2288_s25 }
  0x20   : > { %p2291_p1 = pnand %p2289_p0, %p2648_p6  ;;  %p2298_p9 = por %p2297_p8, %p2296_p7 }
  0x22   : > { %p2292_p4 = pneg %p2291_p1 }
  0x24   : > { %p2299_p10 = pnand %p2298_p9, %p2292_p4 }
  0x26   : > { %2302 = shalt.err (!%p2299_p10)
}
  0x27   : > { %2163 = dma.hbm_to_vmem [thread:$0]  (!%p2638_p5), %s2879_s5, 512, %s2634_s26, [#allocation8], %s2533_s15, %s2533_s15, %s2534_s16  }
  0x28   : > { %s2314_s21 = scalar_lea.vmem %s2642_s29, 512  ;;  %p2322_p0 = scmp.lt.s32.totalorder %s2642_s29, %s2642_s29 }
  0x29   : > { %p2315_p11 = scmp.ne.s32.totalorder %s2642_s29, %s2314_s21  ;;  %p2323_p1 = scmp.lt.s32.totalorder %s2314_s21, %s2314_s21 }
  0x2b   : > { %p2317_p12 = pnand %p2315_p11, %p2648_p6  ;;  %p2324_p4 = por %p2323_p1, %p2322_p0 }
  0x2d   : > { %p2318_p13 = pneg %p2317_p12 }
  0x2f   : > { %p2325_p7 = pnand %p2324_p4, %p2318_p13 }
  0x31   : > { %2328 = shalt.err (!%p2325_p7)
}
  0x32   : > { %2169 = dma.hbm_to_vmem [thread:$0]  (!%p2638_p5), %s2881_s7, 512, %s2642_s29, [#allocation11], %s2533_s15, %s2533_s15, %s2534_s16  }
  0x33   : > { %s2340_s26 = scalar_lea.vmem %s408_s12, 8192  ;;  %p2348_p11 = scmp.lt.s32.totalorder %s408_s12, %s408_s12 }
  0x34   : > { %p2341_p8 = scmp.ne.s32.totalorder %s408_s12, %s2340_s26  ;;  %p2349_p12 = scmp.lt.s32.totalorder %s2340_s26, %s2340_s26 }
  0x36   : > { %p2343_p9 = pnand %p2341_p8, %p2648_p6  ;;  %p2350_p0 = por %p2349_p12, %p2348_p11 }
  0x38   : > { %p2344_p10 = pneg %p2343_p9 }
  0x3a   : > { %p2351_p13 = pnand %p2350_p0, %p2344_p10 }
  0x3c   : > { %2354 = shalt.err (!%p2351_p13)
}
  0x3d   : > { %s2535_s22 = smov 512   ;;  %s2536_s25 = smov 32  }
  0x3e   : > { %2175 = dma.hbm_to_vmem [thread:$0]  (!%p2638_p5), %s2883_s9, 8192, %s408_s12, [#allocation14], %s2535_s22, %s2535_s22, %s2536_s25  }
  0x3f   : > { %s38_s29 = sadd.s32 1, %s2523_s18  ;;  %s2537_s15 = smov [#allocation2]  }
  0x40   : > { %s325_s16 = sshll.u32 %s2537_s15, 4  ;;  %p40_p1 = scmp.ge.s32.totalorder %s38_s29, 2  ;;  %s326_s16 = int_to_ptr.vmem [resolvable:$true] %s325_s16 }
  0x41   : > { %s2366_s21 = scalar_lea.vmem %s326_s16, 16  ;;  %s2373_s14 = scalar_lea.vmem %s326_s16, 32 }
  0x42   : > { %p2367_p4 = scmp.ne.s32.totalorder %s326_s16, %s2366_s21  ;;  %p2374_p9 = scmp.lt.s32.totalorder %s326_s16, %s326_s16 }
  0x43   : > { %p2375_p10 = scmp.lt.s32.totalorder %s2373_s14, %s2366_s21 }
  0x44   : > { %p2369_p7 = pnand %p2367_p4, %p2648_p6 }
  0x45   : > { %p2376_p11 = por %p2375_p10, %p2374_p9 }
  0x46   : > { %p2370_p8 = pneg %p2369_p7 }
  0x48   : > { %p2377_p12 = pnand %p2376_p11, %p2370_p8 }
  0x4a   : > { %2380 = shalt.err (!%p2377_p12)
}
  0x4b   : > { %2154 = dma.hbm_to_vmem [thread:$0]  (!%p2638_p5), %s2876_s2, 16, %s326_s16, [#allocation3]  }
  0x4c   : > { %s2910_s29 = smov (%p40_p1, %s38_s29), 0  ;;  %s2538_s26 = smov [#allocation6]  }
  0x4d   : > { %s349_s22 = sshll.u32 %s2538_s26, 4  ;;  %s2539_s25 = smov [#allocation9]   ;;  %s350_s22 = int_to_ptr.vmem [resolvable:$true] %s349_s22 }
  0x4e   : > { %s373_s28 = sshll.u32 %s2539_s25, 4  ;;  %s2392_s30 = scalar_lea.vmem %s350_s22, 16  ;;  %s374_s28 = int_to_ptr.vmem [resolvable:$true] %s373_s28 }
  0x4f   : > { %p2393_p0 = scmp.ne.s32.totalorder %s350_s22, %s2392_s30  ;;  %s2399_s15 = scalar_lea.vmem %s350_s22, 32 }
  0x50   : > { %p2400_p7 = scmp.lt.s32.totalorder %s350_s22, %s350_s22  ;;  %p2401_p8 = scmp.lt.s32.totalorder %s2399_s15, %s2392_s30 }
  0x51   : > { %p2395_p13 = pnand %p2393_p0, %p2648_p6 }
  0x52   : > { %p2402_p9 = por %p2401_p8, %p2400_p7 }
  0x53   : > { %p2396_p4 = pneg %p2395_p13 }
  0x55   : > { %p2403_p10 = pnand %p2402_p9, %p2396_p4 }
  0x57   : > { %2406 = shalt.err (!%p2403_p10)
}
  0x58   : > { %2160 = dma.hbm_to_vmem [thread:$0]  (!%p2638_p5), %s2878_s4, 16, %s350_s22, [#allocation5]  }
  0x59   : > { %s2418_s14 = scalar_lea.vmem %s374_s28, 16  ;;  %s2425_s20 = scalar_lea.vmem %s374_s28, 32 }
  0x5a   : > { %p2419_p1 = scmp.ne.s32.totalorder %s374_s28, %s2418_s14  ;;  %p2426_p0 = scmp.lt.s32.totalorder %s374_s28, %s374_s28 }
  0x5b   : > { %p2427_p13 = scmp.lt.s32.totalorder %s2425_s20, %s2418_s14 }
  0x5c   : > { %p2421_p11 = pnand %p2419_p1, %p2648_p6 }
  0x5d   : > { %p2428_p2 = por %p2427_p13, %p2426_p0 }
  0x5e   : > { %p2422_p12 = pneg %p2421_p11 }
  0x60   : > { %p2429_p3 = pnand %p2428_p2, %p2422_p12 }
  0x62   : > { %2432 = shalt.err (!%p2429_p3)
}
  0x63   : > { %2166 = dma.hbm_to_vmem [thread:$0]  (!%p2638_p5), %s2880_s6, 16, %s374_s28, [#allocation8]  }
  0x64   : > { %s2540_s25 = smov [#allocation12]   ;;  %s2541_s30 = smov [#allocation15]  }
  0x65   : > { %s397_s22 = sshll.u32 %s2540_s25, 4  ;;  %s421_s15 = sshll.u32 %s2541_s30, 4  ;;  %s398_s22 = int_to_ptr.vmem [resolvable:$true] %s397_s22  ;;  %s422_s15 = int_to_ptr.vmem [resolvable:$true] %s421_s15 }
  0x66   : > { %s2444_s16 = scalar_lea.vmem %s398_s22, 16  ;;  %s2451_s21 = scalar_lea.vmem %s398_s22, 32 }
  0x67   : > { %p2445_p4 = scmp.ne.s32.totalorder %s398_s22, %s2444_s16  ;;  %p2452_p2 = scmp.lt.s32.totalorder %s398_s22, %s398_s22 }
  0x68   : > { %p2453_p3 = scmp.lt.s32.totalorder %s2451_s21, %s2444_s16 }
  0x69   : > { %p2447_p7 = pnand %p2445_p4, %p2648_p6 }
  0x6a   : > { %p2454_p9 = por %p2453_p3, %p2452_p2 }
  0x6b   : > { %p2448_p8 = pneg %p2447_p7 }
  0x6d   : > { %p2455_p10 = pnand %p2454_p9, %p2448_p8 }
  0x6f   : > { %2458 = shalt.err (!%p2455_p10)
}
  0x70   : > { %2172 = dma.hbm_to_vmem [thread:$0]  (!%p2638_p5), %s2882_s8, 16, %s398_s22, [#allocation11]  }
  0x71   : > { %s2470_s20 = scalar_lea.vmem %s422_s15, 128  ;;  %p2478_p0 = scmp.lt.s32.totalorder %s422_s15, %s422_s15 }
  0x72   : > { %p2471_p1 = scmp.ne.s32.totalorder %s422_s15, %s2470_s20  ;;  %p2479_p13 = scmp.lt.s32.totalorder %s2470_s20, %s2470_s20 }
  0x74   : > { %p2473_p11 = pnand %p2471_p1, %p2648_p6  ;;  %p2480_p4 = por %p2479_p13, %p2478_p0 }
  0x76   : > { %p2474_p12 = pneg %p2473_p11 }
  0x78   : > { %p2481_p7 = pnand %p2480_p4, %p2474_p12 }
  0x7a   : > { %2484 = shalt.err (!%p2481_p7)
}
  0x7b   : > { %2178 = dma.hbm_to_vmem [thread:$0]  (!%p2638_p5), %s2884_s10, 128, %s422_s15, [#allocation14]  }
  0x7c   : > { %p2893_p8 = scmp.ne.s32.totalorder %s2890_s24, 0 }
  0x7d   : > { %p2894_p2 = scmp.ne.s32.totalorder (!%p2893_p8), %s2889_s23, 0 }
  0x7e   : > { %454 = sbr.rel (%p2893_p8) target bundleno = 1230 (0x4ce), region = 64 }
  0x83   : > { %2498 = dma.done.wait (%p2894_p2), [#allocation3], 16  }
  0x84   : > { %2500 = vsyncadd (%p2894_p2), [#allocation3], 4294967280 }
  0x85   : > { %2502 = dma.done.wait (%p2894_p2), [#allocation5], 528  }
  0x86   : > { %2504 = vsyncadd (%p2894_p2), [#allocation5], 4294966768 }
  0x87   : > { %2506 = dma.done.wait (%p2894_p2), [#allocation8], 528  }
  0x88   : > { %2508 = vsyncadd (%p2894_p2), [#allocation8], 4294966768 }
  0x89   : > { %2510 = dma.done.wait (%p2894_p2), [#allocation11], 528  }
  0x8a   : > { %2512 = vsyncadd (%p2894_p2), [#allocation11], 4294966768 }
  0x8b   : > { %2514 = dma.done.wait (%p2894_p2), [#allocation14], 8320  }
  0x8c   : > { %2516 = vsyncadd (%p2894_p2), [#allocation14], 4294958976  ;;  %p534_p5 = scmp.lt.s32.totalorder %s2519_s17, 1  ;;  %v2542_v0 = vmov 0.0   ;;  %vm2543_vm0 = vmmov 0   ;;  %vm571_vm1 = vcmask 1043456  }
  0x8d   : > { %2073 = vmatprep.subr.bf16.mxu0 %v2542_v0  ;;  %2075 = vmatprep.mubr.msk.bf16.mxu0 %vm2543_vm0, %v2542_v0  ;;  %vm567_vm2 = vcmask 64512   ;;  %v2239_v4 = vld [vmem:[#allocation4 + $0x18] sm:$0xff]   ;;  %v2240_v5 = vld [vmem:[#allocation4 + $0x10] sm:$0xff]   ;;  %v2241_v6 = vld [vmem:[#allocation4 + $0x8] sm:$0xff]   ;;  %vm658_vm3 = vcmask 523264   ;;  %vm1642_vm4 = vcmask 1040384  }
  0x8e   : > { %s2912_s17 = smov (!%p534_p5, %s2519_s17), 1  ;;  %2079 = vmatprep.subr.bf16.mxu1 %v2542_v0  ;;  %2087 = vmatprep.mubr.msk.bf16.mxu1 %vm2543_vm0, %v2542_v0  ;;  %v2242_v7 = vld [vmem:[#allocation4] sm:$0xff]   ;;  %v1968_v9 = vld [vmem:[#allocation2] ss:$0 sm:$0xff]  ;;  %v2244_v19 = vld [vmem:[#allocation7 + $0x10] sm:$0xff]   ;;  %vm1645_vm6 = vcmask 1041409  }
  0x8f   : > { %s2055_s23 = sshll.u32 %s2912_s17, 3  ;;  %s1966_s24 = sshll.u32 %s2912_s17, 2  ;;  %2080 = vmatpush3.bf16.msra.mxu1 %v2239_v4  ;;  %v2243_v8 = vld [vmem:[#allocation7 + $0x18] sm:$0xff]   ;;  %v2245_v20 = vld [vmem:[#allocation7 + $0x8] sm:$0xff]   ;;  %v2246_v21 = vld [vmem:[#allocation7] sm:$0xff]   ;;  %vm1649_vm10 = vcmask 1042434  }
  0x90   : > { %s541_s25 = scalar_lea.vmem %s2874_s0, %s2055_s23  ;;  %s546_s15 = scalar_lea.vmem %s2875_s1, %s1966_s24  ;;  %2081 = vmatprep.subr.bf16.mxu1 %v2542_v0  ;;  %v2247_v22 = vld [vmem:[#allocation10 + $0x18] sm:$0xff]   ;;  %v2248_v33 = vld [vmem:[#allocation10 + $0x10] sm:$0xff]   ;;  %v2249_v34 = vld [vmem:[#allocation10 + $0x8] sm:$0xff]   ;;  %vm1643_vm5 = vsmask.f32 256  ;;  %vm1653_vm14 = vcmask 1043459  }
  0x91   : > { %v554_v1 = vld [vmem:[%s546_s15] sm:$0xf]  ;;  %v2250_v35 = vld [vmem:[#allocation10] sm:$0xff]   ;;  %v935_v38 = vld [vmem:[#allocation13 + $0x1c8] sm:$0xff]  ;;  %vm1646_vm7 = vsmask.f32 1280  ;;  %s550_s28 = scalar_lea.vmem %s2885_s11, %s2055_s23 }
  0x92   : > { %v573_v2 = vsel %vm571_vm1, %v554_v1, 0  ;;  %v2238_v3 = vld [vmem:[%s541_s25] sm:$0xff]   ;;  %v934_v36 = vld [vmem:[#allocation13 + $0x1c0] sm:$0xff]  ;;  %v939_v41 = vld [vmem:[#allocation13 + $0x1e8] sm:$0xff]  ;;  %vm1650_vm11 = vsmask.f32 2304 }
  0x93   : > { %2074 = vmatpush3.bf16.msra.mxu0 %v573_v2  ;;  %2082 = vmatpush3.bf16.msra.mxu1 %v2240_v5  ;;  %v1971_v23 = vld [vmem:[#allocation6] ss:$0 sm:$0xff]  ;;  %v938_v37 = vld [vmem:[#allocation13 + $0x1e0] sm:$0xff]  ;;  %v2047_v44 = vcombine.low %v935_v38, %v939_v41  ;;  %v2048_v45 = vcombine.high %v935_v38, %v939_v41  ;;  %vm2809_vm8 = vmand %vm1642_vm4, %vm1643_vm5  ;;  %vm1654_vm15 = vsmask.f32 3328 }
  0x94   : > { %2091 = vmatprep.subr.bf16.mxu0 %v2542_v0  ;;  %2083 = vmatprep.subr.bf16.mxu1 %v2542_v0  ;;  %v2045_v39 = vcombine.low %v934_v36, %v938_v37  ;;  %v2046_v40 = vcombine.high %v934_v36, %v938_v37  ;;  %v926_v42 = vld [vmem:[#allocation13 + $0x180] sm:$0xff]  ;;  %vm2815_vm9 = vmand %vm1645_vm6, %vm1646_vm7  ;;  %vm1661_vm6 = vcmask 1045509   ;;  %vm1662_vm7 = vsmask.f32 5376 }
  0x95   : > { %v930_v43 = vld [vmem:[#allocation13 + $0x1a0] sm:$0xff]  ;;  %vm1648_vm12 = vmor %vm2815_vm9, %vm2809_vm8 }
  0x96   : > { %2076 = vmatmul.mubr.msk.bf16.vlgmr.msra.gmra.mxu0 %vm567_vm2, %v2238_v3  ;;  %v2038_v46 = vcombine.high %v926_v42, %v930_v43  ;;  %v2037_v47 = vcombine.low %v926_v42, %v930_v43  ;;  %v918_v48 = vld [vmem:[#allocation13 + $0x140] sm:$0xff]  ;;  %v883_v42 = vld [vmem:[#allocation13 + $0x28] sm:$0xff]  ;;  %vm1651_vm13 = vmand %vm1649_vm10, %vm1650_vm11  ;;  %vm1657_vm2 = vcmask 1044484   ;;  %vm1665_vm10 = vcmask 1046534  }
  0x97   : > { %2099 = vmatprep.mubr.msk.bf16.mxu0 %vm2543_vm0, %v2542_v0  ;;  %2084 = vmatpush3.bf16.msra.mxu1 %v2241_v6  ;;  %v922_v49 = vld [vmem:[#allocation13 + $0x160] sm:$0xff]  ;;  %vm2837_vm1 = vmand %vm1653_vm14, %vm1654_vm15  ;;  %vm1666_vm11 = vsmask.f32 6400  ;;  %vm1669_vm14 = vcmask 1047559   ;;  %vm1670_vm15 = vsmask.f32 7424 }
  0x98   : > { %2085 = vmatprep.subr.bf16.mxu1 %v2542_v0  ;;  %2092 = vmatpush3.bf16.msra.mxu0 %v2243_v8  ;;  %v2030_v50 = vcombine.high %v918_v48, %v922_v49  ;;  %v2029_v51 = vcombine.low %v918_v48, %v922_v49  ;;  %v910_v52 = vld [vmem:[#allocation13 + $0x100] sm:$0xff]  ;;  %v931_v8 = vld [vmem:[#allocation13 + $0x1a8] sm:$0xff]  ;;  %v937_v48 = vld [vmem:[#allocation13 + $0x1d8] sm:$0xff] }
  0x99   : > { %2093 = vmatprep.subr.bf16.mxu0 %v2542_v0  ;;  %v914_v53 = vld [vmem:[#allocation13 + $0x120] sm:$0xff]  ;;  %vm2852_vm9 = vmand %vm1661_vm6, %vm1662_vm7 }
  0x9a   : > { %v2022_v54 = vcombine.high %v910_v52, %v914_v53  ;;  %v2021_v55 = vcombine.low %v910_v52, %v914_v53  ;;  %v902_v56 = vld [vmem:[#allocation13 + $0xc0] sm:$0xff] }
  0x9b   : > { %2086 = vmatpush3.bf16.msra.mxu1 %v2242_v7  ;;  %v906_v57 = vld [vmem:[#allocation13 + $0xe0] sm:$0xff]  ;;  %v927_v7 = vld [vmem:[#allocation13 + $0x188] sm:$0xff] }
  0x9c   : > { %2103 = vmatprep.subr.bf16.mxu1 %v2542_v0  ;;  %2094 = vmatpush3.bf16.msra.mxu0 %v2244_v19  ;;  %v2014_v58 = vcombine.high %v902_v56, %v906_v57  ;;  %v2013_v59 = vcombine.low %v902_v56, %v906_v57  ;;  %v894_v60 = vld [vmem:[#allocation13 + $0x80] sm:$0xff] }
  0x9d   : > { %2095 = vmatprep.subr.bf16.mxu0 %v2542_v0  ;;  %v898_v61 = vld [vmem:[#allocation13 + $0xa0] sm:$0xff] }
  0x9e   : > { %v2006_v62 = vcombine.high %v894_v60, %v898_v61  ;;  %v2005_v63 = vcombine.low %v894_v60, %v898_v61  ;;  %v878_v38 = vld [vmem:[#allocation13] sm:$0xff]  ;;  %v928_v61 = vld [vmem:[#allocation13 + $0x190] sm:$0xff] }
  0xa0   : > { %2096 = vmatpush3.bf16.msra.mxu0 %v2245_v20 }
  0xa1   : > { %2097 = vmatprep.subr.bf16.mxu0 %v2542_v0 }
  0xa4   : > { %2098 = vmatpush3.bf16.msra.mxu0 %v2246_v21  ;;  %v903_v21 = vld [vmem:[#allocation13 + $0xc8] sm:$0xff] }
  0xa5   : > { %1304 = vmatprep.subr.bf16.mxu0 %v2046_v40  ;;  %v879_v40 = vld [vmem:[#allocation13 + $0x8] sm:$0xff] }
 0x156   : > { %v609_v10 = vpop.f32.mrf.mxu0 }
 0x157   : > { %v610_v12 = vadd.f32 %v1968_v9, %v609_v10 }
 0x158   : > { %v2077_v11 = vpop.f32.mrf.mxu0 }
 0x159   : > { %v616_v16 = vmax.f32 %v610_v12, 0.0  ;;  %v2040_v12 = vcombine.high %v927_v7, %v931_v8 }
 0x15a   : > { %v612_v13 = vpop.f32.mrf.mxu0 }
 0x15b   : > { %v613_v14 = vadd.f32 %v1968_v9, %v612_v13  ;;  %v919_v13 = vld [vmem:[#allocation13 + $0x148] sm:$0xff] }
 0x15c   : > { %v2078_v15 = vpop.f32.mrf.mxu0 }
 0x15d   : > { %v617_v17 = vmax.f32 %v613_v14, 0.0  ;;  %v923_v14 = vld [vmem:[#allocation13 + $0x168] sm:$0xff]  ;;  %v2039_v15 = vcombine.low %v927_v7, %v931_v8  ;;  %v920_v7 = vld [vmem:[#allocation13 + $0x150] sm:$0xff] }
 0x15e   : > { %v2031_v19 = vcombine.low %v919_v13, %v923_v14  ;;  %v924_v8 = vld [vmem:[#allocation13 + $0x170] sm:$0xff] }
 0x15f   : > { %v618_v18 = vpack.c.bf16 %v617_v17, %v616_v16  ;;  %v2032_v16 = vcombine.high %v919_v13, %v923_v14  ;;  %v911_v17 = vld [vmem:[#allocation13 + $0x108] sm:$0xff]  ;;  %v2034_v13 = vcombine.high %v920_v7, %v924_v8 }
 0x161   : > { %2088 = vmatmul.mubr.msk.bf16.vlgmr.msra.gmra.mxu1 %vm658_vm3, %v618_v18  ;;  %v915_v18 = vld [vmem:[#allocation13 + $0x128] sm:$0xff] }
 0x162   : > { %2111 = vmatprep.mubr.msk.bf16.mxu1 %vm2543_vm0, %v2542_v0  ;;  %2104 = vmatpush3.bf16.msra.mxu1 %v2247_v22  ;;  %v2024_v20 = vcombine.high %v911_v17, %v915_v18  ;;  %v907_v22 = vld [vmem:[#allocation13 + $0xe8] sm:$0xff]  ;;  %vm2831_vm0 = vmor %vm1651_vm13, %vm1648_vm12 }
 0x163   : > { %2105 = vmatprep.subr.bf16.mxu1 %v2542_v0  ;;  %vm1656_vm4 = vmor %vm2837_vm1, %vm2831_vm0 }
 0x164   : > { %vm1667_vm13 = vmand %vm1665_vm10, %vm1666_vm11 }
 0x165   : > { %vm1671_vm1 = vmand %vm1669_vm14, %vm1670_vm15 }
 0x166   : > { %2106 = vmatpush3.bf16.msra.mxu1 %v2248_v33 }
 0x167   : > { %2107 = vmatprep.subr.bf16.mxu1 %v2542_v0 }
 0x16a   : > { %2108 = vmatpush3.bf16.msra.mxu1 %v2249_v34  ;;  %v891_v34 = vld [vmem:[#allocation13 + $0x68] sm:$0xff] }
 0x16b   : > { %2109 = vmatprep.subr.bf16.mxu1 %v2542_v0  ;;  %v1977_v0 = vld [vmem:[#allocation9] ss:$0 sm:$0xff] }
 0x16e   : > { %2110 = vmatpush3.bf16.msra.mxu1 %v2250_v35 }
 0x16f   : > { %1347 = vmatprep.subr.bf16.mxu1 %v2048_v45  ;;  %v1992_v45 = vcombine.high %v879_v40, %v883_v42 }
 0x221   : > { %v696_v24 = vpop.f32.mrf.mxu1 }
 0x222   : > { %v697_v26 = vadd.f32 %v1971_v23, %v696_v24  ;;  %v2016_v24 = vcombine.high %v903_v21, %v907_v22 }
 0x223   : > { %v2089_v25 = vpop.f32.mrf.mxu1 }
 0x224   : > { %v703_v30 = vmax.f32 %v697_v26, 0.0  ;;  %v895_v25 = vld [vmem:[#allocation13 + $0x88] sm:$0xff] }
 0x225   : > { %v699_v27 = vpop.f32.mrf.mxu1  ;;  %v899_v26 = vld [vmem:[#allocation13 + $0xa8] sm:$0xff] }
 0x226   : > { %v700_v28 = vadd.f32 %v1971_v23, %v699_v27  ;;  %v2023_v23 = vcombine.low %v911_v17, %v915_v18  ;;  %v2015_v27 = vcombine.low %v903_v21, %v907_v22  ;;  %v913_v17 = vld [vmem:[#allocation13 + $0x118] sm:$0xff] }
 0x227   : > { %v2090_v29 = vpop.f32.mrf.mxu1  ;;  %v917_v18 = vld [vmem:[#allocation13 + $0x138] sm:$0xff] }
 0x228   : > { %v704_v31 = vmax.f32 %v700_v28, 0.0  ;;  %v2008_v28 = vcombine.high %v895_v25, %v899_v26  ;;  %v2007_v29 = vcombine.low %v895_v25, %v899_v26  ;;  %v2028_v22 = vcombine.high %v913_v17, %v917_v18  ;;  %v905_v25 = vld [vmem:[#allocation13 + $0xd8] sm:$0xff] }
 0x229   : > { %v909_v26 = vld [vmem:[#allocation13 + $0xf8] sm:$0xff] }
 0x22a   : > { %v705_v32 = vpack.c.bf16 %v704_v31, %v703_v30  ;;  %v886_v30 = vld [vmem:[#allocation13 + $0x40] sm:$0xff] }
 0x22b   : > { %v890_v31 = vld [vmem:[#allocation13 + $0x60] sm:$0xff] }
 0x22c   : > { %2100 = vmatmul.mubr.msk.bf16.vlgmr.msra.gmra.mxu0 %vm658_vm3, %v705_v32  ;;  %v887_v32 = vld [vmem:[#allocation13 + $0x48] sm:$0xff]  ;;  %v1998_v33 = vcombine.high %v886_v30, %v890_v31  ;;  %v1997_v35 = vcombine.low %v886_v30, %v890_v31  ;;  %v2020_v30 = vcombine.high %v905_v25, %v909_v26  ;;  %v896_v31 = vld [vmem:[#allocation13 + $0x90] sm:$0xff] }
 0x22d   : > { %1305 = vmatpush1.bf16.msra.mxu0 %v2045_v39  ;;  %v1999_v36 = vcombine.low %v887_v32, %v891_v34  ;;  %v2000_v37 = vcombine.high %v887_v32, %v891_v34  ;;  %v882_v39 = vld [vmem:[#allocation13 + $0x20] sm:$0xff]  ;;  %v900_v32 = vld [vmem:[#allocation13 + $0xb0] sm:$0xff]  ;;  %v901_v34 = vld [vmem:[#allocation13 + $0xb8] sm:$0xff] }
 0x22e   : > { %1306 = vmatprep.subr.bf16.mxu0 %v2038_v46  ;;  %v1990_v41 = vcombine.high %v878_v38, %v882_v39  ;;  %v1989_v43 = vcombine.low %v878_v38, %v882_v39  ;;  %v936_v46 = vld [vmem:[#allocation13 + $0x1d0] sm:$0xff] }
 0x22f   : > { %v888_v39 = vld [vmem:[#allocation13 + $0x50] sm:$0xff] }
 0x231   : > { %1307 = vmatpush1.bf16.msra.mxu0 %v2037_v47  ;;  %v940_v47 = vld [vmem:[#allocation13 + $0x1f0] sm:$0xff] }
 0x232   : > { %1308 = vmatprep.subr.bf16.mxu0 %v2030_v50  ;;  %v2050_v49 = vcombine.high %v936_v46, %v940_v47  ;;  %v941_v50 = vld [vmem:[#allocation13 + $0x1f8] sm:$0xff] }
 0x233   : > { %v2051_v52 = vcombine.low %v937_v48, %v941_v50  ;;  %v2052_v53 = vcombine.high %v937_v48, %v941_v50  ;;  %v884_v48 = vld [vmem:[#allocation13 + $0x30] sm:$0xff]  ;;  %v885_v50 = vld [vmem:[#allocation13 + $0x38] sm:$0xff] }
 0x235   : > { %1309 = vmatpush1.bf16.msra.mxu0 %v2029_v51  ;;  %v2049_v51 = vcombine.low %v936_v46, %v940_v47  ;;  %v880_v47 = vld [vmem:[#allocation13 + $0x10] sm:$0xff] }
 0x236   : > { %1310 = vmatprep.subr.bf16.mxu0 %v2022_v54  ;;  %v2544_v54 = vmov 0  }
 0x237   : > { %1336 = vmatprep.mubr.bf16.mxu0 %v2544_v54 }
 0x239   : > { %1311 = vmatpush1.bf16.msra.mxu0 %v2021_v55  ;;  %v1983_v55 = vld [vmem:[#allocation12] ss:$0 sm:$0xff] }
 0x23a   : > { %1312 = vmatprep.subr.bf16.mxu0 %v2014_v58 }
 0x23d   : > { %1313 = vmatpush1.bf16.msra.mxu0 %v2013_v59 }
 0x23e   : > { %1314 = vmatprep.subr.bf16.mxu0 %v2006_v62 }
 0x241   : > { %1315 = vmatpush1.bf16.msra.mxu0 %v2005_v63  ;;  %v932_v63 = vld [vmem:[#allocation13 + $0x1b0] sm:$0xff] }
 0x242   : > { %1316 = vmatprep.subr.bf16.mxu0 %v1998_v33  ;;  %v897_v33 = vld [vmem:[#allocation13 + $0x98] sm:$0xff] }
 0x243   : > { %v2012_v38 = vcombine.high %v897_v33, %v901_v34 }
 0x245   : > { %1317 = vmatpush1.bf16.msra.mxu0 %v1997_v35 }
 0x246   : > { %1318 = vmatprep.subr.bf16.mxu0 %v1990_v41  ;;  %v889_v41 = vld [vmem:[#allocation13 + $0x58] sm:$0xff] }
 0x249   : > { %1319 = vmatpush1.bf16.msra.mxu0 %v1989_v43  ;;  %v2009_v43 = vcombine.low %v896_v31, %v900_v32 }
 0x24a   : > { %1390 = vmatprep.subr.bf16.mxu0 %v2050_v49  ;;  %v881_v49 = vld [vmem:[#allocation13 + $0x18] sm:$0xff] }
 0x2ec   : > { %v782_v1 = vpop.f32.mrf.mxu0 }
 0x2ed   : > { %v783_v3 = vadd.f32 %v1977_v0, %v782_v1  ;;  %v933_v1 = vld [vmem:[#allocation13 + $0x1b8] sm:$0xff] }
 0x2ee   : > { %v2101_v2 = vpop.f32.mrf.mxu0 }
 0x2ef   : > { %v789_v9 = vmax.f32 %v783_v3, 0.0 }
 0x2f0   : > { %v785_v4 = vpop.f32.mrf.mxu0 }
 0x2f1   : > { %v786_v5 = vadd.f32 %v1977_v0, %v785_v4  ;;  %v929_v0 = vld [vmem:[#allocation13 + $0x198] sm:$0xff] }
 0x2f2   : > { %v2102_v6 = vpop.f32.mrf.mxu0 }
 0x2f3   : > { %v790_v10 = vmax.f32 %v786_v5, 0.0  ;;  %v2042_v5 = vcombine.high %v928_v61, %v932_v63  ;;  %v2044_v6 = vcombine.high %v929_v0, %v933_v1 }
 0x2f5   : > { %v791_v11 = vpack.c.bf16 %v790_v10, %v789_v9  ;;  %v921_v9 = vld [vmem:[#allocation13 + $0x158] sm:$0xff] }
 0x2f6   : > { %v925_v10 = vld [vmem:[#allocation13 + $0x178] sm:$0xff] }
 0x2f7   : > { %2112 = vmatmul.mubr.msk.bf16.vlgmr.msra.gmra.mxu1 %vm658_vm3, %v791_v11  ;;  %v2041_v11 = vcombine.low %v928_v61, %v932_v63  ;;  %v2036_v14 = vcombine.high %v921_v9, %v925_v10  ;;  %vm1658_vm3 = vsmask.f32 4352 }
 0x2f8   : > { %1348 = vmatpush1.bf16.msra.mxu1 %v2047_v44  ;;  %v1991_v44 = vcombine.low %v879_v40, %v883_v42  ;;  %1379 = vmatprep.mubr.bf16.mxu1 %v2544_v54  ;;  %v892_v40 = vld [vmem:[#allocation13 + $0x70] sm:$0xff]  ;;  %v893_v42 = vld [vmem:[#allocation13 + $0x78] sm:$0xff]  ;;  %vm1659_vm5 = vmand %vm1657_vm2, %vm1658_vm3 }
 0x2f9   : > { %1349 = vmatprep.subr.bf16.mxu1 %v2040_v12  ;;  %v2043_v12 = vcombine.low %v929_v0, %v933_v1  ;;  %v2004_v46 = vcombine.high %v889_v41, %v893_v42  ;;  %vm2848_vm8 = vmor %vm1659_vm5, %vm1656_vm4 }
 0x2fa   : > { %vm1664_vm12 = vmor %vm2852_vm9, %vm2848_vm8 }
 0x2fb   : > { %vm1668_vm0 = vmor %vm1667_vm13, %vm1664_vm12 }
 0x2fc   : > { %1350 = vmatpush1.bf16.msra.mxu1 %v2039_v15  ;;  %v912_v15 = vld [vmem:[#allocation13 + $0x110] sm:$0xff]  ;;  %vm1672_vm2 = vmor %vm1671_vm1, %vm1668_vm0 }
 0x2fd   : > { %1351 = vmatprep.subr.bf16.mxu1 %v2032_v16  ;;  %v916_v16 = vld [vmem:[#allocation13 + $0x130] sm:$0xff] }
 0x2fe   : > { %v2026_v21 = vcombine.high %v912_v15, %v916_v16 }
 0x300   : > { %1352 = vmatpush1.bf16.msra.mxu1 %v2031_v19  ;;  %v2033_v19 = vcombine.low %v920_v7, %v924_v8 }
 0x301   : > { %1353 = vmatprep.subr.bf16.mxu1 %v2024_v20  ;;  %v2035_v20 = vcombine.low %v921_v9, %v925_v10 }
 0x304   : > { %1354 = vmatpush1.bf16.msra.mxu1 %v2023_v23  ;;  %v904_v23 = vld [vmem:[#allocation13 + $0xd0] sm:$0xff] }
 0x305   : > { %1355 = vmatprep.subr.bf16.mxu1 %v2016_v24  ;;  %v908_v24 = vld [vmem:[#allocation13 + $0xf0] sm:$0xff] }
 0x306   : > { %v2017_v35 = vcombine.low %v904_v23, %v908_v24 }
 0x308   : > { %1356 = vmatpush1.bf16.msra.mxu1 %v2015_v27  ;;  %v2025_v27 = vcombine.low %v912_v15, %v916_v16 }
 0x309   : > { %1357 = vmatprep.subr.bf16.mxu1 %v2008_v28  ;;  %v2027_v28 = vcombine.low %v913_v17, %v917_v18 }
 0x30c   : > { %1358 = vmatpush1.bf16.msra.mxu1 %v2007_v29  ;;  %v2018_v29 = vcombine.high %v904_v23, %v908_v24 }
 0x30d   : > { %1359 = vmatprep.subr.bf16.mxu1 %v2000_v37  ;;  %v2010_v37 = vcombine.high %v896_v31, %v900_v32 }
 0x310   : > { %1360 = vmatpush1.bf16.msra.mxu1 %v1999_v36  ;;  %v2019_v36 = vcombine.low %v905_v25, %v909_v26 }
 0x311   : > { %1361 = vmatprep.subr.bf16.mxu1 %v1992_v45  ;;  %v2002_v45 = vcombine.high %v888_v39, %v892_v40 }
 0x314   : > { %1362 = vmatpush1.bf16.msra.mxu1 %v1991_v44  ;;  %v2011_v44 = vcombine.low %v897_v33, %v901_v34 }
 0x315   : > { %1433 = vmatprep.subr.bf16.mxu1 %v2052_v53  ;;  %v1994_v53 = vcombine.high %v880_v47, %v884_v48 }
 0x3b7   : > { %v868_v56 = vpop.f32.mrf.mxu1 }
 0x3b8   : > { %v869_v58 = vadd.f32 %v1983_v55, %v868_v56  ;;  %v1995_v56 = vcombine.low %v881_v49, %v885_v50 }
 0x3b9   : > { %v2113_v57 = vpop.f32.mrf.mxu1 }
 0x3ba   : > { %v875_v2 = vmax.f32 %v869_v58, 0.0  ;;  %v944_v57 = vlaneseq }
 0x3bb   : > { %v871_v59 = vpop.f32.mrf.mxu1 }
 0x3bc   : > { %v872_v60 = vadd.f32 %v1983_v55, %v871_v59  ;;  %v1993_v55 = vcombine.low %v880_v47, %v884_v48  ;;  %v2795_v58 = vshrl.u32 %v944_v57, 7 }
 0x3bd   : > { %v2114_v62 = vpop.f32.mrf.mxu1 }
 0x3be   : > { %v876_v3 = vmax.f32 %v872_v60, 0.0  ;;  %v950_v61 = vsub.s32 1, %v2795_v58  ;;  %v958_v63 = vsub.s32 3, %v2795_v58  ;;  %v946_v1 = vsub.s32 0, %v2795_v58 }
 0x3c0   : > { %v2789_v4 = vpack.c.bf16 %v876_v3, %v875_v2  ;;  %v954_v2 = vsub.s32 2, %v2795_v58  ;;  %v942_v3 = vld [vmem:[#allocation15] sm:$0xff] }
 0x3c1   : > { %v951_v7 = vrot.slane %v942_v3, %v950_v61  ;;  %v947_v10 = vrot.slane %v942_v3, %v946_v1 }
 0x3c2   : > { %1337 = vmatmul.mubr.bf16.vlgmr.msra.gmra.mxu0 %v2789_v4  ;;  %1380 = vmatmul.mubr.bf16.vlgmr.msra.gmra.mxu1 %v2789_v4 }
 0x3c3   : > { %1391 = vmatpush1.bf16.msra.mxu0 %v2049_v51  ;;  %1434 = vmatpush1.bf16.msra.mxu1 %v2051_v52  ;;  %v2001_v51 = vcombine.low %v888_v39, %v892_v40  ;;  %v2003_v52 = vcombine.low %v889_v41, %v893_v42 }
 0x3c4   : > { %1392 = vmatprep.subr.bf16.mxu0 %v2042_v5  ;;  %1435 = vmatprep.subr.bf16.mxu1 %v2044_v6 }
 0x3c5   : > { %1422 = vmatprep.mubr.bf16.mxu0 %v2544_v54  ;;  %1465 = vmatprep.mubr.bf16.mxu1 %v2544_v54  ;;  %v1996_v54 = vcombine.high %v881_v49, %v885_v50 }
 0x3c7   : > { %1393 = vmatpush1.bf16.msra.mxu0 %v2041_v11  ;;  %1436 = vmatpush1.bf16.msra.mxu1 %v2043_v12  ;;  %v955_v11 = vrot.slane %v942_v3, %v954_v2 }
 0x3c8   : > { %1394 = vmatprep.subr.bf16.mxu0 %v2034_v13  ;;  %1437 = vmatprep.subr.bf16.mxu1 %v2036_v14 }
 0x3cb   : > { %1395 = vmatpush1.bf16.msra.mxu0 %v2033_v19  ;;  %1438 = vmatpush1.bf16.msra.mxu1 %v2035_v20 }
 0x3cc   : > { %1396 = vmatprep.subr.bf16.mxu0 %v2026_v21  ;;  %1439 = vmatprep.subr.bf16.mxu1 %v2028_v22 }
 0x3cf   : > { %1397 = vmatpush1.bf16.msra.mxu0 %v2025_v27  ;;  %1440 = vmatpush1.bf16.msra.mxu1 %v2027_v28 }
 0x3d0   : > { %1398 = vmatprep.subr.bf16.mxu0 %v2018_v29  ;;  %1441 = vmatprep.subr.bf16.mxu1 %v2020_v30 }
 0x3d3   : > { %1399 = vmatpush1.bf16.msra.mxu0 %v2017_v35  ;;  %1442 = vmatpush1.bf16.msra.mxu1 %v2019_v36 }
 0x3d4   : > { %1400 = vmatprep.subr.bf16.mxu0 %v2010_v37  ;;  %1443 = vmatprep.subr.bf16.mxu1 %v2012_v38 }
 0x3d7   : > { %1401 = vmatpush1.bf16.msra.mxu0 %v2009_v43  ;;  %1444 = vmatpush1.bf16.msra.mxu1 %v2011_v44  ;;  %v962_v44 = vsub.s32 4, %v2795_v58 }
 0x3d8   : > { %1402 = vmatprep.subr.bf16.mxu0 %v2002_v45  ;;  %1445 = vmatprep.subr.bf16.mxu1 %v2004_v46  ;;  %v970_v45 = vsub.s32 6, %v2795_v58 }
 0x3d9   : > { %v963_v50 = vrot.slane %v942_v3, %v962_v44 }
 0x3db   : > { %1403 = vmatpush1.bf16.msra.mxu0 %v2001_v51  ;;  %1446 = vmatpush1.bf16.msra.mxu1 %v2003_v52  ;;  %v971_v51 = vrot.slane %v942_v3, %v970_v45  ;;  %v966_v52 = vsub.s32 5, %v2795_v58 }
 0x3dc   : > { %1404 = vmatprep.subr.bf16.mxu0 %v1994_v53  ;;  %1447 = vmatprep.subr.bf16.mxu1 %v1996_v54  ;;  %v974_v53 = vsub.s32 7, %v2795_v58 }
 0x3de   : > { %v975_v1 = vrot.slane %v942_v3, %v974_v53 }
 0x3df   : > { %1405 = vmatpush1.bf16.msra.mxu0 %v1993_v55  ;;  %1448 = vmatpush1.bf16.msra.mxu1 %v1995_v56 }
 0x3e2   : > { %1423 = vmatmul.mubr.bf16.vlgmr.msra.gmra.mxu0 %v2789_v4  ;;  %1466 = vmatmul.mubr.bf16.vlgmr.msra.gmra.mxu1 %v2789_v4  ;;  %v959_v4 = vrot.slane %v942_v3, %v958_v63  ;;  %v967_v63 = vrot.slane %v942_v3, %v966_v52 }
 0x482   : > { %v1338_v59 = vpop.f32.mrf.mxu0  ;;  %v1381_v60 = vpop.f32.mrf.mxu1 }
 0x483   : > { %v1339_v18 = vadd.f32 %v1338_v59, %v947_v10  ;;  %v1382_v19 = vadd.f32 %v1381_v60, %v955_v11 }
 0x484   : > { %v1340_v62 = vpop.f32.mrf.mxu0  ;;  %v1383_v0 = vpop.f32.mrf.mxu1 }
 0x485   : > { %v1341_v16 = vadd.f32 %v1340_v62, %v951_v7  ;;  %v1384_v17 = vadd.f32 %v1383_v0, %v959_v4  ;;  %v1476_v26 = vmax.f32 %v1339_v18, 0.0  ;;  %v1478_v27 = vmax.f32 %v1382_v19, 0.0 }
 0x486   : > { %v1342_v5 = vpop.f32.mrf.mxu0  ;;  %v1385_v6 = vpop.f32.mrf.mxu1 }
 0x487   : > { %v1343_v14 = vadd.f32 %v1342_v5, %v947_v10  ;;  %v1386_v15 = vadd.f32 %v1385_v6, %v955_v11  ;;  %v1477_v24 = vmax.f32 %v1341_v16, 0.0  ;;  %v1479_v25 = vmax.f32 %v1384_v17, 0.0 }
 0x488   : > { %v1344_v8 = vpop.f32.mrf.mxu0  ;;  %v1387_v9 = vpop.f32.mrf.mxu1  ;;  %v2545_v5 = vmov 1966171168  }
 0x489   : > { %v1345_v12 = vadd.f32 %v1344_v8, %v951_v7  ;;  %v1388_v13 = vadd.f32 %v1387_v9, %v959_v4  ;;  %v1484_v22 = vmax.f32 %v1343_v14, 0.0  ;;  %v1486_v23 = vmax.f32 %v1386_v15, 0.0 }
 0x48a   : > { %v2805_v6 = vunpack.c.l.s4 %v2545_v5 }
 0x48b   : > { %v1485_v20 = vmax.f32 %v1345_v12, 0.0  ;;  %v1487_v21 = vmax.f32 %v1388_v13, 0.0  ;;  %v1492_v30 = vpack.c.bf16 %v1484_v22, %v1476_v26  ;;  %v1494_v31 = vpack.c.bf16 %v1486_v23, %v1478_v27 }
 0x48d   : > { %v1493_v28 = vpack.c.bf16 %v1485_v20, %v1477_v24  ;;  %v1495_v29 = vpack.c.bf16 %v1487_v21, %v1479_v25  ;;  %v1500_v36 = vunpack.i.l.bf16 %v1492_v30  ;;  %v1501_v37 = vunpack.i.h.bf16 %v1492_v30 }
 0x48e   : > { %v1520_v38 = vunpack.i.l.bf16 %v1494_v31  ;;  %v1521_v39 = vunpack.i.h.bf16 %v1494_v31 }
 0x48f   : > { %v1510_v32 = vunpack.i.l.bf16 %v1493_v28  ;;  %v1511_v33 = vunpack.i.h.bf16 %v1493_v28  ;;  %v1530_v34 = vunpack.i.l.bf16 %v1495_v29  ;;  %v1531_v35 = vunpack.i.h.bf16 %v1495_v29 }
 0x490   : > { %v1502_v42 = vmax.f32 %v1500_v36, %v1501_v37  ;;  %v1522_v43 = vmax.f32 %v1520_v38, %v1521_v39 }
 0x491   : > { %v1512_v40 = vmax.f32 %v1510_v32, %v1511_v33  ;;  %v1532_v41 = vmax.f32 %v1530_v34, %v1531_v35 }
 0x492   : > { %v1503_v48 = vrot.slane %v1502_v42, 4  ;;  %v1523_v49 = vrot.slane %v1522_v43, 4 }
 0x493   : > { %v1513_v46 = vrot.slane %v1512_v40, 4  ;;  %v1533_v47 = vrot.slane %v1532_v41, 4 }
 0x494   : > { %v1504_v59 = vmax.f32 %v1502_v42, %v1503_v48  ;;  %v1524_v60 = vmax.f32 %v1522_v43, %v1523_v49 }
 0x495   : > { %v1514_v54 = vmax.f32 %v1512_v40, %v1513_v46  ;;  %v1534_v55 = vmax.f32 %v1532_v41, %v1533_v47 }
 0x496   : > { %v1505_v10 = vrot.slane %v1504_v59, 2  ;;  %v1525_v11 = vrot.slane %v1524_v60, 2 }
 0x497   : > { %v1515_v7 = vrot.slane %v1514_v54, 2  ;;  %v1535_v4 = vrot.slane %v1534_v55, 2 }
 0x498   : > { %v1506_v29 = vmax.f32 %v1504_v59, %v1505_v10  ;;  %v1526_v30 = vmax.f32 %v1524_v60, %v1525_v11  ;;  %v1598_v60 = vunpack.c.0.s8 %v2805_v6 }
 0x499   : > { %v1516_v23 = vmax.f32 %v1514_v54, %v1515_v7  ;;  %v1536_v24 = vmax.f32 %v1534_v55, %v1535_v4 }
 0x49a   : > { %v1507_v49 = vrot.slane %v1506_v29, 1 }
 0x49b   : > { %v1517_v41 = vrot.slane %v1516_v23, 1  ;;  %v1537_v42 = vrot.slane %v1536_v24, 1 }
 0x49d   : > { %v1518_v55 = vmax.f32 %v1516_v23, %v1517_v41 }
 0x4a2   : > { %v1424_v56 = vpop.f32.mrf.mxu0  ;;  %v1467_v57 = vpop.f32.mrf.mxu1 }
 0x4a3   : > { %v1425_v61 = vadd.f32 %v1424_v56, %v963_v50  ;;  %v1468_v62 = vadd.f32 %v1467_v57, %v971_v51  ;;  %v1538_v56 = vmax.f32 %v1536_v24, %v1537_v42 }
 0x4a4   : > { %v1426_v0 = vpop.f32.mrf.mxu0  ;;  %v1469_v2 = vpop.f32.mrf.mxu1 }
 0x4a5   : > { %v1480_v14 = vmax.f32 %v1425_v61, 0.0  ;;  %v1482_v15 = vmax.f32 %v1468_v62, 0.0  ;;  %v1427_v16 = vadd.f32 %v1426_v0, %v967_v63  ;;  %v1470_v17 = vadd.f32 %v1469_v2, %v975_v1 }
 0x4a6   : > { %v1428_v8 = vpop.f32.mrf.mxu0  ;;  %v1471_v9 = vpop.f32.mrf.mxu1 }
 0x4a7   : > { %v1429_v12 = vadd.f32 %v1428_v8, %v963_v50  ;;  %v1472_v13 = vadd.f32 %v1471_v9, %v971_v51  ;;  %v1481_v31 = vmax.f32 %v1427_v16, 0.0  ;;  %v1483_v32 = vmax.f32 %v1470_v17, 0.0 }
 0x4a8   : > { %v1430_v18 = vpop.f32.mrf.mxu0  ;;  %v1473_v3 = vpop.f32.mrf.mxu1  ;;  %v1527_v50 = vrot.slane %v1526_v30, 1  ;;  %v1519_v8 = vpack.i.bf16 %v1518_v55, %v1518_v55  ;;  %v1539_v9 = vpack.i.bf16 %v1538_v56, %v1538_v56 }
 0x4a9   : > { %v1488_v19 = vmax.f32 %v1429_v12, 0.0  ;;  %v1490_v20 = vmax.f32 %v1472_v13, 0.0  ;;  %v1431_v21 = vadd.f32 %v1430_v18, %v967_v63  ;;  %v1474_v22 = vadd.f32 %v1473_v3, %v975_v1 }
 0x4aa   : > { %v1508_v63 = vmax.f32 %v1506_v29, %v1507_v49  ;;  %v1528_v0 = vmax.f32 %v1526_v30, %v1527_v50  ;;  %v1601_v18 = vsub.s32 %v1598_v60, %v2795_v58 }
 0x4ab   : > { %v1496_v25 = vpack.c.bf16 %v1488_v19, %v1480_v14  ;;  %v1498_v26 = vpack.c.bf16 %v1490_v20, %v1482_v15  ;;  %v1489_v27 = vmax.f32 %v1431_v21, 0.0  ;;  %v1491_v28 = vmax.f32 %v1474_v22, 0.0 }
 0x4ac   : > { %v1509_v14 = vpack.i.bf16 %v1508_v63, %v1508_v63  ;;  %v1529_v15 = vpack.i.bf16 %v1528_v0, %v1528_v0 }
 0x4ad   : > { %v1540_v33 = vunpack.i.l.bf16 %v1496_v25  ;;  %v1541_v34 = vunpack.i.h.bf16 %v1496_v25  ;;  %v1560_v35 = vunpack.i.l.bf16 %v1498_v26  ;;  %v1561_v36 = vunpack.i.h.bf16 %v1498_v26 }
 0x4ae   : > { %v1497_v38 = vpack.c.bf16 %v1489_v27, %v1481_v31  ;;  %v1499_v39 = vpack.c.bf16 %v1491_v28, %v1483_v32  ;;  %v1592_v20 = vcombine.low %v1509_v14, %v1519_v8  ;;  %v1593_v21 = vcombine.low %v1529_v15, %v1539_v9 }
 0x4af   : > { %v1542_v43 = vmax.f32 %v1540_v33, %v1541_v34  ;;  %v1562_v44 = vmax.f32 %v1560_v35, %v1561_v36 }
 0x4b0   : > { %v1550_v45 = vunpack.i.l.bf16 %v1497_v38  ;;  %v1551_v46 = vunpack.i.h.bf16 %v1497_v38  ;;  %v1570_v47 = vunpack.i.l.bf16 %v1499_v39  ;;  %v1571_v48 = vunpack.i.h.bf16 %v1499_v39 }
 0x4b1   : > { %v1543_v51 = vrot.slane %v1542_v43, 4  ;;  %v1563_v52 = vrot.slane %v1562_v44, 4  ;;  %v1602_v29 = vrot.slane %v1592_v20, %v1601_v18  ;;  %v1609_v30 = vrot.slane %v1593_v21, %v1601_v18 }
 0x4b2   : > { %v1552_v53 = vmax.f32 %v1550_v45, %v1551_v46  ;;  %v1572_v54 = vmax.f32 %v1570_v47, %v1571_v48 }
 0x4b3   : > { %v1544_v57 = vmax.f32 %v1542_v43, %v1543_v51  ;;  %v1564_v59 = vmax.f32 %v1562_v44, %v1563_v52  ;;  %v1624_v37 = vcombine.low %v1602_v29, %v1609_v30  ;;  %v1673_v43 = vld [vmem:[%s550_s28] sm:$0xff] }
 0x4b4   : > { %v1553_v61 = vrot.slane %v1552_v53, 4  ;;  %v1573_v62 = vrot.slane %v1572_v54, 4 }
 0x4b5   : > { %v1545_v1 = vrot.slane %v1544_v57, 2  ;;  %v1565_v2 = vrot.slane %v1564_v59, 2  ;;  %v1632_v41 = vrot.slane %v1624_v37, %v1601_v18 }
 0x4b6   : > { %v1554_v7 = vmax.f32 %v1552_v53, %v1553_v61  ;;  %v1574_v4 = vmax.f32 %v1572_v54, %v1573_v62 }
 0x4b7   : > { %v1546_v10 = vmax.f32 %v1544_v57, %v1545_v1  ;;  %v1566_v11 = vmax.f32 %v1564_v59, %v1565_v2 }
 0x4b8   : > { %v1555_v12 = vrot.slane %v1554_v7, 2  ;;  %v1575_v13 = vrot.slane %v1574_v4, 2 }
 0x4b9   : > { %v1547_v16 = vrot.slane %v1546_v10, 1  ;;  %v1567_v17 = vrot.slane %v1566_v11, 1 }
 0x4ba   : > { %v1556_v3 = vmax.f32 %v1554_v7, %v1555_v12  ;;  %v1576_v19 = vmax.f32 %v1574_v4, %v1575_v13 }
 0x4bb   : > { %v1548_v22 = vmax.f32 %v1546_v10, %v1547_v16  ;;  %v1568_v23 = vmax.f32 %v1566_v11, %v1567_v17 }
 0x4bc   : > { %v1557_v24 = vrot.slane %v1556_v3, 1  ;;  %v1577_v25 = vrot.slane %v1576_v19, 1 }
 0x4bd   : > { %v1549_v31 = vpack.i.bf16 %v1548_v22, %v1548_v22  ;;  %v1569_v32 = vpack.i.bf16 %v1568_v23, %v1568_v23 }
 0x4be   : > { %v1558_v27 = vmax.f32 %v1556_v3, %v1557_v24  ;;  %v1578_v28 = vmax.f32 %v1576_v19, %v1577_v25 }
 0x4c0   : > { %v1559_v33 = vpack.i.bf16 %v1558_v27, %v1558_v27  ;;  %v1579_v34 = vpack.i.bf16 %v1578_v28, %v1578_v28 }
 0x4c2   : > { %v1594_v35 = vcombine.low %v1549_v31, %v1559_v33  ;;  %v1595_v36 = vcombine.low %v1569_v32, %v1579_v34 }
 0x4c4   : > { %v1616_v38 = vrot.slane %v1594_v35, %v1601_v18  ;;  %v1623_v39 = vrot.slane %v1595_v36, %v1601_v18 }
 0x4c6   : > { %v1625_v40 = vcombine.low %v1616_v38, %v1623_v39 }
 0x4c8   : > { %v1639_v42 = vrot.slane %v1625_v40, %v1601_v18 }
 0x4ca   : > { %v1640_v44 = vcombine.low %v1632_v41, %v1639_v42 }
 0x4cc   : > { %v1674_v45 = vsel %vm1672_vm2, %v1640_v44, %v1673_v43 }
 0x4cd   : > { %1675 = vst [vmem:[%s550_s28] sm:$0xff] %v1674_v45 }
 0x4ce PF: > { %s26_s19 = sadd.s32 1, %s2527_s19   ;;  %s2907_s17 = smov %s2523_s18 }
 0x4cf   : > { %p23_p6 = scmp.ge.s32.totalorder %s26_s19, 4   ;;  %s2908_s18 = smov %s2910_s29 }
 0x4d1   :  { %25 = sbr.rel (!%p23_p6) target bundleno = 6 (0x6), region = 142 }
 0x4d6   :  { %1792 = vsyncpa [#allocation3], 1 }
 0x4d7   :  { %1794 = vsyncpa [#allocation3 + $0x1], 1 }
 0x4d8   :  { %1795 = vsyncpa [#allocation5], 1 }
 0x4d9   :  { %1796 = vsyncpa [#allocation8], 1 }
 0x4da   :  { %1797 = vsyncpa [#allocation11], 1 }
 0x4db   :  { %1798 = vsyncpa [#allocation14], 1 }

// kernel: cls_model_forward.7
= control target key start
LH: loop header
LB: loop body
LE: loop exit
PB: predicated region body
PF: predicated region fallthrough
CT: control target
= control target key end

     0   :  { %12 = vsyncpa [#allocation3], 0  ;;  %s3838_s0 = inlined_call_operand.vmem [shape: bf16[2,1024], index: 0, kind: input, shape index: {}]   ;;  %s3839_s1 = inlined_call_operand.hbm [shape: bf16[1024,512], index: 1, kind: input, shape index: {}]   ;;  %s3840_s2 = inlined_call_operand.hbm [shape: f32[1,512], index: 2, kind: input, shape index: {}]   ;;  %s3841_s3 = inlined_call_operand.hbm [shape: bf16[512,256], index: 3, kind: input, shape index: {}]   ;;  %s3842_s4 = inlined_call_operand.hbm [shape: f32[1,256], index: 4, kind: input, shape index: {}]   ;;  %s3843_s5 = inlined_call_operand.vmem [shape: bf16[256,128], index: 5, kind: input, shape index: {}]   ;;  %s3844_s6 = inlined_call_operand.vmem [shape: f32[1,128], index: 6, kind: input, shape index: {}]   ;;  %s3845_s7 = inlined_call_operand.vmem [shape: f32[2,128], index: 7, kind: output, shape index: {}]  }
   0x1   :  { %13 = vsyncpa [#allocation5], 0 }
   0x2   :  { %14 = vsyncpa [#allocation8], 0  ;;  %s3647_s24 = smov [#allocation4]   ;;  %s3648_s26 = smov [#allocation2]  }
   0x3   :  { %s35_s25 = sshll.u32 %s3647_s24, 4  ;;  %s22_s27 = sshll.u32 %s3648_s26, 4  ;;  %s36_s25 = int_to_ptr.vmem [resolvable:$true] %s35_s25  ;;  %s23_s27 = int_to_ptr.vmem [resolvable:$true] %s22_s27 }
   0x4   :  { %s3569_s28 = scalar_lea.vmem %s36_s25, 64  ;;  %p3574_p1 = scmp.lt.s32.totalorder %s36_s25, %s36_s25 }
   0x5   :  { %p3570_p0 = scmp.ne.s32.totalorder %s36_s25, %s3569_s28  ;;  %p3575_p2 = scmp.lt.s32.totalorder %s3569_s28, %s3569_s28 }
   0x7   :  { %p3576_p3 = por %p3575_p2, %p3574_p1 }
   0x9   :  { %p3577_p4 = pnand %p3576_p3, %p3570_p0 }
   0xb   :  { %3580 = shalt.err (!%p3577_p4)
}
   0xc   :  { %38 = dma.hbm_to_vmem [thread:$0]  %s3840_s2, 64, %s36_s25, [#allocation5]  }
   0xd   :  { %s3589_s8 = scalar_lea.vmem %s23_s27, 32768  ;;  %p3594_p6 = scmp.lt.s32.totalorder %s23_s27, %s23_s27 }
   0xe   :  { %p3590_p5 = scmp.ne.s32.totalorder %s23_s27, %s3589_s8  ;;  %p3595_p7 = scmp.lt.s32.totalorder %s3589_s8, %s3589_s8 }
  0x10   :  { %p3596_p8 = por %p3595_p7, %p3594_p6 }
  0x12   :  { %p3597_p9 = pnand %p3596_p8, %p3590_p5 }
  0x14   :  { %3600 = shalt.err (!%p3597_p9)
}
  0x15   :  { %s3649_s9 = smov 256   ;;  %s3650_s10 = smov 16  }
  0x16   :  { %28 = dma.hbm_to_vmem [thread:$0]  %s3839_s1, 32768, %s23_s27, [#allocation3], %s3649_s9, %s3649_s9, %s3650_s10  }
  0x17   :  { %s3651_s13 = smov [#allocation6]  }
  0x18   :  { %s44_s14 = sshll.u32 %s3651_s13, 4  ;;  %s45_s14 = int_to_ptr.vmem [resolvable:$true] %s44_s14 }
  0x19   :  { %s3609_s15 = scalar_lea.vmem %s45_s14, 8192  ;;  %p3614_p11 = scmp.lt.s32.totalorder %s45_s14, %s45_s14 }
  0x1a   :  { %p3610_p10 = scmp.ne.s32.totalorder %s45_s14, %s3609_s15  ;;  %p3615_p12 = scmp.lt.s32.totalorder %s3609_s15, %s3609_s15 }
  0x1c   :  { %p3616_p13 = por %p3615_p12, %p3614_p11 }
  0x1e   :  { %p3617_p0 = pnand %p3616_p13, %p3610_p10 }
  0x20   :  { %3620 = shalt.err (!%p3617_p0)
}
  0x21   :  { %s3652_s2 = smov 128   ;;  %s3653_s16 = smov 8  }
  0x22   :  { %50 = dma.hbm_to_vmem [thread:$0]  %s3841_s3, 8192, %s45_s14, [#allocation5], %s3652_s2, %s3652_s2, %s3653_s16  }
  0x23   :  { %s3654_s19 = smov [#allocation7]  }
  0x24   :  { %s57_s20 = sshll.u32 %s3654_s19, 4  ;;  %s58_s20 = int_to_ptr.vmem [resolvable:$true] %s57_s20 }
  0x25   :  { %s3629_s1 = scalar_lea.vmem %s58_s20, 32  ;;  %p3634_p2 = scmp.lt.s32.totalorder %s58_s20, %s58_s20 }
  0x26   :  { %p3630_p1 = scmp.ne.s32.totalorder %s58_s20, %s3629_s1  ;;  %p3635_p3 = scmp.lt.s32.totalorder %s3629_s1, %s3629_s1 }
  0x28   :  { %p3636_p4 = por %p3635_p3, %p3634_p2 }
  0x2a   :  { %p3637_p5 = pnand %p3636_p4, %p3630_p1 }
  0x2c   :  { %3640 = shalt.err (!%p3637_p5)
}
  0x2d   :  { %60 = dma.hbm_to_vmem [thread:$0]  %s3842_s4, 32, %s58_s20, [#allocation8]  }
  0x2e   :  { %3641 = dma.done.wait [#allocation3], 32768  }
  0x2f   :  { %3642 = vsyncadd [#allocation3], 4294934528 }
  0x30   :  { %3643 = dma.done.wait [#allocation5], 8256  }
  0x31   :  { %3644 = vsyncadd [#allocation5], 4294959040 }
  0x32   :  { %3645 = dma.done.wait [#allocation8], 32  }
  0x33   :  { %3646 = vsyncadd [#allocation8], 4294967264  ;;  %v3064_v0 = vld [vmem:[#allocation2 + $0xe4] ss:$16 sps:$4 sm:$0xff]   ;;  %v3068_v2 = vld [vmem:[#allocation2 + $0xe0] ss:$16 sps:$4 sm:$0xff]   ;;  %v337_v36 = vlaneseq }
  0x34   :  { %v3066_v1 = vld [vmem:[#allocation2 + $0x2e4] ss:$16 sps:$4 sm:$0xff]   ;;  %1695 = vmatprep.subr.bf16.mxu0 %v3064_v0  ;;  %v3069_v3 = vld [vmem:[#allocation2 + $0x2e0] ss:$16 sps:$4 sm:$0xff]   ;;  %v3655_v37 = vmov 1966171168  }
  0x35   :  { %1736 = vmatprep.subr.bf16.mxu1 %v3066_v1  ;;  %v3070_v4 = vld [vmem:[#allocation2 + $0xc4] ss:$16 sps:$4 sm:$0xff]   ;;  %1696 = vmatpush1.bf16.msra.mxu0 %v3068_v2  ;;  %v3074_v6 = vld [vmem:[#allocation2 + $0xc0] ss:$16 sps:$4 sm:$0xff]   ;;  %v360_v38 = vunpack.c.l.s4 %v3655_v37  ;;  %v3708_v42 = vshrl.u32 %v337_v36, 7 }
  0x36   :  { %1737 = vmatpush1.bf16.msra.mxu1 %v3069_v3  ;;  %v3072_v5 = vld [vmem:[#allocation2 + $0x2c4] ss:$16 sps:$4 sm:$0xff]   ;;  %1697 = vmatprep.subr.bf16.mxu0 %v3070_v4  ;;  %v3075_v7 = vld [vmem:[#allocation2 + $0x2c0] ss:$16 sps:$4 sm:$0xff]  }
  0x37   :  { %1738 = vmatprep.subr.bf16.mxu1 %v3072_v5  ;;  %v3076_v8 = vld [vmem:[#allocation2 + $0xa4] ss:$16 sps:$4 sm:$0xff]   ;;  %v3080_v10 = vld [vmem:[#allocation2 + $0xa0] ss:$16 sps:$4 sm:$0xff]   ;;  %v361_v43 = vunpack.c.0.s8 %v360_v38 }
  0x38   :  { %v3078_v9 = vld [vmem:[#allocation2 + $0x2a4] ss:$16 sps:$4 sm:$0xff]   ;;  %v3081_v11 = vld [vmem:[#allocation2 + $0x2a0] ss:$16 sps:$4 sm:$0xff]  }
  0x39   :  { %1698 = vmatpush1.bf16.msra.mxu0 %v3074_v6  ;;  %v3082_v12 = vld [vmem:[#allocation2 + $0x84] ss:$16 sps:$4 sm:$0xff]   ;;  %v3086_v14 = vld [vmem:[#allocation2 + $0x80] ss:$16 sps:$4 sm:$0xff]   ;;  %v364_v49 = vsub.s32 %v361_v43, %v3708_v42 }
  0x3a   :  { %1739 = vmatpush1.bf16.msra.mxu1 %v3075_v7  ;;  %1699 = vmatprep.subr.bf16.mxu0 %v3076_v8  ;;  %v3084_v13 = vld [vmem:[#allocation2 + $0x284] ss:$16 sps:$4 sm:$0xff]   ;;  %v3087_v15 = vld [vmem:[#allocation2 + $0x280] ss:$16 sps:$4 sm:$0xff]  }
  0x3b   :  { %1740 = vmatprep.subr.bf16.mxu1 %v3078_v9  ;;  %v3088_v16 = vld [vmem:[#allocation2 + $0x64] ss:$16 sps:$4 sm:$0xff]   ;;  %v3092_v18 = vld [vmem:[#allocation2 + $0x60] ss:$16 sps:$4 sm:$0xff]  }
  0x3c   :  { %v3090_v17 = vld [vmem:[#allocation2 + $0x264] ss:$16 sps:$4 sm:$0xff]   ;;  %v3093_v19 = vld [vmem:[#allocation2 + $0x260] ss:$16 sps:$4 sm:$0xff]  }
  0x3d   :  { %1700 = vmatpush1.bf16.msra.mxu0 %v3080_v10  ;;  %v3094_v20 = vld [vmem:[#allocation2 + $0x44] ss:$16 sps:$4 sm:$0xff]   ;;  %v3098_v22 = vld [vmem:[#allocation2 + $0x40] ss:$16 sps:$4 sm:$0xff]  }
  0x3e   :  { %1741 = vmatpush1.bf16.msra.mxu1 %v3081_v11  ;;  %1701 = vmatprep.subr.bf16.mxu0 %v3082_v12  ;;  %v3096_v21 = vld [vmem:[#allocation2 + $0x244] ss:$16 sps:$4 sm:$0xff]   ;;  %v3099_v23 = vld [vmem:[#allocation2 + $0x240] ss:$16 sps:$4 sm:$0xff]  }
  0x3f   :  { %1742 = vmatprep.subr.bf16.mxu1 %v3084_v13  ;;  %v3100_v24 = vld [vmem:[#allocation2 + $0x24] ss:$16 sps:$4 sm:$0xff]   ;;  %v3104_v26 = vld [vmem:[#allocation2 + $0x20] ss:$16 sps:$4 sm:$0xff]  }
  0x40   :  { %v3102_v25 = vld [vmem:[#allocation2 + $0x224] ss:$16 sps:$4 sm:$0xff]   ;;  %v3105_v27 = vld [vmem:[#allocation2 + $0x220] ss:$16 sps:$4 sm:$0xff]  }
  0x41   :  { %1702 = vmatpush1.bf16.msra.mxu0 %v3086_v14  ;;  %v3106_v28 = vld [vmem:[#allocation2 + $0x4] ss:$16 sps:$4 sm:$0xff]   ;;  %v3110_v30 = vld [vmem:[#allocation2] ss:$16 sps:$4 sm:$0xff]  }
  0x42   :  { %1743 = vmatpush1.bf16.msra.mxu1 %v3087_v15  ;;  %1703 = vmatprep.subr.bf16.mxu0 %v3088_v16  ;;  %v3108_v29 = vld [vmem:[#allocation2 + $0x204] ss:$16 sps:$4 sm:$0xff]   ;;  %v3111_v31 = vld [vmem:[#allocation2 + $0x200] ss:$16 sps:$4 sm:$0xff]  }
  0x43   :  { %1744 = vmatprep.subr.bf16.mxu1 %v3090_v17  ;;  %v3112_v32 = vld [vmem:[#allocation2 + $0x1e4] ss:$16 sps:$4 sm:$0xff]   ;;  %v3116_v34 = vld [vmem:[#allocation2 + $0x1e0] ss:$16 sps:$4 sm:$0xff]  }
  0x44   :  { %v3114_v33 = vld [vmem:[#allocation2 + $0x3e4] ss:$16 sps:$4 sm:$0xff]   ;;  %v3117_v35 = vld [vmem:[#allocation2 + $0x3e0] ss:$16 sps:$4 sm:$0xff]  }
  0x45   :  { %1704 = vmatpush1.bf16.msra.mxu0 %v3092_v18  ;;  %v3118_v39 = vld [vmem:[#allocation2 + $0x1c4] ss:$16 sps:$4 sm:$0xff]   ;;  %v3122_v41 = vld [vmem:[#allocation2 + $0x1c0] ss:$16 sps:$4 sm:$0xff]  }
  0x46   :  { %1745 = vmatpush1.bf16.msra.mxu1 %v3093_v19  ;;  %1705 = vmatprep.subr.bf16.mxu0 %v3094_v20  ;;  %v3120_v40 = vld [vmem:[#allocation2 + $0x3c4] ss:$16 sps:$4 sm:$0xff]   ;;  %v3123_v44 = vld [vmem:[#allocation2 + $0x3c0] ss:$16 sps:$4 sm:$0xff]  }
  0x47   :  { %1746 = vmatprep.subr.bf16.mxu1 %v3096_v21  ;;  %v3124_v45 = vld [vmem:[#allocation2 + $0x1a4] ss:$16 sps:$4 sm:$0xff]   ;;  %v3128_v47 = vld [vmem:[#allocation2 + $0x1a0] ss:$16 sps:$4 sm:$0xff]  }
  0x48   :  { %v3126_v46 = vld [vmem:[#allocation2 + $0x3a4] ss:$16 sps:$4 sm:$0xff]   ;;  %v3129_v48 = vld [vmem:[#allocation2 + $0x3a0] ss:$16 sps:$4 sm:$0xff]  }
  0x49   :  { %1706 = vmatpush1.bf16.msra.mxu0 %v3098_v22  ;;  %v3130_v50 = vld [vmem:[#allocation2 + $0x184] ss:$16 sps:$4 sm:$0xff]   ;;  %v3134_v53 = vld [vmem:[#allocation2 + $0x180] ss:$16 sps:$4 sm:$0xff]  }
  0x4a   :  { %1747 = vmatpush1.bf16.msra.mxu1 %v3099_v23  ;;  %1707 = vmatprep.subr.bf16.mxu0 %v3100_v24  ;;  %v3132_v51 = vld [vmem:[#allocation2 + $0x384] ss:$16 sps:$4 sm:$0xff]   ;;  %v3135_v56 = vld [vmem:[#allocation2 + $0x380] ss:$16 sps:$4 sm:$0xff]  }
  0x4b   :  { %1748 = vmatprep.subr.bf16.mxu1 %v3102_v25  ;;  %v78_v52 = vld [vmem:[%s3838_s0] sm:$0xff] }
  0x4c   :  { %v365_v54 = vrot.slane %v78_v52, %v364_v49  ;;  %v358_v55 = vcombine.high %v78_v52, %v78_v52  ;;  %v3136_v57 = vld [vmem:[#allocation2 + $0x164] ss:$16 sps:$4 sm:$0xff]   ;;  %v3140_v61 = vld [vmem:[#allocation2 + $0x160] ss:$16 sps:$4 sm:$0xff]  }
  0x4d   :  { %1708 = vmatpush1.bf16.msra.mxu0 %v3104_v26  ;;  %v3138_v58 = vld [vmem:[#allocation2 + $0x364] ss:$16 sps:$4 sm:$0xff]   ;;  %v3141_v0 = vld [vmem:[#allocation2 + $0x360] ss:$16 sps:$4 sm:$0xff]  }
  0x4e   :  { %1749 = vmatpush1.bf16.msra.mxu1 %v3105_v27  ;;  %1709 = vmatprep.subr.bf16.mxu0 %v3106_v28  ;;  %v373_v59 = vcombine.high %v365_v54, %v365_v54  ;;  %v372_v60 = vrot.slane %v358_v55, %v364_v49  ;;  %v3142_v1 = vld [vmem:[#allocation2 + $0x144] ss:$16 sps:$4 sm:$0xff]   ;;  %v3146_v4 = vld [vmem:[#allocation2 + $0x140] ss:$16 sps:$4 sm:$0xff]   ;;  %v3724_v14 = vrot.slane %v365_v54, %v364_v49 }
  0x4f   :  { %1750 = vmatprep.subr.bf16.mxu1 %v3108_v29  ;;  %v3144_v2 = vld [vmem:[#allocation2 + $0x344] ss:$16 sps:$4 sm:$0xff]   ;;  %v3147_v5 = vld [vmem:[#allocation2 + $0x340] ss:$16 sps:$4 sm:$0xff]  }
  0x50   :  { %v3714_v62 = vrot.slane %v373_v59, %v364_v49  ;;  %v3716_v63 = vrot.slane %v372_v60, %v364_v49  ;;  %v3148_v6 = vld [vmem:[#allocation2 + $0x124] ss:$16 sps:$4 sm:$0xff]   ;;  %v3152_v8 = vld [vmem:[#allocation2 + $0x120] ss:$16 sps:$4 sm:$0xff]   ;;  %v374_v12 = vcombine.high %v372_v60, %v372_v60  ;;  %v3730_v19 = vcombine.high %v3724_v14, %v3724_v14 }
  0x51   :  { %1710 = vmatpush1.bf16.msra.mxu0 %v3110_v30  ;;  %v3150_v7 = vld [vmem:[#allocation2 + $0x324] ss:$16 sps:$4 sm:$0xff]   ;;  %v3153_v9 = vld [vmem:[#allocation2 + $0x320] ss:$16 sps:$4 sm:$0xff]  }
  0x52   :  { %1751 = vmatpush1.bf16.msra.mxu1 %v3111_v31  ;;  %1711 = vmatprep.subr.bf16.mxu0 %v3112_v32  ;;  %v3720_v3 = vcombine.high %v3714_v62, %v3714_v62  ;;  %v3154_v10 = vld [vmem:[#allocation2 + $0x104] ss:$16 sps:$4 sm:$0xff]   ;;  %v3158_v13 = vld [vmem:[#allocation2 + $0x100] ss:$16 sps:$4 sm:$0xff]   ;;  %v3726_v18 = vrot.slane %v374_v12, %v364_v49 }
  0x53   :  { %1752 = vmatprep.subr.bf16.mxu1 %v3114_v33  ;;  %1727 = vmatprep.mubr.bf16.mxu0 %v3714_v62  ;;  %v3156_v11 = vld [vmem:[#allocation2 + $0x304] ss:$16 sps:$4 sm:$0xff]   ;;  %v3159_v15 = vld [vmem:[#allocation2 + $0x300] ss:$16 sps:$4 sm:$0xff]  }
  0x54   :  { %1768 = vmatprep.mubr.bf16.mxu1 %v3720_v3  ;;  %v3162_v16 = vld [vmem:[#allocation2 + $0x4e4] ss:$16 sps:$4 sm:$0xff]   ;;  %v3160_v20 = vld [vmem:[#allocation2 + $0x4e0] ss:$16 sps:$4 sm:$0xff]   ;;  %v3734_v24 = vcombine.high %v3726_v18, %v3726_v18 }
  0x55   :  { %1712 = vmatpush2.bf16.msra.mxu0 %v3116_v34  ;;  %v3165_v17 = vld [vmem:[#allocation2 + $0x6e4] ss:$16 sps:$4 sm:$0xff]   ;;  %v3163_v21 = vld [vmem:[#allocation2 + $0x6e0] ss:$16 sps:$4 sm:$0xff]  }
  0x56   :  { %1753 = vmatpush2.bf16.msra.mxu1 %v3117_v35  ;;  %1713 = vmatprep.subr.bf16.mxu0 %v3118_v39  ;;  %v3168_v22 = vld [vmem:[#allocation2 + $0x4c4] ss:$16 sps:$4 sm:$0xff]   ;;  %v3166_v25 = vld [vmem:[#allocation2 + $0x4c0] ss:$16 sps:$4 sm:$0xff]  }
  0x57   :  { %1754 = vmatprep.subr.bf16.mxu1 %v3120_v40  ;;  %v3171_v23 = vld [vmem:[#allocation2 + $0x6c4] ss:$16 sps:$4 sm:$0xff]   ;;  %v3169_v26 = vld [vmem:[#allocation2 + $0x6c0] ss:$16 sps:$4 sm:$0xff]  }
  0x58   :  { %v3174_v27 = vld [vmem:[#allocation2 + $0x4a4] ss:$16 sps:$4 sm:$0xff]   ;;  %v3172_v29 = vld [vmem:[#allocation2 + $0x4a0] ss:$16 sps:$4 sm:$0xff]  }
  0x59   :  { %1714 = vmatpush2.bf16.msra.mxu0 %v3122_v41  ;;  %v3177_v28 = vld [vmem:[#allocation2 + $0x6a4] ss:$16 sps:$4 sm:$0xff]   ;;  %v3175_v30 = vld [vmem:[#allocation2 + $0x6a0] ss:$16 sps:$4 sm:$0xff]  }
  0x5a   :  { %1755 = vmatpush2.bf16.msra.mxu1 %v3123_v44  ;;  %1715 = vmatprep.subr.bf16.mxu0 %v3124_v45  ;;  %v3180_v31 = vld [vmem:[#allocation2 + $0x484] ss:$16 sps:$4 sm:$0xff]   ;;  %v3178_v33 = vld [vmem:[#allocation2 + $0x480] ss:$16 sps:$4 sm:$0xff]  }
  0x5b   :  { %1756 = vmatprep.subr.bf16.mxu1 %v3126_v46  ;;  %v3183_v32 = vld [vmem:[#allocation2 + $0x684] ss:$16 sps:$4 sm:$0xff]   ;;  %v3181_v34 = vld [vmem:[#allocation2 + $0x680] ss:$16 sps:$4 sm:$0xff]  }
  0x5c   :  { %v3186_v35 = vld [vmem:[#allocation2 + $0x464] ss:$16 sps:$4 sm:$0xff]   ;;  %v3184_v37 = vld [vmem:[#allocation2 + $0x460] ss:$16 sps:$4 sm:$0xff]  }
  0x5d   :  { %1716 = vmatpush2.bf16.msra.mxu0 %v3128_v47  ;;  %v3189_v36 = vld [vmem:[#allocation2 + $0x664] ss:$16 sps:$4 sm:$0xff]   ;;  %v3187_v38 = vld [vmem:[#allocation2 + $0x660] ss:$16 sps:$4 sm:$0xff]  }
  0x5e   :  { %1757 = vmatpush2.bf16.msra.mxu1 %v3129_v48  ;;  %1717 = vmatprep.subr.bf16.mxu0 %v3130_v50  ;;  %v3192_v39 = vld [vmem:[#allocation2 + $0x444] ss:$16 sps:$4 sm:$0xff]   ;;  %v3190_v41 = vld [vmem:[#allocation2 + $0x440] ss:$16 sps:$4 sm:$0xff]  }
  0x5f   :  { %1758 = vmatprep.subr.bf16.mxu1 %v3132_v51  ;;  %v3195_v40 = vld [vmem:[#allocation2 + $0x644] ss:$16 sps:$4 sm:$0xff]   ;;  %v3193_v43 = vld [vmem:[#allocation2 + $0x640] ss:$16 sps:$4 sm:$0xff]  }
  0x60   :  { %v3198_v44 = vld [vmem:[#allocation2 + $0x424] ss:$16 sps:$4 sm:$0xff]   ;;  %v3196_v46 = vld [vmem:[#allocation2 + $0x420] ss:$16 sps:$4 sm:$0xff]  }
  0x61   :  { %1718 = vmatpush2.bf16.msra.mxu0 %v3134_v53  ;;  %v3201_v45 = vld [vmem:[#allocation2 + $0x624] ss:$16 sps:$4 sm:$0xff]   ;;  %v3199_v47 = vld [vmem:[#allocation2 + $0x620] ss:$16 sps:$4 sm:$0xff]  }
  0x62   :  { %1759 = vmatpush2.bf16.msra.mxu1 %v3135_v56  ;;  %1719 = vmatprep.subr.bf16.mxu0 %v3136_v57  ;;  %v3204_v48 = vld [vmem:[#allocation2 + $0x404] ss:$16 sps:$4 sm:$0xff]   ;;  %v3202_v50 = vld [vmem:[#allocation2 + $0x400] ss:$16 sps:$4 sm:$0xff]  }
  0x63   :  { %1760 = vmatprep.subr.bf16.mxu1 %v3138_v58  ;;  %v3207_v49 = vld [vmem:[#allocation2 + $0x604] ss:$16 sps:$4 sm:$0xff]   ;;  %v3205_v51 = vld [vmem:[#allocation2 + $0x600] ss:$16 sps:$4 sm:$0xff]  }
  0x64   :  { %v3210_v52 = vld [vmem:[#allocation2 + $0x5e4] ss:$16 sps:$4 sm:$0xff]   ;;  %v3208_v54 = vld [vmem:[#allocation2 + $0x5e0] ss:$16 sps:$4 sm:$0xff]  }
  0x65   :  { %1720 = vmatpush2.bf16.msra.mxu0 %v3140_v61  ;;  %v3213_v53 = vld [vmem:[#allocation2 + $0x7e4] ss:$16 sps:$4 sm:$0xff]   ;;  %v3211_v55 = vld [vmem:[#allocation2 + $0x7e0] ss:$16 sps:$4 sm:$0xff]  }
  0x66   :  { %1761 = vmatpush2.bf16.msra.mxu1 %v3141_v0  ;;  %1721 = vmatprep.subr.bf16.mxu0 %v3142_v1  ;;  %v3216_v56 = vld [vmem:[#allocation2 + $0x5c4] ss:$16 sps:$4 sm:$0xff]   ;;  %v3214_v58 = vld [vmem:[#allocation2 + $0x5c0] ss:$16 sps:$4 sm:$0xff]  }
  0x67   :  { %1762 = vmatprep.subr.bf16.mxu1 %v3144_v2  ;;  %v3219_v57 = vld [vmem:[#allocation2 + $0x7c4] ss:$16 sps:$4 sm:$0xff]   ;;  %v3217_v59 = vld [vmem:[#allocation2 + $0x7c0] ss:$16 sps:$4 sm:$0xff]  }
  0x68   :  { %v3222_v60 = vld [vmem:[#allocation2 + $0x5a4] ss:$16 sps:$4 sm:$0xff]   ;;  %v3220_v0 = vld [vmem:[#allocation2 + $0x5a0] ss:$16 sps:$4 sm:$0xff]  }
  0x69   :  { %1722 = vmatpush2.bf16.msra.mxu0 %v3146_v4  ;;  %v3225_v61 = vld [vmem:[#allocation2 + $0x7a4] ss:$16 sps:$4 sm:$0xff]   ;;  %v3223_v1 = vld [vmem:[#allocation2 + $0x7a0] ss:$16 sps:$4 sm:$0xff]  }
  0x6a   :  { %1763 = vmatpush2.bf16.msra.mxu1 %v3147_v5  ;;  %1723 = vmatprep.subr.bf16.mxu0 %v3148_v6  ;;  %v3228_v2 = vld [vmem:[#allocation2 + $0x584] ss:$16 sps:$4 sm:$0xff]   ;;  %v3226_v5 = vld [vmem:[#allocation2 + $0x580] ss:$16 sps:$4 sm:$0xff]  }
  0x6b   :  { %1764 = vmatprep.subr.bf16.mxu1 %v3150_v7  ;;  %v3231_v4 = vld [vmem:[#allocation2 + $0x784] ss:$16 sps:$4 sm:$0xff]   ;;  %v3229_v6 = vld [vmem:[#allocation2 + $0x780] ss:$16 sps:$4 sm:$0xff]  }
  0x6c   :  { %v3234_v7 = vld [vmem:[#allocation2 + $0x564] ss:$16 sps:$4 sm:$0xff]  }
  0x6d   :  { %1724 = vmatpush2.bf16.msra.mxu0 %v3152_v8  ;;  %v3237_v8 = vld [vmem:[#allocation2 + $0x764] ss:$16 sps:$4 sm:$0xff]  }
  0x6e   :  { %1765 = vmatpush2.bf16.msra.mxu1 %v3153_v9  ;;  %1725 = vmatprep.subr.bf16.mxu0 %v3154_v10  ;;  %v3232_v9 = vld [vmem:[#allocation2 + $0x560] ss:$16 sps:$4 sm:$0xff]   ;;  %v3243_v12 = vld [vmem:[#allocation2 + $0x744] ss:$16 sps:$4 sm:$0xff]  }
  0x6f   :  { %1766 = vmatprep.subr.bf16.mxu1 %v3156_v11  ;;  %v3235_v10 = vld [vmem:[#allocation2 + $0x760] ss:$16 sps:$4 sm:$0xff]   ;;  %v3240_v11 = vld [vmem:[#allocation2 + $0x544] ss:$16 sps:$4 sm:$0xff]  }
  0x71   :  { %1726 = vmatpush2.bf16.msra.mxu0 %v3158_v13  ;;  %v3238_v13 = vld [vmem:[#allocation2 + $0x540] ss:$16 sps:$4 sm:$0xff]  }
  0x72   :  { %1767 = vmatpush2.bf16.msra.mxu1 %v3159_v15  ;;  %1777 = vmatprep.subr.bf16.mxu0 %v3162_v16  ;;  %v3241_v15 = vld [vmem:[#allocation2 + $0x740] ss:$16 sps:$4 sm:$0xff]   ;;  %v3246_v16 = vld [vmem:[#allocation2 + $0x524] ss:$16 sps:$4 sm:$0xff]  }
  0x73   :  { %1818 = vmatprep.subr.bf16.mxu1 %v3165_v17  ;;  %v3249_v17 = vld [vmem:[#allocation2 + $0x724] ss:$16 sps:$4 sm:$0xff]  }
  0x74   :  { %1728 = vmatmul.mubr.bf16.vlgmr.msra.gmra.mxu0 %v3724_v14 }
  0x75   :  { %1769 = vmatmul.mubr.bf16.vlgmr.msra.gmra.mxu1 %v3730_v19  ;;  %1778 = vmatpush1.bf16.msra.mxu0 %v3160_v20  ;;  %v3244_v20 = vld [vmem:[#allocation2 + $0x520] ss:$16 sps:$4 sm:$0xff]  }
  0x76   :  { %1819 = vmatpush1.bf16.msra.mxu1 %v3163_v21  ;;  %1779 = vmatprep.subr.bf16.mxu0 %v3168_v22  ;;  %v3247_v21 = vld [vmem:[#allocation2 + $0x720] ss:$16 sps:$4 sm:$0xff]   ;;  %v3252_v22 = vld [vmem:[#allocation2 + $0x504] ss:$16 sps:$4 sm:$0xff]  }
  0x77   :  { %1820 = vmatprep.subr.bf16.mxu1 %v3171_v23  ;;  %1809 = vmatprep.mubr.bf16.mxu0 %v3726_v18  ;;  %v3255_v23 = vld [vmem:[#allocation2 + $0x704] ss:$16 sps:$4 sm:$0xff]  }
  0x78   :  { %1850 = vmatprep.mubr.bf16.mxu1 %v3734_v24 }
  0x79   :  { %1780 = vmatpush1.bf16.msra.mxu0 %v3166_v25  ;;  %v3250_v25 = vld [vmem:[#allocation2 + $0x500] ss:$16 sps:$4 sm:$0xff]  }
  0x7a   :  { %1821 = vmatpush1.bf16.msra.mxu1 %v3169_v26  ;;  %1781 = vmatprep.subr.bf16.mxu0 %v3174_v27  ;;  %v3253_v26 = vld [vmem:[#allocation2 + $0x700] ss:$16 sps:$4 sm:$0xff]   ;;  %v3259_v27 = vld [vmem:[#allocation2 + $0xec] ss:$16 sps:$4 sm:$0xff]  }
  0x7b   :  { %1822 = vmatprep.subr.bf16.mxu1 %v3177_v28  ;;  %v3262_v28 = vld [vmem:[#allocation2 + $0x2ec] ss:$16 sps:$4 sm:$0xff]  }
  0x7d   :  { %1782 = vmatpush1.bf16.msra.mxu0 %v3172_v29  ;;  %v3742_v29 = vcombine.high %v3716_v63, %v3716_v63 }
  0x7e   :  { %1823 = vmatpush1.bf16.msra.mxu1 %v3175_v30  ;;  %1783 = vmatprep.subr.bf16.mxu0 %v3180_v31  ;;  %v3257_v30 = vld [vmem:[#allocation2 + $0xe8] ss:$16 sps:$4 sm:$0xff]  }
  0x7f   :  { %1824 = vmatprep.subr.bf16.mxu1 %v3183_v32  ;;  %v3260_v31 = vld [vmem:[#allocation2 + $0x2e8] ss:$16 sps:$4 sm:$0xff]   ;;  %v3265_v32 = vld [vmem:[#allocation2 + $0xcc] ss:$16 sps:$4 sm:$0xff]  }
  0x81   :  { %1784 = vmatpush1.bf16.msra.mxu0 %v3178_v33  ;;  %v3268_v33 = vld [vmem:[#allocation2 + $0x2cc] ss:$16 sps:$4 sm:$0xff]  }
  0x82   :  { %1825 = vmatpush1.bf16.msra.mxu1 %v3181_v34  ;;  %1785 = vmatprep.subr.bf16.mxu0 %v3186_v35  ;;  %v3263_v34 = vld [vmem:[#allocation2 + $0xc8] ss:$16 sps:$4 sm:$0xff]  }
  0x83   :  { %1826 = vmatprep.subr.bf16.mxu1 %v3189_v36  ;;  %v3266_v35 = vld [vmem:[#allocation2 + $0x2c8] ss:$16 sps:$4 sm:$0xff]   ;;  %v3271_v36 = vld [vmem:[#allocation2 + $0xac] ss:$16 sps:$4 sm:$0xff]  }
  0x85   :  { %1786 = vmatpush1.bf16.msra.mxu0 %v3184_v37  ;;  %v3274_v37 = vld [vmem:[#allocation2 + $0x2ac] ss:$16 sps:$4 sm:$0xff]  }
  0x86   :  { %1827 = vmatpush1.bf16.msra.mxu1 %v3187_v38  ;;  %1787 = vmatprep.subr.bf16.mxu0 %v3192_v39  ;;  %v3269_v38 = vld [vmem:[#allocation2 + $0xa8] ss:$16 sps:$4 sm:$0xff]  }
  0x87   :  { %1828 = vmatprep.subr.bf16.mxu1 %v3195_v40  ;;  %v3272_v39 = vld [vmem:[#allocation2 + $0x2a8] ss:$16 sps:$4 sm:$0xff]   ;;  %v3277_v40 = vld [vmem:[#allocation2 + $0x8c] ss:$16 sps:$4 sm:$0xff]  }
  0x89   :  { %1788 = vmatpush1.bf16.msra.mxu0 %v3190_v41  ;;  %v3280_v41 = vld [vmem:[#allocation2 + $0x28c] ss:$16 sps:$4 sm:$0xff]  }
  0x8a   :  { %1829 = vmatpush1.bf16.msra.mxu1 %v3193_v43  ;;  %1789 = vmatprep.subr.bf16.mxu0 %v3198_v44  ;;  %v3275_v43 = vld [vmem:[#allocation2 + $0x88] ss:$16 sps:$4 sm:$0xff]  }
  0x8b   :  { %1830 = vmatprep.subr.bf16.mxu1 %v3201_v45  ;;  %v3278_v44 = vld [vmem:[#allocation2 + $0x288] ss:$16 sps:$4 sm:$0xff]   ;;  %v3283_v45 = vld [vmem:[#allocation2 + $0x6c] ss:$16 sps:$4 sm:$0xff]  }
  0x8d   :  { %1790 = vmatpush1.bf16.msra.mxu0 %v3196_v46  ;;  %v3286_v46 = vld [vmem:[#allocation2 + $0x26c] ss:$16 sps:$4 sm:$0xff]  }
  0x8e   :  { %1831 = vmatpush1.bf16.msra.mxu1 %v3199_v47  ;;  %1791 = vmatprep.subr.bf16.mxu0 %v3204_v48  ;;  %v3281_v47 = vld [vmem:[#allocation2 + $0x68] ss:$16 sps:$4 sm:$0xff]   ;;  %v3292_v48 = vld [vmem:[#allocation2 + $0x24c] ss:$16 sps:$4 sm:$0xff]  }
  0x8f   :  { %1832 = vmatprep.subr.bf16.mxu1 %v3207_v49  ;;  %v3287_v49 = vld [vmem:[#allocation2 + $0x48] ss:$16 sps:$4 sm:$0xff]  }
  0x91   :  { %1792 = vmatpush1.bf16.msra.mxu0 %v3202_v50  ;;  %v3290_v50 = vld [vmem:[#allocation2 + $0x248] ss:$16 sps:$4 sm:$0xff]  }
  0x92   :  { %1833 = vmatpush1.bf16.msra.mxu1 %v3205_v51  ;;  %1793 = vmatprep.subr.bf16.mxu0 %v3210_v52  ;;  %v3295_v51 = vld [vmem:[#allocation2 + $0x2c] ss:$16 sps:$4 sm:$0xff]  }
  0x93   :  { %1834 = vmatprep.subr.bf16.mxu1 %v3213_v53  ;;  %v3298_v52 = vld [vmem:[#allocation2 + $0x22c] ss:$16 sps:$4 sm:$0xff]   ;;  %v3293_v53 = vld [vmem:[#allocation2 + $0x28] ss:$16 sps:$4 sm:$0xff]  }
  0x95   :  { %1794 = vmatpush2.bf16.msra.mxu0 %v3208_v54  ;;  %v3296_v54 = vld [vmem:[#allocation2 + $0x228] ss:$16 sps:$4 sm:$0xff]  }
  0x96   :  { %1835 = vmatpush2.bf16.msra.mxu1 %v3211_v55  ;;  %1795 = vmatprep.subr.bf16.mxu0 %v3216_v56  ;;  %v3301_v55 = vld [vmem:[#allocation2 + $0xc] ss:$16 sps:$4 sm:$0xff]  }
  0x97   :  { %1836 = vmatprep.subr.bf16.mxu1 %v3219_v57  ;;  %v3304_v56 = vld [vmem:[#allocation2 + $0x20c] ss:$16 sps:$4 sm:$0xff]   ;;  %v3299_v57 = vld [vmem:[#allocation2 + $0x8] ss:$16 sps:$4 sm:$0xff]  }
  0x99   :  { %1796 = vmatpush2.bf16.msra.mxu0 %v3214_v58  ;;  %v3302_v58 = vld [vmem:[#allocation2 + $0x208] ss:$16 sps:$4 sm:$0xff]  }
  0x9a   :  { %1837 = vmatpush2.bf16.msra.mxu1 %v3217_v59  ;;  %1797 = vmatprep.subr.bf16.mxu0 %v3222_v60  ;;  %v3307_v59 = vld [vmem:[#allocation2 + $0x1ec] ss:$16 sps:$4 sm:$0xff]  }
  0x9b   :  { %1838 = vmatprep.subr.bf16.mxu1 %v3225_v61  ;;  %v3310_v60 = vld [vmem:[#allocation2 + $0x3ec] ss:$16 sps:$4 sm:$0xff]   ;;  %v3305_v61 = vld [vmem:[#allocation2 + $0x1e8] ss:$16 sps:$4 sm:$0xff]  }
  0x9d   :  { %1798 = vmatpush2.bf16.msra.mxu0 %v3220_v0  ;;  %v3308_v0 = vld [vmem:[#allocation2 + $0x3e8] ss:$16 sps:$4 sm:$0xff]  }
  0x9e   :  { %1839 = vmatpush2.bf16.msra.mxu1 %v3223_v1  ;;  %1799 = vmatprep.subr.bf16.mxu0 %v3228_v2  ;;  %v3313_v1 = vld [vmem:[#allocation2 + $0x1cc] ss:$16 sps:$4 sm:$0xff]  }
  0x9f   :  { %1840 = vmatprep.subr.bf16.mxu1 %v3231_v4  ;;  %v3316_v2 = vld [vmem:[#allocation2 + $0x3cc] ss:$16 sps:$4 sm:$0xff]   ;;  %v3311_v4 = vld [vmem:[#allocation2 + $0x1c8] ss:$16 sps:$4 sm:$0xff]  }
  0xa1   :  { %1800 = vmatpush2.bf16.msra.mxu0 %v3226_v5  ;;  %v3314_v5 = vld [vmem:[#allocation2 + $0x3c8] ss:$16 sps:$4 sm:$0xff]  }
  0xa2   :  { %1841 = vmatpush2.bf16.msra.mxu1 %v3229_v6  ;;  %1801 = vmatprep.subr.bf16.mxu0 %v3234_v7  ;;  %v3319_v6 = vld [vmem:[#allocation2 + $0x1ac] ss:$16 sps:$4 sm:$0xff]  }
  0xa3   :  { %1842 = vmatprep.subr.bf16.mxu1 %v3237_v8  ;;  %v3322_v7 = vld [vmem:[#allocation2 + $0x3ac] ss:$16 sps:$4 sm:$0xff]   ;;  %v3317_v8 = vld [vmem:[#allocation2 + $0x1a8] ss:$16 sps:$4 sm:$0xff]  }
  0xa5   :  { %1802 = vmatpush2.bf16.msra.mxu0 %v3232_v9  ;;  %v3320_v9 = vld [vmem:[#allocation2 + $0x3a8] ss:$16 sps:$4 sm:$0xff]  }
  0xa6   :  { %1843 = vmatpush2.bf16.msra.mxu1 %v3235_v10  ;;  %1803 = vmatprep.subr.bf16.mxu0 %v3240_v11  ;;  %v3325_v10 = vld [vmem:[#allocation2 + $0x18c] ss:$16 sps:$4 sm:$0xff]  }
  0xa7   :  { %1844 = vmatprep.subr.bf16.mxu1 %v3243_v12  ;;  %v3328_v11 = vld [vmem:[#allocation2 + $0x38c] ss:$16 sps:$4 sm:$0xff]   ;;  %v3323_v12 = vld [vmem:[#allocation2 + $0x188] ss:$16 sps:$4 sm:$0xff]  }
  0xa9   :  { %1804 = vmatpush2.bf16.msra.mxu0 %v3238_v13  ;;  %v3326_v13 = vld [vmem:[#allocation2 + $0x388] ss:$16 sps:$4 sm:$0xff]  }
  0xaa   :  { %1845 = vmatpush2.bf16.msra.mxu1 %v3241_v15  ;;  %1805 = vmatprep.subr.bf16.mxu0 %v3246_v16  ;;  %v3331_v15 = vld [vmem:[#allocation2 + $0x16c] ss:$16 sps:$4 sm:$0xff]  }
  0xab   :  { %1846 = vmatprep.subr.bf16.mxu1 %v3249_v17  ;;  %v3334_v16 = vld [vmem:[#allocation2 + $0x36c] ss:$16 sps:$4 sm:$0xff]   ;;  %v3329_v17 = vld [vmem:[#allocation2 + $0x168] ss:$16 sps:$4 sm:$0xff]  }
  0xad   :  { %1806 = vmatpush2.bf16.msra.mxu0 %v3244_v20  ;;  %v3332_v20 = vld [vmem:[#allocation2 + $0x368] ss:$16 sps:$4 sm:$0xff]  }
  0xae   :  { %1847 = vmatpush2.bf16.msra.mxu1 %v3247_v21  ;;  %1807 = vmatprep.subr.bf16.mxu0 %v3252_v22  ;;  %v3337_v21 = vld [vmem:[#allocation2 + $0x14c] ss:$16 sps:$4 sm:$0xff]  }
  0xaf   :  { %1848 = vmatprep.subr.bf16.mxu1 %v3255_v23  ;;  %v3340_v22 = vld [vmem:[#allocation2 + $0x34c] ss:$16 sps:$4 sm:$0xff]   ;;  %v3335_v23 = vld [vmem:[#allocation2 + $0x148] ss:$16 sps:$4 sm:$0xff]  }
  0xb1   :  { %1808 = vmatpush2.bf16.msra.mxu0 %v3250_v25  ;;  %v3338_v25 = vld [vmem:[#allocation2 + $0x348] ss:$16 sps:$4 sm:$0xff]  }
  0xb2   :  { %1849 = vmatpush2.bf16.msra.mxu1 %v3253_v26  ;;  %1859 = vmatprep.subr.bf16.mxu0 %v3259_v27  ;;  %v3343_v26 = vld [vmem:[#allocation2 + $0x12c] ss:$16 sps:$4 sm:$0xff]  }
  0xb3   :  { %1900 = vmatprep.subr.bf16.mxu1 %v3262_v28  ;;  %v3346_v27 = vld [vmem:[#allocation2 + $0x32c] ss:$16 sps:$4 sm:$0xff]   ;;  %v3341_v28 = vld [vmem:[#allocation2 + $0x128] ss:$16 sps:$4 sm:$0xff]  }
  0xb4   :  { %1810 = vmatmul.mubr.bf16.vlgmr.msra.gmra.mxu0 %v3716_v63 }
  0xb5   :  { %1851 = vmatmul.mubr.bf16.vlgmr.msra.gmra.mxu1 %v3742_v29  ;;  %1860 = vmatpush1.bf16.msra.mxu0 %v3257_v30  ;;  %v3344_v30 = vld [vmem:[#allocation2 + $0x328] ss:$16 sps:$4 sm:$0xff]  }
  0xb6   :  { %1901 = vmatpush1.bf16.msra.mxu1 %v3260_v31  ;;  %1861 = vmatprep.subr.bf16.mxu0 %v3265_v32  ;;  %v3349_v31 = vld [vmem:[#allocation2 + $0x10c] ss:$16 sps:$4 sm:$0xff]  }
  0xb7   :  { %1902 = vmatprep.subr.bf16.mxu1 %v3268_v33  ;;  %1891 = vmatprep.mubr.bf16.mxu0 %v3714_v62  ;;  %v3284_v62 = vld [vmem:[#allocation2 + $0x268] ss:$16 sps:$4 sm:$0xff]   ;;  %v3352_v32 = vld [vmem:[#allocation2 + $0x30c] ss:$16 sps:$4 sm:$0xff]  }
  0xb8   :  { %1932 = vmatprep.mubr.bf16.mxu1 %v3720_v3  ;;  %v3289_v3 = vld [vmem:[#allocation2 + $0x4c] ss:$16 sps:$4 sm:$0xff]   ;;  %v3347_v33 = vld [vmem:[#allocation2 + $0x108] ss:$16 sps:$4 sm:$0xff]  }
  0xb9   :  { %1862 = vmatpush1.bf16.msra.mxu0 %v3263_v34  ;;  %v3350_v34 = vld [vmem:[#allocation2 + $0x308] ss:$16 sps:$4 sm:$0xff]  }
  0xba   :  { %1903 = vmatpush1.bf16.msra.mxu1 %v3266_v35  ;;  %1863 = vmatprep.subr.bf16.mxu0 %v3271_v36  ;;  %v3355_v35 = vld [vmem:[#allocation2 + $0x4ec] ss:$16 sps:$4 sm:$0xff]  }
  0xbb   :  { %1904 = vmatprep.subr.bf16.mxu1 %v3274_v37  ;;  %v3358_v36 = vld [vmem:[#allocation2 + $0x6ec] ss:$16 sps:$4 sm:$0xff]   ;;  %v3353_v37 = vld [vmem:[#allocation2 + $0x4e8] ss:$16 sps:$4 sm:$0xff]  }
  0xbd   :  { %1864 = vmatpush1.bf16.msra.mxu0 %v3269_v38  ;;  %v3356_v38 = vld [vmem:[#allocation2 + $0x6e8] ss:$16 sps:$4 sm:$0xff]  }
  0xbe   :  { %1905 = vmatpush1.bf16.msra.mxu1 %v3272_v39  ;;  %1865 = vmatprep.subr.bf16.mxu0 %v3277_v40  ;;  %v3361_v39 = vld [vmem:[#allocation2 + $0x4cc] ss:$16 sps:$4 sm:$0xff]  }
  0xbf   :  { %1906 = vmatprep.subr.bf16.mxu1 %v3280_v41  ;;  %v3364_v40 = vld [vmem:[#allocation2 + $0x6cc] ss:$16 sps:$4 sm:$0xff]   ;;  %v3359_v41 = vld [vmem:[#allocation2 + $0x4c8] ss:$16 sps:$4 sm:$0xff]  }
  0xc1   :  { %1866 = vmatpush1.bf16.msra.mxu0 %v3275_v43  ;;  %v3362_v43 = vld [vmem:[#allocation2 + $0x6c8] ss:$16 sps:$4 sm:$0xff]  }
  0xc2   :  { %1907 = vmatpush1.bf16.msra.mxu1 %v3278_v44  ;;  %1867 = vmatprep.subr.bf16.mxu0 %v3283_v45  ;;  %v3367_v44 = vld [vmem:[#allocation2 + $0x4ac] ss:$16 sps:$4 sm:$0xff]  }
  0xc3   :  { %1908 = vmatprep.subr.bf16.mxu1 %v3286_v46  ;;  %v3370_v45 = vld [vmem:[#allocation2 + $0x6ac] ss:$16 sps:$4 sm:$0xff]   ;;  %v3365_v46 = vld [vmem:[#allocation2 + $0x4a8] ss:$16 sps:$4 sm:$0xff]  }
  0xc5   :  { %1868 = vmatpush1.bf16.msra.mxu0 %v3281_v47  ;;  %v3368_v47 = vld [vmem:[#allocation2 + $0x6a8] ss:$16 sps:$4 sm:$0xff]  }
  0xc6   :  { %1909 = vmatpush1.bf16.msra.mxu1 %v3284_v62  ;;  %1869 = vmatprep.subr.bf16.mxu0 %v3289_v3  ;;  %v3373_v62 = vld [vmem:[#allocation2 + $0x48c] ss:$16 sps:$4 sm:$0xff]   ;;  %v3371_v3 = vld [vmem:[#allocation2 + $0x488] ss:$16 sps:$4 sm:$0xff]  }
  0xc7   :  { %1910 = vmatprep.subr.bf16.mxu1 %v3292_v48  ;;  %v3379_v48 = vld [vmem:[#allocation2 + $0x46c] ss:$16 sps:$4 sm:$0xff]  }
  0xc9   :  { %1870 = vmatpush1.bf16.msra.mxu0 %v3287_v49  ;;  %v3382_v49 = vld [vmem:[#allocation2 + $0x66c] ss:$16 sps:$4 sm:$0xff]  }
  0xca   :  { %1911 = vmatpush1.bf16.msra.mxu1 %v3290_v50  ;;  %1871 = vmatprep.subr.bf16.mxu0 %v3295_v51  ;;  %v3377_v50 = vld [vmem:[#allocation2 + $0x468] ss:$16 sps:$4 sm:$0xff]  }
  0xcb   :  { %1912 = vmatprep.subr.bf16.mxu1 %v3298_v52  ;;  %v3380_v51 = vld [vmem:[#allocation2 + $0x668] ss:$16 sps:$4 sm:$0xff]   ;;  %v3385_v52 = vld [vmem:[#allocation2 + $0x44c] ss:$16 sps:$4 sm:$0xff]  }
  0xcd   :  { %1872 = vmatpush1.bf16.msra.mxu0 %v3293_v53  ;;  %v3386_v53 = vld [vmem:[#allocation2 + $0x648] ss:$16 sps:$4 sm:$0xff]  }
  0xce   :  { %1913 = vmatpush1.bf16.msra.mxu1 %v3296_v54  ;;  %1873 = vmatprep.subr.bf16.mxu0 %v3301_v55  ;;  %v3391_v54 = vld [vmem:[#allocation2 + $0x42c] ss:$16 sps:$4 sm:$0xff]  }
  0xcf   :  { %1914 = vmatprep.subr.bf16.mxu1 %v3304_v56  ;;  %v3394_v55 = vld [vmem:[#allocation2 + $0x62c] ss:$16 sps:$4 sm:$0xff]   ;;  %v3389_v56 = vld [vmem:[#allocation2 + $0x428] ss:$16 sps:$4 sm:$0xff]  }
  0xd1   :  { %1874 = vmatpush1.bf16.msra.mxu0 %v3299_v57  ;;  %v3392_v57 = vld [vmem:[#allocation2 + $0x628] ss:$16 sps:$4 sm:$0xff]  }
  0xd2   :  { %1915 = vmatpush1.bf16.msra.mxu1 %v3302_v58  ;;  %1875 = vmatprep.subr.bf16.mxu0 %v3307_v59  ;;  %v3397_v58 = vld [vmem:[#allocation2 + $0x40c] ss:$16 sps:$4 sm:$0xff]  }
  0xd3   :  { %1916 = vmatprep.subr.bf16.mxu1 %v3310_v60  ;;  %v3400_v59 = vld [vmem:[#allocation2 + $0x60c] ss:$16 sps:$4 sm:$0xff]   ;;  %v3395_v60 = vld [vmem:[#allocation2 + $0x408] ss:$16 sps:$4 sm:$0xff]  }
  0xd5   :  { %1876 = vmatpush2.bf16.msra.mxu0 %v3305_v61  ;;  %v3398_v61 = vld [vmem:[#allocation2 + $0x608] ss:$16 sps:$4 sm:$0xff]  }
  0xd6   :  { %1917 = vmatpush2.bf16.msra.mxu1 %v3308_v0  ;;  %1877 = vmatprep.subr.bf16.mxu0 %v3313_v1  ;;  %v3403_v0 = vld [vmem:[#allocation2 + $0x5ec] ss:$16 sps:$4 sm:$0xff]  }
  0xd7   :  { %1918 = vmatprep.subr.bf16.mxu1 %v3316_v2  ;;  %v3406_v1 = vld [vmem:[#allocation2 + $0x7ec] ss:$16 sps:$4 sm:$0xff]   ;;  %v3401_v2 = vld [vmem:[#allocation2 + $0x5e8] ss:$16 sps:$4 sm:$0xff]  }
  0xd9   :  { %1878 = vmatpush2.bf16.msra.mxu0 %v3311_v4  ;;  %v3404_v4 = vld [vmem:[#allocation2 + $0x7e8] ss:$16 sps:$4 sm:$0xff]  }
  0xda   :  { %1919 = vmatpush2.bf16.msra.mxu1 %v3314_v5  ;;  %1879 = vmatprep.subr.bf16.mxu0 %v3319_v6  ;;  %v3409_v5 = vld [vmem:[#allocation2 + $0x5cc] ss:$16 sps:$4 sm:$0xff]  }
  0xdb   :  { %1920 = vmatprep.subr.bf16.mxu1 %v3322_v7  ;;  %v3412_v6 = vld [vmem:[#allocation2 + $0x7cc] ss:$16 sps:$4 sm:$0xff]   ;;  %v3407_v7 = vld [vmem:[#allocation2 + $0x5c8] ss:$16 sps:$4 sm:$0xff]  }
  0xdd   :  { %1880 = vmatpush2.bf16.msra.mxu0 %v3317_v8  ;;  %v3410_v8 = vld [vmem:[#allocation2 + $0x7c8] ss:$16 sps:$4 sm:$0xff]  }
  0xde   :  { %1921 = vmatpush2.bf16.msra.mxu1 %v3320_v9  ;;  %1881 = vmatprep.subr.bf16.mxu0 %v3325_v10  ;;  %v3415_v9 = vld [vmem:[#allocation2 + $0x5ac] ss:$16 sps:$4 sm:$0xff]  }
  0xdf   :  { %1922 = vmatprep.subr.bf16.mxu1 %v3328_v11  ;;  %v3418_v10 = vld [vmem:[#allocation2 + $0x7ac] ss:$16 sps:$4 sm:$0xff]   ;;  %v3413_v11 = vld [vmem:[#allocation2 + $0x5a8] ss:$16 sps:$4 sm:$0xff]  }
  0xe1   :  { %1882 = vmatpush2.bf16.msra.mxu0 %v3323_v12  ;;  %v3416_v12 = vld [vmem:[#allocation2 + $0x7a8] ss:$16 sps:$4 sm:$0xff]  }
  0xe2   :  { %1923 = vmatpush2.bf16.msra.mxu1 %v3326_v13  ;;  %1883 = vmatprep.subr.bf16.mxu0 %v3331_v15  ;;  %v3421_v13 = vld [vmem:[#allocation2 + $0x58c] ss:$16 sps:$4 sm:$0xff]  }
  0xe3   :  { %1924 = vmatprep.subr.bf16.mxu1 %v3334_v16  ;;  %v3424_v15 = vld [vmem:[#allocation2 + $0x78c] ss:$16 sps:$4 sm:$0xff]   ;;  %v3419_v16 = vld [vmem:[#allocation2 + $0x588] ss:$16 sps:$4 sm:$0xff]  }
  0xe5   :  { %1884 = vmatpush2.bf16.msra.mxu0 %v3329_v17  ;;  %v3422_v17 = vld [vmem:[#allocation2 + $0x788] ss:$16 sps:$4 sm:$0xff]  }
  0xe6   :  { %1925 = vmatpush2.bf16.msra.mxu1 %v3332_v20  ;;  %1885 = vmatprep.subr.bf16.mxu0 %v3337_v21  ;;  %v3427_v20 = vld [vmem:[#allocation2 + $0x56c] ss:$16 sps:$4 sm:$0xff]  }
  0xe7   :  { %1926 = vmatprep.subr.bf16.mxu1 %v3340_v22  ;;  %v3430_v21 = vld [vmem:[#allocation2 + $0x76c] ss:$16 sps:$4 sm:$0xff]   ;;  %v3425_v22 = vld [vmem:[#allocation2 + $0x568] ss:$16 sps:$4 sm:$0xff]  }
  0xe9   :  { %1886 = vmatpush2.bf16.msra.mxu0 %v3335_v23  ;;  %v3428_v23 = vld [vmem:[#allocation2 + $0x768] ss:$16 sps:$4 sm:$0xff]  }
  0xea   :  { %1927 = vmatpush2.bf16.msra.mxu1 %v3338_v25  ;;  %1887 = vmatprep.subr.bf16.mxu0 %v3343_v26  ;;  %v3433_v25 = vld [vmem:[#allocation2 + $0x54c] ss:$16 sps:$4 sm:$0xff]  }
  0xeb   :  { %1928 = vmatprep.subr.bf16.mxu1 %v3346_v27  ;;  %v3436_v26 = vld [vmem:[#allocation2 + $0x74c] ss:$16 sps:$4 sm:$0xff]   ;;  %v3431_v27 = vld [vmem:[#allocation2 + $0x548] ss:$16 sps:$4 sm:$0xff]  }
  0xed   :  { %1888 = vmatpush2.bf16.msra.mxu0 %v3341_v28  ;;  %v3434_v28 = vld [vmem:[#allocation2 + $0x748] ss:$16 sps:$4 sm:$0xff]  }
  0xee   :  { %1929 = vmatpush2.bf16.msra.mxu1 %v3344_v30  ;;  %1889 = vmatprep.subr.bf16.mxu0 %v3349_v31  ;;  %v3439_v30 = vld [vmem:[#allocation2 + $0x52c] ss:$16 sps:$4 sm:$0xff]  }
  0xef   :  { %1930 = vmatprep.subr.bf16.mxu1 %v3352_v32  ;;  %v3442_v31 = vld [vmem:[#allocation2 + $0x72c] ss:$16 sps:$4 sm:$0xff]   ;;  %v3437_v32 = vld [vmem:[#allocation2 + $0x528] ss:$16 sps:$4 sm:$0xff]  }
  0xf1   :  { %1890 = vmatpush2.bf16.msra.mxu0 %v3347_v33  ;;  %v3440_v33 = vld [vmem:[#allocation2 + $0x728] ss:$16 sps:$4 sm:$0xff]  }
  0xf2   :  { %1931 = vmatpush2.bf16.msra.mxu1 %v3350_v34  ;;  %1941 = vmatprep.subr.bf16.mxu0 %v3355_v35  ;;  %v3445_v34 = vld [vmem:[#allocation2 + $0x50c] ss:$16 sps:$4 sm:$0xff]  }
  0xf3   :  { %1982 = vmatprep.subr.bf16.mxu1 %v3358_v36  ;;  %v3448_v35 = vld [vmem:[#allocation2 + $0x70c] ss:$16 sps:$4 sm:$0xff]   ;;  %v3443_v36 = vld [vmem:[#allocation2 + $0x508] ss:$16 sps:$4 sm:$0xff]  }
  0xf4   :  { %1892 = vmatmul.mubr.bf16.vlgmr.msra.gmra.mxu0 %v3724_v14  ;;  %v3376_v14 = vld [vmem:[#allocation2 + $0x68c] ss:$16 sps:$4 sm:$0xff]  }
  0xf5   :  { %1933 = vmatmul.mubr.bf16.vlgmr.msra.gmra.mxu1 %v3730_v19  ;;  %1942 = vmatpush1.bf16.msra.mxu0 %v3353_v37  ;;  %v3374_v19 = vld [vmem:[#allocation2 + $0x688] ss:$16 sps:$4 sm:$0xff]  }
  0xf6   :  { %1983 = vmatpush1.bf16.msra.mxu1 %v3356_v38  ;;  %1943 = vmatprep.subr.bf16.mxu0 %v3361_v39  ;;  %v3446_v37 = vld [vmem:[#allocation2 + $0x708] ss:$16 sps:$4 sm:$0xff]   ;;  %v3449_v39 = vld [vmem:[#allocation6 + $0x70] ss:$8 sps:$4 sm:$0xff]  }
  0xf7   :  { %1984 = vmatprep.subr.bf16.mxu1 %v3364_v40  ;;  %1973 = vmatprep.mubr.bf16.mxu0 %v3726_v18  ;;  %v3388_v18 = vld [vmem:[#allocation2 + $0x64c] ss:$16 sps:$4 sm:$0xff]   ;;  %v3451_v38 = vld [vmem:[#allocation6 + $0x74] ss:$8 sps:$4 sm:$0xff]   ;;  %v3454_v40 = vld [vmem:[#allocation6 + $0x64] ss:$8 sps:$4 sm:$0xff]  }
  0xf8   :  { %2014 = vmatprep.mubr.bf16.mxu1 %v3734_v24  ;;  %v3383_v24 = vld [vmem:[#allocation2 + $0x448] ss:$16 sps:$4 sm:$0xff]  }
  0xf9   :  { %1944 = vmatpush1.bf16.msra.mxu0 %v3359_v41 }
  0xfa   :  { %1985 = vmatpush1.bf16.msra.mxu1 %v3362_v43  ;;  %1945 = vmatprep.subr.bf16.mxu0 %v3367_v44  ;;  %v3452_v44 = vld [vmem:[#allocation6 + $0x60] ss:$8 sps:$4 sm:$0xff]  }
  0xfb   :  { %1986 = vmatprep.subr.bf16.mxu1 %v3370_v45 }
  0xfd   :  { %1946 = vmatpush1.bf16.msra.mxu0 %v3365_v46 }
  0xfe   :  { %1987 = vmatpush1.bf16.msra.mxu1 %v3368_v47  ;;  %1947 = vmatprep.subr.bf16.mxu0 %v3373_v62  ;;  %v3457_v47 = vld [vmem:[#allocation6 + $0x54] ss:$8 sps:$4 sm:$0xff]  }
  0xff   :  { %1988 = vmatprep.subr.bf16.mxu1 %v3376_v14 }
 0x101   :  { %1948 = vmatpush1.bf16.msra.mxu0 %v3371_v3  ;;  %v3455_v3 = vld [vmem:[#allocation6 + $0x50] ss:$8 sps:$4 sm:$0xff]  }
 0x102   :  { %1989 = vmatpush1.bf16.msra.mxu1 %v3374_v19  ;;  %1949 = vmatprep.subr.bf16.mxu0 %v3379_v48 }
 0x103   :  { %1990 = vmatprep.subr.bf16.mxu1 %v3382_v49  ;;  %v3460_v49 = vld [vmem:[#allocation6 + $0x44] ss:$8 sps:$4 sm:$0xff]  }
 0x105   :  { %1950 = vmatpush1.bf16.msra.mxu0 %v3377_v50  ;;  %v3497_v50 = vld [vmem:[#allocation6 + $0x170] ss:$8 sps:$4 sm:$0xff]  }
 0x106   :  { %1991 = vmatpush1.bf16.msra.mxu1 %v3380_v51  ;;  %1951 = vmatprep.subr.bf16.mxu0 %v3385_v52  ;;  %v3502_v51 = vld [vmem:[#allocation6 + $0x164] ss:$8 sps:$4 sm:$0xff]   ;;  %v3500_v52 = vld [vmem:[#allocation6 + $0x160] ss:$8 sps:$4 sm:$0xff]  }
 0x107   :  { %1992 = vmatprep.subr.bf16.mxu1 %v3388_v18  ;;  %v3463_v18 = vld [vmem:[#allocation6 + $0x34] ss:$8 sps:$4 sm:$0xff]  }
 0x109   :  { %1952 = vmatpush1.bf16.msra.mxu0 %v3383_v24  ;;  %v3505_v24 = vld [vmem:[#allocation6 + $0x154] ss:$8 sps:$4 sm:$0xff]  }
 0x10a   :  { %1993 = vmatpush1.bf16.msra.mxu1 %v3386_v53  ;;  %1953 = vmatprep.subr.bf16.mxu0 %v3391_v54  ;;  %v3461_v53 = vld [vmem:[#allocation6 + $0x30] ss:$8 sps:$4 sm:$0xff]  }
 0x10b   :  { %1994 = vmatprep.subr.bf16.mxu1 %v3394_v55  ;;  %v3503_v54 = vld [vmem:[#allocation6 + $0x150] ss:$8 sps:$4 sm:$0xff]   ;;  %v3466_v55 = vld [vmem:[#allocation6 + $0x24] ss:$8 sps:$4 sm:$0xff]  }
 0x10d   :  { %1954 = vmatpush1.bf16.msra.mxu0 %v3389_v56  ;;  %v3508_v56 = vld [vmem:[#allocation6 + $0x144] ss:$8 sps:$4 sm:$0xff]  }
 0x10e   :  { %1995 = vmatpush1.bf16.msra.mxu1 %v3392_v57  ;;  %1955 = vmatprep.subr.bf16.mxu0 %v3397_v58  ;;  %v3464_v57 = vld [vmem:[#allocation6 + $0x20] ss:$8 sps:$4 sm:$0xff]  }
 0x10f   :  { %1996 = vmatprep.subr.bf16.mxu1 %v3400_v59  ;;  %v3506_v58 = vld [vmem:[#allocation6 + $0x140] ss:$8 sps:$4 sm:$0xff]   ;;  %v3469_v59 = vld [vmem:[#allocation6 + $0x14] ss:$8 sps:$4 sm:$0xff]  }
 0x111   :  { %1956 = vmatpush1.bf16.msra.mxu0 %v3395_v60  ;;  %v3511_v60 = vld [vmem:[#allocation6 + $0x134] ss:$8 sps:$4 sm:$0xff]  }
 0x112   :  { %1997 = vmatpush1.bf16.msra.mxu1 %v3398_v61  ;;  %1957 = vmatprep.subr.bf16.mxu0 %v3403_v0  ;;  %v3467_v61 = vld [vmem:[#allocation6 + $0x10] ss:$8 sps:$4 sm:$0xff]  }
 0x113   :  { %1998 = vmatprep.subr.bf16.mxu1 %v3406_v1  ;;  %v3509_v0 = vld [vmem:[#allocation6 + $0x130] ss:$8 sps:$4 sm:$0xff]   ;;  %v3472_v1 = vld [vmem:[#allocation6 + $0x4] ss:$8 sps:$4 sm:$0xff]  }
 0x115   :  { %1958 = vmatpush2.bf16.msra.mxu0 %v3401_v2  ;;  %v3514_v2 = vld [vmem:[#allocation6 + $0x124] ss:$8 sps:$4 sm:$0xff]  }
 0x116   :  { %1999 = vmatpush2.bf16.msra.mxu1 %v3404_v4  ;;  %1959 = vmatprep.subr.bf16.mxu0 %v3409_v5  ;;  %v3470_v4 = vld [vmem:[#allocation6] ss:$8 sps:$4 sm:$0xff]  }
 0x117   :  { %2000 = vmatprep.subr.bf16.mxu1 %v3412_v6  ;;  %v3512_v5 = vld [vmem:[#allocation6 + $0x120] ss:$8 sps:$4 sm:$0xff]   ;;  %v3475_v6 = vld [vmem:[#allocation6 + $0xf4] ss:$8 sps:$4 sm:$0xff]  }
 0x119   :  { %1960 = vmatpush2.bf16.msra.mxu0 %v3407_v7  ;;  %v3517_v7 = vld [vmem:[#allocation6 + $0x114] ss:$8 sps:$4 sm:$0xff]  }
 0x11a   :  { %2001 = vmatpush2.bf16.msra.mxu1 %v3410_v8  ;;  %1961 = vmatprep.subr.bf16.mxu0 %v3415_v9  ;;  %v3473_v8 = vld [vmem:[#allocation6 + $0xf0] ss:$8 sps:$4 sm:$0xff]  }
 0x11b   :  { %2002 = vmatprep.subr.bf16.mxu1 %v3418_v10  ;;  %v3515_v9 = vld [vmem:[#allocation6 + $0x110] ss:$8 sps:$4 sm:$0xff]   ;;  %v3478_v10 = vld [vmem:[#allocation6 + $0xe4] ss:$8 sps:$4 sm:$0xff]  }
 0x11d   :  { %1962 = vmatpush2.bf16.msra.mxu0 %v3413_v11  ;;  %v3520_v11 = vld [vmem:[#allocation6 + $0x104] ss:$8 sps:$4 sm:$0xff]  }
 0x11e   :  { %2003 = vmatpush2.bf16.msra.mxu1 %v3416_v12  ;;  %1963 = vmatprep.subr.bf16.mxu0 %v3421_v13  ;;  %v3476_v12 = vld [vmem:[#allocation6 + $0xe0] ss:$8 sps:$4 sm:$0xff]  }
 0x11f   :  { %2004 = vmatprep.subr.bf16.mxu1 %v3424_v15  ;;  %v3518_v13 = vld [vmem:[#allocation6 + $0x100] ss:$8 sps:$4 sm:$0xff]   ;;  %v3481_v15 = vld [vmem:[#allocation6 + $0xd4] ss:$8 sps:$4 sm:$0xff]  }
 0x121   :  { %1964 = vmatpush2.bf16.msra.mxu0 %v3419_v16  ;;  %v3523_v16 = vld [vmem:[#allocation6 + $0x1f4] ss:$8 sps:$4 sm:$0xff]  }
 0x122   :  { %2005 = vmatpush2.bf16.msra.mxu1 %v3422_v17  ;;  %1965 = vmatprep.subr.bf16.mxu0 %v3427_v20  ;;  %v3479_v17 = vld [vmem:[#allocation6 + $0xd0] ss:$8 sps:$4 sm:$0xff]  }
 0x123   :  { %2006 = vmatprep.subr.bf16.mxu1 %v3430_v21  ;;  %v3521_v20 = vld [vmem:[#allocation6 + $0x1f0] ss:$8 sps:$4 sm:$0xff]   ;;  %v3484_v21 = vld [vmem:[#allocation6 + $0xc4] ss:$8 sps:$4 sm:$0xff]  }
 0x125   :  { %1966 = vmatpush2.bf16.msra.mxu0 %v3425_v22  ;;  %v3526_v22 = vld [vmem:[#allocation6 + $0x1e4] ss:$8 sps:$4 sm:$0xff]  }
 0x126   :  { %2007 = vmatpush2.bf16.msra.mxu1 %v3428_v23  ;;  %1967 = vmatprep.subr.bf16.mxu0 %v3433_v25  ;;  %v3482_v23 = vld [vmem:[#allocation6 + $0xc0] ss:$8 sps:$4 sm:$0xff]  }
 0x127   :  { %2008 = vmatprep.subr.bf16.mxu1 %v3436_v26  ;;  %v3524_v25 = vld [vmem:[#allocation6 + $0x1e0] ss:$8 sps:$4 sm:$0xff]   ;;  %v3487_v26 = vld [vmem:[#allocation6 + $0xb4] ss:$8 sps:$4 sm:$0xff]  }
 0x129   :  { %1968 = vmatpush2.bf16.msra.mxu0 %v3431_v27  ;;  %v3529_v27 = vld [vmem:[#allocation6 + $0x1d4] ss:$8 sps:$4 sm:$0xff]  }
 0x12a   :  { %2009 = vmatpush2.bf16.msra.mxu1 %v3434_v28  ;;  %1969 = vmatprep.subr.bf16.mxu0 %v3439_v30  ;;  %v3485_v28 = vld [vmem:[#allocation6 + $0xb0] ss:$8 sps:$4 sm:$0xff]  }
 0x12b   :  { %2010 = vmatprep.subr.bf16.mxu1 %v3442_v31  ;;  %v3527_v30 = vld [vmem:[#allocation6 + $0x1d0] ss:$8 sps:$4 sm:$0xff]   ;;  %v3490_v31 = vld [vmem:[#allocation6 + $0xa4] ss:$8 sps:$4 sm:$0xff]  }
 0x12d   :  { %1970 = vmatpush2.bf16.msra.mxu0 %v3437_v32  ;;  %v3532_v32 = vld [vmem:[#allocation6 + $0x1c4] ss:$8 sps:$4 sm:$0xff]  }
 0x12e   :  { %2011 = vmatpush2.bf16.msra.mxu1 %v3440_v33  ;;  %1971 = vmatprep.subr.bf16.mxu0 %v3445_v34  ;;  %v3488_v33 = vld [vmem:[#allocation6 + $0xa0] ss:$8 sps:$4 sm:$0xff]  }
 0x12f   :  { %2012 = vmatprep.subr.bf16.mxu1 %v3448_v35  ;;  %v3530_v34 = vld [vmem:[#allocation6 + $0x1c0] ss:$8 sps:$4 sm:$0xff]   ;;  %v3493_v35 = vld [vmem:[#allocation6 + $0x94] ss:$8 sps:$4 sm:$0xff]  }
 0x131   :  { %1972 = vmatpush2.bf16.msra.mxu0 %v3443_v36  ;;  %v3535_v36 = vld [vmem:[#allocation6 + $0x1b4] ss:$8 sps:$4 sm:$0xff]  }
 0x132   :  { %2013 = vmatpush2.bf16.msra.mxu1 %v3446_v37  ;;  %2427 = vmatprep.subr.bf16.mxu0 %v3451_v38  ;;  %v339_v37 = vsub.s32 0, %v3708_v42  ;;  %v3763_v38 = vld [vmem:[#allocation4] sm:$0xf] }
 0x134   :  { %v3752_v41 = vpop.f32.mrf.mxu0  ;;  %1974 = vmatmul.mubr.bf16.vlgmr.msra.gmra.mxu0 %v3716_v63  ;;  %v3499_v63 = vld [vmem:[#allocation6 + $0x174] ss:$8 sps:$4 sm:$0xff]  }
 0x135   :  { %v3754_v43 = vpop.f32.mrf.mxu1  ;;  %2015 = vmatmul.mubr.bf16.vlgmr.msra.gmra.mxu1 %v3742_v29  ;;  %2428 = vmatpush1.bf16.msra.mxu0 %v3449_v39  ;;  %v3458_v29 = vld [vmem:[#allocation6 + $0x40] ss:$8 sps:$4 sm:$0xff]   ;;  %v343_v39 = vsub.s32 1, %v3708_v42 }
 0x136   :  { %v3758_v45 = vpop.f32.mrf.mxu0  ;;  %2429 = vmatprep.subr.bf16.mxu0 %v3454_v40  ;;  %2468 = vmatprep.subr.bf16.mxu1 %v3499_v63  ;;  %v3491_v40 = vld [vmem:[#allocation6 + $0x90] ss:$8 sps:$4 sm:$0xff]   ;;  %v3536_v63 = vld [vmem:[#allocation6 + $0x1a0] ss:$8 sps:$4 sm:$0xff]  }
 0x137   :  { %v3760_v46 = vpop.f32.mrf.mxu1  ;;  %2469 = vmatpush1.bf16.msra.mxu1 %v3497_v50 }
 0x138   :  { %v1733_v62 = vpop.f32.mrf.mxu0  ;;  %2470 = vmatprep.subr.bf16.mxu1 %v3502_v51 }
 0x139   :  { %v1774_v14 = vpop.f32.mrf.mxu1  ;;  %2430 = vmatpush1.bf16.msra.mxu0 %v3452_v44  ;;  %v3533_v44 = vld [vmem:[#allocation6 + $0x1b0] ss:$8 sps:$4 sm:$0xff]   ;;  %v340_v62 = vrot.slane %v3763_v38, %v339_v37 }
 0x13a   :  { %v1734_v19 = vpop.f32.mrf.mxu0  ;;  %2431 = vmatprep.subr.bf16.mxu0 %v3457_v47  ;;  %v3496_v47 = vld [vmem:[#allocation6 + $0x84] ss:$8 sps:$4 sm:$0xff]   ;;  %v344_v14 = vrot.slane %v3763_v38, %v343_v39 }
 0x13b   :  { %v1775_v48 = vpop.f32.mrf.mxu1  ;;  %2471 = vmatpush1.bf16.msra.mxu1 %v3500_v52  ;;  %v1730_v19 = vadd.f32 %v3752_v41, %v340_v62  ;;  %v3539_v41 = vld [vmem:[#allocation6 + $0x190] ss:$8 sps:$4 sm:$0xff]  }
 0x13c   :  { %2472 = vmatprep.subr.bf16.mxu1 %v3505_v24  ;;  %v1732_v48 = vadd.f32 %v3758_v45, %v344_v14 }
 0x13d   :  { %2432 = vmatpush1.bf16.msra.mxu0 %v3455_v3  ;;  %v3494_v3 = vld [vmem:[#allocation6 + $0x80] ss:$8 sps:$4 sm:$0xff]   ;;  %v1771_v50 = vadd.f32 %v3754_v43, %v1730_v19 }
 0x13e   :  { %2433 = vmatprep.subr.bf16.mxu0 %v3460_v49  ;;  %v3538_v49 = vld [vmem:[#allocation6 + $0x1a4] ss:$8 sps:$4 sm:$0xff]   ;;  %v1773_v52 = vadd.f32 %v3760_v46, %v1732_v48 }
 0x13f   :  { %2473 = vmatpush1.bf16.msra.mxu1 %v3503_v54  ;;  %v3541_v54 = vld [vmem:[#allocation6 + $0x194] ss:$8 sps:$4 sm:$0xff]  }
 0x140   :  { %2474 = vmatprep.subr.bf16.mxu1 %v3508_v56 }
 0x141   :  { %2434 = vmatpush1.bf16.msra.mxu0 %v3458_v29 }
 0x142   :  { %2435 = vmatprep.subr.bf16.mxu0 %v3463_v18 }
 0x143   :  { %2475 = vmatpush1.bf16.msra.mxu1 %v3506_v58 }
 0x144   :  { %2476 = vmatprep.subr.bf16.mxu1 %v3511_v60 }
 0x145   :  { %2436 = vmatpush1.bf16.msra.mxu0 %v3461_v53 }
 0x146   :  { %2437 = vmatprep.subr.bf16.mxu0 %v3466_v55 }
 0x147   :  { %2477 = vmatpush1.bf16.msra.mxu1 %v3509_v0 }
 0x148   :  { %2478 = vmatprep.subr.bf16.mxu1 %v3514_v2 }
 0x149   :  { %2438 = vmatpush1.bf16.msra.mxu0 %v3464_v57 }
 0x14a   :  { %2439 = vmatprep.subr.bf16.mxu0 %v3469_v59 }
 0x14b   :  { %2479 = vmatpush1.bf16.msra.mxu1 %v3512_v5 }
 0x14c   :  { %2480 = vmatprep.subr.bf16.mxu1 %v3517_v7 }
 0x14d   :  { %2440 = vmatpush1.bf16.msra.mxu0 %v3467_v61  ;;  %v3544_v61 = vld [vmem:[#allocation6 + $0x184] ss:$8 sps:$4 sm:$0xff]  }
 0x14e   :  { %2441 = vmatprep.subr.bf16.mxu0 %v3472_v1  ;;  %v3542_v1 = vld [vmem:[#allocation6 + $0x180] ss:$8 sps:$4 sm:$0xff]  }
 0x14f   :  { %2481 = vmatpush1.bf16.msra.mxu1 %v3515_v9 }
 0x150   :  { %2482 = vmatprep.subr.bf16.mxu1 %v3520_v11 }
 0x151   :  { %2442 = vmatpush1.bf16.msra.mxu0 %v3470_v4 }
 0x152   :  { %2443 = vmatprep.subr.bf16.mxu0 %v3475_v6 }
 0x153   :  { %2483 = vmatpush1.bf16.msra.mxu1 %v3518_v13  ;;  %v3546_v13 = vld [vmem:[%s3843_s5 + $0x38] sm:$0xff]  }
 0x154   :  { %2484 = vmatprep.subr.bf16.mxu1 %v3523_v16  ;;  %v3548_v16 = vld [vmem:[%s3843_s5 + $0x30] sm:$0xff]  }
 0x155   :  { %2444 = vmatpush2.bf16.msra.mxu0 %v3473_v8 }
 0x156   :  { %2445 = vmatprep.subr.bf16.mxu0 %v3478_v10 }
 0x157   :  { %2485 = vmatpush2.bf16.msra.mxu1 %v3521_v20  ;;  %v3550_v20 = vld [vmem:[%s3843_s5 + $0x28] sm:$0xff]  }
 0x158   :  { %2486 = vmatprep.subr.bf16.mxu1 %v3526_v22  ;;  %v3552_v22 = vld [vmem:[%s3843_s5 + $0x20] sm:$0xff]  }
 0x159   :  { %2446 = vmatpush2.bf16.msra.mxu0 %v3476_v12  ;;  %v3545_v12 = vld [vmem:[%s3843_s5 + $0x78] sm:$0xff]  }
 0x15a   :  { %2447 = vmatprep.subr.bf16.mxu0 %v3481_v15  ;;  %v3547_v15 = vld [vmem:[%s3843_s5 + $0x70] sm:$0xff]  }
 0x15b   :  { %2487 = vmatpush2.bf16.msra.mxu1 %v3524_v25  ;;  %v3554_v25 = vld [vmem:[%s3843_s5 + $0x18] sm:$0xff]  }
 0x15c   :  { %2488 = vmatprep.subr.bf16.mxu1 %v3529_v27  ;;  %v3556_v27 = vld [vmem:[%s3843_s5 + $0x10] sm:$0xff]  }
 0x15d   :  { %2448 = vmatpush2.bf16.msra.mxu0 %v3479_v17  ;;  %v3549_v17 = vld [vmem:[%s3843_s5 + $0x68] sm:$0xff]  }
 0x15e   :  { %2449 = vmatprep.subr.bf16.mxu0 %v3484_v21  ;;  %v3551_v21 = vld [vmem:[%s3843_s5 + $0x60] sm:$0xff]  }
 0x15f   :  { %2489 = vmatpush2.bf16.msra.mxu1 %v3527_v30  ;;  %v351_v30 = vsub.s32 3, %v3708_v42 }
 0x160   :  { %2490 = vmatprep.subr.bf16.mxu1 %v3532_v32 }
 0x161   :  { %2450 = vmatpush2.bf16.msra.mxu0 %v3482_v23  ;;  %v3553_v23 = vld [vmem:[%s3843_s5 + $0x58] sm:$0xff]   ;;  %v352_v32 = vrot.slane %v3763_v38, %v351_v30 }
 0x162   :  { %2451 = vmatprep.subr.bf16.mxu0 %v3487_v26  ;;  %v3555_v26 = vld [vmem:[%s3843_s5 + $0x50] sm:$0xff]  }
 0x163   :  { %2491 = vmatpush2.bf16.msra.mxu1 %v3530_v34 }
 0x164   :  { %2492 = vmatprep.subr.bf16.mxu1 %v3535_v36 }
 0x165   :  { %2452 = vmatpush2.bf16.msra.mxu0 %v3485_v28  ;;  %v347_v28 = vsub.s32 2, %v3708_v42  ;;  %v3016_v42 = vld [vmem:[%s3844_s6] ss:$0 sm:$0xff] }
 0x166   :  { %2453 = vmatprep.subr.bf16.mxu0 %v3490_v31 }
 0x167   :  { %2493 = vmatpush2.bf16.msra.mxu1 %v3533_v44  ;;  %v348_v31 = vrot.slane %v3763_v38, %v347_v28 }
 0x168   :  { %2494 = vmatprep.subr.bf16.mxu1 %v3538_v49 }
 0x169   :  { %2454 = vmatpush2.bf16.msra.mxu0 %v3488_v33 }
 0x16a   :  { %2455 = vmatprep.subr.bf16.mxu0 %v3493_v35 }
 0x16b   :  { %2495 = vmatpush2.bf16.msra.mxu1 %v3536_v63 }
 0x16c   :  { %2496 = vmatprep.subr.bf16.mxu1 %v3541_v54  ;;  %v3558_v54 = vld [vmem:[%s3843_s5 + $0x8] sm:$0xff]  }
 0x16d   :  { %2456 = vmatpush2.bf16.msra.mxu0 %v3491_v40 }
 0x16e   :  { %2457 = vmatprep.subr.bf16.mxu0 %v3496_v47 }
 0x16f   :  { %2497 = vmatpush2.bf16.msra.mxu1 %v3539_v41  ;;  %v3559_v41 = vld [vmem:[%s3843_s5 + $0x40] sm:$0xff]  }
 0x170   :  { %2498 = vmatprep.subr.bf16.mxu1 %v3544_v61 }
 0x171   :  { %2458 = vmatpush2.bf16.msra.mxu0 %v3494_v3 }
 0x172   :  { %3033 = vmatprep.subr.bf16.mxu0 %v3545_v12 }
 0x173   :  { %2499 = vmatpush2.bf16.msra.mxu1 %v3542_v1 }
 0x174   :  { %v1811_v51 = vpop.f32.mrf.mxu0 }
 0x175   :  { %v1852_v29 = vpop.f32.mrf.mxu1  ;;  %v1812_v18 = vadd.f32 %v1811_v51, %v1771_v50 }
 0x176   :  { %v1813_v24 = vpop.f32.mrf.mxu0 }
 0x177   :  { %v1854_v53 = vpop.f32.mrf.mxu1  ;;  %v1853_v55 = vadd.f32 %v1852_v29, %v1812_v18  ;;  %v1814_v56 = vadd.f32 %v1813_v24, %v1773_v52 }
 0x178   :  { %v1815_v57 = vpop.f32.mrf.mxu0 }
 0x179   :  { %v1856_v45 = vpop.f32.mrf.mxu1  ;;  %v1855_v58 = vadd.f32 %v1854_v53, %v1814_v56  ;;  %v2023_v43 = vmax.f32 %v1853_v55, 0.0  ;;  %v3557_v53 = vld [vmem:[%s3843_s5 + $0x48] sm:$0xff]   ;;  %v3560_v57 = vld [vmem:[%s3843_s5] sm:$0xff]  }
 0x17a   :  { %v1816_v59 = vpop.f32.mrf.mxu0 }
 0x17b   :  { %v1857_v60 = vpop.f32.mrf.mxu1  ;;  %v2024_v0 = vmax.f32 %v1855_v58, 0.0  ;;  %v2027_v2 = vpack.c.bf16 %v2023_v43, %v2023_v43  ;;  %v2095_v58 = vld [vmem:[#allocation7] sm:$0x3] }
 0x17c   :  { %v2100_v43 = vrot.slane %v2095_v58, %v339_v37  ;;  %v2104_v59 = vrot.slane %v2095_v58, %v343_v39 }
 0x17d   :  { %v2028_v46 = vpack.c.bf16 %v2024_v0, %v2024_v0 }
 0x17f   :  { %2459 = vmatprep.mubr.bf16.mxu0 %v2028_v46 }
 0x180   :  { %2460 = vmatmul.mubr.bf16.vlgmr.msra.gmra.mxu0 %v2027_v2 }
 0x181   :  { %3034 = vmatpush3.bf16.msra.mxu0 %v3546_v13 }
 0x182   :  { %3035 = vmatprep.subr.bf16.mxu0 %v3547_v15 }
 0x185   :  { %3036 = vmatpush3.bf16.msra.mxu0 %v3548_v16 }
 0x186   :  { %3037 = vmatprep.subr.bf16.mxu0 %v3549_v17 }
 0x189   :  { %3038 = vmatpush3.bf16.msra.mxu0 %v3550_v20 }
 0x18a   :  { %3039 = vmatprep.subr.bf16.mxu0 %v3551_v21 }
 0x18d   :  { %3040 = vmatpush3.bf16.msra.mxu0 %v3552_v22 }
 0x18e   :  { %3041 = vmatprep.subr.bf16.mxu0 %v3553_v23 }
 0x191   :  { %3042 = vmatpush3.bf16.msra.mxu0 %v3554_v25 }
 0x192   :  { %3043 = vmatprep.subr.bf16.mxu0 %v3555_v26 }
 0x195   :  { %3044 = vmatpush3.bf16.msra.mxu0 %v3556_v27 }
 0x196   :  { %3045 = vmatprep.subr.bf16.mxu0 %v3557_v53 }
 0x199   :  { %3046 = vmatpush3.bf16.msra.mxu0 %v3558_v54 }
 0x19a   :  { %3047 = vmatprep.subr.bf16.mxu0 %v3559_v41 }
 0x19d   :  { %3048 = vmatpush3.bf16.msra.mxu0 %v3560_v57 }
 0x1b4   :  { %v1893_v4 = vpop.f32.mrf.mxu0 }
 0x1b5   :  { %v1934_v5 = vpop.f32.mrf.mxu1  ;;  %v1894_v33 = vadd.f32 %v1893_v4, %v348_v31 }
 0x1b6   :  { %v1895_v6 = vpop.f32.mrf.mxu0 }
 0x1b7   :  { %v1936_v7 = vpop.f32.mrf.mxu1  ;;  %v1896_v34 = vadd.f32 %v1895_v6, %v352_v32  ;;  %v1935_v35 = vadd.f32 %v1934_v5, %v1894_v33 }
 0x1b8   :  { %v1897_v8 = vpop.f32.mrf.mxu0 }
 0x1b9   :  { %v1938_v9 = vpop.f32.mrf.mxu1  ;;  %v1937_v44 = vadd.f32 %v1936_v7, %v1896_v34 }
 0x1ba   :  { %v1898_v10 = vpop.f32.mrf.mxu0 }
 0x1bb   :  { %v1939_v11 = vpop.f32.mrf.mxu1 }
 0x1f4   :  { %v1975_v36 = vpop.f32.mrf.mxu0 }
 0x1f5   :  { %v2016_v40 = vpop.f32.mrf.mxu1  ;;  %v1976_v47 = vadd.f32 %v1975_v36, %v1935_v35 }
 0x1f6   :  { %v1977_v62 = vpop.f32.mrf.mxu0 }
 0x1f7   :  { %v2018_v14 = vpop.f32.mrf.mxu1  ;;  %v2017_v3 = vadd.f32 %v2016_v40, %v1976_v47  ;;  %v1978_v19 = vadd.f32 %v1977_v62, %v1937_v44 }
 0x1f8   :  { %v1979_v48 = vpop.f32.mrf.mxu0 }
 0x1f9   :  { %v2020_v49 = vpop.f32.mrf.mxu1  ;;  %v2019_v50 = vadd.f32 %v2018_v14, %v1978_v19  ;;  %v2025_v63 = vmax.f32 %v2017_v3, 0.0 }
 0x1fa   :  { %v1980_v51 = vpop.f32.mrf.mxu0 }
 0x1fb   :  { %v2021_v29 = vpop.f32.mrf.mxu1  ;;  %v2026_v52 = vmax.f32 %v2019_v50, 0.0  ;;  %v2029_v38 = vpack.c.bf16 %v2025_v63, %v2025_v63 }
 0x1fd   :  { %v2030_v18 = vpack.c.bf16 %v2026_v52, %v2026_v52 }
 0x1ff   :  { %2500 = vmatprep.mubr.bf16.mxu1 %v2030_v18 }
 0x200   :  { %2501 = vmatmul.mubr.bf16.vlgmr.msra.gmra.mxu1 %v2029_v38 }
 0x240   :  { %v2461_v24 = vpop.f32.mrf.mxu0 }
 0x241   :  { %v2462_v60 = vadd.f32 %v2461_v24, %v2100_v43 }
 0x242   :  { %v2463_v55 = vpop.f32.mrf.mxu0 }
 0x243   :  { %v2464_v0 = vadd.f32 %v2463_v55, %v2104_v59 }
 0x244   :  { %v2465_v56 = vpop.f32.mrf.mxu0 }
 0x246   :  { %v2466_v45 = vpop.f32.mrf.mxu0 }
 0x2c0   :  { %v2502_v61 = vpop.f32.mrf.mxu1 }
 0x2c1   :  { %v2503_v1 = vadd.f32 %v2502_v61, %v2462_v60 }
 0x2c2   :  { %v2504_v46 = vpop.f32.mrf.mxu1 }
 0x2c3   :  { %v2505_v2 = vadd.f32 %v2504_v46, %v2464_v0  ;;  %v2509_v4 = vmax.f32 %v2503_v1, 0.0 }
 0x2c4   :  { %v2506_v5 = vpop.f32.mrf.mxu1 }
 0x2c5   :  { %v2510_v6 = vmax.f32 %v2505_v2, 0.0  ;;  %v2511_v9 = vpack.c.bf16 %v2509_v4, %v2509_v4 }
 0x2c6   :  { %v2507_v7 = vpop.f32.mrf.mxu1 }
 0x2c7   :  { %v2512_v8 = vpack.c.bf16 %v2510_v6, %v2510_v6 }
 0x2c9   :  { %2680 = vmatprep.mubr.bf16.mxu0 %v2512_v8 }
 0x2ca   :  { %2681 = vmatmul.mubr.bf16.vlgmr.msra.gmra.mxu0 %v2511_v9 }
 0x38a   :  { %v3049_v10 = vpop.f32.mrf.mxu0 }
 0x38c   :  { %v3050_v37 = vpop.f32.mrf.mxu0 }
 0x38d   :  { %v3051_v39 = vadd.f32 %v3050_v37, %v3049_v10 }
 0x38e   :  { %v3052_v11 = vpop.f32.mrf.mxu0 }
 0x38f   :  { %v2683_v12 = vadd.f32 %v3051_v39, %v3016_v42 }
 0x390   :  { %v3053_v13 = vpop.f32.mrf.mxu0 }
 0x391   :  { %2688 = vst [vmem:[%s3845_s7] sm:$0x3] %v2683_v12 }
 0x392   :  { %2693 = vsyncpa [#allocation3], 1 }
 0x393   :  { %2694 = vsyncpa [#allocation5], 1 }
 0x394   :  { %2695 = vsyncpa [#allocation8], 1 }

// kernel: cls_model_forward.10
= control target key start
LH: loop header
LB: loop body
LE: loop exit
PB: predicated region body
PF: predicated region fallthrough
CT: control target
= control target key end

     0   :  { %s2051_s17 = smov 0   ;;  %s2053_s18 = smov 0   ;;  %s2431_s0 = inlined_call_operand.vmem [shape: bf16[2,16,8], index: 0, kind: input, shape index: {}]   ;;  %s2432_s1 = inlined_call_operand.vmem [shape: bf16[2,8,64], index: 1, kind: input, shape index: {}]   ;;  %s2433_s2 = inlined_call_operand.vmem [shape: f32[1,64], index: 2, kind: input, shape index: {}]   ;;  %s2434_s3 = inlined_call_operand.vmem [shape: bf16[64,64], index: 3, kind: input, shape index: {}]   ;;  %s2435_s4 = inlined_call_operand.vmem [shape: f32[1,64], index: 4, kind: input, shape index: {}]   ;;  %s2436_s5 = inlined_call_operand.vmem [shape: bf16[2,64,64], index: 5, kind: input, shape index: {}]   ;;  %s2437_s6 = inlined_call_operand.vmem [shape: f32[1,64], index: 6, kind: input, shape index: {}]   ;;  %s2438_s7 = inlined_call_operand.vmem [shape: bf16[64,128], index: 7, kind: input, shape index: {}]   ;;  %s2439_s8 = inlined_call_operand.vmem [shape: f32[1,128], index: 8, kind: input, shape index: {}]   ;;  %s2440_s9 = inlined_call_operand.vmem [shape: bf16[128,1024], index: 9, kind: input, shape index: {}]   ;;  %s2441_s10 = inlined_call_operand.vmem [shape: f32[1,1024], index: 10, kind: input, shape index: {}]   ;;  %s2442_s11 = inlined_call_operand.vmem [shape: bf16[2,1,1024], index: 11, kind: output, shape index: {}]  }
   0x1   :  { %s2055_s19 = smov 0  }
   0x2 LB: > { %s33_s20 = sadd.s32 1, %s1981_s18  ;;  %p1767_p0 = scmp.ge.s32.totalorder %s1985_s19, 1  ;;  %s1985_s19 = sphi %s2055_s19, %s21_s19   ;;  %s1981_s18 = sphi %s2053_s18, %s2456_s18   ;;  %s1977_s17 = sphi %s2051_s17, %s2455_s17  }
   0x3   : > { %p35_p1 = scmp.ge.s32.totalorder %s33_s20, 2  ;;  %p375_p2 = scmp.lt.s32.totalorder %s1985_s19, 3 }
   0x5   : > { %s2458_s20 = smov (%p35_p1, %s33_s20), 0  ;;  %p376_p3 = pnand %p1767_p0, %p375_p2 }
   0x6   : > { %p428_p4 = scmp.lt.s32.totalorder (!%p376_p3), %s1977_s17, 1 }
   0x7   : > { %379 = sbr.rel (%p376_p3) target bundleno = 1100 (0x44c), region = 64 }
   0xc   : > { %v1951_v0 = vld [vmem:[%s2434_s3 + $0x18] sm:$0xff]   ;;  %v1987_v1 = vmov 0.0   ;;  %vm1988_vm0 = vmmov 0   ;;  %s2460_s17 = smov (!%p428_p4, %s1977_s17), 1  ;;  %vm470_vm1 = vcmask 1043456   ;;  %vm466_vm2 = vcmask 64512  }
   0xd   : > { %1880 = vmatprep.subr.bf16.mxu0 %v1987_v1  ;;  %1882 = vmatprep.mubr.msk.bf16.mxu0 %vm1988_vm0, %v1987_v1  ;;  %s1770_s23 = sshll.u32 %s2460_s17, 2  ;;  %s1862_s24 = sshll.u32 %s2460_s17, 5  ;;  %v1952_v5 = vld [vmem:[%s2434_s3 + $0x10] sm:$0xff]   ;;  %v1953_v6 = vld [vmem:[%s2434_s3 + $0x8] sm:$0xff]   ;;  %v1954_v7 = vld [vmem:[%s2434_s3] sm:$0xff]   ;;  %vm557_vm3 = vcmask 523264  }
   0xe   : > { %1886 = vmatprep.subr.bf16.mxu1 %v1987_v1  ;;  %1894 = vmatprep.mubr.msk.bf16.mxu1 %vm1988_vm0, %v1987_v1  ;;  %s440_s27 = scalar_lea.vmem %s2432_s1, %s1770_s23  ;;  %s2089_s30 = scalar_lea.vmem %s2436_s5, %s1862_s24  ;;  %v1774_v9 = vld [vmem:[%s2433_s2] ss:$0 sm:$0xff]  ;;  %v1959_v22 = vld [vmem:[%s2438_s7 + $0x18] sm:$0xff]   ;;  %v1960_v33 = vld [vmem:[%s2438_s7 + $0x10] sm:$0xff]   ;;  %vm1541_vm4 = vcmask 1040384   ;;  %vm1544_vm6 = vcmask 1041409  }
   0xf   : > { %1887 = vmatpush3.bf16.msra.mxu1 %v1951_v0  ;;  %v453_v2 = vld [vmem:[%s440_s27] sm:$0xf]  ;;  %s1861_s12 = sshll.u32 %s2460_s17, 3  ;;  %v1955_v8 = vld [vmem:[%s2089_s30 + $0x18] sm:$0xff]   ;;  %v1956_v19 = vld [vmem:[%s2089_s30 + $0x10] sm:$0xff]   ;;  %vm1548_vm10 = vcmask 1042434  }
  0x10   : > { %1888 = vmatprep.subr.bf16.mxu1 %v1987_v1  ;;  %v472_v3 = vsel %vm470_vm1, %v453_v2, 0  ;;  %s435_s15 = scalar_lea.vmem %s2431_s0, %s1861_s12  ;;  %v1957_v20 = vld [vmem:[%s2089_s30 + $0x8] sm:$0xff]   ;;  %v1958_v21 = vld [vmem:[%s2089_s30] sm:$0xff]   ;;  %vm1542_vm5 = vsmask.f32 256  ;;  %vm1552_vm14 = vcmask 1043459   ;;  %s449_s16 = scalar_lea.vmem %s2442_s11, %s1861_s12 }
  0x11   : > { %1881 = vmatpush3.bf16.msra.mxu0 %v472_v3  ;;  %v1950_v4 = vld [vmem:[%s435_s15] sm:$0xff]   ;;  %v1961_v34 = vld [vmem:[%s2438_s7 + $0x8] sm:$0xff]   ;;  %vm1545_vm7 = vsmask.f32 1280  ;;  %vm2366_vm8 = vmand %vm1541_vm4, %vm1542_vm5  ;;  %vm1549_vm11 = vsmask.f32 2304 }
  0x12   : > { %1898 = vmatprep.subr.bf16.mxu0 %v1987_v1  ;;  %v1777_v23 = vld [vmem:[%s2435_s4] ss:$0 sm:$0xff]  ;;  %v834_v38 = vld [vmem:[%s2440_s9 + $0x1c8] sm:$0xff]  ;;  %vm2372_vm9 = vmand %vm1544_vm6, %vm1545_vm7  ;;  %vm1553_vm15 = vsmask.f32 3328  ;;  %vm1560_vm6 = vcmask 1045509  }
  0x13   : > { %1889 = vmatpush3.bf16.msra.mxu1 %v1952_v5  ;;  %v1962_v35 = vld [vmem:[%s2438_s7] sm:$0xff]   ;;  %v838_v41 = vld [vmem:[%s2440_s9 + $0x1e8] sm:$0xff]  ;;  %vm1547_vm12 = vmor %vm2372_vm9, %vm2366_vm8  ;;  %vm1561_vm7 = vsmask.f32 5376 }
  0x14   : > { %1883 = vmatmul.mubr.msk.bf16.vlgmr.msra.gmra.mxu0 %vm466_vm2, %v1950_v4  ;;  %1890 = vmatprep.subr.bf16.mxu1 %v1987_v1  ;;  %v833_v36 = vld [vmem:[%s2440_s9 + $0x1c0] sm:$0xff]  ;;  %v1853_v44 = vcombine.low %v834_v38, %v838_v41  ;;  %v1854_v45 = vcombine.high %v834_v38, %v838_v41  ;;  %vm1550_vm13 = vmand %vm1548_vm10, %vm1549_vm11  ;;  %vm1556_vm2 = vcmask 1044484   ;;  %vm1564_vm10 = vcmask 1046534  }
  0x15   : > { %1906 = vmatprep.mubr.msk.bf16.mxu0 %vm1988_vm0, %v1987_v1  ;;  %1899 = vmatpush3.bf16.msra.mxu0 %v1955_v8  ;;  %v837_v37 = vld [vmem:[%s2440_s9 + $0x1e0] sm:$0xff]  ;;  %v830_v8 = vld [vmem:[%s2440_s9 + $0x1a8] sm:$0xff]  ;;  %vm2394_vm1 = vmand %vm1552_vm14, %vm1553_vm15  ;;  %vm1565_vm11 = vsmask.f32 6400  ;;  %vm1568_vm14 = vcmask 1047559  }
  0x16   : > { %1900 = vmatprep.subr.bf16.mxu0 %v1987_v1  ;;  %v1851_v39 = vcombine.low %v833_v36, %v837_v37  ;;  %v1852_v40 = vcombine.high %v833_v36, %v837_v37  ;;  %v825_v42 = vld [vmem:[%s2440_s9 + $0x180] sm:$0xff]  ;;  %vm2409_vm9 = vmand %vm1560_vm6, %vm1561_vm7  ;;  %vm1569_vm15 = vsmask.f32 7424 }
  0x17   : > { %1891 = vmatpush3.bf16.msra.mxu1 %v1953_v6  ;;  %v829_v43 = vld [vmem:[%s2440_s9 + $0x1a0] sm:$0xff] }
  0x18   : > { %1892 = vmatprep.subr.bf16.mxu1 %v1987_v1  ;;  %v1844_v46 = vcombine.high %v825_v42, %v829_v43  ;;  %v1843_v47 = vcombine.low %v825_v42, %v829_v43  ;;  %v817_v48 = vld [vmem:[%s2440_s9 + $0x140] sm:$0xff]  ;;  %v782_v42 = vld [vmem:[%s2440_s9 + $0x28] sm:$0xff] }
  0x19   : > { %1901 = vmatpush3.bf16.msra.mxu0 %v1956_v19  ;;  %v821_v49 = vld [vmem:[%s2440_s9 + $0x160] sm:$0xff] }
  0x1a   : > { %1902 = vmatprep.subr.bf16.mxu0 %v1987_v1  ;;  %v1836_v50 = vcombine.high %v817_v48, %v821_v49  ;;  %v1835_v51 = vcombine.low %v817_v48, %v821_v49  ;;  %v809_v52 = vld [vmem:[%s2440_s9 + $0x100] sm:$0xff]  ;;  %v836_v48 = vld [vmem:[%s2440_s9 + $0x1d8] sm:$0xff] }
  0x1b   : > { %1893 = vmatpush3.bf16.msra.mxu1 %v1954_v7  ;;  %v813_v53 = vld [vmem:[%s2440_s9 + $0x120] sm:$0xff]  ;;  %v826_v7 = vld [vmem:[%s2440_s9 + $0x188] sm:$0xff] }
  0x1c   : > { %1910 = vmatprep.subr.bf16.mxu1 %v1987_v1  ;;  %v1828_v54 = vcombine.high %v809_v52, %v813_v53  ;;  %v1827_v55 = vcombine.low %v809_v52, %v813_v53  ;;  %v801_v56 = vld [vmem:[%s2440_s9 + $0xc0] sm:$0xff] }
  0x1d   : > { %1903 = vmatpush3.bf16.msra.mxu0 %v1957_v20  ;;  %v805_v57 = vld [vmem:[%s2440_s9 + $0xe0] sm:$0xff] }
  0x1e   : > { %1904 = vmatprep.subr.bf16.mxu0 %v1987_v1  ;;  %v1820_v58 = vcombine.high %v801_v56, %v805_v57  ;;  %v1819_v59 = vcombine.low %v801_v56, %v805_v57  ;;  %v793_v60 = vld [vmem:[%s2440_s9 + $0x80] sm:$0xff] }
  0x1f   : > { %v797_v61 = vld [vmem:[%s2440_s9 + $0xa0] sm:$0xff] }
  0x20   : > { %v1812_v62 = vcombine.high %v793_v60, %v797_v61  ;;  %v1811_v63 = vcombine.low %v793_v60, %v797_v61  ;;  %v1783_v0 = vld [vmem:[%s2437_s6] ss:$0 sm:$0xff]  ;;  %v827_v61 = vld [vmem:[%s2440_s9 + $0x190] sm:$0xff] }
  0x21   : > { %1905 = vmatpush3.bf16.msra.mxu0 %v1958_v21  ;;  %v802_v21 = vld [vmem:[%s2440_s9 + $0xc8] sm:$0xff]  ;;  %v777_v38 = vld [vmem:[%s2440_s9] sm:$0xff] }
  0x22   : > { %1203 = vmatprep.subr.bf16.mxu0 %v1852_v40  ;;  %v778_v40 = vld [vmem:[%s2440_s9 + $0x8] sm:$0xff] }
  0xd4   : > { %v508_v10 = vpop.f32.mrf.mxu0 }
  0xd5   : > { %v509_v12 = vadd.f32 %v1774_v9, %v508_v10 }
  0xd6   : > { %v1884_v11 = vpop.f32.mrf.mxu0 }
  0xd7   : > { %v515_v16 = vmax.f32 %v509_v12, 0.0  ;;  %v1846_v12 = vcombine.high %v826_v7, %v830_v8 }
  0xd8   : > { %v511_v13 = vpop.f32.mrf.mxu0 }
  0xd9   : > { %v512_v14 = vadd.f32 %v1774_v9, %v511_v13  ;;  %v818_v13 = vld [vmem:[%s2440_s9 + $0x148] sm:$0xff] }
  0xda   : > { %v1885_v15 = vpop.f32.mrf.mxu0 }
  0xdb   : > { %v516_v17 = vmax.f32 %v512_v14, 0.0  ;;  %v822_v14 = vld [vmem:[%s2440_s9 + $0x168] sm:$0xff]  ;;  %v1845_v15 = vcombine.low %v826_v7, %v830_v8  ;;  %v819_v7 = vld [vmem:[%s2440_s9 + $0x150] sm:$0xff] }
  0xdc   : > { %v1837_v19 = vcombine.low %v818_v13, %v822_v14  ;;  %v823_v8 = vld [vmem:[%s2440_s9 + $0x170] sm:$0xff] }
  0xdd   : > { %v517_v18 = vpack.c.bf16 %v516_v17, %v515_v16  ;;  %v1838_v16 = vcombine.high %v818_v13, %v822_v14  ;;  %v810_v17 = vld [vmem:[%s2440_s9 + $0x108] sm:$0xff]  ;;  %v1840_v13 = vcombine.high %v819_v7, %v823_v8 }
  0xdf   : > { %1895 = vmatmul.mubr.msk.bf16.vlgmr.msra.gmra.mxu1 %vm557_vm3, %v517_v18  ;;  %v814_v18 = vld [vmem:[%s2440_s9 + $0x128] sm:$0xff] }
  0xe0   : > { %1918 = vmatprep.mubr.msk.bf16.mxu1 %vm1988_vm0, %v1987_v1  ;;  %1911 = vmatpush3.bf16.msra.mxu1 %v1959_v22  ;;  %v1830_v20 = vcombine.high %v810_v17, %v814_v18  ;;  %v806_v22 = vld [vmem:[%s2440_s9 + $0xe8] sm:$0xff]  ;;  %vm2388_vm0 = vmor %vm1550_vm13, %vm1547_vm12 }
  0xe1   : > { %1912 = vmatprep.subr.bf16.mxu1 %v1987_v1  ;;  %vm1555_vm4 = vmor %vm2394_vm1, %vm2388_vm0 }
  0xe2   : > { %vm1566_vm13 = vmand %vm1564_vm10, %vm1565_vm11 }
  0xe3   : > { %vm1570_vm1 = vmand %vm1568_vm14, %vm1569_vm15 }
  0xe4   : > { %1913 = vmatpush3.bf16.msra.mxu1 %v1960_v33 }
  0xe5   : > { %1914 = vmatprep.subr.bf16.mxu1 %v1987_v1 }
  0xe8   : > { %1915 = vmatpush3.bf16.msra.mxu1 %v1961_v34  ;;  %v790_v34 = vld [vmem:[%s2440_s9 + $0x68] sm:$0xff] }
  0xe9   : > { %1916 = vmatprep.subr.bf16.mxu1 %v1987_v1 }
  0xec   : > { %1917 = vmatpush3.bf16.msra.mxu1 %v1962_v35 }
  0xed   : > { %1246 = vmatprep.subr.bf16.mxu1 %v1854_v45  ;;  %v1798_v45 = vcombine.high %v778_v40, %v782_v42 }
 0x19f   : > { %v595_v24 = vpop.f32.mrf.mxu1 }
 0x1a0   : > { %v596_v26 = vadd.f32 %v1777_v23, %v595_v24  ;;  %v1822_v24 = vcombine.high %v802_v21, %v806_v22 }
 0x1a1   : > { %v1896_v25 = vpop.f32.mrf.mxu1 }
 0x1a2   : > { %v602_v30 = vmax.f32 %v596_v26, 0.0  ;;  %v794_v25 = vld [vmem:[%s2440_s9 + $0x88] sm:$0xff] }
 0x1a3   : > { %v598_v27 = vpop.f32.mrf.mxu1  ;;  %v798_v26 = vld [vmem:[%s2440_s9 + $0xa8] sm:$0xff] }
 0x1a4   : > { %v599_v28 = vadd.f32 %v1777_v23, %v598_v27  ;;  %v1829_v23 = vcombine.low %v810_v17, %v814_v18  ;;  %v1821_v27 = vcombine.low %v802_v21, %v806_v22  ;;  %v812_v17 = vld [vmem:[%s2440_s9 + $0x118] sm:$0xff] }
 0x1a5   : > { %v1897_v29 = vpop.f32.mrf.mxu1  ;;  %v816_v18 = vld [vmem:[%s2440_s9 + $0x138] sm:$0xff] }
 0x1a6   : > { %v603_v31 = vmax.f32 %v599_v28, 0.0  ;;  %v1814_v28 = vcombine.high %v794_v25, %v798_v26  ;;  %v1813_v29 = vcombine.low %v794_v25, %v798_v26  ;;  %v1834_v22 = vcombine.high %v812_v17, %v816_v18  ;;  %v804_v25 = vld [vmem:[%s2440_s9 + $0xd8] sm:$0xff] }
 0x1a7   : > { %v808_v26 = vld [vmem:[%s2440_s9 + $0xf8] sm:$0xff] }
 0x1a8   : > { %v604_v32 = vpack.c.bf16 %v603_v31, %v602_v30  ;;  %v785_v30 = vld [vmem:[%s2440_s9 + $0x40] sm:$0xff] }
 0x1a9   : > { %v789_v31 = vld [vmem:[%s2440_s9 + $0x60] sm:$0xff] }
 0x1aa   : > { %1907 = vmatmul.mubr.msk.bf16.vlgmr.msra.gmra.mxu0 %vm557_vm3, %v604_v32  ;;  %v786_v32 = vld [vmem:[%s2440_s9 + $0x48] sm:$0xff]  ;;  %v1804_v33 = vcombine.high %v785_v30, %v789_v31  ;;  %v1803_v35 = vcombine.low %v785_v30, %v789_v31  ;;  %v1826_v30 = vcombine.high %v804_v25, %v808_v26  ;;  %v795_v31 = vld [vmem:[%s2440_s9 + $0x90] sm:$0xff] }
 0x1ab   : > { %1204 = vmatpush1.bf16.msra.mxu0 %v1851_v39  ;;  %v1805_v36 = vcombine.low %v786_v32, %v790_v34  ;;  %v1806_v37 = vcombine.high %v786_v32, %v790_v34  ;;  %v781_v39 = vld [vmem:[%s2440_s9 + $0x20] sm:$0xff]  ;;  %v799_v32 = vld [vmem:[%s2440_s9 + $0xb0] sm:$0xff]  ;;  %v800_v34 = vld [vmem:[%s2440_s9 + $0xb8] sm:$0xff] }
 0x1ac   : > { %1205 = vmatprep.subr.bf16.mxu0 %v1844_v46  ;;  %v1796_v41 = vcombine.high %v777_v38, %v781_v39  ;;  %v1795_v43 = vcombine.low %v777_v38, %v781_v39  ;;  %v835_v46 = vld [vmem:[%s2440_s9 + $0x1d0] sm:$0xff] }
 0x1ad   : > { %v787_v39 = vld [vmem:[%s2440_s9 + $0x50] sm:$0xff] }
 0x1af   : > { %1206 = vmatpush1.bf16.msra.mxu0 %v1843_v47  ;;  %v839_v47 = vld [vmem:[%s2440_s9 + $0x1f0] sm:$0xff] }
 0x1b0   : > { %1207 = vmatprep.subr.bf16.mxu0 %v1836_v50  ;;  %v1856_v49 = vcombine.high %v835_v46, %v839_v47  ;;  %v840_v50 = vld [vmem:[%s2440_s9 + $0x1f8] sm:$0xff] }
 0x1b1   : > { %v1857_v52 = vcombine.low %v836_v48, %v840_v50  ;;  %v1858_v53 = vcombine.high %v836_v48, %v840_v50  ;;  %v783_v48 = vld [vmem:[%s2440_s9 + $0x30] sm:$0xff]  ;;  %v784_v50 = vld [vmem:[%s2440_s9 + $0x38] sm:$0xff] }
 0x1b3   : > { %1208 = vmatpush1.bf16.msra.mxu0 %v1835_v51  ;;  %v1855_v51 = vcombine.low %v835_v46, %v839_v47  ;;  %v779_v47 = vld [vmem:[%s2440_s9 + $0x10] sm:$0xff] }
 0x1b4   : > { %1209 = vmatprep.subr.bf16.mxu0 %v1828_v54  ;;  %v1989_v54 = vmov 0  }
 0x1b5   : > { %1235 = vmatprep.mubr.bf16.mxu0 %v1989_v54 }
 0x1b7   : > { %1210 = vmatpush1.bf16.msra.mxu0 %v1827_v55  ;;  %v1789_v55 = vld [vmem:[%s2439_s8] ss:$0 sm:$0xff] }
 0x1b8   : > { %1211 = vmatprep.subr.bf16.mxu0 %v1820_v58 }
 0x1bb   : > { %1212 = vmatpush1.bf16.msra.mxu0 %v1819_v59 }
 0x1bc   : > { %1213 = vmatprep.subr.bf16.mxu0 %v1812_v62 }
 0x1bf   : > { %1214 = vmatpush1.bf16.msra.mxu0 %v1811_v63  ;;  %v831_v63 = vld [vmem:[%s2440_s9 + $0x1b0] sm:$0xff] }
 0x1c0   : > { %1215 = vmatprep.subr.bf16.mxu0 %v1804_v33  ;;  %v796_v33 = vld [vmem:[%s2440_s9 + $0x98] sm:$0xff] }
 0x1c1   : > { %v1818_v38 = vcombine.high %v796_v33, %v800_v34 }
 0x1c3   : > { %1216 = vmatpush1.bf16.msra.mxu0 %v1803_v35 }
 0x1c4   : > { %1217 = vmatprep.subr.bf16.mxu0 %v1796_v41  ;;  %v788_v41 = vld [vmem:[%s2440_s9 + $0x58] sm:$0xff] }
 0x1c7   : > { %1218 = vmatpush1.bf16.msra.mxu0 %v1795_v43  ;;  %v1815_v43 = vcombine.low %v795_v31, %v799_v32 }
 0x1c8   : > { %1289 = vmatprep.subr.bf16.mxu0 %v1856_v49  ;;  %v780_v49 = vld [vmem:[%s2440_s9 + $0x18] sm:$0xff] }
 0x26a   : > { %v681_v1 = vpop.f32.mrf.mxu0 }
 0x26b   : > { %v682_v3 = vadd.f32 %v1783_v0, %v681_v1  ;;  %v832_v1 = vld [vmem:[%s2440_s9 + $0x1b8] sm:$0xff] }
 0x26c   : > { %v1908_v2 = vpop.f32.mrf.mxu0 }
 0x26d   : > { %v688_v9 = vmax.f32 %v682_v3, 0.0 }
 0x26e   : > { %v684_v4 = vpop.f32.mrf.mxu0 }
 0x26f   : > { %v685_v5 = vadd.f32 %v1783_v0, %v684_v4  ;;  %v828_v0 = vld [vmem:[%s2440_s9 + $0x198] sm:$0xff] }
 0x270   : > { %v1909_v6 = vpop.f32.mrf.mxu0 }
 0x271   : > { %v689_v10 = vmax.f32 %v685_v5, 0.0  ;;  %v1848_v5 = vcombine.high %v827_v61, %v831_v63  ;;  %v1850_v6 = vcombine.high %v828_v0, %v832_v1 }
 0x273   : > { %v690_v11 = vpack.c.bf16 %v689_v10, %v688_v9  ;;  %v820_v9 = vld [vmem:[%s2440_s9 + $0x158] sm:$0xff] }
 0x274   : > { %v824_v10 = vld [vmem:[%s2440_s9 + $0x178] sm:$0xff] }
 0x275   : > { %1919 = vmatmul.mubr.msk.bf16.vlgmr.msra.gmra.mxu1 %vm557_vm3, %v690_v11  ;;  %v1847_v11 = vcombine.low %v827_v61, %v831_v63  ;;  %v1842_v14 = vcombine.high %v820_v9, %v824_v10  ;;  %vm1557_vm3 = vsmask.f32 4352 }
 0x276   : > { %1247 = vmatpush1.bf16.msra.mxu1 %v1853_v44  ;;  %v1797_v44 = vcombine.low %v778_v40, %v782_v42  ;;  %1278 = vmatprep.mubr.bf16.mxu1 %v1989_v54  ;;  %v791_v40 = vld [vmem:[%s2440_s9 + $0x70] sm:$0xff]  ;;  %v792_v42 = vld [vmem:[%s2440_s9 + $0x78] sm:$0xff]  ;;  %vm1558_vm5 = vmand %vm1556_vm2, %vm1557_vm3 }
 0x277   : > { %1248 = vmatprep.subr.bf16.mxu1 %v1846_v12  ;;  %v1849_v12 = vcombine.low %v828_v0, %v832_v1  ;;  %v1810_v46 = vcombine.high %v788_v41, %v792_v42  ;;  %vm2405_vm8 = vmor %vm1558_vm5, %vm1555_vm4 }
 0x278   : > { %vm1563_vm12 = vmor %vm2409_vm9, %vm2405_vm8 }
 0x279   : > { %vm1567_vm0 = vmor %vm1566_vm13, %vm1563_vm12 }
 0x27a   : > { %1249 = vmatpush1.bf16.msra.mxu1 %v1845_v15  ;;  %v811_v15 = vld [vmem:[%s2440_s9 + $0x110] sm:$0xff]  ;;  %vm1571_vm2 = vmor %vm1570_vm1, %vm1567_vm0 }
 0x27b   : > { %1250 = vmatprep.subr.bf16.mxu1 %v1838_v16  ;;  %v815_v16 = vld [vmem:[%s2440_s9 + $0x130] sm:$0xff] }
 0x27c   : > { %v1832_v21 = vcombine.high %v811_v15, %v815_v16 }
 0x27e   : > { %1251 = vmatpush1.bf16.msra.mxu1 %v1837_v19  ;;  %v1839_v19 = vcombine.low %v819_v7, %v823_v8 }
 0x27f   : > { %1252 = vmatprep.subr.bf16.mxu1 %v1830_v20  ;;  %v1841_v20 = vcombine.low %v820_v9, %v824_v10 }
 0x282   : > { %1253 = vmatpush1.bf16.msra.mxu1 %v1829_v23  ;;  %v803_v23 = vld [vmem:[%s2440_s9 + $0xd0] sm:$0xff] }
 0x283   : > { %1254 = vmatprep.subr.bf16.mxu1 %v1822_v24  ;;  %v807_v24 = vld [vmem:[%s2440_s9 + $0xf0] sm:$0xff] }
 0x284   : > { %v1823_v35 = vcombine.low %v803_v23, %v807_v24 }
 0x286   : > { %1255 = vmatpush1.bf16.msra.mxu1 %v1821_v27  ;;  %v1831_v27 = vcombine.low %v811_v15, %v815_v16 }
 0x287   : > { %1256 = vmatprep.subr.bf16.mxu1 %v1814_v28  ;;  %v1833_v28 = vcombine.low %v812_v17, %v816_v18 }
 0x28a   : > { %1257 = vmatpush1.bf16.msra.mxu1 %v1813_v29  ;;  %v1824_v29 = vcombine.high %v803_v23, %v807_v24 }
 0x28b   : > { %1258 = vmatprep.subr.bf16.mxu1 %v1806_v37  ;;  %v1816_v37 = vcombine.high %v795_v31, %v799_v32 }
 0x28e   : > { %1259 = vmatpush1.bf16.msra.mxu1 %v1805_v36  ;;  %v1825_v36 = vcombine.low %v804_v25, %v808_v26 }
 0x28f   : > { %1260 = vmatprep.subr.bf16.mxu1 %v1798_v45  ;;  %v1808_v45 = vcombine.high %v787_v39, %v791_v40 }
 0x292   : > { %1261 = vmatpush1.bf16.msra.mxu1 %v1797_v44  ;;  %v1817_v44 = vcombine.low %v796_v33, %v800_v34 }
 0x293   : > { %1332 = vmatprep.subr.bf16.mxu1 %v1858_v53  ;;  %v1800_v53 = vcombine.high %v779_v47, %v783_v48 }
 0x335   : > { %v767_v56 = vpop.f32.mrf.mxu1 }
 0x336   : > { %v768_v58 = vadd.f32 %v1789_v55, %v767_v56  ;;  %v1801_v56 = vcombine.low %v780_v49, %v784_v50 }
 0x337   : > { %v1920_v57 = vpop.f32.mrf.mxu1 }
 0x338   : > { %v774_v2 = vmax.f32 %v768_v58, 0.0  ;;  %v843_v57 = vlaneseq }
 0x339   : > { %v770_v59 = vpop.f32.mrf.mxu1 }
 0x33a   : > { %v771_v60 = vadd.f32 %v1789_v55, %v770_v59  ;;  %v1799_v55 = vcombine.low %v779_v47, %v783_v48  ;;  %v2349_v58 = vshrl.u32 %v843_v57, 7 }
 0x33b   : > { %v1921_v62 = vpop.f32.mrf.mxu1 }
 0x33c   : > { %v775_v3 = vmax.f32 %v771_v60, 0.0  ;;  %v849_v61 = vsub.s32 1, %v2349_v58  ;;  %v857_v63 = vsub.s32 3, %v2349_v58  ;;  %v845_v1 = vsub.s32 0, %v2349_v58 }
 0x33e   : > { %v2271_v4 = vpack.c.bf16 %v775_v3, %v774_v2  ;;  %v853_v2 = vsub.s32 2, %v2349_v58  ;;  %v841_v3 = vld [vmem:[%s2441_s10] sm:$0xff] }
 0x33f   : > { %v858_v7 = vrot.slane %v841_v3, %v857_v63  ;;  %v846_v10 = vrot.slane %v841_v3, %v845_v1 }
 0x340   : > { %1236 = vmatmul.mubr.bf16.vlgmr.msra.gmra.mxu0 %v2271_v4  ;;  %1279 = vmatmul.mubr.bf16.vlgmr.msra.gmra.mxu1 %v2271_v4 }
 0x341   : > { %1290 = vmatpush1.bf16.msra.mxu0 %v1855_v51  ;;  %1333 = vmatpush1.bf16.msra.mxu1 %v1857_v52  ;;  %v1807_v51 = vcombine.low %v787_v39, %v791_v40  ;;  %v1809_v52 = vcombine.low %v788_v41, %v792_v42 }
 0x342   : > { %1291 = vmatprep.subr.bf16.mxu0 %v1848_v5  ;;  %1334 = vmatprep.subr.bf16.mxu1 %v1850_v6  ;;  %v850_v6 = vrot.slane %v841_v3, %v849_v61 }
 0x343   : > { %1321 = vmatprep.mubr.bf16.mxu0 %v1989_v54  ;;  %1364 = vmatprep.mubr.bf16.mxu1 %v1989_v54  ;;  %v1802_v54 = vcombine.high %v780_v49, %v784_v50 }
 0x345   : > { %1292 = vmatpush1.bf16.msra.mxu0 %v1847_v11  ;;  %1335 = vmatpush1.bf16.msra.mxu1 %v1849_v12  ;;  %v854_v11 = vrot.slane %v841_v3, %v853_v2 }
 0x346   : > { %1293 = vmatprep.subr.bf16.mxu0 %v1840_v13  ;;  %1336 = vmatprep.subr.bf16.mxu1 %v1842_v14 }
 0x349   : > { %1294 = vmatpush1.bf16.msra.mxu0 %v1839_v19  ;;  %1337 = vmatpush1.bf16.msra.mxu1 %v1841_v20 }
 0x34a   : > { %1295 = vmatprep.subr.bf16.mxu0 %v1832_v21  ;;  %1338 = vmatprep.subr.bf16.mxu1 %v1834_v22 }
 0x34d   : > { %1296 = vmatpush1.bf16.msra.mxu0 %v1831_v27  ;;  %1339 = vmatpush1.bf16.msra.mxu1 %v1833_v28 }
 0x34e   : > { %1297 = vmatprep.subr.bf16.mxu0 %v1824_v29  ;;  %1340 = vmatprep.subr.bf16.mxu1 %v1826_v30 }
 0x351   : > { %1298 = vmatpush1.bf16.msra.mxu0 %v1823_v35  ;;  %1341 = vmatpush1.bf16.msra.mxu1 %v1825_v36 }
 0x352   : > { %1299 = vmatprep.subr.bf16.mxu0 %v1816_v37  ;;  %1342 = vmatprep.subr.bf16.mxu1 %v1818_v38 }
 0x355   : > { %1300 = vmatpush1.bf16.msra.mxu0 %v1815_v43  ;;  %1343 = vmatpush1.bf16.msra.mxu1 %v1817_v44  ;;  %v861_v44 = vsub.s32 4, %v2349_v58 }
 0x356   : > { %1301 = vmatprep.subr.bf16.mxu0 %v1808_v45  ;;  %1344 = vmatprep.subr.bf16.mxu1 %v1810_v46  ;;  %v869_v45 = vsub.s32 6, %v2349_v58 }
 0x357   : > { %v862_v50 = vrot.slane %v841_v3, %v861_v44 }
 0x359   : > { %1302 = vmatpush1.bf16.msra.mxu0 %v1807_v51  ;;  %1345 = vmatpush1.bf16.msra.mxu1 %v1809_v52  ;;  %v870_v51 = vrot.slane %v841_v3, %v869_v45  ;;  %v865_v52 = vsub.s32 5, %v2349_v58 }
 0x35a   : > { %1303 = vmatprep.subr.bf16.mxu0 %v1800_v53  ;;  %1346 = vmatprep.subr.bf16.mxu1 %v1802_v54  ;;  %v873_v53 = vsub.s32 7, %v2349_v58 }
 0x35b   : > { %v866_v63 = vrot.slane %v841_v3, %v865_v52 }
 0x35c   : > { %v874_v1 = vrot.slane %v841_v3, %v873_v53 }
 0x35d   : > { %1304 = vmatpush1.bf16.msra.mxu0 %v1799_v55  ;;  %1347 = vmatpush1.bf16.msra.mxu1 %v1801_v56 }
 0x360   : > { %1322 = vmatmul.mubr.bf16.vlgmr.msra.gmra.mxu0 %v2271_v4  ;;  %1365 = vmatmul.mubr.bf16.vlgmr.msra.gmra.mxu1 %v2271_v4 }
 0x400   : > { %v1237_v59 = vpop.f32.mrf.mxu0  ;;  %v1280_v60 = vpop.f32.mrf.mxu1 }
 0x401   : > { %v1238_v18 = vadd.f32 %v1237_v59, %v846_v10  ;;  %v1281_v19 = vadd.f32 %v1280_v60, %v854_v11 }
 0x402   : > { %v1239_v62 = vpop.f32.mrf.mxu0  ;;  %v1282_v0 = vpop.f32.mrf.mxu1 }
 0x403   : > { %v1240_v16 = vadd.f32 %v1239_v62, %v850_v6  ;;  %v1283_v17 = vadd.f32 %v1282_v0, %v858_v7  ;;  %v1375_v26 = vmax.f32 %v1238_v18, 0.0  ;;  %v1377_v27 = vmax.f32 %v1281_v19, 0.0 }
 0x404   : > { %v1241_v4 = vpop.f32.mrf.mxu0  ;;  %v1284_v5 = vpop.f32.mrf.mxu1 }
 0x405   : > { %v1242_v14 = vadd.f32 %v1241_v4, %v846_v10  ;;  %v1285_v15 = vadd.f32 %v1284_v5, %v854_v11  ;;  %v1376_v24 = vmax.f32 %v1240_v16, 0.0  ;;  %v1378_v25 = vmax.f32 %v1283_v17, 0.0 }
 0x406   : > { %v1243_v8 = vpop.f32.mrf.mxu0  ;;  %v1286_v9 = vpop.f32.mrf.mxu1  ;;  %v1990_v4 = vmov 1966171168  }
 0x407   : > { %v1244_v12 = vadd.f32 %v1243_v8, %v850_v6  ;;  %v1287_v13 = vadd.f32 %v1286_v9, %v858_v7  ;;  %v1383_v22 = vmax.f32 %v1242_v14, 0.0  ;;  %v1385_v23 = vmax.f32 %v1285_v15, 0.0 }
 0x408   : > { %v2362_v5 = vunpack.c.l.s4 %v1990_v4 }
 0x409   : > { %v1384_v20 = vmax.f32 %v1244_v12, 0.0  ;;  %v1386_v21 = vmax.f32 %v1287_v13, 0.0  ;;  %v1391_v30 = vpack.c.bf16 %v1383_v22, %v1375_v26  ;;  %v1393_v31 = vpack.c.bf16 %v1385_v23, %v1377_v27 }
 0x40b   : > { %v1392_v28 = vpack.c.bf16 %v1384_v20, %v1376_v24  ;;  %v1394_v29 = vpack.c.bf16 %v1386_v21, %v1378_v25  ;;  %v1399_v36 = vunpack.i.l.bf16 %v1391_v30  ;;  %v1400_v37 = vunpack.i.h.bf16 %v1391_v30 }
 0x40c   : > { %v1419_v38 = vunpack.i.l.bf16 %v1393_v31  ;;  %v1420_v39 = vunpack.i.h.bf16 %v1393_v31 }
 0x40d   : > { %v1409_v32 = vunpack.i.l.bf16 %v1392_v28  ;;  %v1410_v33 = vunpack.i.h.bf16 %v1392_v28  ;;  %v1429_v34 = vunpack.i.l.bf16 %v1394_v29  ;;  %v1430_v35 = vunpack.i.h.bf16 %v1394_v29 }
 0x40e   : > { %v1401_v42 = vmax.f32 %v1399_v36, %v1400_v37  ;;  %v1421_v43 = vmax.f32 %v1419_v38, %v1420_v39 }
 0x40f   : > { %v1411_v40 = vmax.f32 %v1409_v32, %v1410_v33  ;;  %v1431_v41 = vmax.f32 %v1429_v34, %v1430_v35 }
 0x410   : > { %v1402_v48 = vrot.slane %v1401_v42, 4  ;;  %v1422_v49 = vrot.slane %v1421_v43, 4 }
 0x411   : > { %v1412_v46 = vrot.slane %v1411_v40, 4  ;;  %v1432_v47 = vrot.slane %v1431_v41, 4 }
 0x412   : > { %v1403_v59 = vmax.f32 %v1401_v42, %v1402_v48  ;;  %v1423_v60 = vmax.f32 %v1421_v43, %v1422_v49 }
 0x413   : > { %v1413_v54 = vmax.f32 %v1411_v40, %v1412_v46  ;;  %v1433_v55 = vmax.f32 %v1431_v41, %v1432_v47 }
 0x414   : > { %v1404_v10 = vrot.slane %v1403_v59, 2  ;;  %v1424_v11 = vrot.slane %v1423_v60, 2 }
 0x415   : > { %v1414_v6 = vrot.slane %v1413_v54, 2  ;;  %v1434_v7 = vrot.slane %v1433_v55, 2 }
 0x416   : > { %v1405_v29 = vmax.f32 %v1403_v59, %v1404_v10  ;;  %v1425_v30 = vmax.f32 %v1423_v60, %v1424_v11  ;;  %v1497_v60 = vunpack.c.0.s8 %v2362_v5 }
 0x417   : > { %v1415_v23 = vmax.f32 %v1413_v54, %v1414_v6  ;;  %v1435_v24 = vmax.f32 %v1433_v55, %v1434_v7 }
 0x418   : > { %v1406_v49 = vrot.slane %v1405_v29, 1 }
 0x419   : > { %v1416_v41 = vrot.slane %v1415_v23, 1  ;;  %v1436_v42 = vrot.slane %v1435_v24, 1 }
 0x41b   : > { %v1417_v55 = vmax.f32 %v1415_v23, %v1416_v41 }
 0x420   : > { %v1323_v56 = vpop.f32.mrf.mxu0  ;;  %v1366_v57 = vpop.f32.mrf.mxu1 }
 0x421   : > { %v1324_v61 = vadd.f32 %v1323_v56, %v862_v50  ;;  %v1367_v62 = vadd.f32 %v1366_v57, %v870_v51  ;;  %v1437_v56 = vmax.f32 %v1435_v24, %v1436_v42 }
 0x422   : > { %v1325_v0 = vpop.f32.mrf.mxu0  ;;  %v1368_v2 = vpop.f32.mrf.mxu1 }
 0x423   : > { %v1379_v14 = vmax.f32 %v1324_v61, 0.0  ;;  %v1381_v15 = vmax.f32 %v1367_v62, 0.0  ;;  %v1326_v16 = vadd.f32 %v1325_v0, %v866_v63  ;;  %v1369_v17 = vadd.f32 %v1368_v2, %v874_v1 }
 0x424   : > { %v1327_v8 = vpop.f32.mrf.mxu0  ;;  %v1370_v9 = vpop.f32.mrf.mxu1 }
 0x425   : > { %v1328_v12 = vadd.f32 %v1327_v8, %v862_v50  ;;  %v1371_v13 = vadd.f32 %v1370_v9, %v870_v51  ;;  %v1380_v31 = vmax.f32 %v1326_v16, 0.0  ;;  %v1382_v32 = vmax.f32 %v1369_v17, 0.0 }
 0x426   : > { %v1329_v18 = vpop.f32.mrf.mxu0  ;;  %v1372_v3 = vpop.f32.mrf.mxu1  ;;  %v1426_v50 = vrot.slane %v1425_v30, 1  ;;  %v1418_v8 = vpack.i.bf16 %v1417_v55, %v1417_v55  ;;  %v1438_v9 = vpack.i.bf16 %v1437_v56, %v1437_v56 }
 0x427   : > { %v1387_v19 = vmax.f32 %v1328_v12, 0.0  ;;  %v1389_v20 = vmax.f32 %v1371_v13, 0.0  ;;  %v1330_v21 = vadd.f32 %v1329_v18, %v866_v63  ;;  %v1373_v22 = vadd.f32 %v1372_v3, %v874_v1 }
 0x428   : > { %v1407_v63 = vmax.f32 %v1405_v29, %v1406_v49  ;;  %v1427_v0 = vmax.f32 %v1425_v30, %v1426_v50  ;;  %v1500_v18 = vsub.s32 %v1497_v60, %v2349_v58 }
 0x429   : > { %v1395_v25 = vpack.c.bf16 %v1387_v19, %v1379_v14  ;;  %v1397_v26 = vpack.c.bf16 %v1389_v20, %v1381_v15  ;;  %v1388_v27 = vmax.f32 %v1330_v21, 0.0  ;;  %v1390_v28 = vmax.f32 %v1373_v22, 0.0 }
 0x42a   : > { %v1408_v14 = vpack.i.bf16 %v1407_v63, %v1407_v63  ;;  %v1428_v15 = vpack.i.bf16 %v1427_v0, %v1427_v0 }
 0x42b   : > { %v1439_v33 = vunpack.i.l.bf16 %v1395_v25  ;;  %v1440_v34 = vunpack.i.h.bf16 %v1395_v25  ;;  %v1459_v35 = vunpack.i.l.bf16 %v1397_v26  ;;  %v1460_v36 = vunpack.i.h.bf16 %v1397_v26 }
 0x42c   : > { %v1396_v38 = vpack.c.bf16 %v1388_v27, %v1380_v31  ;;  %v1398_v39 = vpack.c.bf16 %v1390_v28, %v1382_v32  ;;  %v1491_v20 = vcombine.low %v1408_v14, %v1418_v8  ;;  %v1492_v21 = vcombine.low %v1428_v15, %v1438_v9 }
 0x42d   : > { %v1441_v43 = vmax.f32 %v1439_v33, %v1440_v34  ;;  %v1461_v44 = vmax.f32 %v1459_v35, %v1460_v36 }
 0x42e   : > { %v1449_v45 = vunpack.i.l.bf16 %v1396_v38  ;;  %v1450_v46 = vunpack.i.h.bf16 %v1396_v38  ;;  %v1469_v47 = vunpack.i.l.bf16 %v1398_v39  ;;  %v1470_v48 = vunpack.i.h.bf16 %v1398_v39 }
 0x42f   : > { %v1442_v51 = vrot.slane %v1441_v43, 4  ;;  %v1462_v52 = vrot.slane %v1461_v44, 4  ;;  %v1501_v29 = vrot.slane %v1491_v20, %v1500_v18  ;;  %v1508_v30 = vrot.slane %v1492_v21, %v1500_v18 }
 0x430   : > { %v1451_v53 = vmax.f32 %v1449_v45, %v1450_v46  ;;  %v1471_v54 = vmax.f32 %v1469_v47, %v1470_v48 }
 0x431   : > { %v1443_v57 = vmax.f32 %v1441_v43, %v1442_v51  ;;  %v1463_v59 = vmax.f32 %v1461_v44, %v1462_v52  ;;  %v1523_v37 = vcombine.low %v1501_v29, %v1508_v30  ;;  %v1572_v43 = vld [vmem:[%s449_s16] sm:$0xff] }
 0x432   : > { %v1452_v61 = vrot.slane %v1451_v53, 4  ;;  %v1472_v62 = vrot.slane %v1471_v54, 4 }
 0x433   : > { %v1444_v1 = vrot.slane %v1443_v57, 2  ;;  %v1464_v2 = vrot.slane %v1463_v59, 2  ;;  %v1531_v41 = vrot.slane %v1523_v37, %v1500_v18 }
 0x434   : > { %v1453_v6 = vmax.f32 %v1451_v53, %v1452_v61  ;;  %v1473_v7 = vmax.f32 %v1471_v54, %v1472_v62 }
 0x435   : > { %v1445_v10 = vmax.f32 %v1443_v57, %v1444_v1  ;;  %v1465_v11 = vmax.f32 %v1463_v59, %v1464_v2 }
 0x436   : > { %v1454_v12 = vrot.slane %v1453_v6, 2  ;;  %v1474_v13 = vrot.slane %v1473_v7, 2 }
 0x437   : > { %v1446_v16 = vrot.slane %v1445_v10, 1  ;;  %v1466_v17 = vrot.slane %v1465_v11, 1 }
 0x438   : > { %v1455_v3 = vmax.f32 %v1453_v6, %v1454_v12  ;;  %v1475_v19 = vmax.f32 %v1473_v7, %v1474_v13 }
 0x439   : > { %v1447_v22 = vmax.f32 %v1445_v10, %v1446_v16  ;;  %v1467_v23 = vmax.f32 %v1465_v11, %v1466_v17 }
 0x43a   : > { %v1456_v24 = vrot.slane %v1455_v3, 1  ;;  %v1476_v25 = vrot.slane %v1475_v19, 1 }
 0x43b   : > { %v1448_v31 = vpack.i.bf16 %v1447_v22, %v1447_v22  ;;  %v1468_v32 = vpack.i.bf16 %v1467_v23, %v1467_v23 }
 0x43c   : > { %v1457_v27 = vmax.f32 %v1455_v3, %v1456_v24  ;;  %v1477_v28 = vmax.f32 %v1475_v19, %v1476_v25 }
 0x43e   : > { %v1458_v33 = vpack.i.bf16 %v1457_v27, %v1457_v27  ;;  %v1478_v34 = vpack.i.bf16 %v1477_v28, %v1477_v28 }
 0x440   : > { %v1493_v35 = vcombine.low %v1448_v31, %v1458_v33  ;;  %v1494_v36 = vcombine.low %v1468_v32, %v1478_v34 }
 0x442   : > { %v1515_v38 = vrot.slane %v1493_v35, %v1500_v18  ;;  %v1522_v39 = vrot.slane %v1494_v36, %v1500_v18 }
 0x444   : > { %v1524_v40 = vcombine.low %v1515_v38, %v1522_v39 }
 0x446   : > { %v1538_v42 = vrot.slane %v1524_v40, %v1500_v18 }
 0x448   : > { %v1539_v44 = vcombine.low %v1531_v41, %v1538_v42 }
 0x44a   : > { %v1573_v45 = vsel %vm1571_vm2, %v1539_v44, %v1572_v43 }
 0x44b   : > { %1574 = vst [vmem:[%s449_s16] sm:$0xff] %v1573_v45 }
 0x44c PF: > { %s21_s19 = sadd.s32 1, %s1985_s19   ;;  %s2455_s17 = smov %s1981_s18 }
 0x44d   : > { %p18_p5 = scmp.ge.s32.totalorder %s21_s19, 4   ;;  %s2456_s18 = smov %s2458_s20 }
 0x44f   :  { %20 = sbr.rel (!%p18_p5) target bundleno = 2 (0x2), region = 108 }

// kernel: cls_model_forward.11
= control target key start
LH: loop header
LB: loop body
LE: loop exit
PB: predicated region body
PF: predicated region fallthrough
CT: control target
= control target key end

     0   :  { %v287_v36 = vlaneseq  ;;  %v3533_v37 = vmov 1966171168   ;;  %s4671_s0 = inlined_call_operand.vmem [shape: bf16[2,1024], index: 0, kind: input, shape index: {}]   ;;  %s4672_s1 = inlined_call_operand.vmem [shape: bf16[1024,512], index: 1, kind: input, shape index: {}]   ;;  %s4673_s2 = inlined_call_operand.vmem [shape: f32[1,512], index: 2, kind: input, shape index: {}]   ;;  %s4674_s3 = inlined_call_operand.vmem [shape: bf16[512,256], index: 3, kind: input, shape index: {}]   ;;  %s4675_s4 = inlined_call_operand.vmem [shape: f32[1,256], index: 4, kind: input, shape index: {}]   ;;  %s4676_s5 = inlined_call_operand.vmem [shape: bf16[256,128], index: 5, kind: input, shape index: {}]   ;;  %s4677_s6 = inlined_call_operand.vmem [shape: f32[1,128], index: 6, kind: input, shape index: {}]   ;;  %s4678_s7 = inlined_call_operand.hbm [shape: f32[2,128], index: 7, kind: output, shape index: {}]  }
   0x1   :  { %v3014_v0 = vld [vmem:[%s4672_s1 + $0xe4] ss:$16 sps:$4 sm:$0xff]   ;;  %v3018_v2 = vld [vmem:[%s4672_s1 + $0xe0] ss:$16 sps:$4 sm:$0xff]   ;;  %v310_v38 = vunpack.c.l.s4 %v3533_v37 }
   0x2   :  { %v3016_v1 = vld [vmem:[%s4672_s1 + $0x2e4] ss:$16 sps:$4 sm:$0xff]   ;;  %1645 = vmatprep.subr.bf16.mxu0 %v3014_v0  ;;  %v3019_v3 = vld [vmem:[%s4672_s1 + $0x2e0] ss:$16 sps:$4 sm:$0xff]   ;;  %v3692_v42 = vshrl.u32 %v287_v36, 7 }
   0x3   :  { %1686 = vmatprep.subr.bf16.mxu1 %v3016_v1  ;;  %v3020_v4 = vld [vmem:[%s4672_s1 + $0xc4] ss:$16 sps:$4 sm:$0xff]   ;;  %1646 = vmatpush1.bf16.msra.mxu0 %v3018_v2  ;;  %v3024_v6 = vld [vmem:[%s4672_s1 + $0xc0] ss:$16 sps:$4 sm:$0xff]   ;;  %v311_v43 = vunpack.c.0.s8 %v310_v38 }
   0x4   :  { %1687 = vmatpush1.bf16.msra.mxu1 %v3019_v3  ;;  %v3022_v5 = vld [vmem:[%s4672_s1 + $0x2c4] ss:$16 sps:$4 sm:$0xff]   ;;  %1647 = vmatprep.subr.bf16.mxu0 %v3020_v4  ;;  %v3025_v7 = vld [vmem:[%s4672_s1 + $0x2c0] ss:$16 sps:$4 sm:$0xff]  }
   0x5   :  { %1688 = vmatprep.subr.bf16.mxu1 %v3022_v5  ;;  %v3026_v8 = vld [vmem:[%s4672_s1 + $0xa4] ss:$16 sps:$4 sm:$0xff]   ;;  %v3030_v10 = vld [vmem:[%s4672_s1 + $0xa0] ss:$16 sps:$4 sm:$0xff]   ;;  %v314_v49 = vsub.s32 %v311_v43, %v3692_v42 }
   0x6   :  { %v3028_v9 = vld [vmem:[%s4672_s1 + $0x2a4] ss:$16 sps:$4 sm:$0xff]   ;;  %v3031_v11 = vld [vmem:[%s4672_s1 + $0x2a0] ss:$16 sps:$4 sm:$0xff]  }
   0x7   :  { %1648 = vmatpush1.bf16.msra.mxu0 %v3024_v6  ;;  %v3032_v12 = vld [vmem:[%s4672_s1 + $0x84] ss:$16 sps:$4 sm:$0xff]   ;;  %v3036_v14 = vld [vmem:[%s4672_s1 + $0x80] ss:$16 sps:$4 sm:$0xff]  }
   0x8   :  { %1689 = vmatpush1.bf16.msra.mxu1 %v3025_v7  ;;  %1649 = vmatprep.subr.bf16.mxu0 %v3026_v8  ;;  %v3034_v13 = vld [vmem:[%s4672_s1 + $0x284] ss:$16 sps:$4 sm:$0xff]   ;;  %v3037_v15 = vld [vmem:[%s4672_s1 + $0x280] ss:$16 sps:$4 sm:$0xff]  }
   0x9   :  { %1690 = vmatprep.subr.bf16.mxu1 %v3028_v9  ;;  %v3038_v16 = vld [vmem:[%s4672_s1 + $0x64] ss:$16 sps:$4 sm:$0xff]   ;;  %v3042_v18 = vld [vmem:[%s4672_s1 + $0x60] ss:$16 sps:$4 sm:$0xff]  }
   0xa   :  { %v3040_v17 = vld [vmem:[%s4672_s1 + $0x264] ss:$16 sps:$4 sm:$0xff]   ;;  %v3043_v19 = vld [vmem:[%s4672_s1 + $0x260] ss:$16 sps:$4 sm:$0xff]  }
   0xb   :  { %1650 = vmatpush1.bf16.msra.mxu0 %v3030_v10  ;;  %v3044_v20 = vld [vmem:[%s4672_s1 + $0x44] ss:$16 sps:$4 sm:$0xff]   ;;  %v3048_v22 = vld [vmem:[%s4672_s1 + $0x40] ss:$16 sps:$4 sm:$0xff]  }
   0xc   :  { %1691 = vmatpush1.bf16.msra.mxu1 %v3031_v11  ;;  %1651 = vmatprep.subr.bf16.mxu0 %v3032_v12  ;;  %v3046_v21 = vld [vmem:[%s4672_s1 + $0x244] ss:$16 sps:$4 sm:$0xff]   ;;  %v3049_v23 = vld [vmem:[%s4672_s1 + $0x240] ss:$16 sps:$4 sm:$0xff]  }
   0xd   :  { %1692 = vmatprep.subr.bf16.mxu1 %v3034_v13  ;;  %v3050_v24 = vld [vmem:[%s4672_s1 + $0x24] ss:$16 sps:$4 sm:$0xff]   ;;  %v3054_v26 = vld [vmem:[%s4672_s1 + $0x20] ss:$16 sps:$4 sm:$0xff]  }
   0xe   :  { %v3052_v25 = vld [vmem:[%s4672_s1 + $0x224] ss:$16 sps:$4 sm:$0xff]   ;;  %v3055_v27 = vld [vmem:[%s4672_s1 + $0x220] ss:$16 sps:$4 sm:$0xff]  }
   0xf   :  { %1652 = vmatpush1.bf16.msra.mxu0 %v3036_v14  ;;  %v3056_v28 = vld [vmem:[%s4672_s1 + $0x4] ss:$16 sps:$4 sm:$0xff]   ;;  %v3060_v30 = vld [vmem:[%s4672_s1] ss:$16 sps:$4 sm:$0xff]  }
  0x10   :  { %1693 = vmatpush1.bf16.msra.mxu1 %v3037_v15  ;;  %1653 = vmatprep.subr.bf16.mxu0 %v3038_v16  ;;  %v3058_v29 = vld [vmem:[%s4672_s1 + $0x204] ss:$16 sps:$4 sm:$0xff]   ;;  %v3061_v31 = vld [vmem:[%s4672_s1 + $0x200] ss:$16 sps:$4 sm:$0xff]  }
  0x11   :  { %1694 = vmatprep.subr.bf16.mxu1 %v3040_v17  ;;  %v3062_v32 = vld [vmem:[%s4672_s1 + $0x1e4] ss:$16 sps:$4 sm:$0xff]   ;;  %v3066_v34 = vld [vmem:[%s4672_s1 + $0x1e0] ss:$16 sps:$4 sm:$0xff]  }
  0x12   :  { %v3064_v33 = vld [vmem:[%s4672_s1 + $0x3e4] ss:$16 sps:$4 sm:$0xff]   ;;  %v3067_v35 = vld [vmem:[%s4672_s1 + $0x3e0] ss:$16 sps:$4 sm:$0xff]  }
  0x13   :  { %1654 = vmatpush1.bf16.msra.mxu0 %v3042_v18  ;;  %v3068_v39 = vld [vmem:[%s4672_s1 + $0x1c4] ss:$16 sps:$4 sm:$0xff]   ;;  %v3072_v41 = vld [vmem:[%s4672_s1 + $0x1c0] ss:$16 sps:$4 sm:$0xff]  }
  0x14   :  { %1695 = vmatpush1.bf16.msra.mxu1 %v3043_v19  ;;  %1655 = vmatprep.subr.bf16.mxu0 %v3044_v20  ;;  %v3070_v40 = vld [vmem:[%s4672_s1 + $0x3c4] ss:$16 sps:$4 sm:$0xff]   ;;  %v3073_v44 = vld [vmem:[%s4672_s1 + $0x3c0] ss:$16 sps:$4 sm:$0xff]  }
  0x15   :  { %1696 = vmatprep.subr.bf16.mxu1 %v3046_v21  ;;  %v3074_v45 = vld [vmem:[%s4672_s1 + $0x1a4] ss:$16 sps:$4 sm:$0xff]   ;;  %v3078_v47 = vld [vmem:[%s4672_s1 + $0x1a0] ss:$16 sps:$4 sm:$0xff]  }
  0x16   :  { %v3076_v46 = vld [vmem:[%s4672_s1 + $0x3a4] ss:$16 sps:$4 sm:$0xff]   ;;  %v3079_v48 = vld [vmem:[%s4672_s1 + $0x3a0] ss:$16 sps:$4 sm:$0xff]  }
  0x17   :  { %1656 = vmatpush1.bf16.msra.mxu0 %v3048_v22  ;;  %v3080_v50 = vld [vmem:[%s4672_s1 + $0x184] ss:$16 sps:$4 sm:$0xff]   ;;  %v3084_v53 = vld [vmem:[%s4672_s1 + $0x180] ss:$16 sps:$4 sm:$0xff]  }
  0x18   :  { %1697 = vmatpush1.bf16.msra.mxu1 %v3049_v23  ;;  %1657 = vmatprep.subr.bf16.mxu0 %v3050_v24  ;;  %v3082_v51 = vld [vmem:[%s4672_s1 + $0x384] ss:$16 sps:$4 sm:$0xff]   ;;  %v3085_v56 = vld [vmem:[%s4672_s1 + $0x380] ss:$16 sps:$4 sm:$0xff]  }
  0x19   :  { %1698 = vmatprep.subr.bf16.mxu1 %v3052_v25  ;;  %v28_v52 = vld [vmem:[%s4671_s0] sm:$0xff] }
  0x1a   :  { %v315_v54 = vrot.slane %v28_v52, %v314_v49  ;;  %v308_v55 = vcombine.high %v28_v52, %v28_v52  ;;  %v3086_v57 = vld [vmem:[%s4672_s1 + $0x164] ss:$16 sps:$4 sm:$0xff]   ;;  %v3090_v61 = vld [vmem:[%s4672_s1 + $0x160] ss:$16 sps:$4 sm:$0xff]  }
  0x1b   :  { %1658 = vmatpush1.bf16.msra.mxu0 %v3054_v26  ;;  %v3088_v58 = vld [vmem:[%s4672_s1 + $0x364] ss:$16 sps:$4 sm:$0xff]   ;;  %v3091_v0 = vld [vmem:[%s4672_s1 + $0x360] ss:$16 sps:$4 sm:$0xff]  }
  0x1c   :  { %1699 = vmatpush1.bf16.msra.mxu1 %v3055_v27  ;;  %1659 = vmatprep.subr.bf16.mxu0 %v3056_v28  ;;  %v323_v59 = vcombine.high %v315_v54, %v315_v54  ;;  %v322_v60 = vrot.slane %v308_v55, %v314_v49  ;;  %v3092_v1 = vld [vmem:[%s4672_s1 + $0x144] ss:$16 sps:$4 sm:$0xff]   ;;  %v3096_v4 = vld [vmem:[%s4672_s1 + $0x140] ss:$16 sps:$4 sm:$0xff]   ;;  %v3780_v14 = vrot.slane %v315_v54, %v314_v49 }
  0x1d   :  { %1700 = vmatprep.subr.bf16.mxu1 %v3058_v29  ;;  %v3094_v2 = vld [vmem:[%s4672_s1 + $0x344] ss:$16 sps:$4 sm:$0xff]   ;;  %v3097_v5 = vld [vmem:[%s4672_s1 + $0x340] ss:$16 sps:$4 sm:$0xff]  }
  0x1e   :  { %v3734_v62 = vrot.slane %v323_v59, %v314_v49  ;;  %v3736_v63 = vrot.slane %v322_v60, %v314_v49  ;;  %v3098_v6 = vld [vmem:[%s4672_s1 + $0x124] ss:$16 sps:$4 sm:$0xff]   ;;  %v3102_v8 = vld [vmem:[%s4672_s1 + $0x120] ss:$16 sps:$4 sm:$0xff]   ;;  %v324_v12 = vcombine.high %v322_v60, %v322_v60  ;;  %v3795_v19 = vcombine.high %v3780_v14, %v3780_v14 }
  0x1f   :  { %1660 = vmatpush1.bf16.msra.mxu0 %v3060_v30  ;;  %v3100_v7 = vld [vmem:[%s4672_s1 + $0x324] ss:$16 sps:$4 sm:$0xff]   ;;  %v3103_v9 = vld [vmem:[%s4672_s1 + $0x320] ss:$16 sps:$4 sm:$0xff]  }
  0x20   :  { %1701 = vmatpush1.bf16.msra.mxu1 %v3061_v31  ;;  %1661 = vmatprep.subr.bf16.mxu0 %v3062_v32  ;;  %v3749_v3 = vcombine.high %v3734_v62, %v3734_v62  ;;  %v3104_v10 = vld [vmem:[%s4672_s1 + $0x104] ss:$16 sps:$4 sm:$0xff]   ;;  %v3108_v13 = vld [vmem:[%s4672_s1 + $0x100] ss:$16 sps:$4 sm:$0xff]   ;;  %v3791_v18 = vrot.slane %v324_v12, %v314_v49 }
  0x21   :  { %1702 = vmatprep.subr.bf16.mxu1 %v3064_v33  ;;  %1677 = vmatprep.mubr.bf16.mxu0 %v3734_v62  ;;  %v3106_v11 = vld [vmem:[%s4672_s1 + $0x304] ss:$16 sps:$4 sm:$0xff]   ;;  %v3109_v15 = vld [vmem:[%s4672_s1 + $0x300] ss:$16 sps:$4 sm:$0xff]  }
  0x22   :  { %1718 = vmatprep.mubr.bf16.mxu1 %v3749_v3  ;;  %v3112_v16 = vld [vmem:[%s4672_s1 + $0x4e4] ss:$16 sps:$4 sm:$0xff]   ;;  %v3110_v20 = vld [vmem:[%s4672_s1 + $0x4e0] ss:$16 sps:$4 sm:$0xff]   ;;  %v3811_v24 = vcombine.high %v3791_v18, %v3791_v18 }
  0x23   :  { %1662 = vmatpush2.bf16.msra.mxu0 %v3066_v34  ;;  %v3115_v17 = vld [vmem:[%s4672_s1 + $0x6e4] ss:$16 sps:$4 sm:$0xff]   ;;  %v3113_v21 = vld [vmem:[%s4672_s1 + $0x6e0] ss:$16 sps:$4 sm:$0xff]  }
  0x24   :  { %1703 = vmatpush2.bf16.msra.mxu1 %v3067_v35  ;;  %1663 = vmatprep.subr.bf16.mxu0 %v3068_v39  ;;  %v3118_v22 = vld [vmem:[%s4672_s1 + $0x4c4] ss:$16 sps:$4 sm:$0xff]   ;;  %v3116_v25 = vld [vmem:[%s4672_s1 + $0x4c0] ss:$16 sps:$4 sm:$0xff]  }
  0x25   :  { %1704 = vmatprep.subr.bf16.mxu1 %v3070_v40  ;;  %v3121_v23 = vld [vmem:[%s4672_s1 + $0x6c4] ss:$16 sps:$4 sm:$0xff]   ;;  %v3119_v26 = vld [vmem:[%s4672_s1 + $0x6c0] ss:$16 sps:$4 sm:$0xff]  }
  0x26   :  { %v3124_v27 = vld [vmem:[%s4672_s1 + $0x4a4] ss:$16 sps:$4 sm:$0xff]   ;;  %v3122_v29 = vld [vmem:[%s4672_s1 + $0x4a0] ss:$16 sps:$4 sm:$0xff]  }
  0x27   :  { %1664 = vmatpush2.bf16.msra.mxu0 %v3072_v41  ;;  %v3127_v28 = vld [vmem:[%s4672_s1 + $0x6a4] ss:$16 sps:$4 sm:$0xff]   ;;  %v3125_v30 = vld [vmem:[%s4672_s1 + $0x6a0] ss:$16 sps:$4 sm:$0xff]  }
  0x28   :  { %1705 = vmatpush2.bf16.msra.mxu1 %v3073_v44  ;;  %1665 = vmatprep.subr.bf16.mxu0 %v3074_v45  ;;  %v3130_v31 = vld [vmem:[%s4672_s1 + $0x484] ss:$16 sps:$4 sm:$0xff]   ;;  %v3128_v33 = vld [vmem:[%s4672_s1 + $0x480] ss:$16 sps:$4 sm:$0xff]  }
  0x29   :  { %1706 = vmatprep.subr.bf16.mxu1 %v3076_v46  ;;  %v3133_v32 = vld [vmem:[%s4672_s1 + $0x684] ss:$16 sps:$4 sm:$0xff]   ;;  %v3131_v34 = vld [vmem:[%s4672_s1 + $0x680] ss:$16 sps:$4 sm:$0xff]  }
  0x2a   :  { %v3136_v35 = vld [vmem:[%s4672_s1 + $0x464] ss:$16 sps:$4 sm:$0xff]   ;;  %v3134_v37 = vld [vmem:[%s4672_s1 + $0x460] ss:$16 sps:$4 sm:$0xff]  }
  0x2b   :  { %1666 = vmatpush2.bf16.msra.mxu0 %v3078_v47  ;;  %v3139_v36 = vld [vmem:[%s4672_s1 + $0x664] ss:$16 sps:$4 sm:$0xff]   ;;  %v3137_v38 = vld [vmem:[%s4672_s1 + $0x660] ss:$16 sps:$4 sm:$0xff]  }
  0x2c   :  { %1707 = vmatpush2.bf16.msra.mxu1 %v3079_v48  ;;  %1667 = vmatprep.subr.bf16.mxu0 %v3080_v50  ;;  %v3142_v39 = vld [vmem:[%s4672_s1 + $0x444] ss:$16 sps:$4 sm:$0xff]   ;;  %v3140_v41 = vld [vmem:[%s4672_s1 + $0x440] ss:$16 sps:$4 sm:$0xff]  }
  0x2d   :  { %1708 = vmatprep.subr.bf16.mxu1 %v3082_v51  ;;  %v3145_v40 = vld [vmem:[%s4672_s1 + $0x644] ss:$16 sps:$4 sm:$0xff]   ;;  %v3143_v43 = vld [vmem:[%s4672_s1 + $0x640] ss:$16 sps:$4 sm:$0xff]  }
  0x2e   :  { %v3148_v44 = vld [vmem:[%s4672_s1 + $0x424] ss:$16 sps:$4 sm:$0xff]   ;;  %v3146_v46 = vld [vmem:[%s4672_s1 + $0x420] ss:$16 sps:$4 sm:$0xff]  }
  0x2f   :  { %1668 = vmatpush2.bf16.msra.mxu0 %v3084_v53  ;;  %v3151_v45 = vld [vmem:[%s4672_s1 + $0x624] ss:$16 sps:$4 sm:$0xff]   ;;  %v3149_v47 = vld [vmem:[%s4672_s1 + $0x620] ss:$16 sps:$4 sm:$0xff]  }
  0x30   :  { %1709 = vmatpush2.bf16.msra.mxu1 %v3085_v56  ;;  %1669 = vmatprep.subr.bf16.mxu0 %v3086_v57  ;;  %v3154_v48 = vld [vmem:[%s4672_s1 + $0x404] ss:$16 sps:$4 sm:$0xff]   ;;  %v3152_v50 = vld [vmem:[%s4672_s1 + $0x400] ss:$16 sps:$4 sm:$0xff]  }
  0x31   :  { %1710 = vmatprep.subr.bf16.mxu1 %v3088_v58  ;;  %v3157_v49 = vld [vmem:[%s4672_s1 + $0x604] ss:$16 sps:$4 sm:$0xff]   ;;  %v3155_v51 = vld [vmem:[%s4672_s1 + $0x600] ss:$16 sps:$4 sm:$0xff]  }
  0x32   :  { %v3160_v52 = vld [vmem:[%s4672_s1 + $0x5e4] ss:$16 sps:$4 sm:$0xff]   ;;  %v3158_v54 = vld [vmem:[%s4672_s1 + $0x5e0] ss:$16 sps:$4 sm:$0xff]  }
  0x33   :  { %1670 = vmatpush2.bf16.msra.mxu0 %v3090_v61  ;;  %v3163_v53 = vld [vmem:[%s4672_s1 + $0x7e4] ss:$16 sps:$4 sm:$0xff]   ;;  %v3161_v55 = vld [vmem:[%s4672_s1 + $0x7e0] ss:$16 sps:$4 sm:$0xff]  }
  0x34   :  { %1711 = vmatpush2.bf16.msra.mxu1 %v3091_v0  ;;  %1671 = vmatprep.subr.bf16.mxu0 %v3092_v1  ;;  %v3166_v56 = vld [vmem:[%s4672_s1 + $0x5c4] ss:$16 sps:$4 sm:$0xff]   ;;  %v3164_v58 = vld [vmem:[%s4672_s1 + $0x5c0] ss:$16 sps:$4 sm:$0xff]  }
  0x35   :  { %1712 = vmatprep.subr.bf16.mxu1 %v3094_v2  ;;  %v3169_v57 = vld [vmem:[%s4672_s1 + $0x7c4] ss:$16 sps:$4 sm:$0xff]   ;;  %v3167_v59 = vld [vmem:[%s4672_s1 + $0x7c0] ss:$16 sps:$4 sm:$0xff]  }
  0x36   :  { %v3172_v60 = vld [vmem:[%s4672_s1 + $0x5a4] ss:$16 sps:$4 sm:$0xff]   ;;  %v3170_v0 = vld [vmem:[%s4672_s1 + $0x5a0] ss:$16 sps:$4 sm:$0xff]  }
  0x37   :  { %1672 = vmatpush2.bf16.msra.mxu0 %v3096_v4  ;;  %v3175_v61 = vld [vmem:[%s4672_s1 + $0x7a4] ss:$16 sps:$4 sm:$0xff]   ;;  %v3173_v1 = vld [vmem:[%s4672_s1 + $0x7a0] ss:$16 sps:$4 sm:$0xff]  }
  0x38   :  { %1713 = vmatpush2.bf16.msra.mxu1 %v3097_v5  ;;  %1673 = vmatprep.subr.bf16.mxu0 %v3098_v6  ;;  %v3178_v2 = vld [vmem:[%s4672_s1 + $0x584] ss:$16 sps:$4 sm:$0xff]   ;;  %v3176_v5 = vld [vmem:[%s4672_s1 + $0x580] ss:$16 sps:$4 sm:$0xff]  }
  0x39   :  { %1714 = vmatprep.subr.bf16.mxu1 %v3100_v7  ;;  %v3181_v4 = vld [vmem:[%s4672_s1 + $0x784] ss:$16 sps:$4 sm:$0xff]   ;;  %v3179_v6 = vld [vmem:[%s4672_s1 + $0x780] ss:$16 sps:$4 sm:$0xff]  }
  0x3a   :  { %v3184_v7 = vld [vmem:[%s4672_s1 + $0x564] ss:$16 sps:$4 sm:$0xff]  }
  0x3b   :  { %1674 = vmatpush2.bf16.msra.mxu0 %v3102_v8  ;;  %v3187_v8 = vld [vmem:[%s4672_s1 + $0x764] ss:$16 sps:$4 sm:$0xff]  }
  0x3c   :  { %1715 = vmatpush2.bf16.msra.mxu1 %v3103_v9  ;;  %1675 = vmatprep.subr.bf16.mxu0 %v3104_v10  ;;  %v3182_v9 = vld [vmem:[%s4672_s1 + $0x560] ss:$16 sps:$4 sm:$0xff]   ;;  %v3193_v12 = vld [vmem:[%s4672_s1 + $0x744] ss:$16 sps:$4 sm:$0xff]  }
  0x3d   :  { %1716 = vmatprep.subr.bf16.mxu1 %v3106_v11  ;;  %v3185_v10 = vld [vmem:[%s4672_s1 + $0x760] ss:$16 sps:$4 sm:$0xff]   ;;  %v3190_v11 = vld [vmem:[%s4672_s1 + $0x544] ss:$16 sps:$4 sm:$0xff]  }
  0x3f   :  { %1676 = vmatpush2.bf16.msra.mxu0 %v3108_v13  ;;  %v3188_v13 = vld [vmem:[%s4672_s1 + $0x540] ss:$16 sps:$4 sm:$0xff]  }
  0x40   :  { %1717 = vmatpush2.bf16.msra.mxu1 %v3109_v15  ;;  %1727 = vmatprep.subr.bf16.mxu0 %v3112_v16  ;;  %v3191_v15 = vld [vmem:[%s4672_s1 + $0x740] ss:$16 sps:$4 sm:$0xff]   ;;  %v3196_v16 = vld [vmem:[%s4672_s1 + $0x524] ss:$16 sps:$4 sm:$0xff]  }
  0x41   :  { %1768 = vmatprep.subr.bf16.mxu1 %v3115_v17  ;;  %v3199_v17 = vld [vmem:[%s4672_s1 + $0x724] ss:$16 sps:$4 sm:$0xff]  }
  0x42   :  { %1678 = vmatmul.mubr.bf16.vlgmr.msra.gmra.mxu0 %v3780_v14 }
  0x43   :  { %1719 = vmatmul.mubr.bf16.vlgmr.msra.gmra.mxu1 %v3795_v19  ;;  %1728 = vmatpush1.bf16.msra.mxu0 %v3110_v20  ;;  %v3194_v20 = vld [vmem:[%s4672_s1 + $0x520] ss:$16 sps:$4 sm:$0xff]  }
  0x44   :  { %1769 = vmatpush1.bf16.msra.mxu1 %v3113_v21  ;;  %1729 = vmatprep.subr.bf16.mxu0 %v3118_v22  ;;  %v3197_v21 = vld [vmem:[%s4672_s1 + $0x720] ss:$16 sps:$4 sm:$0xff]   ;;  %v3202_v22 = vld [vmem:[%s4672_s1 + $0x504] ss:$16 sps:$4 sm:$0xff]  }
  0x45   :  { %1770 = vmatprep.subr.bf16.mxu1 %v3121_v23  ;;  %1759 = vmatprep.mubr.bf16.mxu0 %v3791_v18  ;;  %v3205_v23 = vld [vmem:[%s4672_s1 + $0x704] ss:$16 sps:$4 sm:$0xff]  }
  0x46   :  { %1800 = vmatprep.mubr.bf16.mxu1 %v3811_v24 }
  0x47   :  { %1730 = vmatpush1.bf16.msra.mxu0 %v3116_v25  ;;  %v3200_v25 = vld [vmem:[%s4672_s1 + $0x500] ss:$16 sps:$4 sm:$0xff]  }
  0x48   :  { %1771 = vmatpush1.bf16.msra.mxu1 %v3119_v26  ;;  %1731 = vmatprep.subr.bf16.mxu0 %v3124_v27  ;;  %v3203_v26 = vld [vmem:[%s4672_s1 + $0x700] ss:$16 sps:$4 sm:$0xff]   ;;  %v3209_v27 = vld [vmem:[%s4672_s1 + $0xec] ss:$16 sps:$4 sm:$0xff]  }
  0x49   :  { %1772 = vmatprep.subr.bf16.mxu1 %v3127_v28  ;;  %v3212_v28 = vld [vmem:[%s4672_s1 + $0x2ec] ss:$16 sps:$4 sm:$0xff]  }
  0x4b   :  { %1732 = vmatpush1.bf16.msra.mxu0 %v3122_v29  ;;  %v3999_v29 = vcombine.high %v3736_v63, %v3736_v63 }
  0x4c   :  { %1773 = vmatpush1.bf16.msra.mxu1 %v3125_v30  ;;  %1733 = vmatprep.subr.bf16.mxu0 %v3130_v31  ;;  %v3207_v30 = vld [vmem:[%s4672_s1 + $0xe8] ss:$16 sps:$4 sm:$0xff]  }
  0x4d   :  { %1774 = vmatprep.subr.bf16.mxu1 %v3133_v32  ;;  %v3210_v31 = vld [vmem:[%s4672_s1 + $0x2e8] ss:$16 sps:$4 sm:$0xff]   ;;  %v3215_v32 = vld [vmem:[%s4672_s1 + $0xcc] ss:$16 sps:$4 sm:$0xff]  }
  0x4f   :  { %1734 = vmatpush1.bf16.msra.mxu0 %v3128_v33  ;;  %v3218_v33 = vld [vmem:[%s4672_s1 + $0x2cc] ss:$16 sps:$4 sm:$0xff]  }
  0x50   :  { %1775 = vmatpush1.bf16.msra.mxu1 %v3131_v34  ;;  %1735 = vmatprep.subr.bf16.mxu0 %v3136_v35  ;;  %v3213_v34 = vld [vmem:[%s4672_s1 + $0xc8] ss:$16 sps:$4 sm:$0xff]  }
  0x51   :  { %1776 = vmatprep.subr.bf16.mxu1 %v3139_v36  ;;  %v3216_v35 = vld [vmem:[%s4672_s1 + $0x2c8] ss:$16 sps:$4 sm:$0xff]   ;;  %v3221_v36 = vld [vmem:[%s4672_s1 + $0xac] ss:$16 sps:$4 sm:$0xff]  }
  0x53   :  { %1736 = vmatpush1.bf16.msra.mxu0 %v3134_v37  ;;  %v3224_v37 = vld [vmem:[%s4672_s1 + $0x2ac] ss:$16 sps:$4 sm:$0xff]  }
  0x54   :  { %1777 = vmatpush1.bf16.msra.mxu1 %v3137_v38  ;;  %1737 = vmatprep.subr.bf16.mxu0 %v3142_v39  ;;  %v3219_v38 = vld [vmem:[%s4672_s1 + $0xa8] ss:$16 sps:$4 sm:$0xff]  }
  0x55   :  { %1778 = vmatprep.subr.bf16.mxu1 %v3145_v40  ;;  %v3222_v39 = vld [vmem:[%s4672_s1 + $0x2a8] ss:$16 sps:$4 sm:$0xff]   ;;  %v3227_v40 = vld [vmem:[%s4672_s1 + $0x8c] ss:$16 sps:$4 sm:$0xff]  }
  0x57   :  { %1738 = vmatpush1.bf16.msra.mxu0 %v3140_v41  ;;  %v3228_v41 = vld [vmem:[%s4672_s1 + $0x288] ss:$16 sps:$4 sm:$0xff]  }
  0x58   :  { %1779 = vmatpush1.bf16.msra.mxu1 %v3143_v43  ;;  %1739 = vmatprep.subr.bf16.mxu0 %v3148_v44  ;;  %v3233_v43 = vld [vmem:[%s4672_s1 + $0x6c] ss:$16 sps:$4 sm:$0xff]  }
  0x59   :  { %1780 = vmatprep.subr.bf16.mxu1 %v3151_v45  ;;  %v3236_v44 = vld [vmem:[%s4672_s1 + $0x26c] ss:$16 sps:$4 sm:$0xff]   ;;  %v3231_v45 = vld [vmem:[%s4672_s1 + $0x68] ss:$16 sps:$4 sm:$0xff]  }
  0x5b   :  { %1740 = vmatpush1.bf16.msra.mxu0 %v3146_v46  ;;  %v3234_v46 = vld [vmem:[%s4672_s1 + $0x268] ss:$16 sps:$4 sm:$0xff]  }
  0x5c   :  { %1781 = vmatpush1.bf16.msra.mxu1 %v3149_v47  ;;  %1741 = vmatprep.subr.bf16.mxu0 %v3154_v48  ;;  %v3239_v47 = vld [vmem:[%s4672_s1 + $0x4c] ss:$16 sps:$4 sm:$0xff]  }
  0x5d   :  { %1782 = vmatprep.subr.bf16.mxu1 %v3157_v49  ;;  %v3242_v48 = vld [vmem:[%s4672_s1 + $0x24c] ss:$16 sps:$4 sm:$0xff]   ;;  %v3237_v49 = vld [vmem:[%s4672_s1 + $0x48] ss:$16 sps:$4 sm:$0xff]  }
  0x5f   :  { %1742 = vmatpush1.bf16.msra.mxu0 %v3152_v50  ;;  %v3240_v50 = vld [vmem:[%s4672_s1 + $0x248] ss:$16 sps:$4 sm:$0xff]  }
  0x60   :  { %1783 = vmatpush1.bf16.msra.mxu1 %v3155_v51  ;;  %1743 = vmatprep.subr.bf16.mxu0 %v3160_v52  ;;  %v3245_v51 = vld [vmem:[%s4672_s1 + $0x2c] ss:$16 sps:$4 sm:$0xff]  }
  0x61   :  { %1784 = vmatprep.subr.bf16.mxu1 %v3163_v53  ;;  %v3248_v52 = vld [vmem:[%s4672_s1 + $0x22c] ss:$16 sps:$4 sm:$0xff]   ;;  %v3243_v53 = vld [vmem:[%s4672_s1 + $0x28] ss:$16 sps:$4 sm:$0xff]  }
  0x63   :  { %1744 = vmatpush2.bf16.msra.mxu0 %v3158_v54  ;;  %v3246_v54 = vld [vmem:[%s4672_s1 + $0x228] ss:$16 sps:$4 sm:$0xff]  }
  0x64   :  { %1785 = vmatpush2.bf16.msra.mxu1 %v3161_v55  ;;  %1745 = vmatprep.subr.bf16.mxu0 %v3166_v56  ;;  %v3251_v55 = vld [vmem:[%s4672_s1 + $0xc] ss:$16 sps:$4 sm:$0xff]  }
  0x65   :  { %1786 = vmatprep.subr.bf16.mxu1 %v3169_v57  ;;  %v3254_v56 = vld [vmem:[%s4672_s1 + $0x20c] ss:$16 sps:$4 sm:$0xff]   ;;  %v3249_v57 = vld [vmem:[%s4672_s1 + $0x8] ss:$16 sps:$4 sm:$0xff]  }
  0x67   :  { %1746 = vmatpush2.bf16.msra.mxu0 %v3164_v58  ;;  %v3252_v58 = vld [vmem:[%s4672_s1 + $0x208] ss:$16 sps:$4 sm:$0xff]  }
  0x68   :  { %1787 = vmatpush2.bf16.msra.mxu1 %v3167_v59  ;;  %1747 = vmatprep.subr.bf16.mxu0 %v3172_v60  ;;  %v3257_v59 = vld [vmem:[%s4672_s1 + $0x1ec] ss:$16 sps:$4 sm:$0xff]  }
  0x69   :  { %1788 = vmatprep.subr.bf16.mxu1 %v3175_v61  ;;  %v3260_v60 = vld [vmem:[%s4672_s1 + $0x3ec] ss:$16 sps:$4 sm:$0xff]   ;;  %v3255_v61 = vld [vmem:[%s4672_s1 + $0x1e8] ss:$16 sps:$4 sm:$0xff]  }
  0x6b   :  { %1748 = vmatpush2.bf16.msra.mxu0 %v3170_v0  ;;  %v3258_v0 = vld [vmem:[%s4672_s1 + $0x3e8] ss:$16 sps:$4 sm:$0xff]  }
  0x6c   :  { %1789 = vmatpush2.bf16.msra.mxu1 %v3173_v1  ;;  %1749 = vmatprep.subr.bf16.mxu0 %v3178_v2  ;;  %v3263_v1 = vld [vmem:[%s4672_s1 + $0x1cc] ss:$16 sps:$4 sm:$0xff]  }
  0x6d   :  { %1790 = vmatprep.subr.bf16.mxu1 %v3181_v4  ;;  %v3266_v2 = vld [vmem:[%s4672_s1 + $0x3cc] ss:$16 sps:$4 sm:$0xff]   ;;  %v3261_v4 = vld [vmem:[%s4672_s1 + $0x1c8] ss:$16 sps:$4 sm:$0xff]  }
  0x6f   :  { %1750 = vmatpush2.bf16.msra.mxu0 %v3176_v5  ;;  %v3264_v5 = vld [vmem:[%s4672_s1 + $0x3c8] ss:$16 sps:$4 sm:$0xff]  }
  0x70   :  { %1791 = vmatpush2.bf16.msra.mxu1 %v3179_v6  ;;  %1751 = vmatprep.subr.bf16.mxu0 %v3184_v7  ;;  %v3269_v6 = vld [vmem:[%s4672_s1 + $0x1ac] ss:$16 sps:$4 sm:$0xff]  }
  0x71   :  { %1792 = vmatprep.subr.bf16.mxu1 %v3187_v8  ;;  %v3272_v7 = vld [vmem:[%s4672_s1 + $0x3ac] ss:$16 sps:$4 sm:$0xff]   ;;  %v3267_v8 = vld [vmem:[%s4672_s1 + $0x1a8] ss:$16 sps:$4 sm:$0xff]  }
  0x73   :  { %1752 = vmatpush2.bf16.msra.mxu0 %v3182_v9  ;;  %v3270_v9 = vld [vmem:[%s4672_s1 + $0x3a8] ss:$16 sps:$4 sm:$0xff]  }
  0x74   :  { %1793 = vmatpush2.bf16.msra.mxu1 %v3185_v10  ;;  %1753 = vmatprep.subr.bf16.mxu0 %v3190_v11  ;;  %v3275_v10 = vld [vmem:[%s4672_s1 + $0x18c] ss:$16 sps:$4 sm:$0xff]  }
  0x75   :  { %1794 = vmatprep.subr.bf16.mxu1 %v3193_v12  ;;  %v3278_v11 = vld [vmem:[%s4672_s1 + $0x38c] ss:$16 sps:$4 sm:$0xff]   ;;  %v3273_v12 = vld [vmem:[%s4672_s1 + $0x188] ss:$16 sps:$4 sm:$0xff]  }
  0x77   :  { %1754 = vmatpush2.bf16.msra.mxu0 %v3188_v13  ;;  %v3276_v13 = vld [vmem:[%s4672_s1 + $0x388] ss:$16 sps:$4 sm:$0xff]  }
  0x78   :  { %1795 = vmatpush2.bf16.msra.mxu1 %v3191_v15  ;;  %1755 = vmatprep.subr.bf16.mxu0 %v3196_v16  ;;  %v3281_v15 = vld [vmem:[%s4672_s1 + $0x16c] ss:$16 sps:$4 sm:$0xff]  }
  0x79   :  { %1796 = vmatprep.subr.bf16.mxu1 %v3199_v17  ;;  %v3284_v16 = vld [vmem:[%s4672_s1 + $0x36c] ss:$16 sps:$4 sm:$0xff]   ;;  %v3279_v17 = vld [vmem:[%s4672_s1 + $0x168] ss:$16 sps:$4 sm:$0xff]  }
  0x7b   :  { %1756 = vmatpush2.bf16.msra.mxu0 %v3194_v20  ;;  %v3282_v20 = vld [vmem:[%s4672_s1 + $0x368] ss:$16 sps:$4 sm:$0xff]  }
  0x7c   :  { %1797 = vmatpush2.bf16.msra.mxu1 %v3197_v21  ;;  %1757 = vmatprep.subr.bf16.mxu0 %v3202_v22  ;;  %v3287_v21 = vld [vmem:[%s4672_s1 + $0x14c] ss:$16 sps:$4 sm:$0xff]  }
  0x7d   :  { %1798 = vmatprep.subr.bf16.mxu1 %v3205_v23  ;;  %v3290_v22 = vld [vmem:[%s4672_s1 + $0x34c] ss:$16 sps:$4 sm:$0xff]   ;;  %v3285_v23 = vld [vmem:[%s4672_s1 + $0x148] ss:$16 sps:$4 sm:$0xff]  }
  0x7f   :  { %1758 = vmatpush2.bf16.msra.mxu0 %v3200_v25  ;;  %v3288_v25 = vld [vmem:[%s4672_s1 + $0x348] ss:$16 sps:$4 sm:$0xff]  }
  0x80   :  { %1799 = vmatpush2.bf16.msra.mxu1 %v3203_v26  ;;  %1809 = vmatprep.subr.bf16.mxu0 %v3209_v27  ;;  %v3293_v26 = vld [vmem:[%s4672_s1 + $0x12c] ss:$16 sps:$4 sm:$0xff]  }
  0x81   :  { %1850 = vmatprep.subr.bf16.mxu1 %v3212_v28  ;;  %v3296_v27 = vld [vmem:[%s4672_s1 + $0x32c] ss:$16 sps:$4 sm:$0xff]   ;;  %v3291_v28 = vld [vmem:[%s4672_s1 + $0x128] ss:$16 sps:$4 sm:$0xff]  }
  0x82   :  { %1760 = vmatmul.mubr.bf16.vlgmr.msra.gmra.mxu0 %v3736_v63 }
  0x83   :  { %1801 = vmatmul.mubr.bf16.vlgmr.msra.gmra.mxu1 %v3999_v29  ;;  %1810 = vmatpush1.bf16.msra.mxu0 %v3207_v30  ;;  %v3294_v30 = vld [vmem:[%s4672_s1 + $0x328] ss:$16 sps:$4 sm:$0xff]  }
  0x84   :  { %1851 = vmatpush1.bf16.msra.mxu1 %v3210_v31  ;;  %1811 = vmatprep.subr.bf16.mxu0 %v3215_v32  ;;  %v3299_v31 = vld [vmem:[%s4672_s1 + $0x10c] ss:$16 sps:$4 sm:$0xff]  }
  0x85   :  { %1852 = vmatprep.subr.bf16.mxu1 %v3218_v33  ;;  %1841 = vmatprep.mubr.bf16.mxu0 %v3734_v62  ;;  %v3230_v62 = vld [vmem:[%s4672_s1 + $0x28c] ss:$16 sps:$4 sm:$0xff]   ;;  %v3297_v33 = vld [vmem:[%s4672_s1 + $0x108] ss:$16 sps:$4 sm:$0xff]  }
  0x86   :  { %1882 = vmatprep.mubr.bf16.mxu1 %v3749_v3  ;;  %v3225_v3 = vld [vmem:[%s4672_s1 + $0x88] ss:$16 sps:$4 sm:$0xff]   ;;  %v3302_v32 = vld [vmem:[%s4672_s1 + $0x30c] ss:$16 sps:$4 sm:$0xff]  }
  0x87   :  { %1812 = vmatpush1.bf16.msra.mxu0 %v3213_v34  ;;  %v3300_v34 = vld [vmem:[%s4672_s1 + $0x308] ss:$16 sps:$4 sm:$0xff]  }
  0x88   :  { %1853 = vmatpush1.bf16.msra.mxu1 %v3216_v35  ;;  %1813 = vmatprep.subr.bf16.mxu0 %v3221_v36  ;;  %v3305_v35 = vld [vmem:[%s4672_s1 + $0x4ec] ss:$16 sps:$4 sm:$0xff]  }
  0x89   :  { %1854 = vmatprep.subr.bf16.mxu1 %v3224_v37  ;;  %v3308_v36 = vld [vmem:[%s4672_s1 + $0x6ec] ss:$16 sps:$4 sm:$0xff]   ;;  %v3303_v37 = vld [vmem:[%s4672_s1 + $0x4e8] ss:$16 sps:$4 sm:$0xff]  }
  0x8b   :  { %1814 = vmatpush1.bf16.msra.mxu0 %v3219_v38  ;;  %v3306_v38 = vld [vmem:[%s4672_s1 + $0x6e8] ss:$16 sps:$4 sm:$0xff]  }
  0x8c   :  { %1855 = vmatpush1.bf16.msra.mxu1 %v3222_v39  ;;  %1815 = vmatprep.subr.bf16.mxu0 %v3227_v40  ;;  %v3311_v39 = vld [vmem:[%s4672_s1 + $0x4cc] ss:$16 sps:$4 sm:$0xff]  }
  0x8d   :  { %1856 = vmatprep.subr.bf16.mxu1 %v3230_v62  ;;  %v3314_v40 = vld [vmem:[%s4672_s1 + $0x6cc] ss:$16 sps:$4 sm:$0xff]   ;;  %v3309_v62 = vld [vmem:[%s4672_s1 + $0x4c8] ss:$16 sps:$4 sm:$0xff]  }
  0x8f   :  { %1816 = vmatpush1.bf16.msra.mxu0 %v3225_v3  ;;  %v3312_v3 = vld [vmem:[%s4672_s1 + $0x6c8] ss:$16 sps:$4 sm:$0xff]  }
  0x90   :  { %1857 = vmatpush1.bf16.msra.mxu1 %v3228_v41  ;;  %1817 = vmatprep.subr.bf16.mxu0 %v3233_v43  ;;  %v3317_v41 = vld [vmem:[%s4672_s1 + $0x4ac] ss:$16 sps:$4 sm:$0xff]  }
  0x91   :  { %1858 = vmatprep.subr.bf16.mxu1 %v3236_v44  ;;  %v3320_v43 = vld [vmem:[%s4672_s1 + $0x6ac] ss:$16 sps:$4 sm:$0xff]   ;;  %v3315_v44 = vld [vmem:[%s4672_s1 + $0x4a8] ss:$16 sps:$4 sm:$0xff]  }
  0x93   :  { %1818 = vmatpush1.bf16.msra.mxu0 %v3231_v45  ;;  %v3326_v45 = vld [vmem:[%s4672_s1 + $0x68c] ss:$16 sps:$4 sm:$0xff]  }
  0x94   :  { %1859 = vmatpush1.bf16.msra.mxu1 %v3234_v46  ;;  %1819 = vmatprep.subr.bf16.mxu0 %v3239_v47  ;;  %v3321_v46 = vld [vmem:[%s4672_s1 + $0x488] ss:$16 sps:$4 sm:$0xff]   ;;  %v3332_v47 = vld [vmem:[%s4672_s1 + $0x66c] ss:$16 sps:$4 sm:$0xff]  }
  0x95   :  { %1860 = vmatprep.subr.bf16.mxu1 %v3242_v48  ;;  %v3327_v48 = vld [vmem:[%s4672_s1 + $0x468] ss:$16 sps:$4 sm:$0xff]  }
  0x97   :  { %1820 = vmatpush1.bf16.msra.mxu0 %v3237_v49  ;;  %v3330_v49 = vld [vmem:[%s4672_s1 + $0x668] ss:$16 sps:$4 sm:$0xff]  }
  0x98   :  { %1861 = vmatpush1.bf16.msra.mxu1 %v3240_v50  ;;  %1821 = vmatprep.subr.bf16.mxu0 %v3245_v51  ;;  %v3335_v50 = vld [vmem:[%s4672_s1 + $0x44c] ss:$16 sps:$4 sm:$0xff]  }
  0x99   :  { %1862 = vmatprep.subr.bf16.mxu1 %v3248_v52  ;;  %v3338_v51 = vld [vmem:[%s4672_s1 + $0x64c] ss:$16 sps:$4 sm:$0xff]   ;;  %v3333_v52 = vld [vmem:[%s4672_s1 + $0x448] ss:$16 sps:$4 sm:$0xff]  }
  0x9b   :  { %1822 = vmatpush1.bf16.msra.mxu0 %v3243_v53  ;;  %v3336_v53 = vld [vmem:[%s4672_s1 + $0x648] ss:$16 sps:$4 sm:$0xff]  }
  0x9c   :  { %1863 = vmatpush1.bf16.msra.mxu1 %v3246_v54  ;;  %1823 = vmatprep.subr.bf16.mxu0 %v3251_v55  ;;  %v3341_v54 = vld [vmem:[%s4672_s1 + $0x42c] ss:$16 sps:$4 sm:$0xff]  }
  0x9d   :  { %1864 = vmatprep.subr.bf16.mxu1 %v3254_v56  ;;  %v3344_v55 = vld [vmem:[%s4672_s1 + $0x62c] ss:$16 sps:$4 sm:$0xff]  }
  0x9f   :  { %1824 = vmatpush1.bf16.msra.mxu0 %v3249_v57 }
  0xa0   :  { %1865 = vmatpush1.bf16.msra.mxu1 %v3252_v58  ;;  %1825 = vmatprep.subr.bf16.mxu0 %v3257_v59 }
  0xa1   :  { %1866 = vmatprep.subr.bf16.mxu1 %v3260_v60 }
  0xa3   :  { %1826 = vmatpush2.bf16.msra.mxu0 %v3255_v61 }
  0xa4   :  { %1867 = vmatpush2.bf16.msra.mxu1 %v3258_v0  ;;  %1827 = vmatprep.subr.bf16.mxu0 %v3263_v1 }
  0xa5   :  { %1868 = vmatprep.subr.bf16.mxu1 %v3266_v2 }
  0xa7   :  { %1828 = vmatpush2.bf16.msra.mxu0 %v3261_v4 }
  0xa8   :  { %1869 = vmatpush2.bf16.msra.mxu1 %v3264_v5  ;;  %1829 = vmatprep.subr.bf16.mxu0 %v3269_v6 }
  0xa9   :  { %1870 = vmatprep.subr.bf16.mxu1 %v3272_v7 }
  0xab   :  { %1830 = vmatpush2.bf16.msra.mxu0 %v3267_v8 }
  0xac   :  { %1871 = vmatpush2.bf16.msra.mxu1 %v3270_v9  ;;  %1831 = vmatprep.subr.bf16.mxu0 %v3275_v10 }
  0xad   :  { %1872 = vmatprep.subr.bf16.mxu1 %v3278_v11 }
  0xaf   :  { %1832 = vmatpush2.bf16.msra.mxu0 %v3273_v12 }
  0xb0   :  { %1873 = vmatpush2.bf16.msra.mxu1 %v3276_v13  ;;  %1833 = vmatprep.subr.bf16.mxu0 %v3281_v15 }
  0xb1   :  { %1874 = vmatprep.subr.bf16.mxu1 %v3284_v16 }
  0xb3   :  { %1834 = vmatpush2.bf16.msra.mxu0 %v3279_v17 }
  0xb4   :  { %1875 = vmatpush2.bf16.msra.mxu1 %v3282_v20  ;;  %1835 = vmatprep.subr.bf16.mxu0 %v3287_v21 }
  0xb5   :  { %1876 = vmatprep.subr.bf16.mxu1 %v3290_v22 }
  0xb7   :  { %1836 = vmatpush2.bf16.msra.mxu0 %v3285_v23 }
  0xb8   :  { %1877 = vmatpush2.bf16.msra.mxu1 %v3288_v25  ;;  %1837 = vmatprep.subr.bf16.mxu0 %v3293_v26 }
  0xb9   :  { %1878 = vmatprep.subr.bf16.mxu1 %v3296_v27 }
  0xbb   :  { %1838 = vmatpush2.bf16.msra.mxu0 %v3291_v28 }
  0xbc   :  { %1879 = vmatpush2.bf16.msra.mxu1 %v3294_v30  ;;  %1839 = vmatprep.subr.bf16.mxu0 %v3299_v31 }
  0xbd   :  { %1880 = vmatprep.subr.bf16.mxu1 %v3302_v32 }
  0xbf   :  { %1840 = vmatpush2.bf16.msra.mxu0 %v3297_v33 }
  0xc0   :  { %1881 = vmatpush2.bf16.msra.mxu1 %v3300_v34  ;;  %1891 = vmatprep.subr.bf16.mxu0 %v3305_v35 }
  0xc1   :  { %1932 = vmatprep.subr.bf16.mxu1 %v3308_v36 }
  0xc2   :  { %1842 = vmatmul.mubr.bf16.vlgmr.msra.gmra.mxu0 %v3780_v14  ;;  %v3318_v14 = vld [vmem:[%s4672_s1 + $0x6a8] ss:$16 sps:$4 sm:$0xff]  }
  0xc3   :  { %1883 = vmatmul.mubr.bf16.vlgmr.msra.gmra.mxu1 %v3795_v19  ;;  %1892 = vmatpush1.bf16.msra.mxu0 %v3303_v37  ;;  %v3323_v19 = vld [vmem:[%s4672_s1 + $0x48c] ss:$16 sps:$4 sm:$0xff]  }
  0xc4   :  { %1933 = vmatpush1.bf16.msra.mxu1 %v3306_v38  ;;  %1893 = vmatprep.subr.bf16.mxu0 %v3311_v39 }
  0xc5   :  { %1934 = vmatprep.subr.bf16.mxu1 %v3314_v40  ;;  %1923 = vmatprep.mubr.bf16.mxu0 %v3791_v18  ;;  %v3324_v18 = vld [vmem:[%s4672_s1 + $0x688] ss:$16 sps:$4 sm:$0xff]  }
  0xc6   :  { %1964 = vmatprep.mubr.bf16.mxu1 %v3811_v24  ;;  %v3329_v24 = vld [vmem:[%s4672_s1 + $0x46c] ss:$16 sps:$4 sm:$0xff]  }
  0xc7   :  { %1894 = vmatpush1.bf16.msra.mxu0 %v3309_v62 }
  0xc8   :  { %1935 = vmatpush1.bf16.msra.mxu1 %v3312_v3  ;;  %1895 = vmatprep.subr.bf16.mxu0 %v3317_v41 }
  0xc9   :  { %1936 = vmatprep.subr.bf16.mxu1 %v3320_v43 }
  0xcb   :  { %1896 = vmatpush1.bf16.msra.mxu0 %v3315_v44 }
  0xcc   :  { %1937 = vmatpush1.bf16.msra.mxu1 %v3318_v14  ;;  %1897 = vmatprep.subr.bf16.mxu0 %v3323_v19 }
  0xcd   :  { %1938 = vmatprep.subr.bf16.mxu1 %v3326_v45 }
  0xcf   :  { %1898 = vmatpush1.bf16.msra.mxu0 %v3321_v46 }
  0xd0   :  { %1939 = vmatpush1.bf16.msra.mxu1 %v3324_v18  ;;  %1899 = vmatprep.subr.bf16.mxu0 %v3329_v24 }
  0xd1   :  { %1940 = vmatprep.subr.bf16.mxu1 %v3332_v47 }
  0xd3   :  { %1900 = vmatpush1.bf16.msra.mxu0 %v3327_v48 }
  0xd4   :  { %1941 = vmatpush1.bf16.msra.mxu1 %v3330_v49  ;;  %1901 = vmatprep.subr.bf16.mxu0 %v3335_v50 }
  0xd5   :  { %1942 = vmatprep.subr.bf16.mxu1 %v3338_v51 }
  0xd6   :  { %12 = vsyncpa [#allocation3], 0  ;;  %v3339_v56 = vld [vmem:[%s4672_s1 + $0x428] ss:$16 sps:$4 sm:$0xff]   ;;  %v3347_v58 = vld [vmem:[%s4672_s1 + $0x40c] ss:$16 sps:$4 sm:$0xff]  }
  0xd7   :  { %1902 = vmatpush1.bf16.msra.mxu0 %v3333_v52  ;;  %v3342_v57 = vld [vmem:[%s4672_s1 + $0x628] ss:$16 sps:$4 sm:$0xff]   ;;  %v3350_v59 = vld [vmem:[%s4672_s1 + $0x60c] ss:$16 sps:$4 sm:$0xff]   ;;  %s3534_s23 = smov [#allocation2]  }
  0xd8   :  { %1943 = vmatpush1.bf16.msra.mxu1 %v3336_v53  ;;  %1903 = vmatprep.subr.bf16.mxu0 %v3341_v54  ;;  %v3345_v60 = vld [vmem:[%s4672_s1 + $0x408] ss:$16 sps:$4 sm:$0xff]   ;;  %v3353_v0 = vld [vmem:[%s4672_s1 + $0x5ec] ss:$16 sps:$4 sm:$0xff]   ;;  %s2645_s24 = sshll.u32 %s3534_s23, 4  ;;  %s2646_s24 = int_to_ptr.vmem [resolvable:$true] %s2645_s24 }
  0xd9   :  { %1944 = vmatprep.subr.bf16.mxu1 %v3344_v55  ;;  %v3348_v61 = vld [vmem:[%s4672_s1 + $0x608] ss:$16 sps:$4 sm:$0xff]   ;;  %v3356_v1 = vld [vmem:[%s4672_s1 + $0x7ec] ss:$16 sps:$4 sm:$0xff]   ;;  %s3511_s25 = scalar_lea.vmem %s2646_s24, 32  ;;  %p3516_p1 = scmp.lt.s32.totalorder %s2646_s24, %s2646_s24 }
  0xda   :  { %v3351_v2 = vld [vmem:[%s4672_s1 + $0x5e8] ss:$16 sps:$4 sm:$0xff]   ;;  %v3359_v5 = vld [vmem:[%s4672_s1 + $0x5cc] ss:$16 sps:$4 sm:$0xff]   ;;  %p3512_p0 = scmp.ne.s32.totalorder %s2646_s24, %s3511_s25  ;;  %p3517_p2 = scmp.lt.s32.totalorder %s3511_s25, %s3511_s25 }
  0xdb   :  { %1904 = vmatpush1.bf16.msra.mxu0 %v3339_v56  ;;  %v3354_v4 = vld [vmem:[%s4672_s1 + $0x7e8] ss:$16 sps:$4 sm:$0xff]   ;;  %v3362_v6 = vld [vmem:[%s4672_s1 + $0x7cc] ss:$16 sps:$4 sm:$0xff]  }
  0xdc   :  { %1945 = vmatpush1.bf16.msra.mxu1 %v3342_v57  ;;  %1905 = vmatprep.subr.bf16.mxu0 %v3347_v58  ;;  %v3357_v7 = vld [vmem:[%s4672_s1 + $0x5c8] ss:$16 sps:$4 sm:$0xff]   ;;  %v3365_v9 = vld [vmem:[%s4672_s1 + $0x5ac] ss:$16 sps:$4 sm:$0xff]   ;;  %p3518_p3 = por %p3517_p2, %p3516_p1 }
  0xdd   :  { %1946 = vmatprep.subr.bf16.mxu1 %v3350_v59  ;;  %v3360_v8 = vld [vmem:[%s4672_s1 + $0x7c8] ss:$16 sps:$4 sm:$0xff]   ;;  %v3368_v10 = vld [vmem:[%s4672_s1 + $0x7ac] ss:$16 sps:$4 sm:$0xff]  }
  0xde   :  { %v3363_v11 = vld [vmem:[%s4672_s1 + $0x5a8] ss:$16 sps:$4 sm:$0xff]   ;;  %v3371_v13 = vld [vmem:[%s4672_s1 + $0x58c] ss:$16 sps:$4 sm:$0xff]   ;;  %p3519_p4 = pnand %p3518_p3, %p3512_p0 }
  0xdf   :  { %1906 = vmatpush1.bf16.msra.mxu0 %v3345_v60  ;;  %v3366_v12 = vld [vmem:[%s4672_s1 + $0x7a8] ss:$16 sps:$4 sm:$0xff]   ;;  %v3374_v15 = vld [vmem:[%s4672_s1 + $0x78c] ss:$16 sps:$4 sm:$0xff]  }
  0xe0   :  { %1947 = vmatpush1.bf16.msra.mxu1 %v3348_v61  ;;  %1907 = vmatprep.subr.bf16.mxu0 %v3353_v0  ;;  %v3369_v16 = vld [vmem:[%s4672_s1 + $0x588] ss:$16 sps:$4 sm:$0xff]   ;;  %v3377_v20 = vld [vmem:[%s4672_s1 + $0x56c] ss:$16 sps:$4 sm:$0xff]  }
  0xe1   :  { %1948 = vmatprep.subr.bf16.mxu1 %v3356_v1  ;;  %v3372_v17 = vld [vmem:[%s4672_s1 + $0x788] ss:$16 sps:$4 sm:$0xff]   ;;  %v3380_v21 = vld [vmem:[%s4672_s1 + $0x76c] ss:$16 sps:$4 sm:$0xff]  }
  0xe2   :  { %v3375_v22 = vld [vmem:[%s4672_s1 + $0x568] ss:$16 sps:$4 sm:$0xff]   ;;  %v3383_v25 = vld [vmem:[%s4672_s1 + $0x54c] ss:$16 sps:$4 sm:$0xff]  }
  0xe3   :  { %1908 = vmatpush2.bf16.msra.mxu0 %v3351_v2  ;;  %v3378_v23 = vld [vmem:[%s4672_s1 + $0x768] ss:$16 sps:$4 sm:$0xff]   ;;  %v3386_v26 = vld [vmem:[%s4672_s1 + $0x74c] ss:$16 sps:$4 sm:$0xff]  }
  0xe4   :  { %1949 = vmatpush2.bf16.msra.mxu1 %v3354_v4  ;;  %1909 = vmatprep.subr.bf16.mxu0 %v3359_v5  ;;  %v3381_v27 = vld [vmem:[%s4672_s1 + $0x548] ss:$16 sps:$4 sm:$0xff]   ;;  %v3389_v30 = vld [vmem:[%s4672_s1 + $0x52c] ss:$16 sps:$4 sm:$0xff]  }
  0xe5   :  { %1950 = vmatprep.subr.bf16.mxu1 %v3362_v6  ;;  %v3384_v28 = vld [vmem:[%s4672_s1 + $0x748] ss:$16 sps:$4 sm:$0xff]   ;;  %v3392_v31 = vld [vmem:[%s4672_s1 + $0x72c] ss:$16 sps:$4 sm:$0xff]  }
  0xe6   :  { %v3387_v32 = vld [vmem:[%s4672_s1 + $0x528] ss:$16 sps:$4 sm:$0xff]   ;;  %v3395_v34 = vld [vmem:[%s4672_s1 + $0x50c] ss:$16 sps:$4 sm:$0xff]  }
  0xe7   :  { %1910 = vmatpush2.bf16.msra.mxu0 %v3357_v7  ;;  %v3390_v33 = vld [vmem:[%s4672_s1 + $0x728] ss:$16 sps:$4 sm:$0xff]   ;;  %v3398_v35 = vld [vmem:[%s4672_s1 + $0x70c] ss:$16 sps:$4 sm:$0xff]  }
  0xe8   :  { %1951 = vmatpush2.bf16.msra.mxu1 %v3360_v8  ;;  %1911 = vmatprep.subr.bf16.mxu0 %v3365_v9  ;;  %v3393_v36 = vld [vmem:[%s4672_s1 + $0x508] ss:$16 sps:$4 sm:$0xff]   ;;  %v3401_v38 = vld [vmem:[%s4674_s3 + $0x74] ss:$8 sps:$4 sm:$0xff]   ;;  %v3404_v40 = vld [vmem:[%s4674_s3 + $0x64] ss:$8 sps:$4 sm:$0xff]  }
  0xe9   :  { %1952 = vmatprep.subr.bf16.mxu1 %v3368_v10  ;;  %v3396_v37 = vld [vmem:[%s4672_s1 + $0x708] ss:$16 sps:$4 sm:$0xff]   ;;  %v3407_v14 = vld [vmem:[%s4674_s3 + $0x54] ss:$8 sps:$4 sm:$0xff]   ;;  %v3410_v18 = vld [vmem:[%s4674_s3 + $0x44] ss:$8 sps:$4 sm:$0xff]  }
  0xea   :  { %v3399_v39 = vld [vmem:[%s4674_s3 + $0x70] ss:$8 sps:$4 sm:$0xff]   ;;  %v3402_v41 = vld [vmem:[%s4674_s3 + $0x60] ss:$8 sps:$4 sm:$0xff]   ;;  %v3449_v47 = vld [vmem:[%s4674_s3 + $0x174] ss:$8 sps:$4 sm:$0xff]  }
  0xeb   :  { %1912 = vmatpush2.bf16.msra.mxu0 %v3363_v11  ;;  %v3447_v24 = vld [vmem:[%s4674_s3 + $0x170] ss:$8 sps:$4 sm:$0xff]   ;;  %v3452_v48 = vld [vmem:[%s4674_s3 + $0x164] ss:$8 sps:$4 sm:$0xff]   ;;  %v3408_v49 = vld [vmem:[%s4674_s3 + $0x40] ss:$8 sps:$4 sm:$0xff]  }
  0xec   :  { %1953 = vmatpush2.bf16.msra.mxu1 %v3366_v12  ;;  %1913 = vmatprep.subr.bf16.mxu0 %v3371_v13  ;;  %v3450_v50 = vld [vmem:[%s4674_s3 + $0x160] ss:$8 sps:$4 sm:$0xff]   ;;  %v3413_v51 = vld [vmem:[%s4674_s3 + $0x34] ss:$8 sps:$4 sm:$0xff]   ;;  %v3411_v53 = vld [vmem:[%s4674_s3 + $0x30] ss:$8 sps:$4 sm:$0xff]  }
  0xed   :  { %1954 = vmatprep.subr.bf16.mxu1 %v3374_v15  ;;  %v3455_v52 = vld [vmem:[%s4674_s3 + $0x154] ss:$8 sps:$4 sm:$0xff]   ;;  %v3453_v54 = vld [vmem:[%s4674_s3 + $0x150] ss:$8 sps:$4 sm:$0xff]   ;;  %v3416_v55 = vld [vmem:[%s4674_s3 + $0x24] ss:$8 sps:$4 sm:$0xff]  }
  0xee   :  { %v3458_v56 = vld [vmem:[%s4674_s3 + $0x144] ss:$8 sps:$4 sm:$0xff]   ;;  %v3414_v57 = vld [vmem:[%s4674_s3 + $0x20] ss:$8 sps:$4 sm:$0xff]   ;;  %v3419_v59 = vld [vmem:[%s4674_s3 + $0x14] ss:$8 sps:$4 sm:$0xff]  }
  0xef   :  { %1914 = vmatpush2.bf16.msra.mxu0 %v3369_v16  ;;  %v3456_v58 = vld [vmem:[%s4674_s3 + $0x140] ss:$8 sps:$4 sm:$0xff]   ;;  %v3461_v60 = vld [vmem:[%s4674_s3 + $0x134] ss:$8 sps:$4 sm:$0xff]   ;;  %v3417_v61 = vld [vmem:[%s4674_s3 + $0x10] ss:$8 sps:$4 sm:$0xff]  }
  0xf0   :  { %1955 = vmatpush2.bf16.msra.mxu1 %v3372_v17  ;;  %1915 = vmatprep.subr.bf16.mxu0 %v3377_v20  ;;  %v3459_v0 = vld [vmem:[%s4674_s3 + $0x130] ss:$8 sps:$4 sm:$0xff]   ;;  %v3422_v1 = vld [vmem:[%s4674_s3 + $0x4] ss:$8 sps:$4 sm:$0xff]   ;;  %v3420_v4 = vld [vmem:[%s4674_s3] ss:$8 sps:$4 sm:$0xff]  }
  0xf1   :  { %1956 = vmatprep.subr.bf16.mxu1 %v3380_v21  ;;  %v3464_v2 = vld [vmem:[%s4674_s3 + $0x124] ss:$8 sps:$4 sm:$0xff]   ;;  %v3462_v5 = vld [vmem:[%s4674_s3 + $0x120] ss:$8 sps:$4 sm:$0xff]   ;;  %v3425_v6 = vld [vmem:[%s4674_s3 + $0xf4] ss:$8 sps:$4 sm:$0xff]  }
  0xf2   :  { %v3467_v7 = vld [vmem:[%s4674_s3 + $0x114] ss:$8 sps:$4 sm:$0xff]   ;;  %v3423_v8 = vld [vmem:[%s4674_s3 + $0xf0] ss:$8 sps:$4 sm:$0xff]   ;;  %v3428_v10 = vld [vmem:[%s4674_s3 + $0xe4] ss:$8 sps:$4 sm:$0xff]  }
  0xf3   :  { %1916 = vmatpush2.bf16.msra.mxu0 %v3375_v22  ;;  %v3465_v9 = vld [vmem:[%s4674_s3 + $0x110] ss:$8 sps:$4 sm:$0xff]   ;;  %v3470_v11 = vld [vmem:[%s4674_s3 + $0x104] ss:$8 sps:$4 sm:$0xff]   ;;  %v3426_v12 = vld [vmem:[%s4674_s3 + $0xe0] ss:$8 sps:$4 sm:$0xff]  }
  0xf4   :  { %1957 = vmatpush2.bf16.msra.mxu1 %v3378_v23  ;;  %1917 = vmatprep.subr.bf16.mxu0 %v3383_v25  ;;  %v3468_v13 = vld [vmem:[%s4674_s3 + $0x100] ss:$8 sps:$4 sm:$0xff]   ;;  %v3431_v15 = vld [vmem:[%s4674_s3 + $0xd4] ss:$8 sps:$4 sm:$0xff]   ;;  %v3429_v17 = vld [vmem:[%s4674_s3 + $0xd0] ss:$8 sps:$4 sm:$0xff]  }
  0xf5   :  { %1958 = vmatprep.subr.bf16.mxu1 %v3386_v26  ;;  %v3473_v16 = vld [vmem:[%s4674_s3 + $0x1f4] ss:$8 sps:$4 sm:$0xff]   ;;  %v3471_v20 = vld [vmem:[%s4674_s3 + $0x1f0] ss:$8 sps:$4 sm:$0xff]   ;;  %v3434_v21 = vld [vmem:[%s4674_s3 + $0xc4] ss:$8 sps:$4 sm:$0xff]  }
  0xf6   :  { %v3476_v22 = vld [vmem:[%s4674_s3 + $0x1e4] ss:$8 sps:$4 sm:$0xff]   ;;  %v3432_v23 = vld [vmem:[%s4674_s3 + $0xc0] ss:$8 sps:$4 sm:$0xff]   ;;  %v3437_v26 = vld [vmem:[%s4674_s3 + $0xb4] ss:$8 sps:$4 sm:$0xff]  }
  0xf7   :  { %1918 = vmatpush2.bf16.msra.mxu0 %v3381_v27  ;;  %v3474_v25 = vld [vmem:[%s4674_s3 + $0x1e0] ss:$8 sps:$4 sm:$0xff]   ;;  %v3479_v27 = vld [vmem:[%s4674_s3 + $0x1d4] ss:$8 sps:$4 sm:$0xff]  }
  0xf8   :  { %1959 = vmatpush2.bf16.msra.mxu1 %v3384_v28  ;;  %1919 = vmatprep.subr.bf16.mxu0 %v3389_v30  ;;  %v3435_v28 = vld [vmem:[%s4674_s3 + $0xb0] ss:$8 sps:$4 sm:$0xff]  }
  0xf9   :  { %1960 = vmatprep.subr.bf16.mxu1 %v3392_v31  ;;  %v3477_v30 = vld [vmem:[%s4674_s3 + $0x1d0] ss:$8 sps:$4 sm:$0xff]   ;;  %v3440_v31 = vld [vmem:[%s4674_s3 + $0xa4] ss:$8 sps:$4 sm:$0xff]  }
  0xfb   :  { %1920 = vmatpush2.bf16.msra.mxu0 %v3387_v32  ;;  %v3482_v32 = vld [vmem:[%s4674_s3 + $0x1c4] ss:$8 sps:$4 sm:$0xff]  }
  0xfc   :  { %1961 = vmatpush2.bf16.msra.mxu1 %v3390_v33  ;;  %1921 = vmatprep.subr.bf16.mxu0 %v3395_v34  ;;  %v3438_v33 = vld [vmem:[%s4674_s3 + $0xa0] ss:$8 sps:$4 sm:$0xff]  }
  0xfd   :  { %1962 = vmatprep.subr.bf16.mxu1 %v3398_v35  ;;  %v3480_v34 = vld [vmem:[%s4674_s3 + $0x1c0] ss:$8 sps:$4 sm:$0xff]   ;;  %v3443_v35 = vld [vmem:[%s4674_s3 + $0x94] ss:$8 sps:$4 sm:$0xff]  }
  0xff   :  { %1922 = vmatpush2.bf16.msra.mxu0 %v3393_v36  ;;  %v3485_v36 = vld [vmem:[%s4674_s3 + $0x1b4] ss:$8 sps:$4 sm:$0xff]  }
 0x100   :  { %1963 = vmatpush2.bf16.msra.mxu1 %v3396_v37  ;;  %2377 = vmatprep.subr.bf16.mxu0 %v3401_v38  ;;  %v289_v37 = vsub.s32 0, %v3692_v42  ;;  %v4563_v38 = vld [vmem:[%s4673_s2] sm:$0xf] }
 0x101   :  { %2418 = vmatprep.subr.bf16.mxu1 %v3449_v47  ;;  %v3486_v47 = vld [vmem:[%s4674_s3 + $0x1a0] ss:$8 sps:$4 sm:$0xff]  }
 0x102   :  { %v4396_v62 = vpop.f32.mrf.mxu0  ;;  %1924 = vmatmul.mubr.bf16.vlgmr.msra.gmra.mxu0 %v3736_v63  ;;  %v3405_v63 = vld [vmem:[%s4674_s3 + $0x50] ss:$8 sps:$4 sm:$0xff]  }
 0x103   :  { %v4398_v3 = vpop.f32.mrf.mxu1  ;;  %1965 = vmatmul.mubr.bf16.vlgmr.msra.gmra.mxu1 %v3999_v29  ;;  %2378 = vmatpush1.bf16.msra.mxu0 %v3399_v39  ;;  %v293_v39 = vsub.s32 1, %v3692_v42 }
 0x104   :  { %v4405_v43 = vpop.f32.mrf.mxu0  ;;  %2379 = vmatprep.subr.bf16.mxu0 %v3404_v40  ;;  %2419 = vmatpush1.bf16.msra.mxu1 %v3447_v24  ;;  %v3441_v40 = vld [vmem:[%s4674_s3 + $0x90] ss:$8 sps:$4 sm:$0xff]  }
 0x105   :  { %v4407_v44 = vpop.f32.mrf.mxu1  ;;  %2420 = vmatprep.subr.bf16.mxu1 %v3452_v48 }
 0x106   :  { %v1683_v19 = vpop.f32.mrf.mxu0 }
 0x107   :  { %v1724_v45 = vpop.f32.mrf.mxu1  ;;  %2380 = vmatpush1.bf16.msra.mxu0 %v3402_v41  ;;  %v3483_v41 = vld [vmem:[%s4674_s3 + $0x1b0] ss:$8 sps:$4 sm:$0xff]   ;;  %v290_v19 = vrot.slane %v4563_v38, %v289_v37 }
 0x108   :  { %v1684_v29 = vpop.f32.mrf.mxu0  ;;  %2381 = vmatprep.subr.bf16.mxu0 %v3407_v14  ;;  %2421 = vmatpush1.bf16.msra.mxu1 %v3450_v50  ;;  %v3446_v14 = vld [vmem:[%s4674_s3 + $0x84] ss:$8 sps:$4 sm:$0xff]   ;;  %v294_v45 = vrot.slane %v4563_v38, %v293_v39 }
 0x109   :  { %v1725_v46 = vpop.f32.mrf.mxu1  ;;  %2422 = vmatprep.subr.bf16.mxu1 %v3455_v52  ;;  %v1680_v29 = vadd.f32 %v4396_v62, %v290_v19  ;;  %v3491_v52 = vld [vmem:[%s4674_s3 + $0x194] ss:$8 sps:$4 sm:$0xff]  }
 0x10a   :  { %v1682_v46 = vadd.f32 %v4405_v43, %v294_v45 }
 0x10b   :  { %2382 = vmatpush1.bf16.msra.mxu0 %v3405_v63  ;;  %v3444_v63 = vld [vmem:[%s4674_s3 + $0x80] ss:$8 sps:$4 sm:$0xff]   ;;  %v1721_v24 = vadd.f32 %v4398_v3, %v1680_v29  ;;  %v3489_v3 = vld [vmem:[%s4674_s3 + $0x190] ss:$8 sps:$4 sm:$0xff]  }
 0x10c   :  { %2383 = vmatprep.subr.bf16.mxu0 %v3410_v18  ;;  %2423 = vmatpush1.bf16.msra.mxu1 %v3453_v54  ;;  %v3488_v18 = vld [vmem:[%s4674_s3 + $0x1a4] ss:$8 sps:$4 sm:$0xff]   ;;  %v1723_v50 = vadd.f32 %v4407_v44, %v1682_v46 }
 0x10d   :  { %2424 = vmatprep.subr.bf16.mxu1 %v3458_v56 }
 0x10f   :  { %2384 = vmatpush1.bf16.msra.mxu0 %v3408_v49 }
 0x110   :  { %2385 = vmatprep.subr.bf16.mxu0 %v3413_v51  ;;  %2425 = vmatpush1.bf16.msra.mxu1 %v3456_v58 }
 0x111   :  { %2426 = vmatprep.subr.bf16.mxu1 %v3461_v60  ;;  %v3494_v60 = vld [vmem:[%s4674_s3 + $0x184] ss:$8 sps:$4 sm:$0xff]  }
 0x113   :  { %2386 = vmatpush1.bf16.msra.mxu0 %v3411_v53 }
 0x114   :  { %2387 = vmatprep.subr.bf16.mxu0 %v3416_v55  ;;  %2427 = vmatpush1.bf16.msra.mxu1 %v3459_v0  ;;  %v3492_v0 = vld [vmem:[%s4674_s3 + $0x180] ss:$8 sps:$4 sm:$0xff]  }
 0x115   :  { %2428 = vmatprep.subr.bf16.mxu1 %v3464_v2 }
 0x117   :  { %2388 = vmatpush1.bf16.msra.mxu0 %v3414_v57 }
 0x118   :  { %2389 = vmatprep.subr.bf16.mxu0 %v3419_v59  ;;  %2429 = vmatpush1.bf16.msra.mxu1 %v3462_v5 }
 0x119   :  { %2430 = vmatprep.subr.bf16.mxu1 %v3467_v7 }
 0x11b   :  { %2390 = vmatpush1.bf16.msra.mxu0 %v3417_v61 }
 0x11c   :  { %2391 = vmatprep.subr.bf16.mxu0 %v3422_v1  ;;  %2431 = vmatpush1.bf16.msra.mxu1 %v3465_v9 }
 0x11d   :  { %2432 = vmatprep.subr.bf16.mxu1 %v3470_v11 }
 0x11f   :  { %2392 = vmatpush1.bf16.msra.mxu0 %v3420_v4 }
 0x120   :  { %2393 = vmatprep.subr.bf16.mxu0 %v3425_v6  ;;  %2433 = vmatpush1.bf16.msra.mxu1 %v3468_v13  ;;  %v3496_v13 = vld [vmem:[%s4676_s5 + $0x38] sm:$0xff]  }
 0x121   :  { %2434 = vmatprep.subr.bf16.mxu1 %v3473_v16  ;;  %v3498_v16 = vld [vmem:[%s4676_s5 + $0x30] sm:$0xff]  }
 0x123   :  { %2394 = vmatpush2.bf16.msra.mxu0 %v3423_v8 }
 0x124   :  { %2395 = vmatprep.subr.bf16.mxu0 %v3428_v10  ;;  %2435 = vmatpush2.bf16.msra.mxu1 %v3471_v20  ;;  %v3500_v20 = vld [vmem:[%s4676_s5 + $0x28] sm:$0xff]  }
 0x125   :  { %2436 = vmatprep.subr.bf16.mxu1 %v3476_v22  ;;  %v3502_v22 = vld [vmem:[%s4676_s5 + $0x20] sm:$0xff]  }
 0x127   :  { %2396 = vmatpush2.bf16.msra.mxu0 %v3426_v12  ;;  %v3495_v12 = vld [vmem:[%s4676_s5 + $0x78] sm:$0xff]  }
 0x128   :  { %2397 = vmatprep.subr.bf16.mxu0 %v3431_v15  ;;  %2437 = vmatpush2.bf16.msra.mxu1 %v3474_v25  ;;  %v3497_v15 = vld [vmem:[%s4676_s5 + $0x70] sm:$0xff]   ;;  %v3504_v25 = vld [vmem:[%s4676_s5 + $0x18] sm:$0xff]  }
 0x129   :  { %2438 = vmatprep.subr.bf16.mxu1 %v3479_v27  ;;  %v3506_v27 = vld [vmem:[%s4676_s5 + $0x10] sm:$0xff]  }
 0x12b   :  { %2398 = vmatpush2.bf16.msra.mxu0 %v3429_v17  ;;  %v3499_v17 = vld [vmem:[%s4676_s5 + $0x68] sm:$0xff]  }
 0x12c   :  { %2399 = vmatprep.subr.bf16.mxu0 %v3434_v21  ;;  %2439 = vmatpush2.bf16.msra.mxu1 %v3477_v30  ;;  %v3501_v21 = vld [vmem:[%s4676_s5 + $0x60] sm:$0xff]   ;;  %v301_v30 = vsub.s32 3, %v3692_v42 }
 0x12d   :  { %2440 = vmatprep.subr.bf16.mxu1 %v3482_v32 }
 0x12e   :  { %v302_v32 = vrot.slane %v4563_v38, %v301_v30 }
 0x12f   :  { %2400 = vmatpush2.bf16.msra.mxu0 %v3432_v23  ;;  %v3503_v23 = vld [vmem:[%s4676_s5 + $0x58] sm:$0xff]  }
 0x130   :  { %2401 = vmatprep.subr.bf16.mxu0 %v3437_v26  ;;  %2441 = vmatpush2.bf16.msra.mxu1 %v3480_v34  ;;  %v3505_v26 = vld [vmem:[%s4676_s5 + $0x50] sm:$0xff]  }
 0x131   :  { %2442 = vmatprep.subr.bf16.mxu1 %v3485_v36 }
 0x133   :  { %2402 = vmatpush2.bf16.msra.mxu0 %v3435_v28  ;;  %v297_v28 = vsub.s32 2, %v3692_v42  ;;  %v2973_v42 = vld [vmem:[%s4677_s6] ss:$0 sm:$0xff] }
 0x134   :  { %2403 = vmatprep.subr.bf16.mxu0 %v3440_v31  ;;  %2443 = vmatpush2.bf16.msra.mxu1 %v3483_v41 }
 0x135   :  { %2444 = vmatprep.subr.bf16.mxu1 %v3488_v18  ;;  %v298_v31 = vrot.slane %v4563_v38, %v297_v28 }
 0x137   :  { %2404 = vmatpush2.bf16.msra.mxu0 %v3438_v33 }
 0x138   :  { %2405 = vmatprep.subr.bf16.mxu0 %v3443_v35  ;;  %2445 = vmatpush2.bf16.msra.mxu1 %v3486_v47 }
 0x139   :  { %2446 = vmatprep.subr.bf16.mxu1 %v3491_v52  ;;  %v3508_v52 = vld [vmem:[%s4676_s5 + $0x8] sm:$0xff]  }
 0x13b   :  { %2406 = vmatpush2.bf16.msra.mxu0 %v3441_v40 }
 0x13c   :  { %2407 = vmatprep.subr.bf16.mxu0 %v3446_v14  ;;  %2447 = vmatpush2.bf16.msra.mxu1 %v3489_v3  ;;  %v3509_v3 = vld [vmem:[%s4676_s5 + $0x40] sm:$0xff]  }
 0x13d   :  { %2448 = vmatprep.subr.bf16.mxu1 %v3494_v60 }
 0x13f   :  { %2408 = vmatpush2.bf16.msra.mxu0 %v3444_v63 }
 0x140   :  { %2449 = vmatpush2.bf16.msra.mxu1 %v3492_v0  ;;  %2990 = vmatprep.subr.bf16.mxu0 %v3495_v12 }
 0x142   :  { %v1761_v48 = vpop.f32.mrf.mxu0 }
 0x143   :  { %v1802_v49 = vpop.f32.mrf.mxu1  ;;  %v1762_v51 = vadd.f32 %v1761_v48, %v1721_v24 }
 0x144   :  { %v1763_v62 = vpop.f32.mrf.mxu0 }
 0x145   :  { %v1804_v43 = vpop.f32.mrf.mxu1  ;;  %v1803_v53 = vadd.f32 %v1802_v49, %v1762_v51  ;;  %v1764_v54 = vadd.f32 %v1763_v62, %v1723_v50 }
 0x146   :  { %v1765_v55 = vpop.f32.mrf.mxu0 }
 0x147   :  { %v1806_v56 = vpop.f32.mrf.mxu1  ;;  %v1805_v57 = vadd.f32 %v1804_v43, %v1764_v54  ;;  %v1973_v44 = vmax.f32 %v1803_v53, 0.0  ;;  %v3507_v43 = vld [vmem:[%s4676_s5 + $0x48] sm:$0xff]   ;;  %v3510_v55 = vld [vmem:[%s4676_s5] sm:$0xff]  }
 0x148   :  { %v1766_v58 = vpop.f32.mrf.mxu0 }
 0x149   :  { %v1807_v59 = vpop.f32.mrf.mxu1  ;;  %v1974_v61 = vmax.f32 %v1805_v57, 0.0  ;;  %v1977_v2 = vpack.c.bf16 %v1973_v44, %v1973_v44  ;;  %v2045_v57 = vld [vmem:[%s4675_s4] sm:$0x3] }
 0x14a   :  { %v2050_v44 = vrot.slane %v2045_v57, %v289_v37  ;;  %v2054_v58 = vrot.slane %v2045_v57, %v293_v39 }
 0x14b   :  { %v1978_v1 = vpack.c.bf16 %v1974_v61, %v1974_v61 }
 0x14d   :  { %2409 = vmatprep.mubr.bf16.mxu0 %v1978_v1 }
 0x14e   :  { %2410 = vmatmul.mubr.bf16.vlgmr.msra.gmra.mxu0 %v1977_v2 }
 0x14f   :  { %2991 = vmatpush3.bf16.msra.mxu0 %v3496_v13 }
 0x150   :  { %2992 = vmatprep.subr.bf16.mxu0 %v3497_v15 }
 0x153   :  { %2993 = vmatpush3.bf16.msra.mxu0 %v3498_v16 }
 0x154   :  { %2994 = vmatprep.subr.bf16.mxu0 %v3499_v17 }
 0x157   :  { %2995 = vmatpush3.bf16.msra.mxu0 %v3500_v20 }
 0x158   :  { %2996 = vmatprep.subr.bf16.mxu0 %v3501_v21 }
 0x15b   :  { %2997 = vmatpush3.bf16.msra.mxu0 %v3502_v22 }
 0x15c   :  { %2998 = vmatprep.subr.bf16.mxu0 %v3503_v23 }
 0x15f   :  { %2999 = vmatpush3.bf16.msra.mxu0 %v3504_v25 }
 0x160   :  { %3000 = vmatprep.subr.bf16.mxu0 %v3505_v26 }
 0x163   :  { %3001 = vmatpush3.bf16.msra.mxu0 %v3506_v27 }
 0x164   :  { %3002 = vmatprep.subr.bf16.mxu0 %v3507_v43 }
 0x167   :  { %3003 = vmatpush3.bf16.msra.mxu0 %v3508_v52 }
 0x168   :  { %3004 = vmatprep.subr.bf16.mxu0 %v3509_v3 }
 0x16b   :  { %3005 = vmatpush3.bf16.msra.mxu0 %v3510_v55 }
 0x182   :  { %v1843_v4 = vpop.f32.mrf.mxu0 }
 0x183   :  { %v1884_v5 = vpop.f32.mrf.mxu1  ;;  %v1844_v33 = vadd.f32 %v1843_v4, %v298_v31 }
 0x184   :  { %v1845_v6 = vpop.f32.mrf.mxu0 }
 0x185   :  { %v1886_v7 = vpop.f32.mrf.mxu1  ;;  %v1846_v34 = vadd.f32 %v1845_v6, %v302_v32  ;;  %v1885_v35 = vadd.f32 %v1884_v5, %v1844_v33 }
 0x186   :  { %v1847_v8 = vpop.f32.mrf.mxu0 }
 0x187   :  { %v1888_v9 = vpop.f32.mrf.mxu1  ;;  %v1887_v41 = vadd.f32 %v1886_v7, %v1846_v34 }
 0x188   :  { %v1848_v10 = vpop.f32.mrf.mxu0 }
 0x189   :  { %v1889_v11 = vpop.f32.mrf.mxu1 }
 0x1c2   :  { %v1925_v36 = vpop.f32.mrf.mxu0 }
 0x1c3   :  { %v1966_v40 = vpop.f32.mrf.mxu1  ;;  %v1926_v14 = vadd.f32 %v1925_v36, %v1885_v35 }
 0x1c4   :  { %v1927_v19 = vpop.f32.mrf.mxu0 }
 0x1c5   :  { %v1968_v45 = vpop.f32.mrf.mxu1  ;;  %v1967_v63 = vadd.f32 %v1966_v40, %v1926_v14  ;;  %v1928_v29 = vadd.f32 %v1927_v19, %v1887_v41 }
 0x1c6   :  { %v1929_v46 = vpop.f32.mrf.mxu0 }
 0x1c7   :  { %v1970_v18 = vpop.f32.mrf.mxu1  ;;  %v1969_v24 = vadd.f32 %v1968_v45, %v1928_v29  ;;  %v1975_v47 = vmax.f32 %v1967_v63, 0.0 }
 0x1c8   :  { %v1930_v48 = vpop.f32.mrf.mxu0 }
 0x1c9   :  { %v1971_v49 = vpop.f32.mrf.mxu1  ;;  %v1976_v50 = vmax.f32 %v1969_v24, 0.0  ;;  %v1979_v38 = vpack.c.bf16 %v1975_v47, %v1975_v47 }
 0x1cb   :  { %v1980_v51 = vpack.c.bf16 %v1976_v50, %v1976_v50 }
 0x1cd   :  { %2450 = vmatprep.mubr.bf16.mxu1 %v1980_v51 }
 0x1ce   :  { %2451 = vmatmul.mubr.bf16.vlgmr.msra.gmra.mxu1 %v1979_v38 }
 0x20e   :  { %v2411_v62 = vpop.f32.mrf.mxu0 }
 0x20f   :  { %v2412_v59 = vadd.f32 %v2411_v62, %v2050_v44 }
 0x210   :  { %v2413_v53 = vpop.f32.mrf.mxu0 }
 0x211   :  { %v2414_v61 = vadd.f32 %v2413_v53, %v2054_v58 }
 0x212   :  { %v2415_v54 = vpop.f32.mrf.mxu0 }
 0x214   :  { %v2416_v56 = vpop.f32.mrf.mxu0 }
 0x28e   :  { %v2452_v60 = vpop.f32.mrf.mxu1 }
 0x28f   :  { %v2453_v0 = vadd.f32 %v2452_v60, %v2412_v59 }
 0x290   :  { %v2454_v1 = vpop.f32.mrf.mxu1 }
 0x291   :  { %v2455_v2 = vadd.f32 %v2454_v1, %v2414_v61  ;;  %v2459_v4 = vmax.f32 %v2453_v0, 0.0 }
 0x292   :  { %v2456_v5 = vpop.f32.mrf.mxu1 }
 0x293   :  { %v2460_v6 = vmax.f32 %v2455_v2, 0.0  ;;  %v2461_v9 = vpack.c.bf16 %v2459_v4, %v2459_v4 }
 0x294   :  { %v2457_v7 = vpop.f32.mrf.mxu1 }
 0x295   :  { %v2462_v8 = vpack.c.bf16 %v2460_v6, %v2460_v6 }
 0x297   :  { %2630 = vmatprep.mubr.bf16.mxu0 %v2462_v8 }
 0x298   :  { %2631 = vmatmul.mubr.bf16.vlgmr.msra.gmra.mxu0 %v2461_v9 }
 0x358   :  { %v3006_v10 = vpop.f32.mrf.mxu0 }
 0x35a   :  { %v3007_v11 = vpop.f32.mrf.mxu0 }
 0x35b   :  { %v3008_v37 = vadd.f32 %v3007_v11, %v3006_v10 }
 0x35c   :  { %v3009_v39 = vpop.f32.mrf.mxu0 }
 0x35d   :  { %v2633_v12 = vadd.f32 %v3008_v37, %v2973_v42 }
 0x35e   :  { %v3010_v13 = vpop.f32.mrf.mxu0 }
 0x35f   :  { %2638 = vst [vmem:[#allocation2] sm:$0x3] %v2633_v12 }
 0x360   :  { %3522 = shalt.err (!%p3519_p4)
}
 0x361   :  { %2648 = dma.vmem_to_hbm [thread:$0]  %s2646_s24, 32, %s4678_s7, [#allocation3]  }
 0x362   :  { %3531 = dma.done.wait [#allocation3], 32  }
 0x363   :  { %3532 = vsyncadd [#allocation3], 4294967264 }
 0x364   :  { %2652 = vsyncpa [#allocation3], 1 }

// kernel: cls_model_forward.9
= control target key start
LH: loop header
LB: loop body
LE: loop exit
PB: predicated region body
PF: predicated region fallthrough
CT: control target
= control target key end

     0   :  { %12 = vsyncpa [#allocation3], 0  ;;  %s9793_s0 = inlined_call_operand.vmem [shape: bf16[2,1024], index: 0, kind: input, shape index: {}]   ;;  %s9794_s1 = inlined_call_operand.hbm [shape: bf16[1024,512], index: 1, kind: input, shape index: {}]   ;;  %s9795_s2 = inlined_call_operand.vmem [shape: f32[1,512], index: 2, kind: input, shape index: {}]   ;;  %s9796_s3 = inlined_call_operand.hbm [shape: bf16[512,256], index: 3, kind: input, shape index: {}]   ;;  %s9797_s4 = inlined_call_operand.vmem [shape: f32[1,256], index: 4, kind: input, shape index: {}]   ;;  %s9798_s5 = inlined_call_operand.vmem [shape: bf16[256,4096], index: 5, kind: input, shape index: {}]   ;;  %s9799_s6 = inlined_call_operand.vmem [shape: f32[1,4096], index: 6, kind: input, shape index: {}]   ;;  %s9800_s7 = inlined_call_operand.vmem [shape: f32[2,4096], index: 7, kind: output, shape index: {}]  }
   0x1   :  { %13 = vsyncpa [#allocation5], 0  ;;  %s7940_s24 = smov [#allocation2]  }
   0x2   :  { %s21_s25 = sshll.u32 %s7940_s24, 4  ;;  %s22_s25 = int_to_ptr.vmem [resolvable:$true] %s21_s25 }
   0x3   :  { %s7904_s26 = scalar_lea.vmem %s22_s25, 32768  ;;  %p7909_p1 = scmp.lt.s32.totalorder %s22_s25, %s22_s25 }
   0x4   :  { %p7905_p0 = scmp.ne.s32.totalorder %s22_s25, %s7904_s26  ;;  %p7910_p2 = scmp.lt.s32.totalorder %s7904_s26, %s7904_s26 }
   0x6   :  { %p7911_p3 = por %p7910_p2, %p7909_p1 }
   0x8   :  { %p7912_p4 = pnand %p7911_p3, %p7905_p0 }
   0xa   :  { %7915 = shalt.err (!%p7912_p4)
}
   0xb   :  { %s7941_s27 = smov 256   ;;  %s7942_s28 = smov 16  }
   0xc   :  { %27 = dma.hbm_to_vmem [thread:$0]  %s9794_s1, 32768, %s22_s25, [#allocation3], %s7941_s27, %s7941_s27, %s7942_s28  }
   0xd   :  { %s7943_s8 = smov [#allocation4]  }
   0xe   :  { %s35_s9 = sshll.u32 %s7943_s8, 4  ;;  %s36_s9 = int_to_ptr.vmem [resolvable:$true] %s35_s9 }
   0xf   :  { %s7924_s10 = scalar_lea.vmem %s36_s9, 8192  ;;  %p7929_p6 = scmp.lt.s32.totalorder %s36_s9, %s36_s9 }
  0x10   :  { %p7925_p5 = scmp.ne.s32.totalorder %s36_s9, %s7924_s10  ;;  %p7930_p7 = scmp.lt.s32.totalorder %s7924_s10, %s7924_s10 }
  0x12   :  { %p7931_p8 = por %p7930_p7, %p7929_p6 }
  0x14   :  { %p7932_p9 = pnand %p7931_p8, %p7925_p5 }
  0x16   :  { %7935 = shalt.err (!%p7932_p9)
}
  0x17   :  { %s7944_s11 = smov 128   ;;  %s7945_s12 = smov 8  }
  0x18   :  { %41 = dma.hbm_to_vmem [thread:$0]  %s9796_s3, 8192, %s36_s9, [#allocation5], %s7944_s11, %s7944_s11, %s7945_s12  }
  0x19   :  { %7936 = dma.done.wait [#allocation3], 32768  }
  0x1a   :  { %7937 = vsyncadd [#allocation3], 4294934528 }
  0x1b   :  { %7938 = dma.done.wait [#allocation5], 8192  }
  0x1c   :  { %7939 = vsyncadd [#allocation5], 4294959104  ;;  %v7415_v0 = vld [vmem:[#allocation2 + $0xe4] ss:$16 sps:$4 sm:$0xff]   ;;  %v7419_v2 = vld [vmem:[#allocation2 + $0xe0] ss:$16 sps:$4 sm:$0xff]   ;;  %v313_v36 = vlaneseq }
  0x1d   :  { %v7417_v1 = vld [vmem:[#allocation2 + $0x2e4] ss:$16 sps:$4 sm:$0xff]   ;;  %1671 = vmatprep.subr.bf16.mxu0 %v7415_v0  ;;  %v7420_v3 = vld [vmem:[#allocation2 + $0x2e0] ss:$16 sps:$4 sm:$0xff]   ;;  %v7946_v37 = vmov 1966171168  }
  0x1e   :  { %1712 = vmatprep.subr.bf16.mxu1 %v7417_v1  ;;  %v7421_v4 = vld [vmem:[#allocation2 + $0xc4] ss:$16 sps:$4 sm:$0xff]   ;;  %1672 = vmatpush1.bf16.msra.mxu0 %v7419_v2  ;;  %v7425_v6 = vld [vmem:[#allocation2 + $0xc0] ss:$16 sps:$4 sm:$0xff]   ;;  %v336_v38 = vunpack.c.l.s4 %v7946_v37  ;;  %v7994_v42 = vshrl.u32 %v313_v36, 7 }
  0x1f   :  { %1713 = vmatpush1.bf16.msra.mxu1 %v7420_v3  ;;  %v7423_v5 = vld [vmem:[#allocation2 + $0x2c4] ss:$16 sps:$4 sm:$0xff]   ;;  %1673 = vmatprep.subr.bf16.mxu0 %v7421_v4  ;;  %v7426_v7 = vld [vmem:[#allocation2 + $0x2c0] ss:$16 sps:$4 sm:$0xff]  }
  0x20   :  { %1714 = vmatprep.subr.bf16.mxu1 %v7423_v5  ;;  %v7427_v8 = vld [vmem:[#allocation2 + $0xa4] ss:$16 sps:$4 sm:$0xff]   ;;  %v7431_v10 = vld [vmem:[#allocation2 + $0xa0] ss:$16 sps:$4 sm:$0xff]   ;;  %v337_v43 = vunpack.c.0.s8 %v336_v38 }
  0x21   :  { %v7429_v9 = vld [vmem:[#allocation2 + $0x2a4] ss:$16 sps:$4 sm:$0xff]   ;;  %v7432_v11 = vld [vmem:[#allocation2 + $0x2a0] ss:$16 sps:$4 sm:$0xff]  }
  0x22   :  { %1674 = vmatpush1.bf16.msra.mxu0 %v7425_v6  ;;  %v7433_v12 = vld [vmem:[#allocation2 + $0x84] ss:$16 sps:$4 sm:$0xff]   ;;  %v7437_v14 = vld [vmem:[#allocation2 + $0x80] ss:$16 sps:$4 sm:$0xff]   ;;  %v340_v49 = vsub.s32 %v337_v43, %v7994_v42 }
  0x23   :  { %1715 = vmatpush1.bf16.msra.mxu1 %v7426_v7  ;;  %1675 = vmatprep.subr.bf16.mxu0 %v7427_v8  ;;  %v7435_v13 = vld [vmem:[#allocation2 + $0x284] ss:$16 sps:$4 sm:$0xff]   ;;  %v7438_v15 = vld [vmem:[#allocation2 + $0x280] ss:$16 sps:$4 sm:$0xff]  }
  0x24   :  { %1716 = vmatprep.subr.bf16.mxu1 %v7429_v9  ;;  %v7439_v16 = vld [vmem:[#allocation2 + $0x64] ss:$16 sps:$4 sm:$0xff]   ;;  %v7443_v18 = vld [vmem:[#allocation2 + $0x60] ss:$16 sps:$4 sm:$0xff]  }
  0x25   :  { %v7441_v17 = vld [vmem:[#allocation2 + $0x264] ss:$16 sps:$4 sm:$0xff]   ;;  %v7444_v19 = vld [vmem:[#allocation2 + $0x260] ss:$16 sps:$4 sm:$0xff]  }
  0x26   :  { %1676 = vmatpush1.bf16.msra.mxu0 %v7431_v10  ;;  %v7445_v20 = vld [vmem:[#allocation2 + $0x44] ss:$16 sps:$4 sm:$0xff]   ;;  %v7449_v22 = vld [vmem:[#allocation2 + $0x40] ss:$16 sps:$4 sm:$0xff]  }
  0x27   :  { %1717 = vmatpush1.bf16.msra.mxu1 %v7432_v11  ;;  %1677 = vmatprep.subr.bf16.mxu0 %v7433_v12  ;;  %v7447_v21 = vld [vmem:[#allocation2 + $0x244] ss:$16 sps:$4 sm:$0xff]   ;;  %v7450_v23 = vld [vmem:[#allocation2 + $0x240] ss:$16 sps:$4 sm:$0xff]  }
  0x28   :  { %1718 = vmatprep.subr.bf16.mxu1 %v7435_v13  ;;  %v7451_v24 = vld [vmem:[#allocation2 + $0x24] ss:$16 sps:$4 sm:$0xff]   ;;  %v7455_v26 = vld [vmem:[#allocation2 + $0x20] ss:$16 sps:$4 sm:$0xff]  }
  0x29   :  { %v7453_v25 = vld [vmem:[#allocation2 + $0x224] ss:$16 sps:$4 sm:$0xff]   ;;  %v7456_v27 = vld [vmem:[#allocation2 + $0x220] ss:$16 sps:$4 sm:$0xff]  }
  0x2a   :  { %1678 = vmatpush1.bf16.msra.mxu0 %v7437_v14  ;;  %v7457_v28 = vld [vmem:[#allocation2 + $0x4] ss:$16 sps:$4 sm:$0xff]   ;;  %v7461_v30 = vld [vmem:[#allocation2] ss:$16 sps:$4 sm:$0xff]  }
  0x2b   :  { %1719 = vmatpush1.bf16.msra.mxu1 %v7438_v15  ;;  %1679 = vmatprep.subr.bf16.mxu0 %v7439_v16  ;;  %v7459_v29 = vld [vmem:[#allocation2 + $0x204] ss:$16 sps:$4 sm:$0xff]   ;;  %v7462_v31 = vld [vmem:[#allocation2 + $0x200] ss:$16 sps:$4 sm:$0xff]  }
  0x2c   :  { %1720 = vmatprep.subr.bf16.mxu1 %v7441_v17  ;;  %v7463_v32 = vld [vmem:[#allocation2 + $0x1e4] ss:$16 sps:$4 sm:$0xff]   ;;  %v7467_v34 = vld [vmem:[#allocation2 + $0x1e0] ss:$16 sps:$4 sm:$0xff]  }
  0x2d   :  { %v7465_v33 = vld [vmem:[#allocation2 + $0x3e4] ss:$16 sps:$4 sm:$0xff]   ;;  %v7468_v35 = vld [vmem:[#allocation2 + $0x3e0] ss:$16 sps:$4 sm:$0xff]  }
  0x2e   :  { %1680 = vmatpush1.bf16.msra.mxu0 %v7443_v18  ;;  %v7469_v39 = vld [vmem:[#allocation2 + $0x1c4] ss:$16 sps:$4 sm:$0xff]   ;;  %v7473_v41 = vld [vmem:[#allocation2 + $0x1c0] ss:$16 sps:$4 sm:$0xff]  }
  0x2f   :  { %1721 = vmatpush1.bf16.msra.mxu1 %v7444_v19  ;;  %1681 = vmatprep.subr.bf16.mxu0 %v7445_v20  ;;  %v7471_v40 = vld [vmem:[#allocation2 + $0x3c4] ss:$16 sps:$4 sm:$0xff]   ;;  %v7474_v44 = vld [vmem:[#allocation2 + $0x3c0] ss:$16 sps:$4 sm:$0xff]  }
  0x30   :  { %1722 = vmatprep.subr.bf16.mxu1 %v7447_v21  ;;  %v7475_v45 = vld [vmem:[#allocation2 + $0x1a4] ss:$16 sps:$4 sm:$0xff]   ;;  %v7479_v47 = vld [vmem:[#allocation2 + $0x1a0] ss:$16 sps:$4 sm:$0xff]  }
  0x31   :  { %v7477_v46 = vld [vmem:[#allocation2 + $0x3a4] ss:$16 sps:$4 sm:$0xff]   ;;  %v7480_v48 = vld [vmem:[#allocation2 + $0x3a0] ss:$16 sps:$4 sm:$0xff]  }
  0x32   :  { %1682 = vmatpush1.bf16.msra.mxu0 %v7449_v22  ;;  %v7481_v50 = vld [vmem:[#allocation2 + $0x184] ss:$16 sps:$4 sm:$0xff]   ;;  %v7485_v53 = vld [vmem:[#allocation2 + $0x180] ss:$16 sps:$4 sm:$0xff]  }
  0x33   :  { %1723 = vmatpush1.bf16.msra.mxu1 %v7450_v23  ;;  %1683 = vmatprep.subr.bf16.mxu0 %v7451_v24  ;;  %v7483_v51 = vld [vmem:[#allocation2 + $0x384] ss:$16 sps:$4 sm:$0xff]   ;;  %v7486_v56 = vld [vmem:[#allocation2 + $0x380] ss:$16 sps:$4 sm:$0xff]  }
  0x34   :  { %1724 = vmatprep.subr.bf16.mxu1 %v7453_v25  ;;  %v54_v52 = vld [vmem:[%s9793_s0] sm:$0xff] }
  0x35   :  { %v341_v54 = vrot.slane %v54_v52, %v340_v49  ;;  %v334_v55 = vcombine.high %v54_v52, %v54_v52  ;;  %v7487_v57 = vld [vmem:[#allocation2 + $0x164] ss:$16 sps:$4 sm:$0xff]   ;;  %v7491_v61 = vld [vmem:[#allocation2 + $0x160] ss:$16 sps:$4 sm:$0xff]  }
  0x36   :  { %1684 = vmatpush1.bf16.msra.mxu0 %v7455_v26  ;;  %v7489_v58 = vld [vmem:[#allocation2 + $0x364] ss:$16 sps:$4 sm:$0xff]   ;;  %v7492_v0 = vld [vmem:[#allocation2 + $0x360] ss:$16 sps:$4 sm:$0xff]  }
  0x37   :  { %1725 = vmatpush1.bf16.msra.mxu1 %v7456_v27  ;;  %1685 = vmatprep.subr.bf16.mxu0 %v7457_v28  ;;  %v349_v59 = vcombine.high %v341_v54, %v341_v54  ;;  %v348_v60 = vrot.slane %v334_v55, %v340_v49  ;;  %v7493_v1 = vld [vmem:[#allocation2 + $0x144] ss:$16 sps:$4 sm:$0xff]   ;;  %v7497_v4 = vld [vmem:[#allocation2 + $0x140] ss:$16 sps:$4 sm:$0xff]   ;;  %v8010_v14 = vrot.slane %v341_v54, %v340_v49 }
  0x38   :  { %1726 = vmatprep.subr.bf16.mxu1 %v7459_v29  ;;  %v7495_v2 = vld [vmem:[#allocation2 + $0x344] ss:$16 sps:$4 sm:$0xff]   ;;  %v7498_v5 = vld [vmem:[#allocation2 + $0x340] ss:$16 sps:$4 sm:$0xff]  }
  0x39   :  { %v8000_v62 = vrot.slane %v349_v59, %v340_v49  ;;  %v8002_v63 = vrot.slane %v348_v60, %v340_v49  ;;  %v7499_v6 = vld [vmem:[#allocation2 + $0x124] ss:$16 sps:$4 sm:$0xff]   ;;  %v7503_v8 = vld [vmem:[#allocation2 + $0x120] ss:$16 sps:$4 sm:$0xff]   ;;  %v350_v12 = vcombine.high %v348_v60, %v348_v60  ;;  %v8016_v19 = vcombine.high %v8010_v14, %v8010_v14 }
  0x3a   :  { %1686 = vmatpush1.bf16.msra.mxu0 %v7461_v30  ;;  %v7501_v7 = vld [vmem:[#allocation2 + $0x324] ss:$16 sps:$4 sm:$0xff]   ;;  %v7504_v9 = vld [vmem:[#allocation2 + $0x320] ss:$16 sps:$4 sm:$0xff]  }
  0x3b   :  { %1727 = vmatpush1.bf16.msra.mxu1 %v7462_v31  ;;  %1687 = vmatprep.subr.bf16.mxu0 %v7463_v32  ;;  %v8006_v3 = vcombine.high %v8000_v62, %v8000_v62  ;;  %v7505_v10 = vld [vmem:[#allocation2 + $0x104] ss:$16 sps:$4 sm:$0xff]   ;;  %v7509_v13 = vld [vmem:[#allocation2 + $0x100] ss:$16 sps:$4 sm:$0xff]   ;;  %v8012_v18 = vrot.slane %v350_v12, %v340_v49 }
  0x3c   :  { %1728 = vmatprep.subr.bf16.mxu1 %v7465_v33  ;;  %1703 = vmatprep.mubr.bf16.mxu0 %v8000_v62  ;;  %v7507_v11 = vld [vmem:[#allocation2 + $0x304] ss:$16 sps:$4 sm:$0xff]   ;;  %v7510_v15 = vld [vmem:[#allocation2 + $0x300] ss:$16 sps:$4 sm:$0xff]  }
  0x3d   :  { %1744 = vmatprep.mubr.bf16.mxu1 %v8006_v3  ;;  %v7513_v16 = vld [vmem:[#allocation2 + $0x4e4] ss:$16 sps:$4 sm:$0xff]   ;;  %v7511_v20 = vld [vmem:[#allocation2 + $0x4e0] ss:$16 sps:$4 sm:$0xff]   ;;  %v8020_v24 = vcombine.high %v8012_v18, %v8012_v18 }
  0x3e   :  { %1688 = vmatpush2.bf16.msra.mxu0 %v7467_v34  ;;  %v7516_v17 = vld [vmem:[#allocation2 + $0x6e4] ss:$16 sps:$4 sm:$0xff]   ;;  %v7514_v21 = vld [vmem:[#allocation2 + $0x6e0] ss:$16 sps:$4 sm:$0xff]  }
  0x3f   :  { %1729 = vmatpush2.bf16.msra.mxu1 %v7468_v35  ;;  %1689 = vmatprep.subr.bf16.mxu0 %v7469_v39  ;;  %v7519_v22 = vld [vmem:[#allocation2 + $0x4c4] ss:$16 sps:$4 sm:$0xff]   ;;  %v7517_v25 = vld [vmem:[#allocation2 + $0x4c0] ss:$16 sps:$4 sm:$0xff]  }
  0x40   :  { %1730 = vmatprep.subr.bf16.mxu1 %v7471_v40  ;;  %v7522_v23 = vld [vmem:[#allocation2 + $0x6c4] ss:$16 sps:$4 sm:$0xff]   ;;  %v7520_v26 = vld [vmem:[#allocation2 + $0x6c0] ss:$16 sps:$4 sm:$0xff]  }
  0x41   :  { %v7525_v27 = vld [vmem:[#allocation2 + $0x4a4] ss:$16 sps:$4 sm:$0xff]   ;;  %v7523_v29 = vld [vmem:[#allocation2 + $0x4a0] ss:$16 sps:$4 sm:$0xff]  }
  0x42   :  { %1690 = vmatpush2.bf16.msra.mxu0 %v7473_v41  ;;  %v7528_v28 = vld [vmem:[#allocation2 + $0x6a4] ss:$16 sps:$4 sm:$0xff]   ;;  %v7526_v30 = vld [vmem:[#allocation2 + $0x6a0] ss:$16 sps:$4 sm:$0xff]  }
  0x43   :  { %1731 = vmatpush2.bf16.msra.mxu1 %v7474_v44  ;;  %1691 = vmatprep.subr.bf16.mxu0 %v7475_v45  ;;  %v7531_v31 = vld [vmem:[#allocation2 + $0x484] ss:$16 sps:$4 sm:$0xff]   ;;  %v7529_v33 = vld [vmem:[#allocation2 + $0x480] ss:$16 sps:$4 sm:$0xff]  }
  0x44   :  { %1732 = vmatprep.subr.bf16.mxu1 %v7477_v46  ;;  %v7534_v32 = vld [vmem:[#allocation2 + $0x684] ss:$16 sps:$4 sm:$0xff]   ;;  %v7532_v34 = vld [vmem:[#allocation2 + $0x680] ss:$16 sps:$4 sm:$0xff]  }
  0x45   :  { %v7537_v35 = vld [vmem:[#allocation2 + $0x464] ss:$16 sps:$4 sm:$0xff]   ;;  %v7535_v37 = vld [vmem:[#allocation2 + $0x460] ss:$16 sps:$4 sm:$0xff]  }
  0x46   :  { %1692 = vmatpush2.bf16.msra.mxu0 %v7479_v47  ;;  %v7540_v36 = vld [vmem:[#allocation2 + $0x664] ss:$16 sps:$4 sm:$0xff]   ;;  %v7538_v38 = vld [vmem:[#allocation2 + $0x660] ss:$16 sps:$4 sm:$0xff]  }
  0x47   :  { %1733 = vmatpush2.bf16.msra.mxu1 %v7480_v48  ;;  %1693 = vmatprep.subr.bf16.mxu0 %v7481_v50  ;;  %v7543_v39 = vld [vmem:[#allocation2 + $0x444] ss:$16 sps:$4 sm:$0xff]   ;;  %v7541_v41 = vld [vmem:[#allocation2 + $0x440] ss:$16 sps:$4 sm:$0xff]  }
  0x48   :  { %1734 = vmatprep.subr.bf16.mxu1 %v7483_v51  ;;  %v7546_v40 = vld [vmem:[#allocation2 + $0x644] ss:$16 sps:$4 sm:$0xff]   ;;  %v7544_v43 = vld [vmem:[#allocation2 + $0x640] ss:$16 sps:$4 sm:$0xff]  }
  0x49   :  { %v7549_v44 = vld [vmem:[#allocation2 + $0x424] ss:$16 sps:$4 sm:$0xff]   ;;  %v7547_v46 = vld [vmem:[#allocation2 + $0x420] ss:$16 sps:$4 sm:$0xff]  }
  0x4a   :  { %1694 = vmatpush2.bf16.msra.mxu0 %v7485_v53  ;;  %v7552_v45 = vld [vmem:[#allocation2 + $0x624] ss:$16 sps:$4 sm:$0xff]   ;;  %v7550_v47 = vld [vmem:[#allocation2 + $0x620] ss:$16 sps:$4 sm:$0xff]  }
  0x4b   :  { %1735 = vmatpush2.bf16.msra.mxu1 %v7486_v56  ;;  %1695 = vmatprep.subr.bf16.mxu0 %v7487_v57  ;;  %v7555_v48 = vld [vmem:[#allocation2 + $0x404] ss:$16 sps:$4 sm:$0xff]   ;;  %v7553_v50 = vld [vmem:[#allocation2 + $0x400] ss:$16 sps:$4 sm:$0xff]  }
  0x4c   :  { %1736 = vmatprep.subr.bf16.mxu1 %v7489_v58  ;;  %v7558_v49 = vld [vmem:[#allocation2 + $0x604] ss:$16 sps:$4 sm:$0xff]   ;;  %v7556_v51 = vld [vmem:[#allocation2 + $0x600] ss:$16 sps:$4 sm:$0xff]  }
  0x4d   :  { %v7561_v52 = vld [vmem:[#allocation2 + $0x5e4] ss:$16 sps:$4 sm:$0xff]   ;;  %v7559_v54 = vld [vmem:[#allocation2 + $0x5e0] ss:$16 sps:$4 sm:$0xff]  }
  0x4e   :  { %1696 = vmatpush2.bf16.msra.mxu0 %v7491_v61  ;;  %v7564_v53 = vld [vmem:[#allocation2 + $0x7e4] ss:$16 sps:$4 sm:$0xff]   ;;  %v7562_v55 = vld [vmem:[#allocation2 + $0x7e0] ss:$16 sps:$4 sm:$0xff]  }
  0x4f   :  { %1737 = vmatpush2.bf16.msra.mxu1 %v7492_v0  ;;  %1697 = vmatprep.subr.bf16.mxu0 %v7493_v1  ;;  %v7567_v56 = vld [vmem:[#allocation2 + $0x5c4] ss:$16 sps:$4 sm:$0xff]   ;;  %v7565_v58 = vld [vmem:[#allocation2 + $0x5c0] ss:$16 sps:$4 sm:$0xff]  }
  0x50   :  { %1738 = vmatprep.subr.bf16.mxu1 %v7495_v2  ;;  %v7570_v57 = vld [vmem:[#allocation2 + $0x7c4] ss:$16 sps:$4 sm:$0xff]   ;;  %v7568_v59 = vld [vmem:[#allocation2 + $0x7c0] ss:$16 sps:$4 sm:$0xff]  }
  0x51   :  { %v7573_v60 = vld [vmem:[#allocation2 + $0x5a4] ss:$16 sps:$4 sm:$0xff]   ;;  %v7571_v0 = vld [vmem:[#allocation2 + $0x5a0] ss:$16 sps:$4 sm:$0xff]  }
  0x52   :  { %1698 = vmatpush2.bf16.msra.mxu0 %v7497_v4  ;;  %v7576_v61 = vld [vmem:[#allocation2 + $0x7a4] ss:$16 sps:$4 sm:$0xff]   ;;  %v7574_v1 = vld [vmem:[#allocation2 + $0x7a0] ss:$16 sps:$4 sm:$0xff]  }
  0x53   :  { %1739 = vmatpush2.bf16.msra.mxu1 %v7498_v5  ;;  %1699 = vmatprep.subr.bf16.mxu0 %v7499_v6  ;;  %v7579_v2 = vld [vmem:[#allocation2 + $0x584] ss:$16 sps:$4 sm:$0xff]   ;;  %v7577_v5 = vld [vmem:[#allocation2 + $0x580] ss:$16 sps:$4 sm:$0xff]  }
  0x54   :  { %1740 = vmatprep.subr.bf16.mxu1 %v7501_v7  ;;  %v7582_v4 = vld [vmem:[#allocation2 + $0x784] ss:$16 sps:$4 sm:$0xff]   ;;  %v7580_v6 = vld [vmem:[#allocation2 + $0x780] ss:$16 sps:$4 sm:$0xff]  }
  0x55   :  { %v7585_v7 = vld [vmem:[#allocation2 + $0x564] ss:$16 sps:$4 sm:$0xff]  }
  0x56   :  { %1700 = vmatpush2.bf16.msra.mxu0 %v7503_v8  ;;  %v7588_v8 = vld [vmem:[#allocation2 + $0x764] ss:$16 sps:$4 sm:$0xff]  }
  0x57   :  { %1741 = vmatpush2.bf16.msra.mxu1 %v7504_v9  ;;  %1701 = vmatprep.subr.bf16.mxu0 %v7505_v10  ;;  %v7583_v9 = vld [vmem:[#allocation2 + $0x560] ss:$16 sps:$4 sm:$0xff]   ;;  %v7594_v12 = vld [vmem:[#allocation2 + $0x744] ss:$16 sps:$4 sm:$0xff]  }
  0x58   :  { %1742 = vmatprep.subr.bf16.mxu1 %v7507_v11  ;;  %v7586_v10 = vld [vmem:[#allocation2 + $0x760] ss:$16 sps:$4 sm:$0xff]   ;;  %v7591_v11 = vld [vmem:[#allocation2 + $0x544] ss:$16 sps:$4 sm:$0xff]  }
  0x5a   :  { %1702 = vmatpush2.bf16.msra.mxu0 %v7509_v13  ;;  %v7589_v13 = vld [vmem:[#allocation2 + $0x540] ss:$16 sps:$4 sm:$0xff]  }
  0x5b   :  { %1743 = vmatpush2.bf16.msra.mxu1 %v7510_v15  ;;  %1753 = vmatprep.subr.bf16.mxu0 %v7513_v16  ;;  %v7592_v15 = vld [vmem:[#allocation2 + $0x740] ss:$16 sps:$4 sm:$0xff]   ;;  %v7597_v16 = vld [vmem:[#allocation2 + $0x524] ss:$16 sps:$4 sm:$0xff]  }
  0x5c   :  { %1794 = vmatprep.subr.bf16.mxu1 %v7516_v17  ;;  %v7600_v17 = vld [vmem:[#allocation2 + $0x724] ss:$16 sps:$4 sm:$0xff]  }
  0x5d   :  { %1704 = vmatmul.mubr.bf16.vlgmr.msra.gmra.mxu0 %v8010_v14 }
  0x5e   :  { %1745 = vmatmul.mubr.bf16.vlgmr.msra.gmra.mxu1 %v8016_v19  ;;  %1754 = vmatpush1.bf16.msra.mxu0 %v7511_v20  ;;  %v7595_v20 = vld [vmem:[#allocation2 + $0x520] ss:$16 sps:$4 sm:$0xff]  }
  0x5f   :  { %1795 = vmatpush1.bf16.msra.mxu1 %v7514_v21  ;;  %1755 = vmatprep.subr.bf16.mxu0 %v7519_v22  ;;  %v7598_v21 = vld [vmem:[#allocation2 + $0x720] ss:$16 sps:$4 sm:$0xff]   ;;  %v7603_v22 = vld [vmem:[#allocation2 + $0x504] ss:$16 sps:$4 sm:$0xff]  }
  0x60   :  { %1796 = vmatprep.subr.bf16.mxu1 %v7522_v23  ;;  %1785 = vmatprep.mubr.bf16.mxu0 %v8012_v18  ;;  %v7606_v23 = vld [vmem:[#allocation2 + $0x704] ss:$16 sps:$4 sm:$0xff]  }
  0x61   :  { %1826 = vmatprep.mubr.bf16.mxu1 %v8020_v24 }
  0x62   :  { %1756 = vmatpush1.bf16.msra.mxu0 %v7517_v25  ;;  %v7601_v25 = vld [vmem:[#allocation2 + $0x500] ss:$16 sps:$4 sm:$0xff]  }
  0x63   :  { %1797 = vmatpush1.bf16.msra.mxu1 %v7520_v26  ;;  %1757 = vmatprep.subr.bf16.mxu0 %v7525_v27  ;;  %v7604_v26 = vld [vmem:[#allocation2 + $0x700] ss:$16 sps:$4 sm:$0xff]   ;;  %v7610_v27 = vld [vmem:[#allocation2 + $0xec] ss:$16 sps:$4 sm:$0xff]  }
  0x64   :  { %1798 = vmatprep.subr.bf16.mxu1 %v7528_v28  ;;  %v7613_v28 = vld [vmem:[#allocation2 + $0x2ec] ss:$16 sps:$4 sm:$0xff]  }
  0x66   :  { %1758 = vmatpush1.bf16.msra.mxu0 %v7523_v29  ;;  %v8028_v29 = vcombine.high %v8002_v63, %v8002_v63 }
  0x67   :  { %1799 = vmatpush1.bf16.msra.mxu1 %v7526_v30  ;;  %1759 = vmatprep.subr.bf16.mxu0 %v7531_v31  ;;  %v7608_v30 = vld [vmem:[#allocation2 + $0xe8] ss:$16 sps:$4 sm:$0xff]  }
  0x68   :  { %1800 = vmatprep.subr.bf16.mxu1 %v7534_v32  ;;  %v7611_v31 = vld [vmem:[#allocation2 + $0x2e8] ss:$16 sps:$4 sm:$0xff]   ;;  %v7616_v32 = vld [vmem:[#allocation2 + $0xcc] ss:$16 sps:$4 sm:$0xff]  }
  0x6a   :  { %1760 = vmatpush1.bf16.msra.mxu0 %v7529_v33  ;;  %v7619_v33 = vld [vmem:[#allocation2 + $0x2cc] ss:$16 sps:$4 sm:$0xff]  }
  0x6b   :  { %1801 = vmatpush1.bf16.msra.mxu1 %v7532_v34  ;;  %1761 = vmatprep.subr.bf16.mxu0 %v7537_v35  ;;  %v7614_v34 = vld [vmem:[#allocation2 + $0xc8] ss:$16 sps:$4 sm:$0xff]  }
  0x6c   :  { %1802 = vmatprep.subr.bf16.mxu1 %v7540_v36  ;;  %v7617_v35 = vld [vmem:[#allocation2 + $0x2c8] ss:$16 sps:$4 sm:$0xff]   ;;  %v7622_v36 = vld [vmem:[#allocation2 + $0xac] ss:$16 sps:$4 sm:$0xff]  }
  0x6e   :  { %1762 = vmatpush1.bf16.msra.mxu0 %v7535_v37  ;;  %v7625_v37 = vld [vmem:[#allocation2 + $0x2ac] ss:$16 sps:$4 sm:$0xff]  }
  0x6f   :  { %1803 = vmatpush1.bf16.msra.mxu1 %v7538_v38  ;;  %1763 = vmatprep.subr.bf16.mxu0 %v7543_v39  ;;  %v7620_v38 = vld [vmem:[#allocation2 + $0xa8] ss:$16 sps:$4 sm:$0xff]  }
  0x70   :  { %1804 = vmatprep.subr.bf16.mxu1 %v7546_v40  ;;  %v7623_v39 = vld [vmem:[#allocation2 + $0x2a8] ss:$16 sps:$4 sm:$0xff]   ;;  %v7628_v40 = vld [vmem:[#allocation2 + $0x8c] ss:$16 sps:$4 sm:$0xff]  }
  0x72   :  { %1764 = vmatpush1.bf16.msra.mxu0 %v7541_v41  ;;  %v7631_v41 = vld [vmem:[#allocation2 + $0x28c] ss:$16 sps:$4 sm:$0xff]  }
  0x73   :  { %1805 = vmatpush1.bf16.msra.mxu1 %v7544_v43  ;;  %1765 = vmatprep.subr.bf16.mxu0 %v7549_v44  ;;  %v7626_v43 = vld [vmem:[#allocation2 + $0x88] ss:$16 sps:$4 sm:$0xff]  }
  0x74   :  { %1806 = vmatprep.subr.bf16.mxu1 %v7552_v45  ;;  %v7629_v44 = vld [vmem:[#allocation2 + $0x288] ss:$16 sps:$4 sm:$0xff]   ;;  %v7634_v45 = vld [vmem:[#allocation2 + $0x6c] ss:$16 sps:$4 sm:$0xff]  }
  0x76   :  { %1766 = vmatpush1.bf16.msra.mxu0 %v7547_v46  ;;  %v7637_v46 = vld [vmem:[#allocation2 + $0x26c] ss:$16 sps:$4 sm:$0xff]  }
  0x77   :  { %1807 = vmatpush1.bf16.msra.mxu1 %v7550_v47  ;;  %1767 = vmatprep.subr.bf16.mxu0 %v7555_v48  ;;  %v7632_v47 = vld [vmem:[#allocation2 + $0x68] ss:$16 sps:$4 sm:$0xff]   ;;  %v7643_v48 = vld [vmem:[#allocation2 + $0x24c] ss:$16 sps:$4 sm:$0xff]  }
  0x78   :  { %1808 = vmatprep.subr.bf16.mxu1 %v7558_v49  ;;  %v7638_v49 = vld [vmem:[#allocation2 + $0x48] ss:$16 sps:$4 sm:$0xff]  }
  0x7a   :  { %1768 = vmatpush1.bf16.msra.mxu0 %v7553_v50  ;;  %v7641_v50 = vld [vmem:[#allocation2 + $0x248] ss:$16 sps:$4 sm:$0xff]  }
  0x7b   :  { %1809 = vmatpush1.bf16.msra.mxu1 %v7556_v51  ;;  %1769 = vmatprep.subr.bf16.mxu0 %v7561_v52  ;;  %v7646_v51 = vld [vmem:[#allocation2 + $0x2c] ss:$16 sps:$4 sm:$0xff]  }
  0x7c   :  { %1810 = vmatprep.subr.bf16.mxu1 %v7564_v53  ;;  %v7649_v52 = vld [vmem:[#allocation2 + $0x22c] ss:$16 sps:$4 sm:$0xff]   ;;  %v7644_v53 = vld [vmem:[#allocation2 + $0x28] ss:$16 sps:$4 sm:$0xff]  }
  0x7e   :  { %1770 = vmatpush2.bf16.msra.mxu0 %v7559_v54  ;;  %v7647_v54 = vld [vmem:[#allocation2 + $0x228] ss:$16 sps:$4 sm:$0xff]  }
  0x7f   :  { %1811 = vmatpush2.bf16.msra.mxu1 %v7562_v55  ;;  %1771 = vmatprep.subr.bf16.mxu0 %v7567_v56  ;;  %v7652_v55 = vld [vmem:[#allocation2 + $0xc] ss:$16 sps:$4 sm:$0xff]  }
  0x80   :  { %1812 = vmatprep.subr.bf16.mxu1 %v7570_v57  ;;  %v7655_v56 = vld [vmem:[#allocation2 + $0x20c] ss:$16 sps:$4 sm:$0xff]   ;;  %v7650_v57 = vld [vmem:[#allocation2 + $0x8] ss:$16 sps:$4 sm:$0xff]  }
  0x82   :  { %1772 = vmatpush2.bf16.msra.mxu0 %v7565_v58  ;;  %v7653_v58 = vld [vmem:[#allocation2 + $0x208] ss:$16 sps:$4 sm:$0xff]  }
  0x83   :  { %1813 = vmatpush2.bf16.msra.mxu1 %v7568_v59  ;;  %1773 = vmatprep.subr.bf16.mxu0 %v7573_v60  ;;  %v7658_v59 = vld [vmem:[#allocation2 + $0x1ec] ss:$16 sps:$4 sm:$0xff]  }
  0x84   :  { %1814 = vmatprep.subr.bf16.mxu1 %v7576_v61  ;;  %v7661_v60 = vld [vmem:[#allocation2 + $0x3ec] ss:$16 sps:$4 sm:$0xff]   ;;  %v7656_v61 = vld [vmem:[#allocation2 + $0x1e8] ss:$16 sps:$4 sm:$0xff]  }
  0x86   :  { %1774 = vmatpush2.bf16.msra.mxu0 %v7571_v0  ;;  %v7659_v0 = vld [vmem:[#allocation2 + $0x3e8] ss:$16 sps:$4 sm:$0xff]  }
  0x87   :  { %1815 = vmatpush2.bf16.msra.mxu1 %v7574_v1  ;;  %1775 = vmatprep.subr.bf16.mxu0 %v7579_v2  ;;  %v7664_v1 = vld [vmem:[#allocation2 + $0x1cc] ss:$16 sps:$4 sm:$0xff]  }
  0x88   :  { %1816 = vmatprep.subr.bf16.mxu1 %v7582_v4  ;;  %v7667_v2 = vld [vmem:[#allocation2 + $0x3cc] ss:$16 sps:$4 sm:$0xff]   ;;  %v7662_v4 = vld [vmem:[#allocation2 + $0x1c8] ss:$16 sps:$4 sm:$0xff]  }
  0x8a   :  { %1776 = vmatpush2.bf16.msra.mxu0 %v7577_v5  ;;  %v7665_v5 = vld [vmem:[#allocation2 + $0x3c8] ss:$16 sps:$4 sm:$0xff]  }
  0x8b   :  { %1817 = vmatpush2.bf16.msra.mxu1 %v7580_v6  ;;  %1777 = vmatprep.subr.bf16.mxu0 %v7585_v7  ;;  %v7670_v6 = vld [vmem:[#allocation2 + $0x1ac] ss:$16 sps:$4 sm:$0xff]  }
  0x8c   :  { %1818 = vmatprep.subr.bf16.mxu1 %v7588_v8  ;;  %v7673_v7 = vld [vmem:[#allocation2 + $0x3ac] ss:$16 sps:$4 sm:$0xff]   ;;  %v7668_v8 = vld [vmem:[#allocation2 + $0x1a8] ss:$16 sps:$4 sm:$0xff]  }
  0x8e   :  { %1778 = vmatpush2.bf16.msra.mxu0 %v7583_v9  ;;  %v7671_v9 = vld [vmem:[#allocation2 + $0x3a8] ss:$16 sps:$4 sm:$0xff]  }
  0x8f   :  { %1819 = vmatpush2.bf16.msra.mxu1 %v7586_v10  ;;  %1779 = vmatprep.subr.bf16.mxu0 %v7591_v11  ;;  %v7676_v10 = vld [vmem:[#allocation2 + $0x18c] ss:$16 sps:$4 sm:$0xff]  }
  0x90   :  { %1820 = vmatprep.subr.bf16.mxu1 %v7594_v12  ;;  %v7679_v11 = vld [vmem:[#allocation2 + $0x38c] ss:$16 sps:$4 sm:$0xff]   ;;  %v7674_v12 = vld [vmem:[#allocation2 + $0x188] ss:$16 sps:$4 sm:$0xff]  }
  0x92   :  { %1780 = vmatpush2.bf16.msra.mxu0 %v7589_v13  ;;  %v7677_v13 = vld [vmem:[#allocation2 + $0x388] ss:$16 sps:$4 sm:$0xff]  }
  0x93   :  { %1821 = vmatpush2.bf16.msra.mxu1 %v7592_v15  ;;  %1781 = vmatprep.subr.bf16.mxu0 %v7597_v16  ;;  %v7682_v15 = vld [vmem:[#allocation2 + $0x16c] ss:$16 sps:$4 sm:$0xff]  }
  0x94   :  { %1822 = vmatprep.subr.bf16.mxu1 %v7600_v17  ;;  %v7685_v16 = vld [vmem:[#allocation2 + $0x36c] ss:$16 sps:$4 sm:$0xff]   ;;  %v7680_v17 = vld [vmem:[#allocation2 + $0x168] ss:$16 sps:$4 sm:$0xff]  }
  0x96   :  { %1782 = vmatpush2.bf16.msra.mxu0 %v7595_v20  ;;  %v7683_v20 = vld [vmem:[#allocation2 + $0x368] ss:$16 sps:$4 sm:$0xff]  }
  0x97   :  { %1823 = vmatpush2.bf16.msra.mxu1 %v7598_v21  ;;  %1783 = vmatprep.subr.bf16.mxu0 %v7603_v22  ;;  %v7688_v21 = vld [vmem:[#allocation2 + $0x14c] ss:$16 sps:$4 sm:$0xff]  }
  0x98   :  { %1824 = vmatprep.subr.bf16.mxu1 %v7606_v23  ;;  %v7691_v22 = vld [vmem:[#allocation2 + $0x34c] ss:$16 sps:$4 sm:$0xff]   ;;  %v7686_v23 = vld [vmem:[#allocation2 + $0x148] ss:$16 sps:$4 sm:$0xff]  }
  0x9a   :  { %1784 = vmatpush2.bf16.msra.mxu0 %v7601_v25  ;;  %v7689_v25 = vld [vmem:[#allocation2 + $0x348] ss:$16 sps:$4 sm:$0xff]  }
  0x9b   :  { %1825 = vmatpush2.bf16.msra.mxu1 %v7604_v26  ;;  %1835 = vmatprep.subr.bf16.mxu0 %v7610_v27  ;;  %v7694_v26 = vld [vmem:[#allocation2 + $0x12c] ss:$16 sps:$4 sm:$0xff]  }
  0x9c   :  { %1876 = vmatprep.subr.bf16.mxu1 %v7613_v28  ;;  %v7697_v27 = vld [vmem:[#allocation2 + $0x32c] ss:$16 sps:$4 sm:$0xff]   ;;  %v7692_v28 = vld [vmem:[#allocation2 + $0x128] ss:$16 sps:$4 sm:$0xff]  }
  0x9d   :  { %1786 = vmatmul.mubr.bf16.vlgmr.msra.gmra.mxu0 %v8002_v63 }
  0x9e   :  { %1827 = vmatmul.mubr.bf16.vlgmr.msra.gmra.mxu1 %v8028_v29  ;;  %1836 = vmatpush1.bf16.msra.mxu0 %v7608_v30  ;;  %v7695_v30 = vld [vmem:[#allocation2 + $0x328] ss:$16 sps:$4 sm:$0xff]  }
  0x9f   :  { %1877 = vmatpush1.bf16.msra.mxu1 %v7611_v31  ;;  %1837 = vmatprep.subr.bf16.mxu0 %v7616_v32  ;;  %v7700_v31 = vld [vmem:[#allocation2 + $0x10c] ss:$16 sps:$4 sm:$0xff]  }
  0xa0   :  { %1878 = vmatprep.subr.bf16.mxu1 %v7619_v33  ;;  %1867 = vmatprep.mubr.bf16.mxu0 %v8000_v62  ;;  %v7635_v62 = vld [vmem:[#allocation2 + $0x268] ss:$16 sps:$4 sm:$0xff]   ;;  %v7703_v32 = vld [vmem:[#allocation2 + $0x30c] ss:$16 sps:$4 sm:$0xff]  }
  0xa1   :  { %1908 = vmatprep.mubr.bf16.mxu1 %v8006_v3  ;;  %v7640_v3 = vld [vmem:[#allocation2 + $0x4c] ss:$16 sps:$4 sm:$0xff]   ;;  %v7698_v33 = vld [vmem:[#allocation2 + $0x108] ss:$16 sps:$4 sm:$0xff]  }
  0xa2   :  { %1838 = vmatpush1.bf16.msra.mxu0 %v7614_v34  ;;  %v7701_v34 = vld [vmem:[#allocation2 + $0x308] ss:$16 sps:$4 sm:$0xff]  }
  0xa3   :  { %1879 = vmatpush1.bf16.msra.mxu1 %v7617_v35  ;;  %1839 = vmatprep.subr.bf16.mxu0 %v7622_v36  ;;  %v7706_v35 = vld [vmem:[#allocation2 + $0x4ec] ss:$16 sps:$4 sm:$0xff]  }
  0xa4   :  { %1880 = vmatprep.subr.bf16.mxu1 %v7625_v37  ;;  %v7709_v36 = vld [vmem:[#allocation2 + $0x6ec] ss:$16 sps:$4 sm:$0xff]   ;;  %v7704_v37 = vld [vmem:[#allocation2 + $0x4e8] ss:$16 sps:$4 sm:$0xff]  }
  0xa6   :  { %1840 = vmatpush1.bf16.msra.mxu0 %v7620_v38  ;;  %v7707_v38 = vld [vmem:[#allocation2 + $0x6e8] ss:$16 sps:$4 sm:$0xff]  }
  0xa7   :  { %1881 = vmatpush1.bf16.msra.mxu1 %v7623_v39  ;;  %1841 = vmatprep.subr.bf16.mxu0 %v7628_v40  ;;  %v7712_v39 = vld [vmem:[#allocation2 + $0x4cc] ss:$16 sps:$4 sm:$0xff]  }
  0xa8   :  { %1882 = vmatprep.subr.bf16.mxu1 %v7631_v41  ;;  %v7715_v40 = vld [vmem:[#allocation2 + $0x6cc] ss:$16 sps:$4 sm:$0xff]   ;;  %v7710_v41 = vld [vmem:[#allocation2 + $0x4c8] ss:$16 sps:$4 sm:$0xff]  }
  0xaa   :  { %1842 = vmatpush1.bf16.msra.mxu0 %v7626_v43  ;;  %v7713_v43 = vld [vmem:[#allocation2 + $0x6c8] ss:$16 sps:$4 sm:$0xff]  }
  0xab   :  { %1883 = vmatpush1.bf16.msra.mxu1 %v7629_v44  ;;  %1843 = vmatprep.subr.bf16.mxu0 %v7634_v45  ;;  %v7718_v44 = vld [vmem:[#allocation2 + $0x4ac] ss:$16 sps:$4 sm:$0xff]  }
  0xac   :  { %1884 = vmatprep.subr.bf16.mxu1 %v7637_v46  ;;  %v7721_v45 = vld [vmem:[#allocation2 + $0x6ac] ss:$16 sps:$4 sm:$0xff]   ;;  %v7716_v46 = vld [vmem:[#allocation2 + $0x4a8] ss:$16 sps:$4 sm:$0xff]  }
  0xae   :  { %1844 = vmatpush1.bf16.msra.mxu0 %v7632_v47  ;;  %v7719_v47 = vld [vmem:[#allocation2 + $0x6a8] ss:$16 sps:$4 sm:$0xff]  }
  0xaf   :  { %1885 = vmatpush1.bf16.msra.mxu1 %v7635_v62  ;;  %1845 = vmatprep.subr.bf16.mxu0 %v7640_v3  ;;  %v7724_v62 = vld [vmem:[#allocation2 + $0x48c] ss:$16 sps:$4 sm:$0xff]   ;;  %v7725_v3 = vld [vmem:[#allocation2 + $0x688] ss:$16 sps:$4 sm:$0xff]  }
  0xb0   :  { %1886 = vmatprep.subr.bf16.mxu1 %v7643_v48  ;;  %v7730_v48 = vld [vmem:[#allocation2 + $0x46c] ss:$16 sps:$4 sm:$0xff]  }
  0xb2   :  { %1846 = vmatpush1.bf16.msra.mxu0 %v7638_v49  ;;  %v7733_v49 = vld [vmem:[#allocation2 + $0x66c] ss:$16 sps:$4 sm:$0xff]  }
  0xb3   :  { %1887 = vmatpush1.bf16.msra.mxu1 %v7641_v50  ;;  %1847 = vmatprep.subr.bf16.mxu0 %v7646_v51  ;;  %v7728_v50 = vld [vmem:[#allocation2 + $0x468] ss:$16 sps:$4 sm:$0xff]   ;;  %v7739_v51 = vld [vmem:[#allocation2 + $0x64c] ss:$16 sps:$4 sm:$0xff]  }
  0xb4   :  { %1888 = vmatprep.subr.bf16.mxu1 %v7649_v52  ;;  %v7734_v52 = vld [vmem:[#allocation2 + $0x448] ss:$16 sps:$4 sm:$0xff]  }
  0xb6   :  { %1848 = vmatpush1.bf16.msra.mxu0 %v7644_v53  ;;  %v7737_v53 = vld [vmem:[#allocation2 + $0x648] ss:$16 sps:$4 sm:$0xff]  }
  0xb7   :  { %1889 = vmatpush1.bf16.msra.mxu1 %v7647_v54  ;;  %1849 = vmatprep.subr.bf16.mxu0 %v7652_v55  ;;  %v7742_v54 = vld [vmem:[#allocation2 + $0x42c] ss:$16 sps:$4 sm:$0xff]  }
  0xb8   :  { %1890 = vmatprep.subr.bf16.mxu1 %v7655_v56  ;;  %v7745_v55 = vld [vmem:[#allocation2 + $0x62c] ss:$16 sps:$4 sm:$0xff]   ;;  %v7740_v56 = vld [vmem:[#allocation2 + $0x428] ss:$16 sps:$4 sm:$0xff]  }
  0xba   :  { %1850 = vmatpush1.bf16.msra.mxu0 %v7650_v57  ;;  %v7743_v57 = vld [vmem:[#allocation2 + $0x628] ss:$16 sps:$4 sm:$0xff]  }
  0xbb   :  { %1891 = vmatpush1.bf16.msra.mxu1 %v7653_v58  ;;  %1851 = vmatprep.subr.bf16.mxu0 %v7658_v59  ;;  %v7748_v58 = vld [vmem:[#allocation2 + $0x40c] ss:$16 sps:$4 sm:$0xff]  }
  0xbc   :  { %1892 = vmatprep.subr.bf16.mxu1 %v7661_v60  ;;  %v7751_v59 = vld [vmem:[#allocation2 + $0x60c] ss:$16 sps:$4 sm:$0xff]   ;;  %v7746_v60 = vld [vmem:[#allocation2 + $0x408] ss:$16 sps:$4 sm:$0xff]  }
  0xbe   :  { %1852 = vmatpush2.bf16.msra.mxu0 %v7656_v61  ;;  %v7749_v61 = vld [vmem:[#allocation2 + $0x608] ss:$16 sps:$4 sm:$0xff]  }
  0xbf   :  { %1893 = vmatpush2.bf16.msra.mxu1 %v7659_v0  ;;  %1853 = vmatprep.subr.bf16.mxu0 %v7664_v1  ;;  %v7754_v0 = vld [vmem:[#allocation2 + $0x5ec] ss:$16 sps:$4 sm:$0xff]  }
  0xc0   :  { %1894 = vmatprep.subr.bf16.mxu1 %v7667_v2  ;;  %v7757_v1 = vld [vmem:[#allocation2 + $0x7ec] ss:$16 sps:$4 sm:$0xff]   ;;  %v7752_v2 = vld [vmem:[#allocation2 + $0x5e8] ss:$16 sps:$4 sm:$0xff]  }
  0xc2   :  { %1854 = vmatpush2.bf16.msra.mxu0 %v7662_v4  ;;  %v7755_v4 = vld [vmem:[#allocation2 + $0x7e8] ss:$16 sps:$4 sm:$0xff]  }
  0xc3   :  { %1895 = vmatpush2.bf16.msra.mxu1 %v7665_v5  ;;  %1855 = vmatprep.subr.bf16.mxu0 %v7670_v6  ;;  %v7760_v5 = vld [vmem:[#allocation2 + $0x5cc] ss:$16 sps:$4 sm:$0xff]  }
  0xc4   :  { %1896 = vmatprep.subr.bf16.mxu1 %v7673_v7  ;;  %v7763_v6 = vld [vmem:[#allocation2 + $0x7cc] ss:$16 sps:$4 sm:$0xff]   ;;  %v7758_v7 = vld [vmem:[#allocation2 + $0x5c8] ss:$16 sps:$4 sm:$0xff]  }
  0xc6   :  { %1856 = vmatpush2.bf16.msra.mxu0 %v7668_v8  ;;  %v7761_v8 = vld [vmem:[#allocation2 + $0x7c8] ss:$16 sps:$4 sm:$0xff]  }
  0xc7   :  { %1897 = vmatpush2.bf16.msra.mxu1 %v7671_v9  ;;  %1857 = vmatprep.subr.bf16.mxu0 %v7676_v10  ;;  %v7766_v9 = vld [vmem:[#allocation2 + $0x5ac] ss:$16 sps:$4 sm:$0xff]  }
  0xc8   :  { %1898 = vmatprep.subr.bf16.mxu1 %v7679_v11  ;;  %v7769_v10 = vld [vmem:[#allocation2 + $0x7ac] ss:$16 sps:$4 sm:$0xff]   ;;  %v7764_v11 = vld [vmem:[#allocation2 + $0x5a8] ss:$16 sps:$4 sm:$0xff]  }
  0xca   :  { %1858 = vmatpush2.bf16.msra.mxu0 %v7674_v12  ;;  %v7767_v12 = vld [vmem:[#allocation2 + $0x7a8] ss:$16 sps:$4 sm:$0xff]  }
  0xcb   :  { %1899 = vmatpush2.bf16.msra.mxu1 %v7677_v13  ;;  %1859 = vmatprep.subr.bf16.mxu0 %v7682_v15  ;;  %v7772_v13 = vld [vmem:[#allocation2 + $0x58c] ss:$16 sps:$4 sm:$0xff]  }
  0xcc   :  { %1900 = vmatprep.subr.bf16.mxu1 %v7685_v16  ;;  %v7775_v15 = vld [vmem:[#allocation2 + $0x78c] ss:$16 sps:$4 sm:$0xff]   ;;  %v7770_v16 = vld [vmem:[#allocation2 + $0x588] ss:$16 sps:$4 sm:$0xff]  }
  0xce   :  { %1860 = vmatpush2.bf16.msra.mxu0 %v7680_v17  ;;  %v7773_v17 = vld [vmem:[#allocation2 + $0x788] ss:$16 sps:$4 sm:$0xff]  }
  0xcf   :  { %1901 = vmatpush2.bf16.msra.mxu1 %v7683_v20  ;;  %1861 = vmatprep.subr.bf16.mxu0 %v7688_v21  ;;  %v7778_v20 = vld [vmem:[#allocation2 + $0x56c] ss:$16 sps:$4 sm:$0xff]  }
  0xd0   :  { %1902 = vmatprep.subr.bf16.mxu1 %v7691_v22  ;;  %v7781_v21 = vld [vmem:[#allocation2 + $0x76c] ss:$16 sps:$4 sm:$0xff]   ;;  %v7776_v22 = vld [vmem:[#allocation2 + $0x568] ss:$16 sps:$4 sm:$0xff]  }
  0xd2   :  { %1862 = vmatpush2.bf16.msra.mxu0 %v7686_v23  ;;  %v7779_v23 = vld [vmem:[#allocation2 + $0x768] ss:$16 sps:$4 sm:$0xff]  }
  0xd3   :  { %1903 = vmatpush2.bf16.msra.mxu1 %v7689_v25  ;;  %1863 = vmatprep.subr.bf16.mxu0 %v7694_v26  ;;  %v7784_v25 = vld [vmem:[#allocation2 + $0x54c] ss:$16 sps:$4 sm:$0xff]  }
  0xd4   :  { %1904 = vmatprep.subr.bf16.mxu1 %v7697_v27  ;;  %v7787_v26 = vld [vmem:[#allocation2 + $0x74c] ss:$16 sps:$4 sm:$0xff]   ;;  %v7782_v27 = vld [vmem:[#allocation2 + $0x548] ss:$16 sps:$4 sm:$0xff]  }
  0xd6   :  { %1864 = vmatpush2.bf16.msra.mxu0 %v7692_v28  ;;  %v7785_v28 = vld [vmem:[#allocation2 + $0x748] ss:$16 sps:$4 sm:$0xff]  }
  0xd7   :  { %1905 = vmatpush2.bf16.msra.mxu1 %v7695_v30  ;;  %1865 = vmatprep.subr.bf16.mxu0 %v7700_v31  ;;  %v7790_v30 = vld [vmem:[#allocation2 + $0x52c] ss:$16 sps:$4 sm:$0xff]  }
  0xd8   :  { %1906 = vmatprep.subr.bf16.mxu1 %v7703_v32  ;;  %v7793_v31 = vld [vmem:[#allocation2 + $0x72c] ss:$16 sps:$4 sm:$0xff]   ;;  %v7788_v32 = vld [vmem:[#allocation2 + $0x528] ss:$16 sps:$4 sm:$0xff]  }
  0xda   :  { %1866 = vmatpush2.bf16.msra.mxu0 %v7698_v33  ;;  %v7791_v33 = vld [vmem:[#allocation2 + $0x728] ss:$16 sps:$4 sm:$0xff]  }
  0xdb   :  { %1907 = vmatpush2.bf16.msra.mxu1 %v7701_v34  ;;  %1917 = vmatprep.subr.bf16.mxu0 %v7706_v35  ;;  %v7796_v34 = vld [vmem:[#allocation2 + $0x50c] ss:$16 sps:$4 sm:$0xff]  }
  0xdc   :  { %1958 = vmatprep.subr.bf16.mxu1 %v7709_v36  ;;  %v7799_v35 = vld [vmem:[#allocation2 + $0x70c] ss:$16 sps:$4 sm:$0xff]   ;;  %v7794_v36 = vld [vmem:[#allocation2 + $0x508] ss:$16 sps:$4 sm:$0xff]  }
  0xdd   :  { %1868 = vmatmul.mubr.bf16.vlgmr.msra.gmra.mxu0 %v8010_v14  ;;  %v7727_v14 = vld [vmem:[#allocation2 + $0x68c] ss:$16 sps:$4 sm:$0xff]  }
  0xde   :  { %1909 = vmatmul.mubr.bf16.vlgmr.msra.gmra.mxu1 %v8016_v19  ;;  %1918 = vmatpush1.bf16.msra.mxu0 %v7704_v37  ;;  %v7722_v19 = vld [vmem:[#allocation2 + $0x488] ss:$16 sps:$4 sm:$0xff]  }
  0xdf   :  { %1959 = vmatpush1.bf16.msra.mxu1 %v7707_v38  ;;  %1919 = vmatprep.subr.bf16.mxu0 %v7712_v39  ;;  %v7797_v37 = vld [vmem:[#allocation2 + $0x708] ss:$16 sps:$4 sm:$0xff]   ;;  %v7802_v38 = vld [vmem:[#allocation4 + $0x74] ss:$8 sps:$4 sm:$0xff]  }
  0xe0   :  { %1960 = vmatprep.subr.bf16.mxu1 %v7715_v40  ;;  %1949 = vmatprep.mubr.bf16.mxu0 %v8012_v18  ;;  %v7731_v18 = vld [vmem:[#allocation2 + $0x668] ss:$16 sps:$4 sm:$0xff]   ;;  %v7805_v40 = vld [vmem:[#allocation4 + $0x64] ss:$8 sps:$4 sm:$0xff]  }
  0xe1   :  { %1990 = vmatprep.mubr.bf16.mxu1 %v8020_v24  ;;  %v7736_v24 = vld [vmem:[#allocation2 + $0x44c] ss:$16 sps:$4 sm:$0xff]   ;;  %v7800_v39 = vld [vmem:[#allocation4 + $0x70] ss:$8 sps:$4 sm:$0xff]  }
  0xe2   :  { %1920 = vmatpush1.bf16.msra.mxu0 %v7710_v41 }
  0xe3   :  { %1961 = vmatpush1.bf16.msra.mxu1 %v7713_v43  ;;  %1921 = vmatprep.subr.bf16.mxu0 %v7718_v44  ;;  %v7803_v44 = vld [vmem:[#allocation4 + $0x60] ss:$8 sps:$4 sm:$0xff]  }
  0xe4   :  { %1962 = vmatprep.subr.bf16.mxu1 %v7721_v45 }
  0xe6   :  { %1922 = vmatpush1.bf16.msra.mxu0 %v7716_v46 }
  0xe7   :  { %1963 = vmatpush1.bf16.msra.mxu1 %v7719_v47  ;;  %1923 = vmatprep.subr.bf16.mxu0 %v7724_v62  ;;  %v7808_v47 = vld [vmem:[#allocation4 + $0x54] ss:$8 sps:$4 sm:$0xff]  }
  0xe8   :  { %1964 = vmatprep.subr.bf16.mxu1 %v7727_v14 }
  0xea   :  { %1924 = vmatpush1.bf16.msra.mxu0 %v7722_v19  ;;  %v7806_v19 = vld [vmem:[#allocation4 + $0x50] ss:$8 sps:$4 sm:$0xff]  }
  0xeb   :  { %1965 = vmatpush1.bf16.msra.mxu1 %v7725_v3  ;;  %1925 = vmatprep.subr.bf16.mxu0 %v7730_v48 }
  0xec   :  { %1966 = vmatprep.subr.bf16.mxu1 %v7733_v49  ;;  %v7811_v49 = vld [vmem:[#allocation4 + $0x44] ss:$8 sps:$4 sm:$0xff]  }
  0xee   :  { %1926 = vmatpush1.bf16.msra.mxu0 %v7728_v50  ;;  %v7848_v50 = vld [vmem:[#allocation4 + $0x170] ss:$8 sps:$4 sm:$0xff]  }
  0xef   :  { %1967 = vmatpush1.bf16.msra.mxu1 %v7731_v18  ;;  %1927 = vmatprep.subr.bf16.mxu0 %v7736_v24  ;;  %v7853_v18 = vld [vmem:[#allocation4 + $0x164] ss:$8 sps:$4 sm:$0xff]   ;;  %v7851_v24 = vld [vmem:[#allocation4 + $0x160] ss:$8 sps:$4 sm:$0xff]  }
  0xf0   :  { %1968 = vmatprep.subr.bf16.mxu1 %v7739_v51  ;;  %v7814_v51 = vld [vmem:[#allocation4 + $0x34] ss:$8 sps:$4 sm:$0xff]  }
  0xf2   :  { %1928 = vmatpush1.bf16.msra.mxu0 %v7734_v52  ;;  %v7856_v52 = vld [vmem:[#allocation4 + $0x154] ss:$8 sps:$4 sm:$0xff]  }
  0xf3   :  { %1969 = vmatpush1.bf16.msra.mxu1 %v7737_v53  ;;  %1929 = vmatprep.subr.bf16.mxu0 %v7742_v54  ;;  %v7812_v53 = vld [vmem:[#allocation4 + $0x30] ss:$8 sps:$4 sm:$0xff]  }
  0xf4   :  { %1970 = vmatprep.subr.bf16.mxu1 %v7745_v55  ;;  %v7854_v54 = vld [vmem:[#allocation4 + $0x150] ss:$8 sps:$4 sm:$0xff]   ;;  %v7817_v55 = vld [vmem:[#allocation4 + $0x24] ss:$8 sps:$4 sm:$0xff]  }
  0xf6   :  { %1930 = vmatpush1.bf16.msra.mxu0 %v7740_v56  ;;  %v7859_v56 = vld [vmem:[#allocation4 + $0x144] ss:$8 sps:$4 sm:$0xff]  }
  0xf7   :  { %1971 = vmatpush1.bf16.msra.mxu1 %v7743_v57  ;;  %1931 = vmatprep.subr.bf16.mxu0 %v7748_v58  ;;  %v7815_v57 = vld [vmem:[#allocation4 + $0x20] ss:$8 sps:$4 sm:$0xff]  }
  0xf8   :  { %1972 = vmatprep.subr.bf16.mxu1 %v7751_v59  ;;  %v7857_v58 = vld [vmem:[#allocation4 + $0x140] ss:$8 sps:$4 sm:$0xff]   ;;  %v7820_v59 = vld [vmem:[#allocation4 + $0x14] ss:$8 sps:$4 sm:$0xff]  }
  0xfa   :  { %1932 = vmatpush1.bf16.msra.mxu0 %v7746_v60  ;;  %v7862_v60 = vld [vmem:[#allocation4 + $0x134] ss:$8 sps:$4 sm:$0xff]  }
  0xfb   :  { %1973 = vmatpush1.bf16.msra.mxu1 %v7749_v61  ;;  %1933 = vmatprep.subr.bf16.mxu0 %v7754_v0  ;;  %v7818_v61 = vld [vmem:[#allocation4 + $0x10] ss:$8 sps:$4 sm:$0xff]  }
  0xfc   :  { %1974 = vmatprep.subr.bf16.mxu1 %v7757_v1  ;;  %v7860_v0 = vld [vmem:[#allocation4 + $0x130] ss:$8 sps:$4 sm:$0xff]   ;;  %v7823_v1 = vld [vmem:[#allocation4 + $0x4] ss:$8 sps:$4 sm:$0xff]  }
  0xfe   :  { %1934 = vmatpush2.bf16.msra.mxu0 %v7752_v2  ;;  %v7865_v2 = vld [vmem:[#allocation4 + $0x124] ss:$8 sps:$4 sm:$0xff]  }
  0xff   :  { %1975 = vmatpush2.bf16.msra.mxu1 %v7755_v4  ;;  %1935 = vmatprep.subr.bf16.mxu0 %v7760_v5  ;;  %v7821_v4 = vld [vmem:[#allocation4] ss:$8 sps:$4 sm:$0xff]  }
 0x100   :  { %1976 = vmatprep.subr.bf16.mxu1 %v7763_v6  ;;  %v7863_v5 = vld [vmem:[#allocation4 + $0x120] ss:$8 sps:$4 sm:$0xff]   ;;  %v7826_v6 = vld [vmem:[#allocation4 + $0xf4] ss:$8 sps:$4 sm:$0xff]  }
 0x102   :  { %1936 = vmatpush2.bf16.msra.mxu0 %v7758_v7  ;;  %v7868_v7 = vld [vmem:[#allocation4 + $0x114] ss:$8 sps:$4 sm:$0xff]  }
 0x103   :  { %1977 = vmatpush2.bf16.msra.mxu1 %v7761_v8  ;;  %1937 = vmatprep.subr.bf16.mxu0 %v7766_v9  ;;  %v7824_v8 = vld [vmem:[#allocation4 + $0xf0] ss:$8 sps:$4 sm:$0xff]  }
 0x104   :  { %1978 = vmatprep.subr.bf16.mxu1 %v7769_v10  ;;  %v7866_v9 = vld [vmem:[#allocation4 + $0x110] ss:$8 sps:$4 sm:$0xff]   ;;  %v7829_v10 = vld [vmem:[#allocation4 + $0xe4] ss:$8 sps:$4 sm:$0xff]  }
 0x106   :  { %1938 = vmatpush2.bf16.msra.mxu0 %v7764_v11  ;;  %v7871_v11 = vld [vmem:[#allocation4 + $0x104] ss:$8 sps:$4 sm:$0xff]  }
 0x107   :  { %1979 = vmatpush2.bf16.msra.mxu1 %v7767_v12  ;;  %1939 = vmatprep.subr.bf16.mxu0 %v7772_v13  ;;  %v7827_v12 = vld [vmem:[#allocation4 + $0xe0] ss:$8 sps:$4 sm:$0xff]  }
 0x108   :  { %1980 = vmatprep.subr.bf16.mxu1 %v7775_v15  ;;  %v7869_v13 = vld [vmem:[#allocation4 + $0x100] ss:$8 sps:$4 sm:$0xff]   ;;  %v7832_v15 = vld [vmem:[#allocation4 + $0xd4] ss:$8 sps:$4 sm:$0xff]  }
 0x10a   :  { %1940 = vmatpush2.bf16.msra.mxu0 %v7770_v16  ;;  %v7874_v16 = vld [vmem:[#allocation4 + $0x1f4] ss:$8 sps:$4 sm:$0xff]  }
 0x10b   :  { %1981 = vmatpush2.bf16.msra.mxu1 %v7773_v17  ;;  %1941 = vmatprep.subr.bf16.mxu0 %v7778_v20  ;;  %v7830_v17 = vld [vmem:[#allocation4 + $0xd0] ss:$8 sps:$4 sm:$0xff]  }
 0x10c   :  { %1982 = vmatprep.subr.bf16.mxu1 %v7781_v21  ;;  %v7872_v20 = vld [vmem:[#allocation4 + $0x1f0] ss:$8 sps:$4 sm:$0xff]   ;;  %v7835_v21 = vld [vmem:[#allocation4 + $0xc4] ss:$8 sps:$4 sm:$0xff]  }
 0x10e   :  { %1942 = vmatpush2.bf16.msra.mxu0 %v7776_v22  ;;  %v7877_v22 = vld [vmem:[#allocation4 + $0x1e4] ss:$8 sps:$4 sm:$0xff]  }
 0x10f   :  { %1983 = vmatpush2.bf16.msra.mxu1 %v7779_v23  ;;  %1943 = vmatprep.subr.bf16.mxu0 %v7784_v25  ;;  %v7833_v23 = vld [vmem:[#allocation4 + $0xc0] ss:$8 sps:$4 sm:$0xff]  }
 0x110   :  { %1984 = vmatprep.subr.bf16.mxu1 %v7787_v26  ;;  %v7875_v25 = vld [vmem:[#allocation4 + $0x1e0] ss:$8 sps:$4 sm:$0xff]   ;;  %v7838_v26 = vld [vmem:[#allocation4 + $0xb4] ss:$8 sps:$4 sm:$0xff]  }
 0x112   :  { %1944 = vmatpush2.bf16.msra.mxu0 %v7782_v27  ;;  %v7880_v27 = vld [vmem:[#allocation4 + $0x1d4] ss:$8 sps:$4 sm:$0xff]  }
 0x113   :  { %1985 = vmatpush2.bf16.msra.mxu1 %v7785_v28  ;;  %1945 = vmatprep.subr.bf16.mxu0 %v7790_v30  ;;  %v7836_v28 = vld [vmem:[#allocation4 + $0xb0] ss:$8 sps:$4 sm:$0xff]  }
 0x114   :  { %1986 = vmatprep.subr.bf16.mxu1 %v7793_v31  ;;  %v7878_v30 = vld [vmem:[#allocation4 + $0x1d0] ss:$8 sps:$4 sm:$0xff]   ;;  %v7841_v31 = vld [vmem:[#allocation4 + $0xa4] ss:$8 sps:$4 sm:$0xff]  }
 0x116   :  { %1946 = vmatpush2.bf16.msra.mxu0 %v7788_v32  ;;  %v7883_v32 = vld [vmem:[#allocation4 + $0x1c4] ss:$8 sps:$4 sm:$0xff]  }
 0x117   :  { %1987 = vmatpush2.bf16.msra.mxu1 %v7791_v33  ;;  %1947 = vmatprep.subr.bf16.mxu0 %v7796_v34  ;;  %v7839_v33 = vld [vmem:[#allocation4 + $0xa0] ss:$8 sps:$4 sm:$0xff]  }
 0x118   :  { %1988 = vmatprep.subr.bf16.mxu1 %v7799_v35  ;;  %v7881_v34 = vld [vmem:[#allocation4 + $0x1c0] ss:$8 sps:$4 sm:$0xff]   ;;  %v7844_v35 = vld [vmem:[#allocation4 + $0x94] ss:$8 sps:$4 sm:$0xff]  }
 0x11a   :  { %1948 = vmatpush2.bf16.msra.mxu0 %v7794_v36  ;;  %v7886_v36 = vld [vmem:[#allocation4 + $0x1b4] ss:$8 sps:$4 sm:$0xff]  }
 0x11b   :  { %1989 = vmatpush2.bf16.msra.mxu1 %v7797_v37  ;;  %2403 = vmatprep.subr.bf16.mxu0 %v7802_v38  ;;  %v8049_v37 = vsub.s32 0, %v7994_v42  ;;  %v8054_v38 = vld [vmem:[%s9795_s2] sm:$0xf] }
 0x11d   :  { %v8038_v41 = vpop.f32.mrf.mxu0  ;;  %1950 = vmatmul.mubr.bf16.vlgmr.msra.gmra.mxu0 %v8002_v63  ;;  %v7850_v63 = vld [vmem:[#allocation4 + $0x174] ss:$8 sps:$4 sm:$0xff]  }
 0x11e   :  { %v8040_v43 = vpop.f32.mrf.mxu1  ;;  %1991 = vmatmul.mubr.bf16.vlgmr.msra.gmra.mxu1 %v8028_v29  ;;  %2404 = vmatpush1.bf16.msra.mxu0 %v7800_v39  ;;  %v7809_v29 = vld [vmem:[#allocation4 + $0x40] ss:$8 sps:$4 sm:$0xff]   ;;  %v8057_v39 = vsub.s32 1, %v7994_v42 }
 0x11f   :  { %v8044_v45 = vpop.f32.mrf.mxu0  ;;  %2405 = vmatprep.subr.bf16.mxu0 %v7805_v40  ;;  %2444 = vmatprep.subr.bf16.mxu1 %v7850_v63  ;;  %v7842_v40 = vld [vmem:[#allocation4 + $0x90] ss:$8 sps:$4 sm:$0xff]   ;;  %v7887_v63 = vld [vmem:[#allocation4 + $0x1a0] ss:$8 sps:$4 sm:$0xff]  }
 0x120   :  { %v8046_v46 = vpop.f32.mrf.mxu1  ;;  %2445 = vmatpush1.bf16.msra.mxu1 %v7848_v50 }
 0x121   :  { %v1709_v62 = vpop.f32.mrf.mxu0  ;;  %2446 = vmatprep.subr.bf16.mxu1 %v7853_v18 }
 0x122   :  { %v1750_v14 = vpop.f32.mrf.mxu1  ;;  %2406 = vmatpush1.bf16.msra.mxu0 %v7803_v44  ;;  %v7884_v44 = vld [vmem:[#allocation4 + $0x1b0] ss:$8 sps:$4 sm:$0xff]   ;;  %v316_v62 = vrot.slane %v8054_v38, %v8049_v37 }
 0x123   :  { %v1710_v3 = vpop.f32.mrf.mxu0  ;;  %2407 = vmatprep.subr.bf16.mxu0 %v7808_v47  ;;  %v7847_v47 = vld [vmem:[#allocation4 + $0x84] ss:$8 sps:$4 sm:$0xff]   ;;  %v320_v14 = vrot.slane %v8054_v38, %v8057_v39 }
 0x124   :  { %v1751_v48 = vpop.f32.mrf.mxu1  ;;  %2447 = vmatpush1.bf16.msra.mxu1 %v7851_v24  ;;  %v1706_v3 = vadd.f32 %v8038_v41, %v316_v62  ;;  %v7890_v41 = vld [vmem:[#allocation4 + $0x190] ss:$8 sps:$4 sm:$0xff]   ;;  %v2569_v62 = vld [vmem:[%s9798_s5 + $0x280] sm:$0xff] }
 0x125   :  { %2448 = vmatprep.subr.bf16.mxu1 %v7856_v52  ;;  %v1708_v48 = vadd.f32 %v8044_v45, %v320_v14 }
 0x126   :  { %2408 = vmatpush1.bf16.msra.mxu0 %v7806_v19  ;;  %v7845_v19 = vld [vmem:[#allocation4 + $0x80] ss:$8 sps:$4 sm:$0xff]   ;;  %v1747_v50 = vadd.f32 %v8040_v43, %v1706_v3 }
 0x127   :  { %2409 = vmatprep.subr.bf16.mxu0 %v7811_v49  ;;  %v7889_v49 = vld [vmem:[#allocation4 + $0x1a4] ss:$8 sps:$4 sm:$0xff]   ;;  %v1749_v24 = vadd.f32 %v8046_v46, %v1708_v48 }
 0x128   :  { %2449 = vmatpush1.bf16.msra.mxu1 %v7854_v54  ;;  %v7892_v54 = vld [vmem:[#allocation4 + $0x194] ss:$8 sps:$4 sm:$0xff]   ;;  %v2521_v3 = vld [vmem:[%s9798_s5 + $0x100] sm:$0xff] }
 0x129   :  { %2450 = vmatprep.subr.bf16.mxu1 %v7859_v56  ;;  %v2537_v48 = vld [vmem:[%s9798_s5 + $0x180] sm:$0xff] }
 0x12a   :  { %2410 = vmatpush1.bf16.msra.mxu0 %v7809_v29 }
 0x12b   :  { %2411 = vmatprep.subr.bf16.mxu0 %v7814_v51 }
 0x12c   :  { %2451 = vmatpush1.bf16.msra.mxu1 %v7857_v58 }
 0x12d   :  { %2452 = vmatprep.subr.bf16.mxu1 %v7862_v60 }
 0x12e   :  { %2412 = vmatpush1.bf16.msra.mxu0 %v7812_v53 }
 0x12f   :  { %2413 = vmatprep.subr.bf16.mxu0 %v7817_v55 }
 0x130   :  { %2453 = vmatpush1.bf16.msra.mxu1 %v7860_v0 }
 0x131   :  { %2454 = vmatprep.subr.bf16.mxu1 %v7865_v2 }
 0x132   :  { %2414 = vmatpush1.bf16.msra.mxu0 %v7815_v57 }
 0x133   :  { %2415 = vmatprep.subr.bf16.mxu0 %v7820_v59 }
 0x134   :  { %2455 = vmatpush1.bf16.msra.mxu1 %v7863_v5 }
 0x135   :  { %2456 = vmatprep.subr.bf16.mxu1 %v7868_v7 }
 0x136   :  { %2416 = vmatpush1.bf16.msra.mxu0 %v7818_v61  ;;  %v7895_v61 = vld [vmem:[#allocation4 + $0x184] ss:$8 sps:$4 sm:$0xff]  }
 0x137   :  { %2417 = vmatprep.subr.bf16.mxu0 %v7823_v1  ;;  %v7893_v1 = vld [vmem:[#allocation4 + $0x180] ss:$8 sps:$4 sm:$0xff]  }
 0x138   :  { %2457 = vmatpush1.bf16.msra.mxu1 %v7866_v9 }
 0x139   :  { %2458 = vmatprep.subr.bf16.mxu1 %v7871_v11 }
 0x13a   :  { %2418 = vmatpush1.bf16.msra.mxu0 %v7821_v4 }
 0x13b   :  { %2419 = vmatprep.subr.bf16.mxu0 %v7826_v6 }
 0x13c   :  { %2459 = vmatpush1.bf16.msra.mxu1 %v7869_v13  ;;  %v2729_v13 = vld [vmem:[%s9798_s5 + $0x780] sm:$0xff] }
 0x13d   :  { %2460 = vmatprep.subr.bf16.mxu1 %v7874_v16 }
 0x13e   :  { %2420 = vmatpush2.bf16.msra.mxu0 %v7824_v8 }
 0x13f   :  { %2421 = vmatprep.subr.bf16.mxu0 %v7829_v10 }
 0x140   :  { %2461 = vmatpush2.bf16.msra.mxu1 %v7872_v20  ;;  %v8089_v20 = vld [vmem:[%s9798_s5 + $0x788] sm:$0xff] }
 0x141   :  { %2462 = vmatprep.subr.bf16.mxu1 %v7877_v22  ;;  %v2697_v22 = vld [vmem:[%s9798_s5 + $0x680] sm:$0xff] }
 0x142   :  { %2422 = vmatpush2.bf16.msra.mxu0 %v7827_v12  ;;  %v2713_v12 = vld [vmem:[%s9798_s5 + $0x700] sm:$0xff] }
 0x143   :  { %2423 = vmatprep.subr.bf16.mxu0 %v7832_v15  ;;  %v8084_v15 = vld [vmem:[%s9798_s5 + $0x708] sm:$0xff]  ;;  %v7119_v16 = vcombine.low %v2713_v12, %v2729_v13 }
 0x144   :  { %2463 = vmatpush2.bf16.msra.mxu1 %v7875_v25 }
 0x145   :  { %2464 = vmatprep.subr.bf16.mxu1 %v7880_v27  ;;  %v2665_v27 = vld [vmem:[%s9798_s5 + $0x580] sm:$0xff] }
 0x146   :  { %2424 = vmatpush2.bf16.msra.mxu0 %v7830_v17  ;;  %v7120_v17 = vcombine.high %v2713_v12, %v2729_v13  ;;  %v2857_v12 = vld [vmem:[%s9798_s5 + $0xb80] sm:$0xff] }
 0x147   :  { %2425 = vmatprep.subr.bf16.mxu0 %v7835_v21  ;;  %v2681_v21 = vld [vmem:[%s9798_s5 + $0x600] sm:$0xff] }
 0x148   :  { %2465 = vmatpush2.bf16.msra.mxu1 %v7878_v30  ;;  %v7088_v25 = vcombine.high %v2681_v21, %v2697_v22 }
 0x149   :  { %2466 = vmatprep.subr.bf16.mxu1 %v7883_v32  ;;  %v2633_v32 = vld [vmem:[%s9798_s5 + $0x480] sm:$0xff] }
 0x14a   :  { %2426 = vmatpush2.bf16.msra.mxu0 %v7833_v23  ;;  %v7122_v23 = vcombine.high %v8084_v15, %v8089_v20 }
 0x14b   :  { %2427 = vmatprep.subr.bf16.mxu0 %v7838_v26  ;;  %v2649_v26 = vld [vmem:[%s9798_s5 + $0x500] sm:$0xff] }
 0x14c   :  { %2467 = vmatpush2.bf16.msra.mxu1 %v7881_v34  ;;  %v7056_v30 = vcombine.high %v2649_v26, %v2665_v27 }
 0x14d   :  { %2468 = vmatprep.subr.bf16.mxu1 %v7886_v36  ;;  %v2601_v36 = vld [vmem:[%s9798_s5 + $0x380] sm:$0xff] }
 0x14e   :  { %2428 = vmatpush2.bf16.msra.mxu0 %v7836_v28  ;;  %v7087_v28 = vcombine.low %v2681_v21, %v2697_v22  ;;  %v2809_v22 = vld [vmem:[%s9798_s5 + $0xa00] sm:$0xff] }
 0x14f   :  { %2429 = vmatprep.subr.bf16.mxu0 %v7841_v31  ;;  %v2617_v31 = vld [vmem:[%s9798_s5 + $0x400] sm:$0xff] }
 0x150   :  { %2469 = vmatpush2.bf16.msra.mxu1 %v7884_v44  ;;  %v7024_v34 = vcombine.high %v2617_v31, %v2633_v32 }
 0x151   :  { %2470 = vmatprep.subr.bf16.mxu1 %v7889_v49 }
 0x152   :  { %2430 = vmatpush2.bf16.msra.mxu0 %v7839_v33  ;;  %v7055_v33 = vcombine.low %v2649_v26, %v2665_v27 }
 0x153   :  { %2431 = vmatprep.subr.bf16.mxu0 %v7844_v35  ;;  %v2585_v35 = vld [vmem:[%s9798_s5 + $0x300] sm:$0xff] }
 0x154   :  { %2471 = vmatpush2.bf16.msra.mxu1 %v7887_v63  ;;  %v6992_v44 = vcombine.high %v2585_v35, %v2601_v36  ;;  %v6991_v14 = vcombine.low %v2585_v35, %v2601_v36  ;;  %v2489_v63 = vld [vmem:[%s9798_s5] sm:$0xff] }
 0x155   :  { %2472 = vmatprep.subr.bf16.mxu1 %v7892_v54 }
 0x156   :  { %2432 = vmatpush2.bf16.msra.mxu0 %v7842_v40  ;;  %v7023_v40 = vcombine.low %v2617_v31, %v2633_v32 }
 0x157   :  { %2433 = vmatprep.subr.bf16.mxu0 %v7847_v47  ;;  %v2553_v47 = vld [vmem:[%s9798_s5 + $0x200] sm:$0xff] }
 0x158   :  { %2473 = vmatpush2.bf16.msra.mxu1 %v7890_v41  ;;  %v6959_v49 = vcombine.low %v2553_v47, %v2569_v62 }
 0x159   :  { %2474 = vmatprep.subr.bf16.mxu1 %v7895_v61 }
 0x15a   :  { %2434 = vmatpush2.bf16.msra.mxu0 %v7845_v19  ;;  %v6960_v19 = vcombine.high %v2553_v47, %v2569_v62  ;;  %v2698_v62 = vld [vmem:[%s9798_s5 + $0x688] sm:$0xff] }
 0x15b   :  { %5729 = vmatprep.subr.bf16.mxu0 %v7120_v17 }
 0x15c   :  { %2475 = vmatpush2.bf16.msra.mxu1 %v7893_v1  ;;  %v2873_v1 = vld [vmem:[%s9798_s5 + $0xc00] sm:$0xff] }
 0x15d   :  { %v1787_v18 = vpop.f32.mrf.mxu0  ;;  %5770 = vmatprep.subr.bf16.mxu1 %v7122_v23  ;;  %v2825_v23 = vld [vmem:[%s9798_s5 + $0xa80] sm:$0xff] }
 0x15e   :  { %v1828_v29 = vpop.f32.mrf.mxu1  ;;  %v1788_v51 = vadd.f32 %v1787_v18, %v1747_v50  ;;  %v6928_v50 = vcombine.high %v2521_v3, %v2537_v48  ;;  %v2505_v18 = vld [vmem:[%s9798_s5 + $0x80] sm:$0xff]  ;;  %v7216_v31 = vcombine.high %v2809_v22, %v2825_v23 }
 0x15f   :  { %v1789_v52 = vpop.f32.mrf.mxu0 }
 0x160   :  { %v1830_v53 = vpop.f32.mrf.mxu1  ;;  %v1829_v55 = vadd.f32 %v1828_v29, %v1788_v51  ;;  %v1790_v56 = vadd.f32 %v1789_v52, %v1749_v24  ;;  %v6927_v29 = vcombine.low %v2521_v3, %v2537_v48  ;;  %v6896_v24 = vcombine.high %v2489_v63, %v2505_v18  ;;  %v2969_v51 = vld [vmem:[%s9798_s5 + $0xf00] sm:$0xff] }
 0x161   :  { %v1791_v57 = vpop.f32.mrf.mxu0  ;;  %v2985_v52 = vld [vmem:[%s9798_s5 + $0xf80] sm:$0xff] }
 0x162   :  { %v1832_v45 = vpop.f32.mrf.mxu1  ;;  %v1831_v58 = vadd.f32 %v1830_v53, %v1790_v56  ;;  %v1999_v43 = vmax.f32 %v1829_v55, 0.0  ;;  %v6895_v53 = vcombine.low %v2489_v63, %v2505_v18  ;;  %v7376_v54 = vcombine.high %v2969_v51, %v2985_v52  ;;  %v2937_v55 = vld [vmem:[%s9798_s5 + $0xe00] sm:$0xff] }
 0x163   :  { %v1792_v59 = vpop.f32.mrf.mxu0  ;;  %v2953_v56 = vld [vmem:[%s9798_s5 + $0xe80] sm:$0xff]  ;;  %v7375_v41 = vcombine.low %v2969_v51, %v2985_v52  ;;  %v8148_v57 = vsub.s32 2, %v7994_v42  ;;  %v2586_v51 = vld [vmem:[%s9798_s5 + $0x308] sm:$0xff] }
 0x164   :  { %v1833_v60 = vpop.f32.mrf.mxu1  ;;  %v2000_v0 = vmax.f32 %v1831_v58, 0.0  ;;  %v2003_v2 = vpack.c.bf16 %v1999_v43, %v1999_v43  ;;  %v7344_v45 = vcombine.high %v2937_v55, %v2953_v56  ;;  %v2905_v58 = vld [vmem:[%s9798_s5 + $0xd00] sm:$0xff]  ;;  %v8157_v59 = vsub.s32 3, %v7994_v42  ;;  %v2602_v52 = vld [vmem:[%s9798_s5 + $0x388] sm:$0xff] }
 0x165   :  { %v2921_v43 = vld [vmem:[%s9798_s5 + $0xd80] sm:$0xff]  ;;  %v7343_v60 = vcombine.low %v2937_v55, %v2953_v56  ;;  %v324_v61 = vrot.slane %v8054_v38, %v8148_v57  ;;  %v2554_v55 = vld [vmem:[%s9798_s5 + $0x208] sm:$0xff] }
 0x166   :  { %v2004_v46 = vpack.c.bf16 %v2000_v0, %v2000_v0  ;;  %v7312_v0 = vcombine.high %v2905_v58, %v2921_v43  ;;  %v2570_v56 = vld [vmem:[%s9798_s5 + $0x288] sm:$0xff] }
 0x168   :  { %2435 = vmatprep.mubr.bf16.mxu0 %v2004_v46  ;;  %v2889_v46 = vld [vmem:[%s9798_s5 + $0xc80] sm:$0xff] }
 0x169   :  { %2436 = vmatmul.mubr.bf16.vlgmr.msra.gmra.mxu0 %v2003_v2  ;;  %v328_v2 = vrot.slane %v8054_v38, %v8157_v59 }
 0x16a   :  { %5730 = vmatpush1.bf16.msra.mxu0 %v7119_v16  ;;  %v7279_v16 = vcombine.low %v2873_v1, %v2889_v46 }
 0x16b   :  { %5731 = vmatprep.subr.bf16.mxu0 %v7088_v25 }
 0x16e   :  { %5732 = vmatpush1.bf16.msra.mxu0 %v7087_v28 }
 0x16f   :  { %5733 = vmatprep.subr.bf16.mxu0 %v7056_v30 }
 0x172   :  { %5734 = vmatpush1.bf16.msra.mxu0 %v7055_v33 }
 0x173   :  { %5735 = vmatprep.subr.bf16.mxu0 %v7024_v34 }
 0x176   :  { %5736 = vmatpush1.bf16.msra.mxu0 %v7023_v40 }
 0x177   :  { %5737 = vmatprep.subr.bf16.mxu0 %v6992_v44  ;;  %v7215_v44 = vcombine.low %v2809_v22, %v2825_v23  ;;  %v2874_v23 = vld [vmem:[%s9798_s5 + $0xc08] sm:$0xff] }
 0x17a   :  { %5738 = vmatpush1.bf16.msra.mxu0 %v6991_v14 }
 0x17b   :  { %5739 = vmatprep.subr.bf16.mxu0 %v6960_v19  ;;  %v7121_v19 = vcombine.low %v8084_v15, %v8089_v20  ;;  %v2618_v15 = vld [vmem:[%s9798_s5 + $0x408] sm:$0xff] }
 0x17c   :  { %v2634_v20 = vld [vmem:[%s9798_s5 + $0x488] sm:$0xff] }
 0x17e   :  { %5740 = vmatpush1.bf16.msra.mxu0 %v6959_v49  ;;  %v2650_v49 = vld [vmem:[%s9798_s5 + $0x508] sm:$0xff] }
 0x17f   :  { %5741 = vmatprep.subr.bf16.mxu0 %v6928_v50  ;;  %v2666_v50 = vld [vmem:[%s9798_s5 + $0x588] sm:$0xff] }
 0x180   :  { %v7058_v18 = vcombine.high %v2650_v49, %v2666_v50 }
 0x182   :  { %5742 = vmatpush1.bf16.msra.mxu0 %v6927_v29  ;;  %v7057_v29 = vcombine.low %v2650_v49, %v2666_v50  ;;  %v2745_v49 = vld [vmem:[%s9798_s5 + $0x800] sm:$0xff] }
 0x183   :  { %5743 = vmatprep.subr.bf16.mxu0 %v6896_v24  ;;  %v7026_v24 = vcombine.high %v2618_v15, %v2634_v20  ;;  %v2761_v50 = vld [vmem:[%s9798_s5 + $0x880] sm:$0xff] }
 0x186   :  { %5744 = vmatpush1.bf16.msra.mxu0 %v6895_v53  ;;  %v7025_v53 = vcombine.low %v2618_v15, %v2634_v20  ;;  %v2762_v15 = vld [vmem:[%s9798_s5 + $0x888] sm:$0xff] }
 0x187   :  { %5745 = vmatprep.subr.bf16.mxu0 %v7376_v54  ;;  %v6994_v54 = vcombine.high %v2586_v51, %v2602_v52 }
 0x18a   :  { %5746 = vmatpush2.bf16.msra.mxu0 %v7375_v41  ;;  %v6993_v41 = vcombine.low %v2586_v51, %v2602_v52 }
 0x18b   :  { %5747 = vmatprep.subr.bf16.mxu0 %v7344_v45  ;;  %v6962_v45 = vcombine.high %v2554_v55, %v2570_v56 }
 0x18e   :  { %5748 = vmatpush2.bf16.msra.mxu0 %v7343_v60  ;;  %v6961_v60 = vcombine.low %v2554_v55, %v2570_v56  ;;  %v2716_v55 = vld [vmem:[%s9798_s5 + $0x718] sm:$0xff] }
 0x18f   :  { %5749 = vmatprep.subr.bf16.mxu0 %v7312_v0  ;;  %v2490_v0 = vld [vmem:[%s9798_s5 + $0x8] sm:$0xff] }
 0x19d   :  { %v8067_v4 = vpop.f32.mrf.mxu0 }
 0x19e   :  { %v8069_v5 = vpop.f32.mrf.mxu1 }
 0x19f   :  { %v8071_v6 = vpop.f32.mrf.mxu0 }
 0x1a0   :  { %v8073_v7 = vpop.f32.mrf.mxu1  ;;  %v1872_v13 = vadd.f32 %v8071_v6, %v328_v2 }
 0x1a1   :  { %v1873_v8 = vpop.f32.mrf.mxu0 }
 0x1a2   :  { %v1914_v9 = vpop.f32.mrf.mxu1  ;;  %v7311_v8 = vcombine.low %v2905_v58, %v2921_v43  ;;  %v1913_v25 = vadd.f32 %v8073_v7, %v1872_v13  ;;  %v2682_v7 = vld [vmem:[%s9798_s5 + $0x608] sm:$0xff] }
 0x1a3   :  { %v1874_v10 = vpop.f32.mrf.mxu0  ;;  %v1870_v9 = vadd.f32 %v8067_v4, %v324_v61  ;;  %v7090_v48 = vcombine.high %v2682_v7, %v2698_v62  ;;  %v7089_v63 = vcombine.low %v2682_v7, %v2698_v62  ;;  %v2522_v58 = vld [vmem:[%s9798_s5 + $0x108] sm:$0xff] }
 0x1a4   :  { %v1915_v11 = vpop.f32.mrf.mxu1  ;;  %v7280_v10 = vcombine.high %v2873_v1, %v2889_v46  ;;  %5750 = vmatpush2.bf16.msra.mxu0 %v7311_v8  ;;  %v2538_v43 = vld [vmem:[%s9798_s5 + $0x188] sm:$0xff] }
 0x1a5   :  { %v2841_v11 = vld [vmem:[%s9798_s5 + $0xb00] sm:$0xff]  ;;  %v1911_v38 = vadd.f32 %v8069_v5, %v1870_v9  ;;  %v6930_v61 = vcombine.high %v2522_v58, %v2538_v43  ;;  %v2506_v1 = vld [vmem:[%s9798_s5 + $0x88] sm:$0xff]  ;;  %v6929_v46 = vcombine.low %v2522_v58, %v2538_v43 }
 0x1a6   :  { %5751 = vmatprep.subr.bf16.mxu0 %v7280_v10  ;;  %v7248_v17 = vcombine.high %v2841_v11, %v2857_v12  ;;  %v7247_v28 = vcombine.low %v2841_v11, %v2857_v12  ;;  %v6898_v2 = vcombine.high %v2490_v0, %v2506_v1  ;;  %v2970_v8 = vld [vmem:[%s9798_s5 + $0xf08] sm:$0xff]  ;;  %v6897_v10 = vcombine.low %v2490_v0, %v2506_v1 }
 0x1a7   :  { %v2986_v9 = vld [vmem:[%s9798_s5 + $0xf88] sm:$0xff] }
 0x1a8   :  { %5752 = vmatpush2.bf16.msra.mxu0 %v7279_v16  ;;  %v7378_v11 = vcombine.high %v2970_v8, %v2986_v9  ;;  %v2938_v12 = vld [vmem:[%s9798_s5 + $0xe08] sm:$0xff]  ;;  %v7377_v16 = vcombine.low %v2970_v8, %v2986_v9 }
 0x1a9   :  { %5753 = vmatprep.subr.bf16.mxu0 %v7248_v17  ;;  %v2954_v13 = vld [vmem:[%s9798_s5 + $0xe88] sm:$0xff] }
 0x1aa   :  { %v2906_v17 = vld [vmem:[%s9798_s5 + $0xd08] sm:$0xff] }
 0x1ab   :  { %v2794_v7 = vld [vmem:[%s9798_s5 + $0x988] sm:$0xff] }
 0x1ac   :  { %5754 = vmatpush2.bf16.msra.mxu0 %v7247_v28  ;;  %v2858_v28 = vld [vmem:[%s9798_s5 + $0xb88] sm:$0xff] }
 0x1ad   :  { %5755 = vmatprep.subr.bf16.mxu0 %v7216_v31  ;;  %v2810_v31 = vld [vmem:[%s9798_s5 + $0xa08] sm:$0xff] }
 0x1b0   :  { %5756 = vmatpush2.bf16.msra.mxu0 %v7215_v44  ;;  %v2778_v44 = vld [vmem:[%s9798_s5 + $0x908] sm:$0xff] }
 0x1dd   :  { %v1951_v21 = vpop.f32.mrf.mxu0 }
 0x1de   :  { %v1992_v4 = vpop.f32.mrf.mxu1  ;;  %v1952_v26 = vadd.f32 %v1951_v21, %v1911_v38  ;;  %v7346_v38 = vcombine.high %v2938_v12, %v2954_v13  ;;  %v2922_v21 = vld [vmem:[%s9798_s5 + $0xd88] sm:$0xff] }
 0x1df   :  { %v1953_v6 = vpop.f32.mrf.mxu0  ;;  %v7314_v22 = vcombine.high %v2906_v17, %v2922_v21 }
 0x1e0   :  { %v1994_v27 = vpop.f32.mrf.mxu1  ;;  %v1993_v5 = vadd.f32 %v1992_v4, %v1952_v26  ;;  %v1954_v30 = vadd.f32 %v1953_v6, %v1913_v25  ;;  %v7345_v4 = vcombine.low %v2938_v12, %v2954_v13  ;;  %v2890_v25 = vld [vmem:[%s9798_s5 + $0xc88] sm:$0xff]  ;;  %v7313_v26 = vcombine.low %v2906_v17, %v2922_v21  ;;  %v2699_v17 = vld [vmem:[%s9798_s5 + $0x690] sm:$0xff]  ;;  %v2684_v21 = vld [vmem:[%s9798_s5 + $0x618] sm:$0xff] }
 0x1e1   :  { %v1955_v32 = vpop.f32.mrf.mxu0  ;;  %v7282_v6 = vcombine.high %v2874_v23, %v2890_v25 }
 0x1e2   :  { %v1996_v33 = vpop.f32.mrf.mxu1  ;;  %v1995_v34 = vadd.f32 %v1994_v27, %v1954_v30  ;;  %v2001_v35 = vmax.f32 %v1993_v5, 0.0  ;;  %v2842_v27 = vld [vmem:[%s9798_s5 + $0xb08] sm:$0xff]  ;;  %v7281_v5 = vcombine.low %v2874_v23, %v2890_v25  ;;  %v2651_v25 = vld [vmem:[%s9798_s5 + $0x510] sm:$0xff] }
 0x1e3   :  { %v1956_v36 = vpop.f32.mrf.mxu0  ;;  %v7250_v30 = vcombine.high %v2842_v27, %v2858_v28  ;;  %v2826_v32 = vld [vmem:[%s9798_s5 + $0xa88] sm:$0xff]  ;;  %v7249_v33 = vcombine.low %v2842_v27, %v2858_v28  ;;  %v2667_v27 = vld [vmem:[%s9798_s5 + $0x590] sm:$0xff]  ;;  %v2652_v28 = vld [vmem:[%s9798_s5 + $0x518] sm:$0xff] }
 0x1e4   :  { %v1997_v40 = vpop.f32.mrf.mxu1  ;;  %v2002_v47 = vmax.f32 %v1995_v34, 0.0  ;;  %v2005_v3 = vpack.c.bf16 %v2001_v35, %v2001_v35  ;;  %v7218_v34 = vcombine.high %v2810_v31, %v2826_v32  ;;  %v7217_v35 = vcombine.low %v2810_v31, %v2826_v32  ;;  %v2777_v36 = vld [vmem:[%s9798_s5 + $0x900] sm:$0xff] }
 0x1e5   :  { %v2793_v40 = vld [vmem:[%s9798_s5 + $0x980] sm:$0xff]  ;;  %v7060_v32 = vcombine.high %v2651_v25, %v2667_v27 }
 0x1e6   :  { %v2006_v14 = vpack.c.bf16 %v2002_v47, %v2002_v47  ;;  %v7184_v47 = vcombine.high %v2777_v36, %v2793_v40 }
 0x1e8   :  { %2476 = vmatprep.mubr.bf16.mxu1 %v2006_v14  ;;  %v7183_v14 = vcombine.low %v2777_v36, %v2793_v40  ;;  %5757 = vmatprep.subr.bf16.mxu0 %v7184_v47  ;;  %v2620_v36 = vld [vmem:[%s9798_s5 + $0x418] sm:$0xff] }
 0x1e9   :  { %2477 = vmatmul.mubr.bf16.vlgmr.msra.gmra.mxu1 %v2005_v3  ;;  %v7186_v3 = vcombine.high %v2778_v44, %v2794_v7  ;;  %v2636_v40 = vld [vmem:[%s9798_s5 + $0x498] sm:$0xff] }
 0x1ea   :  { %5771 = vmatpush1.bf16.msra.mxu1 %v7121_v19  ;;  %v7185_v19 = vcombine.low %v2778_v44, %v2794_v7  ;;  %5758 = vmatpush2.bf16.msra.mxu0 %v7183_v14  ;;  %v7059_v44 = vcombine.low %v2651_v25, %v2667_v27  ;;  %v2587_v14 = vld [vmem:[%s9798_s5 + $0x310] sm:$0xff]  ;;  %v2940_v27 = vld [vmem:[%s9798_s5 + $0xe18] sm:$0xff] }
 0x1eb   :  { %5772 = vmatprep.subr.bf16.mxu1 %v7090_v48 }
 0x1ee   :  { %5773 = vmatpush1.bf16.msra.mxu1 %v7089_v63  ;;  %v2746_v63 = vld [vmem:[%s9798_s5 + $0x808] sm:$0xff] }
 0x1ef   :  { %5774 = vmatprep.subr.bf16.mxu1 %v7058_v18  ;;  %v7152_v18 = vcombine.high %v2745_v49, %v2761_v50  ;;  %v7154_v51 = vcombine.high %v2746_v63, %v2762_v15 }
 0x1f1   :  { %5759 = vmatprep.subr.bf16.mxu0 %v7152_v18 }
 0x1f2   :  { %5775 = vmatpush1.bf16.msra.mxu1 %v7057_v29  ;;  %v7151_v29 = vcombine.low %v2745_v49, %v2761_v50  ;;  %v7029_v50 = vcombine.low %v2620_v36, %v2636_v40 }
 0x1f3   :  { %5776 = vmatprep.subr.bf16.mxu1 %v7026_v24  ;;  %v7153_v24 = vcombine.low %v2746_v63, %v2762_v15  ;;  %v2555_v15 = vld [vmem:[%s9798_s5 + $0x210] sm:$0xff] }
 0x1f4   :  { %5760 = vmatpush2.bf16.msra.mxu0 %v7151_v29  ;;  %v2556_v29 = vld [vmem:[%s9798_s5 + $0x218] sm:$0xff] }
 0x1f6   :  { %5777 = vmatpush1.bf16.msra.mxu1 %v7025_v53  ;;  %v2715_v53 = vld [vmem:[%s9798_s5 + $0x710] sm:$0xff] }
 0x1f7   :  { %5778 = vmatprep.subr.bf16.mxu1 %v6994_v54  ;;  %v2731_v54 = vld [vmem:[%s9798_s5 + $0x790] sm:$0xff] }
 0x1f8   :  { %v7124_v56 = vcombine.high %v2715_v53, %v2731_v54 }
 0x1fa   :  { %5779 = vmatpush1.bf16.msra.mxu1 %v6993_v41  ;;  %v2732_v41 = vld [vmem:[%s9798_s5 + $0x798] sm:$0xff]  ;;  %5811 = vmatprep.subr.bf16.mxu0 %v7124_v56  ;;  %v2539_v56 = vld [vmem:[%s9798_s5 + $0x190] sm:$0xff] }
 0x1fb   :  { %5780 = vmatprep.subr.bf16.mxu1 %v6962_v45  ;;  %v7123_v45 = vcombine.low %v2715_v53, %v2731_v54  ;;  %v7125_v58 = vcombine.low %v2716_v55, %v2732_v41  ;;  %v7126_v43 = vcombine.high %v2716_v55, %v2732_v41  ;;  %v2523_v55 = vld [vmem:[%s9798_s5 + $0x110] sm:$0xff]  ;;  %v2524_v41 = vld [vmem:[%s9798_s5 + $0x118] sm:$0xff] }
 0x1fe   :  { %5781 = vmatpush1.bf16.msra.mxu1 %v6961_v60  ;;  %v2071_v60 = vld [vmem:[%s9797_s4] sm:$0x3] }
 0x1ff   :  { %5782 = vmatprep.subr.bf16.mxu1 %v6930_v61  ;;  %v2076_v61 = vrot.slane %v2071_v60, %v8049_v37  ;;  %v2080_v0 = vrot.slane %v2071_v60, %v8057_v39  ;;  %v6932_v60 = vcombine.high %v2523_v55, %v2539_v56 }
 0x202   :  { %5783 = vmatpush1.bf16.msra.mxu1 %v6929_v46 }
 0x203   :  { %5784 = vmatprep.subr.bf16.mxu1 %v6898_v2 }
 0x206   :  { %5785 = vmatpush1.bf16.msra.mxu1 %v6897_v10 }
 0x207   :  { %5786 = vmatprep.subr.bf16.mxu1 %v7378_v11 }
 0x20a   :  { %5787 = vmatpush2.bf16.msra.mxu1 %v7377_v16  ;;  %v2683_v16 = vld [vmem:[%s9798_s5 + $0x610] sm:$0xff] }
 0x20b   :  { %5788 = vmatprep.subr.bf16.mxu1 %v7346_v38 }
 0x20e   :  { %5789 = vmatpush2.bf16.msra.mxu1 %v7345_v4  ;;  %v2700_v4 = vld [vmem:[%s9798_s5 + $0x698] sm:$0xff] }
 0x20f   :  { %5790 = vmatprep.subr.bf16.mxu1 %v7314_v22  ;;  %v7093_v31 = vcombine.low %v2684_v21, %v2700_v4 }
 0x212   :  { %5791 = vmatpush2.bf16.msra.mxu1 %v7313_v26  ;;  %v7092_v26 = vcombine.high %v2683_v16, %v2699_v17 }
 0x213   :  { %5792 = vmatprep.subr.bf16.mxu1 %v7282_v6  ;;  %v7094_v6 = vcombine.high %v2684_v21, %v2700_v4 }
 0x216   :  { %5793 = vmatpush2.bf16.msra.mxu1 %v7281_v5  ;;  %v2668_v5 = vld [vmem:[%s9798_s5 + $0x598] sm:$0xff] }
 0x217   :  { %5794 = vmatprep.subr.bf16.mxu1 %v7250_v30  ;;  %v7091_v30 = vcombine.low %v2683_v16, %v2699_v17  ;;  %v7061_v47 = vcombine.low %v2652_v28, %v2668_v5  ;;  %v2972_v16 = vld [vmem:[%s9798_s5 + $0xf18] sm:$0xff] }
 0x21a   :  { %5795 = vmatpush2.bf16.msra.mxu1 %v7249_v33  ;;  %v7062_v33 = vcombine.high %v2652_v28, %v2668_v5  ;;  %v2956_v28 = vld [vmem:[%s9798_s5 + $0xe98] sm:$0xff] }
 0x21b   :  { %5796 = vmatprep.subr.bf16.mxu1 %v7218_v34  ;;  %v2619_v34 = vld [vmem:[%s9798_s5 + $0x410] sm:$0xff] }
 0x21e   :  { %5797 = vmatpush2.bf16.msra.mxu1 %v7217_v35  ;;  %v2635_v35 = vld [vmem:[%s9798_s5 + $0x490] sm:$0xff] }
 0x21f   :  { %5798 = vmatprep.subr.bf16.mxu1 %v7186_v3  ;;  %v7028_v7 = vcombine.high %v2619_v34, %v2635_v35  ;;  %v2588_v3 = vld [vmem:[%s9798_s5 + $0x318] sm:$0xff]  ;;  %v7027_v49 = vcombine.low %v2619_v34, %v2635_v35  ;;  %v2923_v34 = vld [vmem:[%s9798_s5 + $0xd90] sm:$0xff] }
 0x220   :  { %v2908_v35 = vld [vmem:[%s9798_s5 + $0xd18] sm:$0xff] }
 0x222   :  { %5799 = vmatpush2.bf16.msra.mxu1 %v7185_v19  ;;  %v2603_v19 = vld [vmem:[%s9798_s5 + $0x390] sm:$0xff] }
 0x223   :  { %5800 = vmatprep.subr.bf16.mxu1 %v7154_v51  ;;  %v6996_v63 = vcombine.high %v2587_v14, %v2603_v19  ;;  %v6995_v51 = vcombine.low %v2587_v14, %v2603_v19  ;;  %v2891_v14 = vld [vmem:[%s9798_s5 + $0xc90] sm:$0xff]  ;;  %v2876_v19 = vld [vmem:[%s9798_s5 + $0xc18] sm:$0xff] }
 0x226   :  { %5801 = vmatpush2.bf16.msra.mxu1 %v7153_v24  ;;  %v2572_v24 = vld [vmem:[%s9798_s5 + $0x298] sm:$0xff] }
 0x227   :  { %5852 = vmatprep.subr.bf16.mxu1 %v7126_v43  ;;  %v6966_v54 = vcombine.high %v2556_v29, %v2572_v24  ;;  %v6965_v43 = vcombine.low %v2556_v29, %v2572_v24  ;;  %v2860_v29 = vld [vmem:[%s9798_s5 + $0xb98] sm:$0xff] }
 0x229   :  { %v2437_v62 = vpop.f32.mrf.mxu0 }
 0x22a   :  { %v2438_v1 = vadd.f32 %v2437_v62, %v2076_v61  ;;  %v7030_v62 = vcombine.high %v2620_v36, %v2636_v40  ;;  %v2924_v36 = vld [vmem:[%s9798_s5 + $0xd98] sm:$0xff] }
 0x22b   :  { %v2439_v48 = vpop.f32.mrf.mxu0 }
 0x22c   :  { %v2440_v2 = vadd.f32 %v2439_v48, %v2080_v0  ;;  %v2604_v48 = vld [vmem:[%s9798_s5 + $0x398] sm:$0xff]  ;;  %v2491_v0 = vld [vmem:[%s9798_s5 + $0x10] sm:$0xff] }
 0x22d   :  { %v2441_v20 = vpop.f32.mrf.mxu0  ;;  %v6998_v18 = vcombine.high %v2588_v3, %v2604_v48 }
 0x22e   :  { %v2571_v20 = vld [vmem:[%s9798_s5 + $0x290] sm:$0xff] }
 0x22f   :  { %v2442_v52 = vpop.f32.mrf.mxu0  ;;  %v6964_v53 = vcombine.high %v2555_v15, %v2571_v20 }
 0x230   :  { %v6997_v52 = vcombine.low %v2588_v3, %v2604_v48  ;;  %v2892_v3 = vld [vmem:[%s9798_s5 + $0xc98] sm:$0xff] }
 0x2a9   :  { %v2478_v46 = vpop.f32.mrf.mxu1 }
 0x2aa   :  { %v2479_v8 = vadd.f32 %v2478_v46, %v2438_v1  ;;  %v2507_v1 = vld [vmem:[%s9798_s5 + $0x90] sm:$0xff]  ;;  %v2492_v46 = vld [vmem:[%s9798_s5 + $0x18] sm:$0xff] }
 0x2ab   :  { %v2480_v9 = vpop.f32.mrf.mxu1  ;;  %v6899_v17 = vcombine.low %v2491_v0, %v2507_v1 }
 0x2ac   :  { %v2481_v10 = vadd.f32 %v2480_v9, %v2440_v2  ;;  %v2485_v11 = vmax.f32 %v2479_v8, 0.0  ;;  %v2508_v2 = vld [vmem:[%s9798_s5 + $0x98] sm:$0xff]  ;;  %v6931_v8 = vcombine.low %v2523_v55, %v2539_v56  ;;  %v2827_v55 = vld [vmem:[%s9798_s5 + $0xa90] sm:$0xff] }
 0x2ad   :  { %v2482_v12 = vpop.f32.mrf.mxu1  ;;  %v6901_v21 = vcombine.low %v2492_v46, %v2508_v2  ;;  %v2812_v56 = vld [vmem:[%s9798_s5 + $0xa18] sm:$0xff] }
 0x2ae   :  { %v2486_v13 = vmax.f32 %v2481_v10, 0.0  ;;  %v8320_v23 = vpack.c.bf16 %v2485_v11, %v2485_v11  ;;  %v6900_v10 = vcombine.high %v2491_v0, %v2507_v1  ;;  %v6902_v11 = vcombine.high %v2492_v46, %v2508_v2  ;;  %v2971_v12 = vld [vmem:[%s9798_s5 + $0xf10] sm:$0xff]  ;;  %v2780_v1 = vld [vmem:[%s9798_s5 + $0x918] sm:$0xff] }
 0x2af   :  { %v2483_v38 = vpop.f32.mrf.mxu1  ;;  %v2795_v0 = vld [vmem:[%s9798_s5 + $0x990] sm:$0xff]  ;;  %v2796_v46 = vld [vmem:[%s9798_s5 + $0x998] sm:$0xff] }
 0x2b0   :  { %v8318_v22 = vpack.c.bf16 %v2486_v13, %v2486_v13  ;;  %v2987_v13 = vld [vmem:[%s9798_s5 + $0xf90] sm:$0xff]  ;;  %v2988_v38 = vld [vmem:[%s9798_s5 + $0xf98] sm:$0xff] }
 0x2b1   :  { %v7380_v4 = vcombine.high %v2971_v12, %v2987_v13  ;;  %v7382_v25 = vcombine.high %v2972_v16, %v2988_v38  ;;  %v7379_v5 = vcombine.low %v2971_v12, %v2987_v13  ;;  %v2763_v12 = vld [vmem:[%s9798_s5 + $0x890] sm:$0xff]  ;;  %v2748_v13 = vld [vmem:[%s9798_s5 + $0x818] sm:$0xff] }
 0x2b2   :  { %5761 = vmatprep.mubr.bf16.mxu0 %v8318_v22  ;;  %5802 = vmatprep.mubr.bf16.mxu1 %v8318_v22 }
 0x2b3   :  { %5762 = vmatmul.mubr.bf16.vlgmr.msra.gmra.mxu0 %v8320_v23  ;;  %5803 = vmatmul.mubr.bf16.vlgmr.msra.gmra.mxu1 %v8320_v23 }
 0x2b4   :  { %5812 = vmatpush1.bf16.msra.mxu0 %v7123_v45  ;;  %5853 = vmatpush1.bf16.msra.mxu1 %v7125_v58  ;;  %v2540_v45 = vld [vmem:[%s9798_s5 + $0x198] sm:$0xff]  ;;  %v6963_v58 = vcombine.low %v2555_v15, %v2571_v20  ;;  %v2859_v15 = vld [vmem:[%s9798_s5 + $0xb90] sm:$0xff] }
 0x2b5   :  { %5843 = vmatprep.mubr.bf16.mxu0 %v8318_v22  ;;  %5884 = vmatprep.mubr.bf16.mxu1 %v8318_v22  ;;  %v6934_v61 = vcombine.high %v2524_v41, %v2540_v45  ;;  %v6933_v9 = vcombine.low %v2524_v41, %v2540_v45  ;;  %v2844_v20 = vld [vmem:[%s9798_s5 + $0xb18] sm:$0xff] }
 0x2b6   :  { %5813 = vmatprep.subr.bf16.mxu0 %v7092_v26  ;;  %5854 = vmatprep.subr.bf16.mxu1 %v7094_v6  ;;  %v2939_v26 = vld [vmem:[%s9798_s5 + $0xe10] sm:$0xff]  ;;  %v2828_v41 = vld [vmem:[%s9798_s5 + $0xa98] sm:$0xff] }
 0x2b7   :  { %v2955_v6 = vld [vmem:[%s9798_s5 + $0xe90] sm:$0xff] }
 0x2b8   :  { %5814 = vmatpush1.bf16.msra.mxu0 %v7091_v30  ;;  %5855 = vmatpush1.bf16.msra.mxu1 %v7093_v31  ;;  %v7381_v30 = vcombine.low %v2972_v16, %v2988_v38  ;;  %v7348_v31 = vcombine.high %v2939_v26, %v2955_v6  ;;  %v7347_v40 = vcombine.low %v2939_v26, %v2955_v6  ;;  %v2764_v16 = vld [vmem:[%s9798_s5 + $0x898] sm:$0xff]  ;;  %v2733_v26 = vld [vmem:[%s9798_s5 + $0x7a0] sm:$0xff]  ;;  %v2718_v6 = vld [vmem:[%s9798_s5 + $0x728] sm:$0xff] }
 0x2b9   :  { %5815 = vmatprep.subr.bf16.mxu0 %v7060_v32  ;;  %5856 = vmatprep.subr.bf16.mxu1 %v7062_v33  ;;  %v7350_v32 = vcombine.high %v2940_v27, %v2956_v28  ;;  %v2907_v33 = vld [vmem:[%s9798_s5 + $0xd10] sm:$0xff] }
 0x2ba   :  { %v7315_v48 = vcombine.low %v2907_v33, %v2923_v34 }
 0x2bc   :  { %5816 = vmatpush1.bf16.msra.mxu0 %v7059_v44  ;;  %5857 = vmatpush1.bf16.msra.mxu1 %v7061_v47  ;;  %v7349_v44 = vcombine.low %v2940_v27, %v2956_v28  ;;  %v7316_v47 = vcombine.high %v2907_v33, %v2923_v34  ;;  %v2734_v27 = vld [vmem:[%s9798_s5 + $0x7a8] sm:$0xff]  ;;  %v2701_v33 = vld [vmem:[%s9798_s5 + $0x6a0] sm:$0xff] }
 0x2bd   :  { %5817 = vmatprep.subr.bf16.mxu0 %v7028_v7  ;;  %5858 = vmatprep.subr.bf16.mxu1 %v7030_v62  ;;  %v7318_v7 = vcombine.high %v2908_v35, %v2924_v36  ;;  %v2875_v62 = vld [vmem:[%s9798_s5 + $0xc10] sm:$0xff]  ;;  %v2686_v34 = vld [vmem:[%s9798_s5 + $0x628] sm:$0xff] }
 0x2be   :  { %v7283_v24 = vcombine.low %v2875_v62, %v2891_v14 }
 0x2c0   :  { %5818 = vmatpush1.bf16.msra.mxu0 %v7027_v49  ;;  %5859 = vmatpush1.bf16.msra.mxu1 %v7029_v50  ;;  %v7317_v49 = vcombine.low %v2908_v35, %v2924_v36  ;;  %v7284_v50 = vcombine.high %v2875_v62, %v2891_v14  ;;  %v2702_v35 = vld [vmem:[%s9798_s5 + $0x6a8] sm:$0xff]  ;;  %v2669_v62 = vld [vmem:[%s9798_s5 + $0x5a0] sm:$0xff] }
 0x2c1   :  { %5819 = vmatprep.subr.bf16.mxu0 %v6996_v63  ;;  %5860 = vmatprep.subr.bf16.mxu1 %v6998_v18  ;;  %v7286_v63 = vcombine.high %v2876_v19, %v2892_v3  ;;  %v2843_v18 = vld [vmem:[%s9798_s5 + $0xb10] sm:$0xff]  ;;  %v2654_v14 = vld [vmem:[%s9798_s5 + $0x528] sm:$0xff] }
 0x2c2   :  { %v7251_v45 = vcombine.low %v2843_v18, %v2859_v15 }
 0x2c4   :  { %5820 = vmatpush1.bf16.msra.mxu0 %v6995_v51  ;;  %5861 = vmatpush1.bf16.msra.mxu1 %v6997_v52  ;;  %v7285_v51 = vcombine.low %v2876_v19, %v2892_v3  ;;  %v7252_v52 = vcombine.high %v2843_v18, %v2859_v15  ;;  %v2670_v19 = vld [vmem:[%s9798_s5 + $0x5a8] sm:$0xff]  ;;  %v2637_v18 = vld [vmem:[%s9798_s5 + $0x4a0] sm:$0xff] }
 0x2c5   :  { %5821 = vmatprep.subr.bf16.mxu0 %v6964_v53  ;;  %5862 = vmatprep.subr.bf16.mxu1 %v6966_v54  ;;  %v7254_v53 = vcombine.high %v2844_v20, %v2860_v29  ;;  %v2811_v54 = vld [vmem:[%s9798_s5 + $0xa10] sm:$0xff]  ;;  %v2622_v15 = vld [vmem:[%s9798_s5 + $0x428] sm:$0xff] }
 0x2c6   :  { %v7219_v2 = vcombine.low %v2811_v54, %v2827_v55 }
 0x2c8   :  { %5822 = vmatpush1.bf16.msra.mxu0 %v6963_v58  ;;  %5863 = vmatpush1.bf16.msra.mxu1 %v6965_v43  ;;  %v7253_v58 = vcombine.low %v2844_v20, %v2860_v29  ;;  %v7220_v43 = vcombine.high %v2811_v54, %v2827_v55  ;;  %v2638_v20 = vld [vmem:[%s9798_s5 + $0x4a8] sm:$0xff]  ;;  %v2605_v54 = vld [vmem:[%s9798_s5 + $0x3a0] sm:$0xff] }
 0x2c9   :  { %5823 = vmatprep.subr.bf16.mxu0 %v6932_v60  ;;  %5864 = vmatprep.subr.bf16.mxu1 %v6934_v61  ;;  %v7222_v60 = vcombine.high %v2812_v56, %v2828_v41  ;;  %v2779_v61 = vld [vmem:[%s9798_s5 + $0x910] sm:$0xff]  ;;  %v2590_v55 = vld [vmem:[%s9798_s5 + $0x328] sm:$0xff] }
 0x2ca   :  { %v7187_v38 = vcombine.low %v2779_v61, %v2795_v0 }
 0x2cc   :  { %5824 = vmatpush1.bf16.msra.mxu0 %v6931_v8  ;;  %5865 = vmatpush1.bf16.msra.mxu1 %v6933_v9  ;;  %v7221_v8 = vcombine.low %v2812_v56, %v2828_v41  ;;  %v7188_v9 = vcombine.high %v2779_v61, %v2795_v0  ;;  %v2606_v56 = vld [vmem:[%s9798_s5 + $0x3a8] sm:$0xff]  ;;  %v2573_v61 = vld [vmem:[%s9798_s5 + $0x2a0] sm:$0xff] }
 0x2cd   :  { %5825 = vmatprep.subr.bf16.mxu0 %v6900_v10  ;;  %5866 = vmatprep.subr.bf16.mxu1 %v6902_v11  ;;  %v7190_v10 = vcombine.high %v2780_v1, %v2796_v46  ;;  %v2747_v11 = vld [vmem:[%s9798_s5 + $0x810] sm:$0xff]  ;;  %v2558_v0 = vld [vmem:[%s9798_s5 + $0x228] sm:$0xff] }
 0x2ce   :  { %v7155_v28 = vcombine.low %v2747_v11, %v2763_v12 }
 0x2d0   :  { %5826 = vmatpush1.bf16.msra.mxu0 %v6899_v17  ;;  %5867 = vmatpush1.bf16.msra.mxu1 %v6901_v21  ;;  %v7189_v17 = vcombine.low %v2780_v1, %v2796_v46  ;;  %v7156_v21 = vcombine.high %v2747_v11, %v2763_v12  ;;  %v2574_v1 = vld [vmem:[%s9798_s5 + $0x2a8] sm:$0xff]  ;;  %v2541_v11 = vld [vmem:[%s9798_s5 + $0x1a0] sm:$0xff] }
 0x2d1   :  { %5827 = vmatprep.subr.bf16.mxu0 %v7380_v4  ;;  %5868 = vmatprep.subr.bf16.mxu1 %v7382_v25  ;;  %v7158_v4 = vcombine.high %v2748_v13, %v2764_v16  ;;  %v2717_v25 = vld [vmem:[%s9798_s5 + $0x720] sm:$0xff]  ;;  %v2526_v12 = vld [vmem:[%s9798_s5 + $0x128] sm:$0xff] }
 0x2d2   :  { %v7127_v36 = vcombine.low %v2717_v25, %v2733_v26 }
 0x2d4   :  { %5828 = vmatpush2.bf16.msra.mxu0 %v7379_v5  ;;  %5869 = vmatpush2.bf16.msra.mxu1 %v7381_v30  ;;  %v7157_v5 = vcombine.low %v2748_v13, %v2764_v16  ;;  %v7128_v30 = vcombine.high %v2717_v25, %v2733_v26  ;;  %v2542_v13 = vld [vmem:[%s9798_s5 + $0x1a8] sm:$0xff]  ;;  %v2509_v25 = vld [vmem:[%s9798_s5 + $0xa0] sm:$0xff] }
 0x2d5   :  { %5829 = vmatprep.subr.bf16.mxu0 %v7348_v31  ;;  %5870 = vmatprep.subr.bf16.mxu1 %v7350_v32  ;;  %v7130_v31 = vcombine.high %v2718_v6, %v2734_v27  ;;  %v2685_v32 = vld [vmem:[%s9798_s5 + $0x620] sm:$0xff]  ;;  %v2494_v26 = vld [vmem:[%s9798_s5 + $0x28] sm:$0xff] }
 0x2d6   :  { %v7095_v3 = vcombine.low %v2685_v32, %v2701_v33 }
 0x2d8   :  { %5830 = vmatpush2.bf16.msra.mxu0 %v7347_v40  ;;  %5871 = vmatpush2.bf16.msra.mxu1 %v7349_v44  ;;  %v7129_v40 = vcombine.low %v2718_v6, %v2734_v27  ;;  %v7096_v44 = vcombine.high %v2685_v32, %v2701_v33  ;;  %v2510_v6 = vld [vmem:[%s9798_s5 + $0xa8] sm:$0xff]  ;;  %v2989_v32 = vld [vmem:[%s9798_s5 + $0xfa0] sm:$0xff] }
 0x2d9   :  { %5831 = vmatprep.subr.bf16.mxu0 %v7316_v47  ;;  %5872 = vmatprep.subr.bf16.mxu1 %v7318_v7  ;;  %v7098_v47 = vcombine.high %v2686_v34, %v2702_v35  ;;  %v2653_v7 = vld [vmem:[%s9798_s5 + $0x520] sm:$0xff]  ;;  %v2974_v33 = vld [vmem:[%s9798_s5 + $0xf28] sm:$0xff] }
 0x2da   :  { %v7063_v29 = vcombine.low %v2653_v7, %v2669_v62 }
 0x2dc   :  { %5832 = vmatpush2.bf16.msra.mxu0 %v7315_v48  ;;  %5873 = vmatpush2.bf16.msra.mxu1 %v7317_v49  ;;  %v7097_v48 = vcombine.low %v2686_v34, %v2702_v35  ;;  %v7064_v49 = vcombine.high %v2653_v7, %v2669_v62  ;;  %v2990_v34 = vld [vmem:[%s9798_s5 + $0xfa8] sm:$0xff]  ;;  %v2957_v7 = vld [vmem:[%s9798_s5 + $0xea0] sm:$0xff] }
 0x2dd   :  { %5833 = vmatprep.subr.bf16.mxu0 %v7284_v50  ;;  %5874 = vmatprep.subr.bf16.mxu1 %v7286_v63  ;;  %v7066_v50 = vcombine.high %v2654_v14, %v2670_v19  ;;  %v2621_v63 = vld [vmem:[%s9798_s5 + $0x420] sm:$0xff]  ;;  %v2942_v62 = vld [vmem:[%s9798_s5 + $0xe28] sm:$0xff] }
 0x2de   :  { %v7031_v41 = vcombine.low %v2621_v63, %v2637_v18 }
 0x2e0   :  { %5834 = vmatpush2.bf16.msra.mxu0 %v7283_v24  ;;  %5875 = vmatpush2.bf16.msra.mxu1 %v7285_v51  ;;  %v7065_v24 = vcombine.low %v2654_v14, %v2670_v19  ;;  %v7032_v51 = vcombine.high %v2621_v63, %v2637_v18  ;;  %v2958_v14 = vld [vmem:[%s9798_s5 + $0xea8] sm:$0xff]  ;;  %v2925_v63 = vld [vmem:[%s9798_s5 + $0xda0] sm:$0xff] }
 0x2e1   :  { %5835 = vmatprep.subr.bf16.mxu0 %v7252_v52  ;;  %5876 = vmatprep.subr.bf16.mxu1 %v7254_v53  ;;  %v7034_v52 = vcombine.high %v2622_v15, %v2638_v20  ;;  %v2589_v53 = vld [vmem:[%s9798_s5 + $0x320] sm:$0xff]  ;;  %v2910_v18 = vld [vmem:[%s9798_s5 + $0xd28] sm:$0xff] }
 0x2e2   :  { %v6999_v46 = vcombine.low %v2589_v53, %v2605_v54 }
 0x2e4   :  { %5836 = vmatpush2.bf16.msra.mxu0 %v7251_v45  ;;  %5877 = vmatpush2.bf16.msra.mxu1 %v7253_v58  ;;  %v7033_v45 = vcombine.low %v2622_v15, %v2638_v20  ;;  %v7000_v58 = vcombine.high %v2589_v53, %v2605_v54  ;;  %v2926_v15 = vld [vmem:[%s9798_s5 + $0xda8] sm:$0xff]  ;;  %v2893_v53 = vld [vmem:[%s9798_s5 + $0xca0] sm:$0xff] }
 0x2e5   :  { %5837 = vmatprep.subr.bf16.mxu0 %v7220_v43  ;;  %5878 = vmatprep.subr.bf16.mxu1 %v7222_v60  ;;  %v7002_v43 = vcombine.high %v2590_v55, %v2606_v56  ;;  %v2557_v60 = vld [vmem:[%s9798_s5 + $0x220] sm:$0xff]  ;;  %v2878_v54 = vld [vmem:[%s9798_s5 + $0xc28] sm:$0xff] }
 0x2e6   :  { %v6967_v16 = vcombine.low %v2557_v60, %v2573_v61 }
 0x2e8   :  { %5838 = vmatpush2.bf16.msra.mxu0 %v7219_v2  ;;  %5879 = vmatpush2.bf16.msra.mxu1 %v7221_v8  ;;  %v7001_v2 = vcombine.low %v2590_v55, %v2606_v56  ;;  %v6968_v8 = vcombine.high %v2557_v60, %v2573_v61  ;;  %v2894_v55 = vld [vmem:[%s9798_s5 + $0xca8] sm:$0xff]  ;;  %v2861_v60 = vld [vmem:[%s9798_s5 + $0xba0] sm:$0xff] }
 0x2e9   :  { %5839 = vmatprep.subr.bf16.mxu0 %v7188_v9  ;;  %5880 = vmatprep.subr.bf16.mxu1 %v7190_v10  ;;  %v6970_v9 = vcombine.high %v2558_v0, %v2574_v1  ;;  %v2525_v10 = vld [vmem:[%s9798_s5 + $0x120] sm:$0xff]  ;;  %v2846_v61 = vld [vmem:[%s9798_s5 + $0xb28] sm:$0xff] }
 0x2ea   :  { %v6935_v27 = vcombine.low %v2525_v10, %v2541_v11 }
 0x2ec   :  { %5840 = vmatpush2.bf16.msra.mxu0 %v7187_v38  ;;  %5881 = vmatpush2.bf16.msra.mxu1 %v7189_v17  ;;  %v6969_v38 = vcombine.low %v2558_v0, %v2574_v1  ;;  %v6936_v17 = vcombine.high %v2525_v10, %v2541_v11  ;;  %v2862_v0 = vld [vmem:[%s9798_s5 + $0xba8] sm:$0xff]  ;;  %v2829_v10 = vld [vmem:[%s9798_s5 + $0xaa0] sm:$0xff] }
 0x2ed   :  { %5841 = vmatprep.subr.bf16.mxu0 %v7156_v21  ;;  %5882 = vmatprep.subr.bf16.mxu1 %v7158_v4  ;;  %v6938_v21 = vcombine.high %v2526_v12, %v2542_v13  ;;  %v2493_v4 = vld [vmem:[%s9798_s5 + $0x20] sm:$0xff]  ;;  %v2814_v11 = vld [vmem:[%s9798_s5 + $0xa28] sm:$0xff] }
 0x2ee   :  { %v6903_v35 = vcombine.low %v2493_v4, %v2509_v25 }
 0x2f0   :  { %5842 = vmatpush2.bf16.msra.mxu0 %v7155_v28  ;;  %5883 = vmatpush2.bf16.msra.mxu1 %v7157_v5  ;;  %v6937_v28 = vcombine.low %v2526_v12, %v2542_v13  ;;  %v6904_v5 = vcombine.high %v2493_v4, %v2509_v25  ;;  %v2830_v12 = vld [vmem:[%s9798_s5 + $0xaa8] sm:$0xff]  ;;  %v2797_v4 = vld [vmem:[%s9798_s5 + $0x9a0] sm:$0xff] }
 0x2f1   :  { %5893 = vmatprep.subr.bf16.mxu0 %v7128_v30  ;;  %5934 = vmatprep.subr.bf16.mxu1 %v7130_v31  ;;  %v6906_v30 = vcombine.high %v2494_v26, %v2510_v6  ;;  %v2973_v31 = vld [vmem:[%s9798_s5 + $0xf20] sm:$0xff]  ;;  %v2782_v25 = vld [vmem:[%s9798_s5 + $0x928] sm:$0xff] }
 0x2f2   :  { %v7383_v19 = vcombine.low %v2973_v31, %v2989_v32 }
 0x2f3   :  { %5844 = vmatmul.mubr.bf16.vlgmr.msra.gmra.mxu0 %v8320_v23  ;;  %5885 = vmatmul.mubr.bf16.vlgmr.msra.gmra.mxu1 %v8320_v23 }
 0x2f4   :  { %5894 = vmatpush1.bf16.msra.mxu0 %v7127_v36  ;;  %5925 = vmatprep.mubr.bf16.mxu0 %v8318_v22  ;;  %v6905_v36 = vcombine.low %v2494_v26, %v2510_v6  ;;  %v2798_v26 = vld [vmem:[%s9798_s5 + $0x9a8] sm:$0xff] }
 0x2f5   :  { %5935 = vmatpush1.bf16.msra.mxu1 %v7129_v40  ;;  %5966 = vmatprep.mubr.bf16.mxu1 %v8318_v22  ;;  %v7384_v40 = vcombine.high %v2973_v31, %v2989_v32  ;;  %v2765_v31 = vld [vmem:[%s9798_s5 + $0x8a0] sm:$0xff]  ;;  %v2750_v32 = vld [vmem:[%s9798_s5 + $0x828] sm:$0xff] }
 0x2f6   :  { %5895 = vmatprep.subr.bf16.mxu0 %v7096_v44  ;;  %5936 = vmatprep.subr.bf16.mxu1 %v7098_v47  ;;  %v7386_v44 = vcombine.high %v2974_v33, %v2990_v34  ;;  %v2941_v47 = vld [vmem:[%s9798_s5 + $0xe20] sm:$0xff] }
 0x2f7   :  { %v7351_v20 = vcombine.low %v2941_v47, %v2957_v7 }
 0x2f8   :  { %5896 = vmatpush1.bf16.msra.mxu0 %v7095_v3  ;;  %v7385_v3 = vcombine.low %v2974_v33, %v2990_v34  ;;  %v2766_v33 = vld [vmem:[%s9798_s5 + $0x8a8] sm:$0xff] }
 0x2f9   :  { %5937 = vmatpush1.bf16.msra.mxu1 %v7097_v48  ;;  %5897 = vmatprep.subr.bf16.mxu0 %v7064_v49  ;;  %v7352_v48 = vcombine.high %v2941_v47, %v2957_v7  ;;  %v7354_v49 = vcombine.high %v2942_v62, %v2958_v14  ;;  %v2735_v47 = vld [vmem:[%s9798_s5 + $0x7b0] sm:$0xff]  ;;  %v2720_v7 = vld [vmem:[%s9798_s5 + $0x738] sm:$0xff] }
 0x2fa   :  { %5938 = vmatprep.subr.bf16.mxu1 %v7066_v50  ;;  %v2909_v50 = vld [vmem:[%s9798_s5 + $0xd20] sm:$0xff] }
 0x2fb   :  { %v7319_v56 = vcombine.low %v2909_v50, %v2925_v63 }
 0x2fc   :  { %5898 = vmatpush1.bf16.msra.mxu0 %v7063_v29  ;;  %v7353_v29 = vcombine.low %v2942_v62, %v2958_v14  ;;  %v2736_v62 = vld [vmem:[%s9798_s5 + $0x7b8] sm:$0xff] }
 0x2fd   :  { %5939 = vmatpush1.bf16.msra.mxu1 %v7065_v24  ;;  %5899 = vmatprep.subr.bf16.mxu0 %v7032_v51  ;;  %v7320_v24 = vcombine.high %v2909_v50, %v2925_v63  ;;  %v7322_v51 = vcombine.high %v2910_v18, %v2926_v15  ;;  %v2703_v50 = vld [vmem:[%s9798_s5 + $0x6b0] sm:$0xff] }
 0x2fe   :  { %5940 = vmatprep.subr.bf16.mxu1 %v7034_v52  ;;  %v2877_v52 = vld [vmem:[%s9798_s5 + $0xc20] sm:$0xff] }
 0x2ff   :  { %v7287_v1 = vcombine.low %v2877_v52, %v2893_v53 }
 0x300   :  { %5900 = vmatpush1.bf16.msra.mxu0 %v7031_v41  ;;  %v7321_v41 = vcombine.low %v2910_v18, %v2926_v15  ;;  %v2688_v18 = vld [vmem:[%s9798_s5 + $0x638] sm:$0xff] }
 0x301   :  { %5941 = vmatpush1.bf16.msra.mxu1 %v7033_v45  ;;  %5901 = vmatprep.subr.bf16.mxu0 %v7000_v58  ;;  %v7288_v45 = vcombine.high %v2877_v52, %v2893_v53  ;;  %v7290_v58 = vcombine.high %v2878_v54, %v2894_v55  ;;  %v2704_v15 = vld [vmem:[%s9798_s5 + $0x6b8] sm:$0xff] }
 0x302   :  { %5942 = vmatprep.subr.bf16.mxu1 %v7002_v43  ;;  %v2845_v43 = vld [vmem:[%s9798_s5 + $0xb20] sm:$0xff]  ;;  %v7102_v52 = vcombine.high %v2688_v18, %v2704_v15  ;;  %v2656_v53 = vld [vmem:[%s9798_s5 + $0x538] sm:$0xff] }
 0x303   :  { %v7255_v13 = vcombine.low %v2845_v43, %v2861_v60 }
 0x304   :  { %5902 = vmatpush1.bf16.msra.mxu0 %v6999_v46  ;;  %v7289_v46 = vcombine.low %v2878_v54, %v2894_v55  ;;  %v2672_v54 = vld [vmem:[%s9798_s5 + $0x5b8] sm:$0xff] }
 0x305   :  { %5943 = vmatpush1.bf16.msra.mxu1 %v7001_v2  ;;  %5903 = vmatprep.subr.bf16.mxu0 %v6968_v8  ;;  %v7256_v2 = vcombine.high %v2845_v43, %v2861_v60  ;;  %v7258_v8 = vcombine.high %v2846_v61, %v2862_v0  ;;  %v2639_v43 = vld [vmem:[%s9798_s5 + $0x4b0] sm:$0xff]  ;;  %v2624_v60 = vld [vmem:[%s9798_s5 + $0x438] sm:$0xff] }
 0x306   :  { %5944 = vmatprep.subr.bf16.mxu1 %v6970_v9  ;;  %v2813_v9 = vld [vmem:[%s9798_s5 + $0xa20] sm:$0xff] }
 0x307   :  { %v7223_v6 = vcombine.low %v2813_v9, %v2829_v10 }
 0x308   :  { %5904 = vmatpush1.bf16.msra.mxu0 %v6967_v16  ;;  %v7257_v16 = vcombine.low %v2846_v61, %v2862_v0  ;;  %v2640_v61 = vld [vmem:[%s9798_s5 + $0x4b8] sm:$0xff] }
 0x309   :  { %5945 = vmatpush1.bf16.msra.mxu1 %v6969_v38  ;;  %5905 = vmatprep.subr.bf16.mxu0 %v6936_v17  ;;  %v7224_v38 = vcombine.high %v2813_v9, %v2829_v10  ;;  %v7226_v17 = vcombine.high %v2814_v11, %v2830_v12  ;;  %v2607_v9 = vld [vmem:[%s9798_s5 + $0x3b0] sm:$0xff]  ;;  %v2592_v10 = vld [vmem:[%s9798_s5 + $0x338] sm:$0xff] }
 0x30a   :  { %5946 = vmatprep.subr.bf16.mxu1 %v6938_v21  ;;  %v2781_v21 = vld [vmem:[%s9798_s5 + $0x920] sm:$0xff] }
 0x30b   :  { %v7191_v34 = vcombine.low %v2781_v21, %v2797_v4 }
 0x30c   :  { %5906 = vmatpush1.bf16.msra.mxu0 %v6935_v27  ;;  %v7225_v27 = vcombine.low %v2814_v11, %v2830_v12  ;;  %v2608_v11 = vld [vmem:[%s9798_s5 + $0x3b8] sm:$0xff] }
 0x30d   :  { %5947 = vmatpush1.bf16.msra.mxu1 %v6937_v28  ;;  %5907 = vmatprep.subr.bf16.mxu0 %v6904_v5  ;;  %v7192_v28 = vcombine.high %v2781_v21, %v2797_v4  ;;  %v7194_v5 = vcombine.high %v2782_v25, %v2798_v26  ;;  %v2575_v21 = vld [vmem:[%s9798_s5 + $0x2b0] sm:$0xff]  ;;  %v2560_v4 = vld [vmem:[%s9798_s5 + $0x238] sm:$0xff] }
 0x30e   :  { %5948 = vmatprep.subr.bf16.mxu1 %v6906_v30  ;;  %v2749_v30 = vld [vmem:[%s9798_s5 + $0x820] sm:$0xff] }
 0x30f   :  { %v7159_v14 = vcombine.low %v2749_v30, %v2765_v31 }
 0x310   :  { %5908 = vmatpush1.bf16.msra.mxu0 %v6903_v35  ;;  %v7193_v35 = vcombine.low %v2782_v25, %v2798_v26  ;;  %v2576_v25 = vld [vmem:[%s9798_s5 + $0x2b8] sm:$0xff] }
 0x311   :  { %5949 = vmatpush1.bf16.msra.mxu1 %v6905_v36  ;;  %5909 = vmatprep.subr.bf16.mxu0 %v7384_v40  ;;  %v7160_v36 = vcombine.high %v2749_v30, %v2765_v31  ;;  %v7162_v40 = vcombine.high %v2750_v32, %v2766_v33  ;;  %v2543_v30 = vld [vmem:[%s9798_s5 + $0x1b0] sm:$0xff]  ;;  %v2528_v31 = vld [vmem:[%s9798_s5 + $0x138] sm:$0xff] }
 0x312   :  { %5950 = vmatprep.subr.bf16.mxu1 %v7386_v44  ;;  %v2719_v44 = vld [vmem:[%s9798_s5 + $0x730] sm:$0xff] }
 0x313   :  { %v7131_v63 = vcombine.low %v2719_v44, %v2735_v47 }
 0x314   :  { %5910 = vmatpush2.bf16.msra.mxu0 %v7383_v19  ;;  %v7161_v19 = vcombine.low %v2750_v32, %v2766_v33  ;;  %v2544_v32 = vld [vmem:[%s9798_s5 + $0x1b8] sm:$0xff] }
 0x315   :  { %5951 = vmatpush2.bf16.msra.mxu1 %v7385_v3  ;;  %5911 = vmatprep.subr.bf16.mxu0 %v7352_v48  ;;  %v7132_v3 = vcombine.high %v2719_v44, %v2735_v47  ;;  %v7134_v48 = vcombine.high %v2720_v7, %v2736_v62  ;;  %v2511_v44 = vld [vmem:[%s9798_s5 + $0xb0] sm:$0xff]  ;;  %v2496_v47 = vld [vmem:[%s9798_s5 + $0x38] sm:$0xff] }
 0x316   :  { %5952 = vmatprep.subr.bf16.mxu1 %v7354_v49  ;;  %v2687_v49 = vld [vmem:[%s9798_s5 + $0x630] sm:$0xff] }
 0x317   :  { %v7099_v55 = vcombine.low %v2687_v49, %v2703_v50 }
 0x318   :  { %5912 = vmatpush2.bf16.msra.mxu0 %v7351_v20  ;;  %v7133_v20 = vcombine.low %v2720_v7, %v2736_v62  ;;  %v2512_v7 = vld [vmem:[%s9798_s5 + $0xb8] sm:$0xff] }
 0x319   :  { %5953 = vmatpush2.bf16.msra.mxu1 %v7353_v29  ;;  %5913 = vmatprep.subr.bf16.mxu0 %v7320_v24  ;;  %v7100_v29 = vcombine.high %v2687_v49, %v2703_v50  ;;  %v2655_v24 = vld [vmem:[%s9798_s5 + $0x530] sm:$0xff]  ;;  %v2976_v50 = vld [vmem:[%s9798_s5 + $0xf38] sm:$0xff] }
 0x31a   :  { %5954 = vmatprep.subr.bf16.mxu1 %v7322_v51  ;;  %v2671_v51 = vld [vmem:[%s9798_s5 + $0x5b0] sm:$0xff] }
 0x31b   :  { %v7067_v0 = vcombine.low %v2655_v24, %v2671_v51  ;;  %v2991_v49 = vld [vmem:[%s9798_s5 + $0xfb0] sm:$0xff] }
 0x31c   :  { %5914 = vmatpush2.bf16.msra.mxu0 %v7319_v56  ;;  %v7101_v56 = vcombine.low %v2688_v18, %v2704_v15  ;;  %v6909_v15 = vcombine.low %v2496_v47, %v2512_v7 }
 0x31d   :  { %5955 = vmatpush2.bf16.msra.mxu1 %v7321_v41  ;;  %5915 = vmatprep.subr.bf16.mxu0 %v7288_v45  ;;  %v7068_v41 = vcombine.high %v2655_v24, %v2671_v51  ;;  %v7070_v45 = vcombine.high %v2656_v53, %v2672_v54  ;;  %v2943_v24 = vld [vmem:[%s9798_s5 + $0xe30] sm:$0xff] }
 0x31e   :  { %5956 = vmatprep.subr.bf16.mxu1 %v7290_v58  ;;  %v2623_v58 = vld [vmem:[%s9798_s5 + $0x430] sm:$0xff] }
 0x31f   :  { %v7035_v12 = vcombine.low %v2623_v58, %v2639_v43  ;;  %v2959_v51 = vld [vmem:[%s9798_s5 + $0xeb0] sm:$0xff] }
 0x320   :  { %5916 = vmatpush2.bf16.msra.mxu0 %v7287_v1  ;;  %v7069_v1 = vcombine.low %v2656_v53, %v2672_v54  ;;  %v2960_v53 = vld [vmem:[%s9798_s5 + $0xeb8] sm:$0xff] }
 0x321   :  { %5957 = vmatpush2.bf16.msra.mxu1 %v7289_v46  ;;  %5917 = vmatprep.subr.bf16.mxu0 %v7256_v2  ;;  %v7036_v46 = vcombine.high %v2623_v58, %v2639_v43  ;;  %v7038_v2 = vcombine.high %v2624_v60, %v2640_v61  ;;  %v2927_v58 = vld [vmem:[%s9798_s5 + $0xdb0] sm:$0xff]  ;;  %v2912_v43 = vld [vmem:[%s9798_s5 + $0xd38] sm:$0xff] }
 0x322   :  { %5958 = vmatprep.subr.bf16.mxu1 %v7258_v8  ;;  %v2591_v8 = vld [vmem:[%s9798_s5 + $0x330] sm:$0xff] }
 0x323   :  { %v7003_v26 = vcombine.low %v2591_v8, %v2607_v9 }
 0x324   :  { %5918 = vmatpush2.bf16.msra.mxu0 %v7255_v13  ;;  %v7037_v13 = vcombine.low %v2624_v60, %v2640_v61  ;;  %v2928_v60 = vld [vmem:[%s9798_s5 + $0xdb8] sm:$0xff]  ;;  %v7355_v61 = vcombine.low %v2943_v24, %v2959_v51 }
 0x325   :  { %5959 = vmatpush2.bf16.msra.mxu1 %v7257_v16  ;;  %5919 = vmatprep.subr.bf16.mxu0 %v7224_v38  ;;  %v7004_v16 = vcombine.high %v2591_v8, %v2607_v9  ;;  %v7006_v38 = vcombine.high %v2592_v10, %v2608_v11  ;;  %v2895_v8 = vld [vmem:[%s9798_s5 + $0xcb0] sm:$0xff]  ;;  %v2880_v9 = vld [vmem:[%s9798_s5 + $0xc38] sm:$0xff] }
 0x326   :  { %5960 = vmatprep.subr.bf16.mxu1 %v7226_v17  ;;  %v2559_v17 = vld [vmem:[%s9798_s5 + $0x230] sm:$0xff] }
 0x327   :  { %v6971_v33 = vcombine.low %v2559_v17, %v2575_v21 }
 0x328   :  { %5920 = vmatpush2.bf16.msra.mxu0 %v7223_v6  ;;  %v7005_v6 = vcombine.low %v2592_v10, %v2608_v11  ;;  %v2896_v10 = vld [vmem:[%s9798_s5 + $0xcb8] sm:$0xff] }
 0x329   :  { %5961 = vmatpush2.bf16.msra.mxu1 %v7225_v27  ;;  %5921 = vmatprep.subr.bf16.mxu0 %v7192_v28  ;;  %v6972_v27 = vcombine.high %v2559_v17, %v2575_v21  ;;  %v6974_v28 = vcombine.high %v2560_v4, %v2576_v25  ;;  %v2863_v17 = vld [vmem:[%s9798_s5 + $0xbb0] sm:$0xff]  ;;  %v2848_v21 = vld [vmem:[%s9798_s5 + $0xb38] sm:$0xff] }
 0x32a   :  { %5962 = vmatprep.subr.bf16.mxu1 %v7194_v5  ;;  %v2527_v5 = vld [vmem:[%s9798_s5 + $0x130] sm:$0xff] }
 0x32b   :  { %v6939_v62 = vcombine.low %v2527_v5, %v2543_v30 }
 0x32c   :  { %5922 = vmatpush2.bf16.msra.mxu0 %v7191_v34  ;;  %v6973_v34 = vcombine.low %v2560_v4, %v2576_v25  ;;  %v2864_v4 = vld [vmem:[%s9798_s5 + $0xbb8] sm:$0xff] }
 0x32d   :  { %5963 = vmatpush2.bf16.msra.mxu1 %v7193_v35  ;;  %5923 = vmatprep.subr.bf16.mxu0 %v7160_v36  ;;  %v6940_v35 = vcombine.high %v2527_v5, %v2543_v30  ;;  %v6942_v36 = vcombine.high %v2528_v31, %v2544_v32  ;;  %v2831_v5 = vld [vmem:[%s9798_s5 + $0xab0] sm:$0xff]  ;;  %v2816_v30 = vld [vmem:[%s9798_s5 + $0xa38] sm:$0xff] }
 0x32e   :  { %5964 = vmatprep.subr.bf16.mxu1 %v7162_v40  ;;  %v2495_v40 = vld [vmem:[%s9798_s5 + $0x30] sm:$0xff] }
 0x32f   :  { %v6907_v18 = vcombine.low %v2495_v40, %v2511_v44 }
 0x330   :  { %5924 = vmatpush2.bf16.msra.mxu0 %v7159_v14  ;;  %v6941_v14 = vcombine.low %v2528_v31, %v2544_v32  ;;  %v2832_v31 = vld [vmem:[%s9798_s5 + $0xab8] sm:$0xff] }
 0x331   :  { %5965 = vmatpush2.bf16.msra.mxu1 %v7161_v19  ;;  %5975 = vmatprep.subr.bf16.mxu0 %v7132_v3  ;;  %v6908_v19 = vcombine.high %v2495_v40, %v2511_v44  ;;  %v6910_v3 = vcombine.high %v2496_v47, %v2512_v7  ;;  %v2799_v40 = vld [vmem:[%s9798_s5 + $0x9b0] sm:$0xff]  ;;  %v2784_v44 = vld [vmem:[%s9798_s5 + $0x938] sm:$0xff] }
 0x332   :  { %6016 = vmatprep.subr.bf16.mxu1 %v7134_v48  ;;  %v2975_v48 = vld [vmem:[%s9798_s5 + $0xf30] sm:$0xff]  ;;  %v2800_v47 = vld [vmem:[%s9798_s5 + $0x9b8] sm:$0xff] }
 0x333   :  { %5926 = vmatmul.mubr.bf16.vlgmr.msra.gmra.mxu0 %v8320_v23  ;;  %v7387_v54 = vcombine.low %v2975_v48, %v2991_v49 }
 0x334   :  { %5967 = vmatmul.mubr.bf16.vlgmr.msra.gmra.mxu1 %v8320_v23  ;;  %5976 = vmatpush1.bf16.msra.mxu0 %v7131_v63  ;;  %v2992_v63 = vld [vmem:[%s9798_s5 + $0xfb8] sm:$0xff] }
 0x335   :  { %6007 = vmatprep.mubr.bf16.mxu0 %v8318_v22  ;;  %6017 = vmatpush1.bf16.msra.mxu1 %v7133_v20  ;;  %v7388_v20 = vcombine.high %v2975_v48, %v2991_v49  ;;  %v2767_v48 = vld [vmem:[%s9798_s5 + $0x8b0] sm:$0xff]  ;;  %v2752_v49 = vld [vmem:[%s9798_s5 + $0x838] sm:$0xff] }
 0x336   :  { %6048 = vmatprep.mubr.bf16.mxu1 %v8318_v22  ;;  %5977 = vmatprep.subr.bf16.mxu0 %v7100_v29  ;;  %v7390_v29 = vcombine.high %v2976_v50, %v2992_v63 }
 0x337   :  { %6018 = vmatprep.subr.bf16.mxu1 %v7102_v52  ;;  %v2944_v52 = vld [vmem:[%s9798_s5 + $0xe38] sm:$0xff] }
 0x338   :  { %5978 = vmatpush1.bf16.msra.mxu0 %v7099_v55  ;;  %v7389_v55 = vcombine.low %v2976_v50, %v2992_v63  ;;  %v2768_v50 = vld [vmem:[%s9798_s5 + $0x8b8] sm:$0xff] }
 0x339   :  { %6019 = vmatpush1.bf16.msra.mxu1 %v7101_v56  ;;  %5979 = vmatprep.subr.bf16.mxu0 %v7068_v41  ;;  %v7356_v56 = vcombine.high %v2943_v24, %v2959_v51  ;;  %v7358_v41 = vcombine.high %v2944_v52, %v2960_v53  ;;  %v2737_v24 = vld [vmem:[%s9798_s5 + $0x7c0] sm:$0xff]  ;;  %v2722_v51 = vld [vmem:[%s9798_s5 + $0x748] sm:$0xff] }
 0x33a   :  { %6020 = vmatprep.subr.bf16.mxu1 %v7070_v45  ;;  %v2911_v45 = vld [vmem:[%s9798_s5 + $0xd30] sm:$0xff] }
 0x33b   :  { %v7323_v11 = vcombine.low %v2911_v45, %v2927_v58 }
 0x33c   :  { %5980 = vmatpush1.bf16.msra.mxu0 %v7067_v0  ;;  %v7357_v0 = vcombine.low %v2944_v52, %v2960_v53  ;;  %v2738_v52 = vld [vmem:[%s9798_s5 + $0x7c8] sm:$0xff] }
 0x33d   :  { %6021 = vmatpush1.bf16.msra.mxu1 %v7069_v1  ;;  %5981 = vmatprep.subr.bf16.mxu0 %v7036_v46  ;;  %v7324_v1 = vcombine.high %v2911_v45, %v2927_v58  ;;  %v7326_v46 = vcombine.high %v2912_v43, %v2928_v60  ;;  %v7138_v45 = vcombine.high %v2722_v51, %v2738_v52  ;;  %v8903_v58 = vld [vmem:[%s9799_s6] sm:$0xff] }
 0x33e   :  { %6022 = vmatprep.subr.bf16.mxu1 %v7038_v2  ;;  %v2879_v2 = vld [vmem:[%s9798_s5 + $0xc30] sm:$0xff] }
 0x33f   :  { %v7291_v25 = vcombine.low %v2879_v2, %v2895_v8 }
 0x340   :  { %5982 = vmatpush1.bf16.msra.mxu0 %v7035_v12  ;;  %v7325_v12 = vcombine.low %v2912_v43, %v2928_v60  ;;  %v2689_v43 = vld [vmem:[%s9798_s5 + $0x640] sm:$0xff] }
 0x341   :  { %6023 = vmatpush1.bf16.msra.mxu1 %v7037_v13  ;;  %5983 = vmatprep.subr.bf16.mxu0 %v7004_v16  ;;  %v7292_v13 = vcombine.high %v2879_v2, %v2895_v8  ;;  %v7294_v16 = vcombine.high %v2880_v9, %v2896_v10  ;;  %v2705_v60 = vld [vmem:[%s9798_s5 + $0x6c0] sm:$0xff]  ;;  %v7137_v2 = vcombine.low %v2722_v51, %v2738_v52  ;;  %v2594_v51 = vld [vmem:[%s9798_s5 + $0x348] sm:$0xff] }
 0x342   :  { %6024 = vmatprep.subr.bf16.mxu1 %v7006_v38  ;;  %v2847_v38 = vld [vmem:[%s9798_s5 + $0xb30] sm:$0xff]  ;;  %v3012_v8 = vrot.slane %v8903_v58, %v8049_v37  ;;  %v2610_v52 = vld [vmem:[%s9798_s5 + $0x3c8] sm:$0xff] }
 0x343   :  { %v7259_v32 = vcombine.low %v2847_v38, %v2863_v17 }
 0x344   :  { %5984 = vmatpush1.bf16.msra.mxu0 %v7003_v26  ;;  %v7293_v26 = vcombine.low %v2880_v9, %v2896_v10  ;;  %v2657_v9 = vld [vmem:[%s9798_s5 + $0x540] sm:$0xff]  ;;  %v3020_v10 = vrot.slane %v8903_v58, %v8148_v57 }
 0x345   :  { %6025 = vmatpush1.bf16.msra.mxu1 %v7005_v6  ;;  %5985 = vmatprep.subr.bf16.mxu0 %v6972_v27  ;;  %v7260_v6 = vcombine.high %v2847_v38, %v2863_v17  ;;  %v7262_v27 = vcombine.high %v2848_v21, %v2864_v4  ;;  %v2658_v38 = vld [vmem:[%s9798_s5 + $0x548] sm:$0xff] }
 0x346   :  { %6026 = vmatprep.subr.bf16.mxu1 %v6974_v28  ;;  %v2815_v28 = vld [vmem:[%s9798_s5 + $0xa30] sm:$0xff]  ;;  %v2674_v17 = vld [vmem:[%s9798_s5 + $0x5c8] sm:$0xff] }
 0x347   :  { %v7227_v7 = vcombine.low %v2815_v28, %v2831_v5 }
 0x348   :  { %5986 = vmatpush1.bf16.msra.mxu0 %v6971_v33  ;;  %v7261_v33 = vcombine.low %v2848_v21, %v2864_v4 }
 0x349   :  { %6027 = vmatpush1.bf16.msra.mxu1 %v6973_v34  ;;  %5987 = vmatprep.subr.bf16.mxu0 %v6940_v35  ;;  %v7228_v34 = vcombine.high %v2815_v28, %v2831_v5  ;;  %v7230_v35 = vcombine.high %v2816_v30, %v2832_v31 }
 0x34a   :  { %6028 = vmatprep.subr.bf16.mxu1 %v6942_v36  ;;  %v2783_v36 = vld [vmem:[%s9798_s5 + $0x930] sm:$0xff] }
 0x34b   :  { %v7195_v63 = vcombine.low %v2783_v36, %v2799_v40 }
 0x34c   :  { %5988 = vmatpush1.bf16.msra.mxu0 %v6939_v62  ;;  %v7229_v62 = vcombine.low %v2816_v30, %v2832_v31 }
 0x34d   :  { %6029 = vmatpush1.bf16.msra.mxu1 %v6941_v14  ;;  %5989 = vmatprep.subr.bf16.mxu0 %v6908_v19  ;;  %v7196_v14 = vcombine.high %v2783_v36, %v2799_v40  ;;  %v7198_v19 = vcombine.high %v2784_v44, %v2800_v47  ;;  %v2625_v36 = vld [vmem:[%s9798_s5 + $0x440] sm:$0xff] }
 0x34e   :  { %6030 = vmatprep.subr.bf16.mxu1 %v6910_v3  ;;  %v2751_v3 = vld [vmem:[%s9798_s5 + $0x830] sm:$0xff]  ;;  %v2641_v40 = vld [vmem:[%s9798_s5 + $0x4c0] sm:$0xff] }
 0x34f   :  { %v7163_v53 = vcombine.low %v2751_v3, %v2767_v48 }
 0x350   :  { %5990 = vmatpush1.bf16.msra.mxu0 %v6907_v18  ;;  %v7197_v18 = vcombine.low %v2784_v44, %v2800_v47 }
 0x351   :  { %6031 = vmatpush1.bf16.msra.mxu1 %v6909_v15  ;;  %5991 = vmatprep.subr.bf16.mxu0 %v7388_v20  ;;  %v7164_v15 = vcombine.high %v2751_v3, %v2767_v48  ;;  %v7166_v20 = vcombine.high %v2752_v49, %v2768_v50 }
 0x352   :  { %6032 = vmatprep.subr.bf16.mxu1 %v7390_v29  ;;  %v2721_v29 = vld [vmem:[%s9798_s5 + $0x740] sm:$0xff] }
 0x354   :  { %5992 = vmatpush2.bf16.msra.mxu0 %v7387_v54  ;;  %v7947_v54 = vmov 1983009808  }
 0x355   :  { %6033 = vmatpush2.bf16.msra.mxu1 %v7389_v55  ;;  %5993 = vmatprep.subr.bf16.mxu0 %v7356_v56  ;;  %v6420_v55 = vunpack.c.l.s4 %v7947_v54  ;;  %v7165_v56 = vcombine.low %v2752_v49, %v2768_v50  ;;  %v7073_v50 = vcombine.low %v2658_v38, %v2674_v17  ;;  %v7039_v54 = vcombine.low %v2625_v36, %v2641_v40 }
 0x356   :  { %6034 = vmatprep.subr.bf16.mxu1 %v7358_v41  ;;  %v7136_v41 = vcombine.high %v2721_v29, %v2737_v24 }
 0x358   :  { %5994 = vmatpush2.bf16.msra.mxu0 %v7355_v61  ;;  %v7135_v61 = vcombine.low %v2721_v29, %v2737_v24  ;;  %v2593_v29 = vld [vmem:[%s9798_s5 + $0x340] sm:$0xff] }
 0x359   :  { %6035 = vmatpush2.bf16.msra.mxu1 %v7357_v0  ;;  %5995 = vmatprep.subr.bf16.mxu0 %v7324_v1  ;;  %v6421_v0 = vunpack.c.0.s8 %v6420_v55  ;;  %v2690_v1 = vld [vmem:[%s9798_s5 + $0x648] sm:$0xff]  ;;  %v2609_v24 = vld [vmem:[%s9798_s5 + $0x3c0] sm:$0xff] }
 0x35a   :  { %6036 = vmatprep.subr.bf16.mxu1 %v7326_v46  ;;  %v2706_v46 = vld [vmem:[%s9798_s5 + $0x6c8] sm:$0xff] }
 0x35c   :  { %5996 = vmatpush2.bf16.msra.mxu0 %v7323_v11  ;;  %v3016_v11 = vrot.slane %v8903_v58, %v8057_v39 }
 0x35d   :  { %6037 = vmatpush2.bf16.msra.mxu1 %v7325_v12  ;;  %5997 = vmatprep.subr.bf16.mxu0 %v7292_v13  ;;  %v3024_v12 = vrot.slane %v8903_v58, %v8157_v59  ;;  %v7104_v13 = vcombine.high %v2689_v43, %v2705_v60 }
 0x35e   :  { %6038 = vmatprep.subr.bf16.mxu1 %v7294_v16  ;;  %v2673_v16 = vld [vmem:[%s9798_s5 + $0x5c0] sm:$0xff] }
 0x35f   :  { %v7072_v31 = vcombine.high %v2657_v9, %v2673_v16  ;;  %v7071_v3 = vcombine.low %v2657_v9, %v2673_v16  ;;  %v2545_v9 = vld [vmem:[%s9798_s5 + $0x1c0] sm:$0xff] }
 0x360   :  { %5998 = vmatpush2.bf16.msra.mxu0 %v7291_v25  ;;  %v7106_v25 = vcombine.high %v2690_v1, %v2706_v46 }
 0x361   :  { %6039 = vmatpush2.bf16.msra.mxu1 %v7293_v26  ;;  %5999 = vmatprep.subr.bf16.mxu0 %v7260_v6  ;;  %v8940_v26 = vsub.s32 %v6421_v0, %v7994_v42  ;;  %v7103_v6 = vcombine.low %v2689_v43, %v2705_v60  ;;  %v2577_v43 = vld [vmem:[%s9798_s5 + $0x2c0] sm:$0xff]  ;;  %v2562_v60 = vld [vmem:[%s9798_s5 + $0x248] sm:$0xff]  ;;  %v7007_v0 = vcombine.low %v2593_v29, %v2609_v24 }
 0x362   :  { %6040 = vmatprep.subr.bf16.mxu1 %v7262_v27  ;;  %v7105_v27 = vcombine.low %v2690_v1, %v2706_v46  ;;  %v7009_v1 = vcombine.low %v2594_v51, %v2610_v52 }
 0x364   :  { %6000 = vmatpush2.bf16.msra.mxu0 %v7259_v32  ;;  %v7074_v32 = vcombine.high %v2658_v38, %v2674_v17  ;;  %v2497_v17 = vld [vmem:[%s9798_s5 + $0x40] sm:$0xff] }
 0x365   :  { %6041 = vmatpush2.bf16.msra.mxu1 %v7261_v33  ;;  %6001 = vmatprep.subr.bf16.mxu0 %v7228_v34 }
 0x366   :  { %6042 = vmatprep.subr.bf16.mxu1 %v7230_v35 }
 0x368   :  { %6002 = vmatpush2.bf16.msra.mxu0 %v7227_v7  ;;  %v2626_v7 = vld [vmem:[%s9798_s5 + $0x448] sm:$0xff] }
 0x369   :  { %6043 = vmatpush2.bf16.msra.mxu1 %v7229_v62  ;;  %6003 = vmatprep.subr.bf16.mxu0 %v7196_v14  ;;  %v2642_v62 = vld [vmem:[%s9798_s5 + $0x4c8] sm:$0xff] }
 0x36a   :  { %6044 = vmatprep.subr.bf16.mxu1 %v7198_v19  ;;  %v7041_v55 = vcombine.low %v2626_v7, %v2642_v62 }
 0x36c   :  { %6004 = vmatpush2.bf16.msra.mxu0 %v7195_v63  ;;  %v7040_v63 = vcombine.high %v2625_v36, %v2641_v40 }
 0x36d   :  { %6045 = vmatpush2.bf16.msra.mxu1 %v7197_v18  ;;  %6005 = vmatprep.subr.bf16.mxu0 %v7164_v15 }
 0x36e   :  { %6046 = vmatprep.subr.bf16.mxu1 %v7166_v20  ;;  %v7042_v20 = vcombine.high %v2626_v7, %v2642_v62  ;;  %v2946_v7 = vld [vmem:[%s9798_s5 + $0xe48] sm:$0xff] }
 0x36f   :  { %v2962_v62 = vld [vmem:[%s9798_s5 + $0xec8] sm:$0xff] }
 0x370   :  { %6006 = vmatpush2.bf16.msra.mxu0 %v7163_v53 }
 0x371   :  { %6047 = vmatpush2.bf16.msra.mxu1 %v7165_v56  ;;  %6057 = vmatprep.subr.bf16.mxu0 %v7136_v41  ;;  %v7008_v56 = vcombine.high %v2593_v29, %v2609_v24  ;;  %v7010_v41 = vcombine.high %v2594_v51, %v2610_v52  ;;  %v2881_v51 = vld [vmem:[%s9798_s5 + $0xc40] sm:$0xff] }
 0x372   :  { %6098 = vmatprep.subr.bf16.mxu1 %v7138_v45  ;;  %v2561_v45 = vld [vmem:[%s9798_s5 + $0x240] sm:$0xff] }
 0x373   :  { %6008 = vmatmul.mubr.bf16.vlgmr.msra.gmra.mxu0 %v8320_v23  ;;  %v5763_v21 = vpop.f32.mrf.mxu0  ;;  %v5804_v4 = vpop.f32.mrf.mxu1  ;;  %v6976_v46 = vcombine.high %v2561_v45, %v2577_v43  ;;  %v2897_v52 = vld [vmem:[%s9798_s5 + $0xcc0] sm:$0xff] }
 0x374   :  { %6049 = vmatmul.mubr.bf16.vlgmr.msra.gmra.mxu1 %v8320_v23  ;;  %6058 = vmatpush1.bf16.msra.mxu0 %v7135_v61  ;;  %v5764_v28 = vadd.f32 %v5763_v21, %v3012_v8  ;;  %v5805_v33 = vadd.f32 %v5804_v4, %v3020_v10  ;;  %v2578_v61 = vld [vmem:[%s9798_s5 + $0x2c8] sm:$0xff]  ;;  %v2529_v8 = vld [vmem:[%s9798_s5 + $0x140] sm:$0xff] }
 0x375   :  { %6089 = vmatprep.mubr.bf16.mxu0 %v8318_v22  ;;  %6099 = vmatpush1.bf16.msra.mxu1 %v7137_v2  ;;  %v5765_v5 = vpop.f32.mrf.mxu0  ;;  %v5806_v30 = vpop.f32.mrf.mxu1  ;;  %v6978_v2 = vcombine.high %v2562_v60, %v2578_v61  ;;  %v2530_v10 = vld [vmem:[%s9798_s5 + $0x148] sm:$0xff]  ;;  %v6944_v16 = vcombine.high %v2529_v8, %v2545_v9  ;;  %v2513_v21 = vld [vmem:[%s9798_s5 + $0xc0] sm:$0xff] }
 0x376   :  { %6130 = vmatprep.mubr.bf16.mxu1 %v8318_v22  ;;  %v5766_v34 = vadd.f32 %v5765_v5, %v3016_v11  ;;  %v5807_v35 = vadd.f32 %v5806_v30, %v3024_v12  ;;  %6059 = vmatprep.subr.bf16.mxu0 %v7104_v13  ;;  %v2546_v11 = vld [vmem:[%s9798_s5 + $0x1c8] sm:$0xff]  ;;  %v6975_v12 = vcombine.low %v2561_v45, %v2577_v43  ;;  %v2977_v30 = vld [vmem:[%s9798_s5 + $0xf40] sm:$0xff] }
 0x377   :  { %6100 = vmatprep.subr.bf16.mxu1 %v7106_v25  ;;  %v5767_v44 = vpop.f32.mrf.mxu0  ;;  %v5808_v47 = vpop.f32.mrf.mxu1  ;;  %v6977_v13 = vcombine.low %v2562_v60, %v2578_v61  ;;  %v6946_v38 = vcombine.high %v2530_v10, %v2546_v11  ;;  %v2498_v4 = vld [vmem:[%s9798_s5 + $0x48] sm:$0xff]  ;;  %v2849_v43 = vld [vmem:[%s9798_s5 + $0xb40] sm:$0xff] }
 0x378   :  { %v6417_v14 = vcombine.low %v5764_v28, %v5766_v34  ;;  %v6418_v19 = vcombine.low %v5805_v33, %v5807_v35  ;;  %6060 = vmatpush1.bf16.msra.mxu0 %v7103_v6  ;;  %v2514_v25 = vld [vmem:[%s9798_s5 + $0xc8] sm:$0xff]  ;;  %v6943_v6 = vcombine.low %v2529_v8, %v2545_v9  ;;  %v6912_v28 = vcombine.high %v2497_v17, %v2513_v21  ;;  %v2945_v44 = vld [vmem:[%s9798_s5 + $0xe40] sm:$0xff] }
 0x379   :  { %6101 = vmatpush1.bf16.msra.mxu1 %v7105_v27  ;;  %v5768_v48 = vpop.f32.mrf.mxu0  ;;  %v5809_v49 = vpop.f32.mrf.mxu1  ;;  %6061 = vmatprep.subr.bf16.mxu0 %v7072_v31  ;;  %v6945_v27 = vcombine.low %v2530_v10, %v2546_v11  ;;  %v6914_v5 = vcombine.high %v2498_v4, %v2514_v25  ;;  %v2993_v31 = vld [vmem:[%s9798_s5 + $0xfc0] sm:$0xff]  ;;  %v2994_v33 = vld [vmem:[%s9798_s5 + $0xfc8] sm:$0xff]  ;;  %v6911_v34 = vcombine.low %v2497_v17, %v2513_v21 }
 0x37a   :  { %v6425_v18 = vrot.slane %v6417_v14, %v8940_v26  ;;  %v6432_v15 = vrot.slane %v6418_v19, %v8940_v26  ;;  %6102 = vmatprep.subr.bf16.mxu1 %v7074_v32  ;;  %v2978_v32 = vld [vmem:[%s9798_s5 + $0xf48] sm:$0xff]  ;;  %v6913_v35 = vcombine.low %v2498_v4, %v2514_v25  ;;  %v7392_v36 = vcombine.high %v2977_v30, %v2993_v31  ;;  %v2961_v47 = vld [vmem:[%s9798_s5 + $0xec0] sm:$0xff] }
 0x37b   :  { %v7394_v40 = vcombine.high %v2978_v32, %v2994_v33  ;;  %v7391_v14 = vcombine.low %v2977_v30, %v2993_v31  ;;  %v7393_v19 = vcombine.low %v2978_v32, %v2994_v33  ;;  %v7362_v48 = vcombine.high %v2946_v7, %v2962_v62  ;;  %v2913_v49 = vld [vmem:[%s9798_s5 + $0xd40] sm:$0xff]  ;;  %v2850_v61 = vld [vmem:[%s9798_s5 + $0xb48] sm:$0xff] }
 0x37c   :  { %v6433_v53 = vcombine.low %v6425_v18, %v6432_v15  ;;  %6062 = vmatpush1.bf16.msra.mxu0 %v7071_v3  ;;  %v7360_v3 = vcombine.high %v2945_v44, %v2961_v47  ;;  %v2930_v18 = vld [vmem:[%s9798_s5 + $0xdc8] sm:$0xff]  ;;  %v7359_v15 = vcombine.low %v2945_v44, %v2961_v47  ;;  %v2865_v60 = vld [vmem:[%s9798_s5 + $0xbc0] sm:$0xff]  ;;  %v2723_v47 = vld [vmem:[%s9798_s5 + $0x750] sm:$0xff] }
 0x37d   :  { %6103 = vmatpush1.bf16.msra.mxu1 %v7073_v50  ;;  %6063 = vmatprep.subr.bf16.mxu0 %v7040_v63  ;;  %v2929_v50 = vld [vmem:[%s9798_s5 + $0xdc0] sm:$0xff]  ;;  %v2914_v63 = vld [vmem:[%s9798_s5 + $0xd48] sm:$0xff] }
 0x37e   :  { %6561 = vst [vmem:[%s9800_s7] sm:$0xff] %v6433_v53  ;;  %6104 = vmatprep.subr.bf16.mxu1 %v7042_v20  ;;  %v7361_v20 = vcombine.low %v2946_v7, %v2962_v62  ;;  %v7328_v29 = vcombine.high %v2913_v49, %v2929_v50  ;;  %v7330_v24 = vcombine.high %v2914_v63, %v2930_v18  ;;  %v2882_v53 = vld [vmem:[%s9798_s5 + $0xc48] sm:$0xff]  ;;  %v2817_v9 = vld [vmem:[%s9798_s5 + $0xa40] sm:$0xff]  ;;  %v2739_v7 = vld [vmem:[%s9798_s5 + $0x7d0] sm:$0xff] }
 0x37f   :  { %v2833_v10 = vld [vmem:[%s9798_s5 + $0xac0] sm:$0xff]  ;;  %v2818_v11 = vld [vmem:[%s9798_s5 + $0xa48] sm:$0xff]  ;;  %v2724_v62 = vld [vmem:[%s9798_s5 + $0x758] sm:$0xff] }
 0x380   :  { %6064 = vmatpush1.bf16.msra.mxu0 %v7039_v54  ;;  %v2898_v54 = vld [vmem:[%s9798_s5 + $0xcc8] sm:$0xff]  ;;  %v2785_v21 = vld [vmem:[%s9798_s5 + $0x940] sm:$0xff] }
 0x381   :  { %6105 = vmatpush1.bf16.msra.mxu1 %v7041_v55  ;;  %6065 = vmatprep.subr.bf16.mxu0 %v7008_v56  ;;  %v7327_v55 = vcombine.low %v2913_v49, %v2929_v50  ;;  %v7329_v56 = vcombine.low %v2914_v63, %v2930_v18  ;;  %v7298_v45 = vcombine.high %v2882_v53, %v2898_v54  ;;  %v2801_v4 = vld [vmem:[%s9798_s5 + $0x9c0] sm:$0xff]  ;;  %v2786_v25 = vld [vmem:[%s9798_s5 + $0x948] sm:$0xff]  ;;  %v9121_v50 = vsub.s32 6, %v7994_v42 }
 0x382   :  { %6106 = vmatprep.subr.bf16.mxu1 %v7010_v41  ;;  %v7296_v41 = vcombine.high %v2881_v51, %v2897_v52  ;;  %v2753_v31 = vld [vmem:[%s9798_s5 + $0x840] sm:$0xff]  ;;  %v2754_v33 = vld [vmem:[%s9798_s5 + $0x848] sm:$0xff]  ;;  %v7140_v49 = vcombine.high %v2723_v47, %v2739_v7  ;;  %v9124_v18 = vsub.s32 5, %v7994_v42 }
 0x383   :  { %v2769_v32 = vld [vmem:[%s9798_s5 + $0x8c0] sm:$0xff] }
 0x384   :  { %6066 = vmatpush1.bf16.msra.mxu0 %v7007_v0  ;;  %v2866_v0 = vld [vmem:[%s9798_s5 + $0xbc8] sm:$0xff] }
 0x385   :  { %6107 = vmatpush1.bf16.msra.mxu1 %v7009_v1  ;;  %6067 = vmatprep.subr.bf16.mxu0 %v6976_v46  ;;  %v7295_v1 = vcombine.low %v2881_v51, %v2897_v52  ;;  %v7297_v46 = vcombine.low %v2882_v53, %v2898_v54  ;;  %v7266_v8 = vcombine.high %v2850_v61, %v2866_v0  ;;  %v2692_v51 = vld [vmem:[%s9798_s5 + $0x658] sm:$0xff]  ;;  %v2659_v54 = vld [vmem:[%s9798_s5 + $0x550] sm:$0xff] }
 0x386   :  { %6108 = vmatprep.subr.bf16.mxu1 %v6978_v2  ;;  %v7264_v2 = vcombine.high %v2849_v43, %v2865_v60  ;;  %v2708_v52 = vld [vmem:[%s9798_s5 + $0x6d8] sm:$0xff] }
 0x388   :  { %6068 = vmatpush1.bf16.msra.mxu0 %v6975_v12  ;;  %v2834_v12 = vld [vmem:[%s9798_s5 + $0xac8] sm:$0xff] }
 0x389   :  { %6109 = vmatpush1.bf16.msra.mxu1 %v6977_v13  ;;  %6069 = vmatprep.subr.bf16.mxu0 %v6944_v16  ;;  %v7263_v13 = vcombine.low %v2849_v43, %v2865_v60  ;;  %v7265_v16 = vcombine.low %v2850_v61, %v2866_v0  ;;  %v7234_v17 = vcombine.high %v2818_v11, %v2834_v12  ;;  %v2675_v43 = vld [vmem:[%s9798_s5 + $0x5d0] sm:$0xff]  ;;  %v2660_v60 = vld [vmem:[%s9798_s5 + $0x558] sm:$0xff] }
 0x38a   :  { %6110 = vmatprep.subr.bf16.mxu1 %v6946_v38  ;;  %v7232_v38 = vcombine.high %v2817_v9, %v2833_v10  ;;  %v2676_v61 = vld [vmem:[%s9798_s5 + $0x5d8] sm:$0xff] }
 0x38c   :  { %6070 = vmatpush1.bf16.msra.mxu0 %v6943_v6  ;;  %v2802_v6 = vld [vmem:[%s9798_s5 + $0x9c8] sm:$0xff] }
 0x38d   :  { %6111 = vmatpush1.bf16.msra.mxu1 %v6945_v27  ;;  %6071 = vmatprep.subr.bf16.mxu0 %v6912_v28  ;;  %v7231_v27 = vcombine.low %v2817_v9, %v2833_v10  ;;  %v7233_v28 = vcombine.low %v2818_v11, %v2834_v12  ;;  %v7202_v30 = vcombine.high %v2786_v25, %v2802_v6 }
 0x38e   :  { %6112 = vmatprep.subr.bf16.mxu1 %v6914_v5  ;;  %v7200_v5 = vcombine.high %v2785_v21, %v2801_v4  ;;  %v7076_v11 = vcombine.high %v2659_v54, %v2675_v43  ;;  %v7078_v12 = vcombine.high %v2660_v60, %v2676_v61 }
 0x390   :  { %6072 = vmatpush1.bf16.msra.mxu0 %v6911_v34  ;;  %v2770_v34 = vld [vmem:[%s9798_s5 + $0x8c8] sm:$0xff] }
 0x391   :  { %6113 = vmatpush1.bf16.msra.mxu1 %v6913_v35  ;;  %6073 = vmatprep.subr.bf16.mxu0 %v7392_v36  ;;  %v7199_v35 = vcombine.low %v2785_v21, %v2801_v4  ;;  %v7201_v36 = vcombine.low %v2786_v25, %v2802_v6  ;;  %v7170_v44 = vcombine.high %v2754_v33, %v2770_v34  ;;  %v2643_v21 = vld [vmem:[%s9798_s5 + $0x4d0] sm:$0xff]  ;;  %v2628_v6 = vld [vmem:[%s9798_s5 + $0x458] sm:$0xff] }
 0x392   :  { %6114 = vmatprep.subr.bf16.mxu1 %v7394_v40  ;;  %v7168_v40 = vcombine.high %v2753_v31, %v2769_v32 }
 0x394   :  { %6074 = vmatpush2.bf16.msra.mxu0 %v7391_v14  ;;  %v2740_v14 = vld [vmem:[%s9798_s5 + $0x7d8] sm:$0xff] }
 0x395   :  { %6115 = vmatpush2.bf16.msra.mxu1 %v7393_v19  ;;  %6075 = vmatprep.subr.bf16.mxu0 %v7360_v3  ;;  %v7167_v19 = vcombine.low %v2753_v31, %v2769_v32  ;;  %v7169_v3 = vcombine.low %v2754_v33, %v2770_v34  ;;  %v7142_v63 = vcombine.high %v2724_v62, %v2740_v14 }
 0x396   :  { %6116 = vmatprep.subr.bf16.mxu1 %v7362_v48  ;;  %v9118_v48 = vsub.s32 4, %v7994_v42  ;;  %v7141_v53 = vcombine.low %v2724_v62, %v2740_v14  ;;  %v7077_v33 = vcombine.low %v2660_v60, %v2676_v61  ;;  %v2612_v62 = vld [vmem:[%s9798_s5 + $0x3d8] sm:$0xff] }
 0x398   :  { %6076 = vmatpush2.bf16.msra.mxu0 %v7359_v15  ;;  %v9127_v15 = vsub.s32 7, %v7994_v42  ;;  %v3028_v42 = vrot.slane %v8903_v58, %v9118_v48 }
 0x399   :  { %6117 = vmatpush2.bf16.msra.mxu1 %v7361_v20  ;;  %6077 = vmatprep.subr.bf16.mxu0 %v7328_v29  ;;  %v2691_v20 = vld [vmem:[%s9798_s5 + $0x650] sm:$0xff] }
 0x39a   :  { %6118 = vmatprep.subr.bf16.mxu1 %v7330_v24  ;;  %v2707_v29 = vld [vmem:[%s9798_s5 + $0x6d0] sm:$0xff]  ;;  %v7139_v24 = vcombine.low %v2723_v47, %v2739_v7  ;;  %v2596_v7 = vld [vmem:[%s9798_s5 + $0x358] sm:$0xff] }
 0x39b   :  { %v2611_v47 = vld [vmem:[%s9798_s5 + $0x3d0] sm:$0xff] }
 0x39c   :  { %6078 = vmatpush2.bf16.msra.mxu0 %v7327_v55  ;;  %v3036_v55 = vrot.slane %v8903_v58, %v9121_v50 }
 0x39d   :  { %6119 = vmatpush2.bf16.msra.mxu1 %v7329_v56  ;;  %6079 = vmatprep.subr.bf16.mxu0 %v7296_v41  ;;  %v3032_v56 = vrot.slane %v8903_v58, %v9124_v18  ;;  %v3040_v41 = vrot.slane %v8903_v58, %v9127_v15  ;;  %v7107_v58 = vcombine.low %v2691_v20, %v2707_v29 }
 0x39e   :  { %6120 = vmatprep.subr.bf16.mxu1 %v7298_v45  ;;  %v7108_v45 = vcombine.high %v2691_v20, %v2707_v29  ;;  %v2563_v20 = vld [vmem:[%s9798_s5 + $0x250] sm:$0xff] }
 0x39f   :  { %v2579_v29 = vld [vmem:[%s9798_s5 + $0x2d0] sm:$0xff] }
 0x3a0   :  { %6080 = vmatpush2.bf16.msra.mxu0 %v7295_v1 }
 0x3a1   :  { %6121 = vmatpush2.bf16.msra.mxu1 %v7297_v46  ;;  %6081 = vmatprep.subr.bf16.mxu0 %v7264_v2  ;;  %v7110_v46 = vcombine.high %v2692_v51, %v2708_v52  ;;  %v7109_v2 = vcombine.low %v2692_v51, %v2708_v52  ;;  %v2580_v51 = vld [vmem:[%s9798_s5 + $0x2d8] sm:$0xff] }
 0x3a2   :  { %6122 = vmatprep.subr.bf16.mxu1 %v7266_v8 }
 0x3a4   :  { %6082 = vmatpush2.bf16.msra.mxu0 %v7263_v13 }
 0x3a5   :  { %6123 = vmatpush2.bf16.msra.mxu1 %v7265_v16  ;;  %6083 = vmatprep.subr.bf16.mxu0 %v7232_v38 }
 0x3a6   :  { %6124 = vmatprep.subr.bf16.mxu1 %v7234_v17  ;;  %v2627_v17 = vld [vmem:[%s9798_s5 + $0x450] sm:$0xff] }
 0x3a7   :  { %v7044_v34 = vcombine.high %v2627_v17, %v2643_v21 }
 0x3a8   :  { %6084 = vmatpush2.bf16.msra.mxu0 %v7231_v27  ;;  %v2644_v27 = vld [vmem:[%s9798_s5 + $0x4d8] sm:$0xff] }
 0x3a9   :  { %6125 = vmatpush2.bf16.msra.mxu1 %v7233_v28  ;;  %6085 = vmatprep.subr.bf16.mxu0 %v7200_v5 }
 0x3aa   :  { %6126 = vmatprep.subr.bf16.mxu1 %v7202_v30  ;;  %v7075_v30 = vcombine.low %v2659_v54, %v2675_v43  ;;  %v6979_v43 = vcombine.low %v2563_v20, %v2579_v29 }
 0x3ac   :  { %6086 = vmatpush2.bf16.msra.mxu0 %v7199_v35 }
 0x3ad   :  { %6127 = vmatpush2.bf16.msra.mxu1 %v7201_v36  ;;  %6087 = vmatprep.subr.bf16.mxu0 %v7168_v40  ;;  %v7046_v40 = vcombine.high %v2628_v6, %v2644_v27 }
 0x3ae   :  { %6128 = vmatprep.subr.bf16.mxu1 %v7170_v44  ;;  %v2595_v44 = vld [vmem:[%s9798_s5 + $0x350] sm:$0xff] }
 0x3af   :  { %v7011_v52 = vcombine.low %v2595_v44, %v2611_v47 }
 0x3b0   :  { %6088 = vmatpush2.bf16.msra.mxu0 %v7167_v19  ;;  %v7043_v19 = vcombine.low %v2627_v17, %v2643_v21 }
 0x3b1   :  { %6129 = vmatpush2.bf16.msra.mxu1 %v7169_v3  ;;  %6139 = vmatprep.subr.bf16.mxu0 %v7140_v49  ;;  %v7045_v3 = vcombine.low %v2628_v6, %v2644_v27  ;;  %v7012_v49 = vcombine.high %v2595_v44, %v2611_v47  ;;  %v2947_v6 = vld [vmem:[%s9798_s5 + $0xe50] sm:$0xff] }
 0x3b2   :  { %6180 = vmatprep.subr.bf16.mxu1 %v7142_v63  ;;  %v7014_v63 = vcombine.high %v2596_v7, %v2612_v62  ;;  %v2963_v27 = vld [vmem:[%s9798_s5 + $0xed0] sm:$0xff] }
 0x3b3   :  { %v5845_v0 = vpop.f32.mrf.mxu0  ;;  %v5886_v1 = vpop.f32.mrf.mxu1  ;;  %6090 = vmatmul.mubr.bf16.vlgmr.msra.gmra.mxu0 %v8320_v23  ;;  %v7363_v44 = vcombine.low %v2947_v6, %v2963_v27 }
 0x3b4   :  { %6131 = vmatmul.mubr.bf16.vlgmr.msra.gmra.mxu1 %v8320_v23  ;;  %6140 = vmatpush1.bf16.msra.mxu0 %v7139_v24  ;;  %v5846_v8 = vadd.f32 %v5845_v0, %v3028_v42  ;;  %v5887_v13 = vadd.f32 %v5886_v1, %v3036_v55  ;;  %v2564_v24 = vld [vmem:[%s9798_s5 + $0x258] sm:$0xff]  ;;  %v7013_v42 = vcombine.low %v2596_v7, %v2612_v62  ;;  %v2531_v55 = vld [vmem:[%s9798_s5 + $0x150] sm:$0xff] }
 0x3b5   :  { %6171 = vmatprep.mubr.bf16.mxu0 %v8318_v22  ;;  %6181 = vmatpush1.bf16.msra.mxu1 %v7141_v53  ;;  %v5847_v9 = vpop.f32.mrf.mxu0  ;;  %v5888_v10 = vpop.f32.mrf.mxu1  ;;  %v6980_v53 = vcombine.high %v2563_v20, %v2579_v29  ;;  %v6982_v54 = vcombine.high %v2564_v24, %v2580_v51  ;;  %v6981_v60 = vcombine.low %v2564_v24, %v2580_v51  ;;  %v2499_v1 = vld [vmem:[%s9798_s5 + $0x50] sm:$0xff] }
 0x3b6   :  { %6212 = vmatprep.mubr.bf16.mxu1 %v8318_v22  ;;  %v5848_v16 = vadd.f32 %v5847_v9, %v3032_v56  ;;  %v5889_v38 = vadd.f32 %v5888_v10, %v3040_v41  ;;  %6141 = vmatprep.subr.bf16.mxu0 %v7108_v45  ;;  %v2547_v56 = vld [vmem:[%s9798_s5 + $0x1d0] sm:$0xff]  ;;  %v2532_v41 = vld [vmem:[%s9798_s5 + $0x158] sm:$0xff] }
 0x3b7   :  { %v5849_v4 = vpop.f32.mrf.mxu0  ;;  %v5890_v25 = vpop.f32.mrf.mxu1  ;;  %6182 = vmatprep.subr.bf16.mxu1 %v7110_v46  ;;  %v2548_v45 = vld [vmem:[%s9798_s5 + $0x1d8] sm:$0xff]  ;;  %v6948_v61 = vcombine.high %v2531_v55, %v2547_v56  ;;  %v2515_v46 = vld [vmem:[%s9798_s5 + $0xd0] sm:$0xff] }
 0x3b8   :  { %v6434_v28 = vcombine.low %v5846_v8, %v5848_v16  ;;  %v6435_v5 = vcombine.low %v5887_v13, %v5889_v38  ;;  %6142 = vmatpush1.bf16.msra.mxu0 %v7107_v58  ;;  %v6950_v0 = vcombine.high %v2532_v41, %v2548_v45  ;;  %v2500_v58 = vld [vmem:[%s9798_s5 + $0x58] sm:$0xff]  ;;  %v6947_v8 = vcombine.low %v2531_v55, %v2547_v56  ;;  %v2995_v13 = vld [vmem:[%s9798_s5 + $0xfd0] sm:$0xff] }
 0x3b9   :  { %6183 = vmatpush1.bf16.msra.mxu1 %v7109_v2  ;;  %v5850_v31 = vpop.f32.mrf.mxu0  ;;  %v5891_v32 = vpop.f32.mrf.mxu1  ;;  %6143 = vmatprep.subr.bf16.mxu0 %v7076_v11  ;;  %v2516_v2 = vld [vmem:[%s9798_s5 + $0xd8] sm:$0xff]  ;;  %v6949_v9 = vcombine.low %v2532_v41, %v2548_v45  ;;  %v6916_v10 = vcombine.high %v2499_v1, %v2515_v46  ;;  %v6915_v17 = vcombine.low %v2499_v1, %v2515_v46  ;;  %v2851_v51 = vld [vmem:[%s9798_s5 + $0xb50] sm:$0xff] }
 0x3ba   :  { %v6442_v35 = vrot.slane %v6434_v28, %v8940_v26  ;;  %v6449_v36 = vrot.slane %v6435_v5, %v8940_v26  ;;  %6184 = vmatprep.subr.bf16.mxu1 %v7078_v12  ;;  %v6918_v11 = vcombine.high %v2500_v58, %v2516_v2  ;;  %v2979_v12 = vld [vmem:[%s9798_s5 + $0xf50] sm:$0xff]  ;;  %v2980_v16 = vld [vmem:[%s9798_s5 + $0xf58] sm:$0xff]  ;;  %v6917_v21 = vcombine.low %v2500_v58, %v2516_v2 }
 0x3bb   :  { %v2996_v38 = vld [vmem:[%s9798_s5 + $0xfd8] sm:$0xff]  ;;  %v7396_v4 = vcombine.high %v2979_v12, %v2995_v13  ;;  %v7364_v32 = vcombine.high %v2947_v6, %v2963_v27  ;;  %v2819_v45 = vld [vmem:[%s9798_s5 + $0xa50] sm:$0xff] }
 0x3bc   :  { %v6450_v14 = vcombine.low %v6442_v35, %v6449_v36  ;;  %6144 = vmatpush1.bf16.msra.mxu0 %v7075_v30  ;;  %v7398_v25 = vcombine.high %v2980_v16, %v2996_v38  ;;  %v2948_v28 = vld [vmem:[%s9798_s5 + $0xe58] sm:$0xff]  ;;  %v7395_v30 = vcombine.low %v2979_v12, %v2995_v13  ;;  %v7397_v31 = vcombine.low %v2980_v16, %v2996_v38  ;;  %v2931_v35 = vld [vmem:[%s9798_s5 + $0xdd0] sm:$0xff] }
 0x3bd   :  { %6185 = vmatpush1.bf16.msra.mxu1 %v7077_v33  ;;  %6145 = vmatprep.subr.bf16.mxu0 %v7044_v34  ;;  %v2964_v5 = vld [vmem:[%s9798_s5 + $0xed8] sm:$0xff]  ;;  %v2915_v34 = vld [vmem:[%s9798_s5 + $0xd50] sm:$0xff] }
 0x3be   :  { %6562 = vst [vmem:[%s9800_s7 + $0x8] sm:$0xff] %v6450_v14  ;;  %6186 = vmatprep.subr.bf16.mxu1 %v7046_v40  ;;  %v7366_v33 = vcombine.high %v2948_v28, %v2964_v5  ;;  %v2916_v36 = vld [vmem:[%s9798_s5 + $0xd58] sm:$0xff]  ;;  %v7365_v47 = vcombine.low %v2948_v28, %v2964_v5  ;;  %v7332_v7 = vcombine.high %v2915_v34, %v2931_v35  ;;  %v2883_v14 = vld [vmem:[%s9798_s5 + $0xc50] sm:$0xff]  ;;  %v2725_v5 = vld [vmem:[%s9798_s5 + $0x760] sm:$0xff] }
 0x3bf   :  { %v2932_v40 = vld [vmem:[%s9798_s5 + $0xdd8] sm:$0xff]  ;;  %v2787_v2 = vld [vmem:[%s9798_s5 + $0x950] sm:$0xff] }
 0x3c0   :  { %6146 = vmatpush1.bf16.msra.mxu0 %v7043_v19  ;;  %v7334_v62 = vcombine.high %v2916_v36, %v2932_v40  ;;  %v2899_v19 = vld [vmem:[%s9798_s5 + $0xcd0] sm:$0xff]  ;;  %v7333_v20 = vcombine.low %v2916_v36, %v2932_v40  ;;  %v9341_v40 = vld [vmem:[%s9799_s6 + $0x8] sm:$0xff] }
 0x3c1   :  { %6187 = vmatpush1.bf16.msra.mxu1 %v7045_v3  ;;  %6147 = vmatprep.subr.bf16.mxu0 %v7012_v49  ;;  %v2884_v3 = vld [vmem:[%s9798_s5 + $0xc58] sm:$0xff]  ;;  %v7300_v29 = vcombine.high %v2883_v14, %v2899_v19  ;;  %v2755_v38 = vld [vmem:[%s9798_s5 + $0x850] sm:$0xff] }
 0x3c2   :  { %6188 = vmatprep.subr.bf16.mxu1 %v7014_v63  ;;  %v2900_v49 = vld [vmem:[%s9798_s5 + $0xcd8] sm:$0xff]  ;;  %v7331_v63 = vcombine.low %v2915_v34, %v2931_v35 }
 0x3c3   :  { %v7302_v24 = vcombine.high %v2884_v3, %v2900_v49  ;;  %v7301_v55 = vcombine.low %v2884_v3, %v2900_v49  ;;  %v3044_v3 = vrot.slane %v9341_v40, %v8049_v37  ;;  %v3048_v49 = vrot.slane %v9341_v40, %v8057_v39 }
 0x3c4   :  { %6148 = vmatpush1.bf16.msra.mxu0 %v7011_v52  ;;  %v2867_v52 = vld [vmem:[%s9798_s5 + $0xbd0] sm:$0xff] }
 0x3c5   :  { %6189 = vmatpush1.bf16.msra.mxu1 %v7013_v42  ;;  %6149 = vmatprep.subr.bf16.mxu0 %v6980_v53  ;;  %v2852_v42 = vld [vmem:[%s9798_s5 + $0xb58] sm:$0xff]  ;;  %v7268_v56 = vcombine.high %v2851_v51, %v2867_v52 }
 0x3c6   :  { %6190 = vmatprep.subr.bf16.mxu1 %v6982_v54  ;;  %v2868_v53 = vld [vmem:[%s9798_s5 + $0xbd8] sm:$0xff]  ;;  %v7299_v54 = vcombine.low %v2883_v14, %v2899_v19  ;;  %v2710_v14 = vld [vmem:[%s9798_s5 + $0x6e8] sm:$0xff] }
 0x3c7   :  { %v7270_v41 = vcombine.high %v2852_v42, %v2868_v53  ;;  %v7269_v1 = vcombine.low %v2852_v42, %v2868_v53  ;;  %v2662_v53 = vld [vmem:[%s9798_s5 + $0x568] sm:$0xff] }
 0x3c8   :  { %6150 = vmatpush1.bf16.msra.mxu0 %v6979_v43  ;;  %v2835_v43 = vld [vmem:[%s9798_s5 + $0xad0] sm:$0xff] }
 0x3c9   :  { %6191 = vmatpush1.bf16.msra.mxu1 %v6981_v60  ;;  %6151 = vmatprep.subr.bf16.mxu0 %v6948_v61  ;;  %v2820_v60 = vld [vmem:[%s9798_s5 + $0xa58] sm:$0xff]  ;;  %v7236_v46 = vcombine.high %v2819_v45, %v2835_v43 }
 0x3ca   :  { %6192 = vmatprep.subr.bf16.mxu1 %v6950_v0  ;;  %v2836_v61 = vld [vmem:[%s9798_s5 + $0xad8] sm:$0xff]  ;;  %v7267_v0 = vcombine.low %v2851_v51, %v2867_v52  ;;  %v3052_v51 = vrot.slane %v9341_v40, %v8148_v57  ;;  %v3056_v52 = vrot.slane %v9341_v40, %v8157_v59 }
 0x3cb   :  { %v7238_v58 = vcombine.high %v2820_v60, %v2836_v61  ;;  %v7237_v12 = vcombine.low %v2820_v60, %v2836_v61 }
 0x3cc   :  { %6152 = vmatpush1.bf16.msra.mxu0 %v6947_v8  ;;  %v2803_v8 = vld [vmem:[%s9798_s5 + $0x9d0] sm:$0xff] }
 0x3cd   :  { %6193 = vmatpush1.bf16.msra.mxu1 %v6949_v9  ;;  %6153 = vmatprep.subr.bf16.mxu0 %v6916_v10  ;;  %v2788_v9 = vld [vmem:[%s9798_s5 + $0x958] sm:$0xff]  ;;  %v7204_v13 = vcombine.high %v2787_v2, %v2803_v8 }
 0x3ce   :  { %6194 = vmatprep.subr.bf16.mxu1 %v6918_v11  ;;  %v2804_v10 = vld [vmem:[%s9798_s5 + $0x9d8] sm:$0xff]  ;;  %v7235_v11 = vcombine.low %v2819_v45, %v2835_v43 }
 0x3cf   :  { %v7206_v16 = vcombine.high %v2788_v9, %v2804_v10  ;;  %v7205_v6 = vcombine.low %v2788_v9, %v2804_v10  ;;  %v2630_v10 = vld [vmem:[%s9798_s5 + $0x468] sm:$0xff] }
 0x3d0   :  { %6154 = vmatpush1.bf16.msra.mxu0 %v6915_v17  ;;  %v2771_v17 = vld [vmem:[%s9798_s5 + $0x8d0] sm:$0xff] }
 0x3d1   :  { %6195 = vmatpush1.bf16.msra.mxu1 %v6917_v21  ;;  %6155 = vmatprep.subr.bf16.mxu0 %v7396_v4  ;;  %v2756_v21 = vld [vmem:[%s9798_s5 + $0x858] sm:$0xff]  ;;  %v7172_v27 = vcombine.high %v2755_v38, %v2771_v17 }
 0x3d2   :  { %6196 = vmatprep.subr.bf16.mxu1 %v7398_v25  ;;  %v2772_v4 = vld [vmem:[%s9798_s5 + $0x8d8] sm:$0xff]  ;;  %v7203_v25 = vcombine.low %v2787_v2, %v2803_v8 }
 0x3d3   :  { %v7174_v28 = vcombine.high %v2756_v21, %v2772_v4  ;;  %v7173_v34 = vcombine.low %v2756_v21, %v2772_v4 }
 0x3d4   :  { %6156 = vmatpush2.bf16.msra.mxu0 %v7395_v30  ;;  %v2741_v30 = vld [vmem:[%s9798_s5 + $0x7e0] sm:$0xff] }
 0x3d5   :  { %6197 = vmatpush2.bf16.msra.mxu1 %v7397_v31  ;;  %6157 = vmatprep.subr.bf16.mxu0 %v7364_v32  ;;  %v2726_v31 = vld [vmem:[%s9798_s5 + $0x768] sm:$0xff]  ;;  %v7144_v35 = vcombine.high %v2725_v5, %v2741_v30 }
 0x3d6   :  { %6198 = vmatprep.subr.bf16.mxu1 %v7366_v33  ;;  %v2742_v32 = vld [vmem:[%s9798_s5 + $0x7e8] sm:$0xff]  ;;  %v7171_v33 = vcombine.low %v2755_v38, %v2771_v17 }
 0x3d7   :  { %v7146_v36 = vcombine.high %v2726_v31, %v2742_v32  ;;  %v7145_v19 = vcombine.low %v2726_v31, %v2742_v32  ;;  %v2598_v31 = vld [vmem:[%s9798_s5 + $0x368] sm:$0xff] }
 0x3d8   :  { %6158 = vmatpush2.bf16.msra.mxu0 %v7363_v44  ;;  %v2693_v44 = vld [vmem:[%s9798_s5 + $0x660] sm:$0xff]  ;;  %v2614_v32 = vld [vmem:[%s9798_s5 + $0x3e8] sm:$0xff] }
 0x3d9   :  { %6199 = vmatpush2.bf16.msra.mxu1 %v7365_v47  ;;  %6159 = vmatprep.subr.bf16.mxu0 %v7332_v7  ;;  %v2709_v47 = vld [vmem:[%s9798_s5 + $0x6e0] sm:$0xff]  ;;  %v7143_v7 = vcombine.low %v2725_v5, %v2741_v30 }
 0x3da   :  { %6200 = vmatprep.subr.bf16.mxu1 %v7334_v62  ;;  %v2694_v62 = vld [vmem:[%s9798_s5 + $0x668] sm:$0xff]  ;;  %v2613_v5 = vld [vmem:[%s9798_s5 + $0x3e0] sm:$0xff] }
 0x3db   :  { %v7114_v42 = vcombine.high %v2694_v62, %v2710_v14  ;;  %v7113_v45 = vcombine.low %v2694_v62, %v2710_v14  ;;  %v2566_v62 = vld [vmem:[%s9798_s5 + $0x268] sm:$0xff] }
 0x3dc   :  { %6160 = vmatpush2.bf16.msra.mxu0 %v7331_v63  ;;  %v7112_v63 = vcombine.high %v2693_v44, %v2709_v47  ;;  %v2582_v14 = vld [vmem:[%s9798_s5 + $0x2e8] sm:$0xff] }
 0x3dd   :  { %6201 = vmatpush2.bf16.msra.mxu1 %v7333_v20  ;;  %6161 = vmatprep.subr.bf16.mxu0 %v7300_v29  ;;  %v2661_v20 = vld [vmem:[%s9798_s5 + $0x560] sm:$0xff] }
 0x3de   :  { %6202 = vmatprep.subr.bf16.mxu1 %v7302_v24  ;;  %v2677_v29 = vld [vmem:[%s9798_s5 + $0x5e0] sm:$0xff] }
 0x3df   :  { %v7080_v43 = vcombine.high %v2661_v20, %v2677_v29 }
 0x3e0   :  { %6162 = vmatpush2.bf16.msra.mxu0 %v7299_v54  ;;  %v2678_v54 = vld [vmem:[%s9798_s5 + $0x5e8] sm:$0xff] }
 0x3e1   :  { %6203 = vmatpush2.bf16.msra.mxu1 %v7301_v55  ;;  %6163 = vmatprep.subr.bf16.mxu0 %v7268_v56  ;;  %v7111_v56 = vcombine.low %v2693_v44, %v2709_v47  ;;  %v7081_v21 = vcombine.low %v2662_v53, %v2678_v54  ;;  %v7018_v44 = vcombine.high %v2598_v31, %v2614_v32  ;;  %v2565_v47 = vld [vmem:[%s9798_s5 + $0x260] sm:$0xff] }
 0x3e2   :  { %6204 = vmatprep.subr.bf16.mxu1 %v7270_v41 }
 0x3e4   :  { %6164 = vmatpush2.bf16.msra.mxu0 %v7267_v0 }
 0x3e5   :  { %6205 = vmatpush2.bf16.msra.mxu1 %v7269_v1  ;;  %6165 = vmatprep.subr.bf16.mxu0 %v7236_v46  ;;  %v7082_v1 = vcombine.high %v2662_v53, %v2678_v54  ;;  %v2629_v46 = vld [vmem:[%s9798_s5 + $0x460] sm:$0xff] }
 0x3e6   :  { %6206 = vmatprep.subr.bf16.mxu1 %v7238_v58  ;;  %v2645_v58 = vld [vmem:[%s9798_s5 + $0x4e0] sm:$0xff] }
 0x3e7   :  { %v7048_v4 = vcombine.high %v2629_v46, %v2645_v58 }
 0x3e8   :  { %6166 = vmatpush2.bf16.msra.mxu0 %v7235_v11  ;;  %v2646_v11 = vld [vmem:[%s9798_s5 + $0x4e8] sm:$0xff] }
 0x3e9   :  { %6207 = vmatpush2.bf16.msra.mxu1 %v7237_v12  ;;  %6167 = vmatprep.subr.bf16.mxu0 %v7204_v13 }
 0x3ea   :  { %6208 = vmatprep.subr.bf16.mxu1 %v7206_v16  ;;  %v7079_v16 = vcombine.low %v2661_v20, %v2677_v29  ;;  %v2533_v20 = vld [vmem:[%s9798_s5 + $0x160] sm:$0xff] }
 0x3eb   :  { %v2549_v29 = vld [vmem:[%s9798_s5 + $0x1e0] sm:$0xff] }
 0x3ec   :  { %6168 = vmatpush2.bf16.msra.mxu0 %v7203_v25  ;;  %v6952_v53 = vcombine.high %v2533_v20, %v2549_v29 }
 0x3ed   :  { %6209 = vmatpush2.bf16.msra.mxu1 %v7205_v6  ;;  %6169 = vmatprep.subr.bf16.mxu0 %v7172_v27  ;;  %v7050_v27 = vcombine.high %v2630_v10, %v2646_v11 }
 0x3ee   :  { %6210 = vmatprep.subr.bf16.mxu1 %v7174_v28  ;;  %v2597_v28 = vld [vmem:[%s9798_s5 + $0x360] sm:$0xff] }
 0x3f0   :  { %6170 = vmatpush2.bf16.msra.mxu0 %v7171_v33  ;;  %v7047_v33 = vcombine.low %v2629_v46, %v2645_v58  ;;  %v2997_v46 = vld [vmem:[%s9798_s5 + $0xfe0] sm:$0xff]  ;;  %v2982_v58 = vld [vmem:[%s9798_s5 + $0xf68] sm:$0xff] }
 0x3f1   :  { %6211 = vmatpush2.bf16.msra.mxu1 %v7173_v34  ;;  %6221 = vmatprep.subr.bf16.mxu0 %v7144_v35  ;;  %v7049_v35 = vcombine.low %v2630_v10, %v2646_v11 }
 0x3f2   :  { %6262 = vmatprep.subr.bf16.mxu1 %v7146_v36  ;;  %v7016_v36 = vcombine.high %v2597_v28, %v2613_v5 }
 0x3f3   :  { %v5927_v24 = vpop.f32.mrf.mxu0  ;;  %6172 = vmatmul.mubr.bf16.vlgmr.msra.gmra.mxu0 %v8320_v23 }
 0x3f4   :  { %v5968_v55 = vpop.f32.mrf.mxu1  ;;  %6213 = vmatmul.mubr.bf16.vlgmr.msra.gmra.mxu1 %v8320_v23  ;;  %6222 = vmatpush1.bf16.msra.mxu0 %v7143_v7  ;;  %v5928_v60 = vadd.f32 %v5927_v24, %v3044_v3  ;;  %v2581_v7 = vld [vmem:[%s9798_s5 + $0x2e0] sm:$0xff]  ;;  %v7017_v3 = vcombine.low %v2598_v31, %v2614_v32  ;;  %v2534_v24 = vld [vmem:[%s9798_s5 + $0x168] sm:$0xff] }
 0x3f5   :  { %6253 = vmatprep.mubr.bf16.mxu0 %v8318_v22  ;;  %6263 = vmatpush1.bf16.msra.mxu1 %v7145_v19  ;;  %v5929_v41 = vpop.f32.mrf.mxu0  ;;  %v5969_v2 = vadd.f32 %v5968_v55, %v3052_v51  ;;  %v7015_v19 = vcombine.low %v2597_v28, %v2613_v5  ;;  %v2550_v51 = vld [vmem:[%s9798_s5 + $0x1e8] sm:$0xff]  ;;  %v2501_v55 = vld [vmem:[%s9798_s5 + $0x60] sm:$0xff] }
 0x3f6   :  { %6294 = vmatprep.mubr.bf16.mxu1 %v8318_v22  ;;  %v5930_v61 = vadd.f32 %v5929_v41, %v3048_v49  ;;  %v5970_v0 = vpop.f32.mrf.mxu1  ;;  %6223 = vmatprep.subr.bf16.mxu0 %v7112_v63  ;;  %v6984_v49 = vcombine.high %v2565_v47, %v2581_v7  ;;  %v6986_v63 = vcombine.high %v2566_v62, %v2582_v14  ;;  %v2502_v41 = vld [vmem:[%s9798_s5 + $0x68] sm:$0xff] }
 0x3f7   :  { %v5971_v8 = vadd.f32 %v5970_v0, %v3056_v52  ;;  %v5931_v9 = vpop.f32.mrf.mxu0  ;;  %6264 = vmatprep.subr.bf16.mxu1 %v7114_v42  ;;  %v6983_v52 = vcombine.low %v2565_v47, %v2581_v7  ;;  %v6985_v42 = vcombine.low %v2566_v62, %v2582_v14  ;;  %v6954_v54 = vcombine.high %v2534_v24, %v2550_v51  ;;  %v2918_v28 = vld [vmem:[%s9798_s5 + $0xd68] sm:$0xff] }
 0x3f8   :  { %v6451_v12 = vcombine.low %v5928_v60, %v5930_v61  ;;  %v5972_v13 = vpop.f32.mrf.mxu1  ;;  %6224 = vmatpush1.bf16.msra.mxu0 %v7111_v56  ;;  %v2517_v56 = vld [vmem:[%s9798_s5 + $0xe0] sm:$0xff]  ;;  %v6953_v60 = vcombine.low %v2534_v24, %v2550_v51  ;;  %v2934_v5 = vld [vmem:[%s9798_s5 + $0xde8] sm:$0xff] }
 0x3f9   :  { %v6452_v38 = vcombine.low %v5969_v2, %v5971_v8  ;;  %6265 = vmatpush1.bf16.msra.mxu1 %v7113_v45  ;;  %v5932_v17 = vpop.f32.mrf.mxu0  ;;  %6225 = vmatprep.subr.bf16.mxu0 %v7080_v43  ;;  %v2518_v45 = vld [vmem:[%s9798_s5 + $0xe8] sm:$0xff]  ;;  %v6951_v43 = vcombine.low %v2533_v20, %v2549_v29  ;;  %v6920_v61 = vcombine.high %v2501_v55, %v2517_v56  ;;  %v2965_v13 = vld [vmem:[%s9798_s5 + $0xee0] sm:$0xff] }
 0x3fa   :  { %v6459_v25 = vrot.slane %v6451_v12, %v8940_v26  ;;  %v5973_v6 = vpop.f32.mrf.mxu1  ;;  %6266 = vmatprep.subr.bf16.mxu1 %v7082_v1  ;;  %v6922_v0 = vcombine.high %v2502_v41, %v2518_v45  ;;  %v2981_v1 = vld [vmem:[%s9798_s5 + $0xf60] sm:$0xff]  ;;  %v2998_v2 = vld [vmem:[%s9798_s5 + $0xfe8] sm:$0xff]  ;;  %v6919_v8 = vcombine.low %v2501_v55, %v2517_v56  ;;  %v6921_v9 = vcombine.low %v2502_v41, %v2518_v45 }
 0x3fb   :  { %v6466_v30 = vrot.slane %v6452_v38, %v8940_v26  ;;  %v7400_v10 = vcombine.high %v2981_v1, %v2997_v46  ;;  %v7402_v11 = vcombine.high %v2982_v58, %v2998_v2  ;;  %v2949_v12 = vld [vmem:[%s9798_s5 + $0xe60] sm:$0xff]  ;;  %v2966_v38 = vld [vmem:[%s9798_s5 + $0xee8] sm:$0xff]  ;;  %v7399_v17 = vcombine.low %v2981_v1, %v2997_v46 }
 0x3fc   :  { %6226 = vmatpush1.bf16.msra.mxu0 %v7079_v16  ;;  %v2950_v16 = vld [vmem:[%s9798_s5 + $0xe68] sm:$0xff]  ;;  %v2917_v6 = vld [vmem:[%s9798_s5 + $0xd60] sm:$0xff]  ;;  %v7337_v7 = vcombine.low %v2918_v28, %v2934_v5 }
 0x3fd   :  { %v6467_v34 = vcombine.low %v6459_v25, %v6466_v30  ;;  %6267 = vmatpush1.bf16.msra.mxu1 %v7081_v21  ;;  %6227 = vmatprep.subr.bf16.mxu0 %v7048_v4  ;;  %v7401_v21 = vcombine.low %v2982_v58, %v2998_v2  ;;  %v7368_v4 = vcombine.high %v2949_v12, %v2965_v13 }
 0x3fe   :  { %6268 = vmatprep.subr.bf16.mxu1 %v7050_v27  ;;  %v7370_v25 = vcombine.high %v2950_v16, %v2966_v38  ;;  %v2933_v27 = vld [vmem:[%s9798_s5 + $0xde0] sm:$0xff]  ;;  %v7367_v30 = vcombine.low %v2949_v12, %v2965_v13  ;;  %v7369_v31 = vcombine.low %v2950_v16, %v2966_v38 }
 0x3ff   :  { %6563 = vst [vmem:[%s9800_s7 + $0x10] sm:$0xff] %v6467_v34  ;;  %v7336_v32 = vcombine.high %v2917_v6, %v2933_v27  ;;  %v2885_v34 = vld [vmem:[%s9798_s5 + $0xc60] sm:$0xff]  ;;  %v7335_v47 = vcombine.low %v2917_v6, %v2933_v27 }
 0x400   :  { %6228 = vmatpush1.bf16.msra.mxu0 %v7047_v33  ;;  %v7338_v33 = vcombine.high %v2918_v28, %v2934_v5 }
 0x401   :  { %6269 = vmatpush1.bf16.msra.mxu1 %v7049_v35  ;;  %6229 = vmatprep.subr.bf16.mxu0 %v7016_v36  ;;  %v2901_v35 = vld [vmem:[%s9798_s5 + $0xce0] sm:$0xff]  ;;  %v2886_v36 = vld [vmem:[%s9798_s5 + $0xc68] sm:$0xff] }
 0x402   :  { %6270 = vmatprep.subr.bf16.mxu1 %v7018_v44  ;;  %v2902_v44 = vld [vmem:[%s9798_s5 + $0xce8] sm:$0xff]  ;;  %v7304_v62 = vcombine.high %v2885_v34, %v2901_v35  ;;  %v7303_v20 = vcombine.low %v2885_v34, %v2901_v35  ;;  %v2712_v34 = vld [vmem:[%s9798_s5 + $0x6f8] sm:$0xff] }
 0x403   :  { %v7306_v14 = vcombine.high %v2886_v36, %v2902_v44  ;;  %v7305_v29 = vcombine.low %v2886_v36, %v2902_v44  ;;  %v3060_v36 = vrot.slane %v9341_v40, %v9118_v48  ;;  %v3064_v44 = vrot.slane %v9341_v40, %v9124_v18 }
 0x404   :  { %6230 = vmatpush1.bf16.msra.mxu0 %v7015_v19  ;;  %v2853_v19 = vld [vmem:[%s9798_s5 + $0xb60] sm:$0xff] }
 0x405   :  { %6271 = vmatpush1.bf16.msra.mxu1 %v7017_v3  ;;  %6231 = vmatprep.subr.bf16.mxu0 %v6984_v49  ;;  %v2869_v3 = vld [vmem:[%s9798_s5 + $0xbe0] sm:$0xff]  ;;  %v2854_v49 = vld [vmem:[%s9798_s5 + $0xb68] sm:$0xff] }
 0x406   :  { %6272 = vmatprep.subr.bf16.mxu1 %v6986_v63  ;;  %v2870_v63 = vld [vmem:[%s9798_s5 + $0xbe8] sm:$0xff]  ;;  %v7272_v24 = vcombine.high %v2853_v19, %v2869_v3  ;;  %v7271_v55 = vcombine.low %v2853_v19, %v2869_v3  ;;  %v3068_v19 = vrot.slane %v9341_v40, %v9121_v50  ;;  %v3072_v3 = vrot.slane %v9341_v40, %v9127_v15 }
 0x407   :  { %v7274_v51 = vcombine.high %v2854_v49, %v2870_v63  ;;  %v7273_v56 = vcombine.low %v2854_v49, %v2870_v63  ;;  %v2664_v63 = vld [vmem:[%s9798_s5 + $0x578] sm:$0xff] }
 0x408   :  { %6232 = vmatpush1.bf16.msra.mxu0 %v6983_v52  ;;  %v2821_v52 = vld [vmem:[%s9798_s5 + $0xa60] sm:$0xff] }
 0x409   :  { %6273 = vmatpush1.bf16.msra.mxu1 %v6985_v42  ;;  %6233 = vmatprep.subr.bf16.mxu0 %v6952_v53  ;;  %v2837_v42 = vld [vmem:[%s9798_s5 + $0xae0] sm:$0xff]  ;;  %v2822_v53 = vld [vmem:[%s9798_s5 + $0xa68] sm:$0xff] }
 0x40a   :  { %6274 = vmatprep.subr.bf16.mxu1 %v6954_v54  ;;  %v2838_v54 = vld [vmem:[%s9798_s5 + $0xae8] sm:$0xff]  ;;  %v7240_v41 = vcombine.high %v2821_v52, %v2837_v42  ;;  %v7239_v1 = vcombine.low %v2821_v52, %v2837_v42 }
 0x40b   :  { %v7242_v45 = vcombine.high %v2822_v53, %v2838_v54  ;;  %v7241_v46 = vcombine.low %v2822_v53, %v2838_v54 }
 0x40c   :  { %6234 = vmatpush1.bf16.msra.mxu0 %v6951_v43  ;;  %v2789_v43 = vld [vmem:[%s9798_s5 + $0x960] sm:$0xff] }
 0x40d   :  { %6275 = vmatpush1.bf16.msra.mxu1 %v6953_v60  ;;  %6235 = vmatprep.subr.bf16.mxu0 %v6920_v61  ;;  %v2805_v60 = vld [vmem:[%s9798_s5 + $0x9e0] sm:$0xff]  ;;  %v2790_v61 = vld [vmem:[%s9798_s5 + $0x968] sm:$0xff] }
 0x40e   :  { %6276 = vmatprep.subr.bf16.mxu1 %v6922_v0  ;;  %v2806_v0 = vld [vmem:[%s9798_s5 + $0x9e8] sm:$0xff]  ;;  %v7208_v58 = vcombine.high %v2789_v43, %v2805_v60  ;;  %v7207_v12 = vcombine.low %v2789_v43, %v2805_v60 }
 0x40f   :  { %v7210_v2 = vcombine.high %v2790_v61, %v2806_v0  ;;  %v7209_v13 = vcombine.low %v2790_v61, %v2806_v0  ;;  %v2648_v61 = vld [vmem:[%s9798_s5 + $0x4f8] sm:$0xff] }
 0x410   :  { %6236 = vmatpush1.bf16.msra.mxu0 %v6919_v8  ;;  %v2757_v8 = vld [vmem:[%s9798_s5 + $0x860] sm:$0xff] }
 0x411   :  { %6277 = vmatpush1.bf16.msra.mxu1 %v6921_v9  ;;  %6237 = vmatprep.subr.bf16.mxu0 %v7400_v10  ;;  %v2773_v9 = vld [vmem:[%s9798_s5 + $0x8e0] sm:$0xff]  ;;  %v2758_v10 = vld [vmem:[%s9798_s5 + $0x868] sm:$0xff] }
 0x412   :  { %6278 = vmatprep.subr.bf16.mxu1 %v7402_v11  ;;  %v2774_v11 = vld [vmem:[%s9798_s5 + $0x8e8] sm:$0xff]  ;;  %v7176_v16 = vcombine.high %v2757_v8, %v2773_v9  ;;  %v7175_v6 = vcombine.low %v2757_v8, %v2773_v9 }
 0x413   :  { %v7178_v38 = vcombine.high %v2758_v10, %v2774_v11  ;;  %v7177_v27 = vcombine.low %v2758_v10, %v2774_v11 }
 0x414   :  { %6238 = vmatpush2.bf16.msra.mxu0 %v7399_v17  ;;  %v2727_v17 = vld [vmem:[%s9798_s5 + $0x770] sm:$0xff] }
 0x415   :  { %6279 = vmatpush2.bf16.msra.mxu1 %v7401_v21  ;;  %6239 = vmatprep.subr.bf16.mxu0 %v7368_v4  ;;  %v2743_v21 = vld [vmem:[%s9798_s5 + $0x7f0] sm:$0xff]  ;;  %v2728_v4 = vld [vmem:[%s9798_s5 + $0x778] sm:$0xff] }
 0x416   :  { %6280 = vmatprep.subr.bf16.mxu1 %v7370_v25  ;;  %v2744_v25 = vld [vmem:[%s9798_s5 + $0x7f8] sm:$0xff]  ;;  %v7148_v28 = vcombine.high %v2727_v17, %v2743_v21 }
 0x417   :  { %v7150_v5 = vcombine.high %v2728_v4, %v2744_v25  ;;  %v7149_v35 = vcombine.low %v2728_v4, %v2744_v25 }
 0x418   :  { %6240 = vmatpush2.bf16.msra.mxu0 %v7367_v30  ;;  %v2695_v30 = vld [vmem:[%s9798_s5 + $0x670] sm:$0xff] }
 0x419   :  { %6281 = vmatpush2.bf16.msra.mxu1 %v7369_v31  ;;  %6241 = vmatprep.subr.bf16.mxu0 %v7336_v32  ;;  %v2711_v31 = vld [vmem:[%s9798_s5 + $0x6f0] sm:$0xff]  ;;  %v7147_v32 = vcombine.low %v2727_v17, %v2743_v21  ;;  %v2600_v17 = vld [vmem:[%s9798_s5 + $0x378] sm:$0xff] }
 0x41a   :  { %6282 = vmatprep.subr.bf16.mxu1 %v7338_v33  ;;  %v2696_v33 = vld [vmem:[%s9798_s5 + $0x678] sm:$0xff] }
 0x41b   :  { %v7118_v49 = vcombine.high %v2696_v33, %v2712_v34  ;;  %v7117_v52 = vcombine.low %v2696_v33, %v2712_v34  ;;  %v2616_v21 = vld [vmem:[%s9798_s5 + $0x3f8] sm:$0xff] }
 0x41c   :  { %6242 = vmatpush2.bf16.msra.mxu0 %v7335_v47  ;;  %v7116_v47 = vcombine.high %v2695_v30, %v2711_v31  ;;  %v7021_v34 = vcombine.low %v2600_v17, %v2616_v21 }
 0x41d   :  { %6283 = vmatpush2.bf16.msra.mxu1 %v7337_v7  ;;  %6243 = vmatprep.subr.bf16.mxu0 %v7304_v62  ;;  %v2663_v7 = vld [vmem:[%s9798_s5 + $0x570] sm:$0xff] }
 0x41e   :  { %6284 = vmatprep.subr.bf16.mxu1 %v7306_v14  ;;  %v2679_v62 = vld [vmem:[%s9798_s5 + $0x5f0] sm:$0xff] }
 0x41f   :  { %v7084_v40 = vcombine.high %v2663_v7, %v2679_v62 }
 0x420   :  { %6244 = vmatpush2.bf16.msra.mxu0 %v7303_v20  ;;  %v2680_v20 = vld [vmem:[%s9798_s5 + $0x5f8] sm:$0xff] }
 0x421   :  { %6285 = vmatpush2.bf16.msra.mxu1 %v7305_v29  ;;  %6245 = vmatprep.subr.bf16.mxu0 %v7272_v24  ;;  %v7115_v24 = vcombine.low %v2695_v30, %v2711_v31  ;;  %v7085_v8 = vcombine.low %v2664_v63, %v2680_v20  ;;  %v2583_v30 = vld [vmem:[%s9798_s5 + $0x2f0] sm:$0xff]  ;;  %v2568_v31 = vld [vmem:[%s9798_s5 + $0x278] sm:$0xff] }
 0x422   :  { %6286 = vmatprep.subr.bf16.mxu1 %v7274_v51 }
 0x424   :  { %6246 = vmatpush2.bf16.msra.mxu0 %v7271_v55  ;;  %v7086_v55 = vcombine.high %v2664_v63, %v2680_v20  ;;  %v2503_v63 = vld [vmem:[%s9798_s5 + $0x70] sm:$0xff] }
 0x425   :  { %6287 = vmatpush2.bf16.msra.mxu1 %v7273_v56  ;;  %6247 = vmatprep.subr.bf16.mxu0 %v7240_v41  ;;  %v2631_v56 = vld [vmem:[%s9798_s5 + $0x470] sm:$0xff] }
 0x426   :  { %6288 = vmatprep.subr.bf16.mxu1 %v7242_v45  ;;  %v2647_v41 = vld [vmem:[%s9798_s5 + $0x4f0] sm:$0xff] }
 0x427   :  { %v7052_v9 = vcombine.high %v2631_v56, %v2647_v41  ;;  %v7051_v4 = vcombine.low %v2631_v56, %v2647_v41  ;;  %v2519_v20 = vld [vmem:[%s9798_s5 + $0xf0] sm:$0xff]  ;;  %v3000_v56 = vld [vmem:[%s9798_s5 + $0xff8] sm:$0xff] }
 0x428   :  { %6248 = vmatpush2.bf16.msra.mxu0 %v7239_v1  ;;  %v6923_v41 = vcombine.low %v2503_v63, %v2519_v20 }
 0x429   :  { %6289 = vmatpush2.bf16.msra.mxu1 %v7241_v46  ;;  %6249 = vmatprep.subr.bf16.mxu0 %v7208_v58  ;;  %v7083_v46 = vcombine.low %v2663_v7, %v2679_v62  ;;  %v2536_v7 = vld [vmem:[%s9798_s5 + $0x178] sm:$0xff] }
 0x42a   :  { %6290 = vmatprep.subr.bf16.mxu1 %v7210_v2  ;;  %v2552_v62 = vld [vmem:[%s9798_s5 + $0x1f8] sm:$0xff] }
 0x42c   :  { %6250 = vmatpush2.bf16.msra.mxu0 %v7207_v12 }
 0x42d   :  { %6291 = vmatpush2.bf16.msra.mxu1 %v7209_v13  ;;  %6251 = vmatprep.subr.bf16.mxu0 %v7176_v16  ;;  %v2599_v13 = vld [vmem:[%s9798_s5 + $0x370] sm:$0xff] }
 0x42e   :  { %6292 = vmatprep.subr.bf16.mxu1 %v7178_v38  ;;  %v2615_v16 = vld [vmem:[%s9798_s5 + $0x3f0] sm:$0xff] }
 0x42f   :  { %v7019_v33 = vcombine.low %v2599_v13, %v2615_v16 }
 0x430   :  { %6252 = vmatpush2.bf16.msra.mxu0 %v7175_v6 }
 0x431   :  { %6293 = vmatpush2.bf16.msra.mxu1 %v7177_v27  ;;  %6303 = vmatprep.subr.bf16.mxu0 %v7148_v28  ;;  %v7020_v27 = vcombine.high %v2599_v13, %v2615_v16  ;;  %v7022_v28 = vcombine.high %v2600_v17, %v2616_v21  ;;  %v2887_v21 = vld [vmem:[%s9798_s5 + $0xc70] sm:$0xff] }
 0x432   :  { %6344 = vmatprep.subr.bf16.mxu1 %v7150_v5  ;;  %v2567_v5 = vld [vmem:[%s9798_s5 + $0x270] sm:$0xff] }
 0x433   :  { %v6009_v14 = vpop.f32.mrf.mxu0  ;;  %6254 = vmatmul.mubr.bf16.vlgmr.msra.gmra.mxu0 %v8320_v23 }
 0x434   :  { %v6050_v29 = vpop.f32.mrf.mxu1  ;;  %6295 = vmatmul.mubr.bf16.vlgmr.msra.gmra.mxu1 %v8320_v23  ;;  %6304 = vmatpush1.bf16.msra.mxu0 %v7147_v32  ;;  %v6010_v42 = vadd.f32 %v6009_v14, %v3060_v36  ;;  %v2584_v32 = vld [vmem:[%s9798_s5 + $0x2f8] sm:$0xff]  ;;  %v6987_v14 = vcombine.low %v2567_v5, %v2583_v30 }
 0x435   :  { %6335 = vmatprep.mubr.bf16.mxu0 %v8318_v22  ;;  %6345 = vmatpush1.bf16.msra.mxu1 %v7149_v35  ;;  %v6011_v51 = vpop.f32.mrf.mxu0  ;;  %v6051_v45 = vadd.f32 %v6050_v29, %v3068_v19  ;;  %v6988_v35 = vcombine.high %v2567_v5, %v2583_v30  ;;  %v6990_v36 = vcombine.high %v2568_v31, %v2584_v32  ;;  %v2504_v29 = vld [vmem:[%s9798_s5 + $0x78] sm:$0xff] }
 0x436   :  { %6376 = vmatprep.mubr.bf16.mxu1 %v8318_v22  ;;  %v6012_v53 = vadd.f32 %v6011_v51, %v3064_v44  ;;  %v6052_v54 = vpop.f32.mrf.mxu1  ;;  %6305 = vmatprep.subr.bf16.mxu0 %v7116_v47  ;;  %v2632_v22 = vld [vmem:[%s9798_s5 + $0x478] sm:$0xff]  ;;  %v2535_v44 = vld [vmem:[%s9798_s5 + $0x170] sm:$0xff]  ;;  %v6989_v19 = vcombine.low %v2568_v31, %v2584_v32 }
 0x437   :  { %v6053_v43 = vadd.f32 %v6052_v54, %v3072_v3  ;;  %v6013_v60 = vpop.f32.mrf.mxu0  ;;  %6346 = vmatprep.subr.bf16.mxu1 %v7118_v49  ;;  %v7054_v12 = vcombine.high %v2632_v22, %v2648_v61  ;;  %v7053_v6 = vcombine.low %v2632_v22, %v2648_v61  ;;  %v2551_v47 = vld [vmem:[%s9798_s5 + $0x1f0] sm:$0xff]  ;;  %v6958_v49 = vcombine.high %v2536_v7, %v2552_v62 }
 0x438   :  { %v6468_v0 = vcombine.low %v6010_v42, %v6012_v53  ;;  %v6054_v1 = vpop.f32.mrf.mxu1  ;;  %6306 = vmatpush1.bf16.msra.mxu0 %v7115_v24  ;;  %v6956_v3 = vcombine.high %v2535_v44, %v2551_v47  ;;  %v2520_v24 = vld [vmem:[%s9798_s5 + $0xf8] sm:$0xff]  ;;  %v6955_v51 = vcombine.low %v2535_v44, %v2551_v47  ;;  %v2983_v53 = vld [vmem:[%s9798_s5 + $0xf70] sm:$0xff] }
 0x439   :  { %v6469_v58 = vcombine.low %v6051_v45, %v6053_v43  ;;  %6347 = vmatpush1.bf16.msra.mxu1 %v7117_v52  ;;  %v6014_v2 = vpop.f32.mrf.mxu0  ;;  %6307 = vmatprep.subr.bf16.mxu0 %v7084_v40  ;;  %v6957_v52 = vcombine.low %v2536_v7, %v2552_v62  ;;  %v6924_v40 = vcombine.high %v2503_v63, %v2519_v20  ;;  %v2999_v54 = vld [vmem:[%s9798_s5 + $0xff0] sm:$0xff]  ;;  %v2968_v1 = vld [vmem:[%s9798_s5 + $0xef8] sm:$0xff] }
 0x43a   :  { %v6476_v10 = vrot.slane %v6468_v0, %v8940_v26  ;;  %v6055_v11 = vpop.f32.mrf.mxu1  ;;  %6348 = vmatprep.subr.bf16.mxu1 %v7086_v55  ;;  %v6926_v42 = vcombine.high %v2504_v29, %v2520_v24  ;;  %v2984_v55 = vld [vmem:[%s9798_s5 + $0xf78] sm:$0xff]  ;;  %v6925_v45 = vcombine.low %v2504_v29, %v2520_v24  ;;  %v7404_v43 = vcombine.high %v2983_v53, %v2999_v54  ;;  %v2951_v22 = vld [vmem:[%s9798_s5 + $0xe70] sm:$0xff] }
 0x43b   :  { %v6483_v38 = vrot.slane %v6469_v58, %v8940_v26  ;;  %v7406_v60 = vcombine.high %v2984_v55, %v3000_v56  ;;  %v2967_v61 = vld [vmem:[%s9798_s5 + $0xef0] sm:$0xff]  ;;  %v2952_v0 = vld [vmem:[%s9798_s5 + $0xe78] sm:$0xff]  ;;  %v7405_v58 = vcombine.low %v2984_v55, %v3000_v56 }
 0x43c   :  { %6308 = vmatpush1.bf16.msra.mxu0 %v7083_v46  ;;  %v7403_v46 = vcombine.low %v2983_v53, %v2999_v54  ;;  %v7372_v2 = vcombine.high %v2951_v22, %v2967_v61  ;;  %v2920_v11 = vld [vmem:[%s9798_s5 + $0xd78] sm:$0xff]  ;;  %v7371_v13 = vcombine.low %v2951_v22, %v2967_v61  ;;  %v7373_v16 = vcombine.low %v2952_v0, %v2968_v1  ;;  %v2855_v31 = vld [vmem:[%s9798_s5 + $0xb70] sm:$0xff] }
 0x43d   :  { %v6484_v25 = vcombine.low %v6476_v10, %v6483_v38  ;;  %6349 = vmatpush1.bf16.msra.mxu1 %v7085_v8  ;;  %6309 = vmatprep.subr.bf16.mxu0 %v7052_v9  ;;  %v7374_v8 = vcombine.high %v2952_v0, %v2968_v1  ;;  %v2919_v9 = vld [vmem:[%s9798_s5 + $0xd70] sm:$0xff] }
 0x43e   :  { %6350 = vmatprep.subr.bf16.mxu1 %v7054_v12  ;;  %v2935_v10 = vld [vmem:[%s9798_s5 + $0xdf0] sm:$0xff]  ;;  %v2936_v12 = vld [vmem:[%s9798_s5 + $0xdf8] sm:$0xff] }
 0x43f   :  { %6564 = vst [vmem:[%s9800_s7 + $0x18] sm:$0xff] %v6484_v25  ;;  %v7340_v38 = vcombine.high %v2919_v9, %v2935_v10  ;;  %v7342_v17 = vcombine.high %v2920_v11, %v2936_v12  ;;  %v2888_v25 = vld [vmem:[%s9798_s5 + $0xc78] sm:$0xff]  ;;  %v2871_v32 = vld [vmem:[%s9798_s5 + $0xbf0] sm:$0xff] }
 0x440   :  { %6310 = vmatpush1.bf16.msra.mxu0 %v7051_v4  ;;  %v2903_v4 = vld [vmem:[%s9798_s5 + $0xcf0] sm:$0xff]  ;;  %v7276_v44 = vcombine.high %v2855_v31, %v2871_v32 }
 0x441   :  { %6351 = vmatpush1.bf16.msra.mxu1 %v7053_v6  ;;  %6311 = vmatprep.subr.bf16.mxu0 %v7020_v27  ;;  %v2904_v6 = vld [vmem:[%s9798_s5 + $0xcf8] sm:$0xff]  ;;  %v7339_v27 = vcombine.low %v2919_v9, %v2935_v10  ;;  %v7308_v5 = vcombine.high %v2887_v21, %v2903_v4  ;;  %v2823_v7 = vld [vmem:[%s9798_s5 + $0xa70] sm:$0xff] }
 0x442   :  { %6352 = vmatprep.subr.bf16.mxu1 %v7022_v28  ;;  %v7341_v28 = vcombine.low %v2920_v11, %v2936_v12  ;;  %v7310_v30 = vcombine.high %v2888_v25, %v2904_v6  ;;  %v2839_v62 = vld [vmem:[%s9798_s5 + $0xaf0] sm:$0xff] }
 0x443   :  { %v7244_v63 = vcombine.high %v2823_v7, %v2839_v62  ;;  %v2791_v29 = vld [vmem:[%s9798_s5 + $0x970] sm:$0xff] }
 0x444   :  { %6312 = vmatpush1.bf16.msra.mxu0 %v7019_v33  ;;  %v2856_v33 = vld [vmem:[%s9798_s5 + $0xb78] sm:$0xff]  ;;  %v2807_v24 = vld [vmem:[%s9798_s5 + $0x9f0] sm:$0xff] }
 0x445   :  { %6353 = vmatpush1.bf16.msra.mxu1 %v7021_v34  ;;  %6313 = vmatprep.subr.bf16.mxu0 %v6988_v35  ;;  %v2872_v34 = vld [vmem:[%s9798_s5 + $0xbf8] sm:$0xff]  ;;  %v7307_v35 = vcombine.low %v2887_v21, %v2903_v4  ;;  %v7212_v53 = vcombine.high %v2791_v29, %v2807_v24  ;;  %v2759_v55 = vld [vmem:[%s9798_s5 + $0x870] sm:$0xff] }
 0x446   :  { %6354 = vmatprep.subr.bf16.mxu1 %v6990_v36  ;;  %v7309_v36 = vcombine.low %v2888_v25, %v2904_v6  ;;  %v7278_v47 = vcombine.high %v2856_v33, %v2872_v34  ;;  %v2775_v56 = vld [vmem:[%s9798_s5 + $0x8f0] sm:$0xff] }
 0x447   :  { %v7180_v22 = vcombine.high %v2759_v55, %v2775_v56  ;;  %v7179_v0 = vcombine.low %v2759_v55, %v2775_v56 }
 0x448   :  { %6314 = vmatpush1.bf16.msra.mxu0 %v6987_v14  ;;  %v2824_v14 = vld [vmem:[%s9798_s5 + $0xa78] sm:$0xff] }
 0x449   :  { %6355 = vmatpush1.bf16.msra.mxu1 %v6989_v19  ;;  %6315 = vmatprep.subr.bf16.mxu0 %v6956_v3  ;;  %v2840_v19 = vld [vmem:[%s9798_s5 + $0xaf8] sm:$0xff]  ;;  %v7275_v3 = vcombine.low %v2855_v31, %v2871_v32 }
 0x44a   :  { %6356 = vmatprep.subr.bf16.mxu1 %v6958_v49  ;;  %v7277_v49 = vcombine.low %v2856_v33, %v2872_v34  ;;  %v7246_v20 = vcombine.high %v2824_v14, %v2840_v19 }
 0x44c   :  { %6316 = vmatpush1.bf16.msra.mxu0 %v6955_v51  ;;  %v2792_v51 = vld [vmem:[%s9798_s5 + $0x978] sm:$0xff] }
 0x44d   :  { %6357 = vmatpush1.bf16.msra.mxu1 %v6957_v52  ;;  %6317 = vmatprep.subr.bf16.mxu0 %v6924_v40  ;;  %v2808_v52 = vld [vmem:[%s9798_s5 + $0x9f8] sm:$0xff]  ;;  %v7243_v40 = vcombine.low %v2823_v7, %v2839_v62 }
 0x44e   :  { %6358 = vmatprep.subr.bf16.mxu1 %v6926_v42  ;;  %v7245_v42 = vcombine.low %v2824_v14, %v2840_v19  ;;  %v7214_v54 = vcombine.high %v2792_v51, %v2808_v52 }
 0x450   :  { %6318 = vmatpush1.bf16.msra.mxu0 %v6923_v41  ;;  %v2760_v41 = vld [vmem:[%s9798_s5 + $0x878] sm:$0xff] }
 0x451   :  { %6359 = vmatpush1.bf16.msra.mxu1 %v6925_v45  ;;  %6319 = vmatprep.subr.bf16.mxu0 %v7404_v43  ;;  %v2776_v45 = vld [vmem:[%s9798_s5 + $0x8f8] sm:$0xff]  ;;  %v7211_v43 = vcombine.low %v2791_v29, %v2807_v24 }
 0x452   :  { %6360 = vmatprep.subr.bf16.mxu1 %v7406_v60  ;;  %v7213_v60 = vcombine.low %v2792_v51, %v2808_v52  ;;  %v7182_v61 = vcombine.high %v2760_v41, %v2776_v45  ;;  %v7181_v1 = vcombine.low %v2760_v41, %v2776_v45 }
 0x454   :  { %6320 = vmatpush2.bf16.msra.mxu0 %v7403_v46  ;;  %v3003_v46 = vld [vmem:[%s9799_s6 + $0x10] sm:$0xff] }
 0x455   :  { %6361 = vmatpush2.bf16.msra.mxu1 %v7405_v58  ;;  %6321 = vmatprep.subr.bf16.mxu0 %v7372_v2  ;;  %v3076_v58 = vrot.slane %v3003_v46, %v8049_v37  ;;  %v3080_v2 = vrot.slane %v3003_v46, %v8057_v39  ;;  %v3084_v9 = vrot.slane %v3003_v46, %v8148_v57 }
 0x456   :  { %6362 = vmatprep.subr.bf16.mxu1 %v7374_v8  ;;  %v3088_v10 = vrot.slane %v3003_v46, %v8157_v59  ;;  %v3096_v33 = vrot.slane %v3003_v46, %v9124_v18 }
 0x458   :  { %6322 = vmatpush2.bf16.msra.mxu0 %v7371_v13 }
 0x459   :  { %6363 = vmatpush2.bf16.msra.mxu1 %v7373_v16  ;;  %6323 = vmatprep.subr.bf16.mxu0 %v7340_v38 }
 0x45a   :  { %6364 = vmatprep.subr.bf16.mxu1 %v7342_v17 }
 0x45c   :  { %6324 = vmatpush2.bf16.msra.mxu0 %v7339_v27 }
 0x45d   :  { %6365 = vmatpush2.bf16.msra.mxu1 %v7341_v28  ;;  %6325 = vmatprep.subr.bf16.mxu0 %v7308_v5 }
 0x45e   :  { %6366 = vmatprep.subr.bf16.mxu1 %v7310_v30 }
 0x460   :  { %6326 = vmatpush2.bf16.msra.mxu0 %v7307_v35  ;;  %v3100_v35 = vrot.slane %v3003_v46, %v9121_v50 }
 0x461   :  { %6367 = vmatpush2.bf16.msra.mxu1 %v7309_v36  ;;  %6327 = vmatprep.subr.bf16.mxu0 %v7276_v44  ;;  %v3104_v36 = vrot.slane %v3003_v46, %v9127_v15 }
 0x462   :  { %6368 = vmatprep.subr.bf16.mxu1 %v7278_v47 }
 0x464   :  { %6328 = vmatpush2.bf16.msra.mxu0 %v7275_v3 }
 0x465   :  { %6369 = vmatpush2.bf16.msra.mxu1 %v7277_v49  ;;  %6329 = vmatprep.subr.bf16.mxu0 %v7244_v63 }
 0x466   :  { %6370 = vmatprep.subr.bf16.mxu1 %v7246_v20 }
 0x468   :  { %6330 = vmatpush2.bf16.msra.mxu0 %v7243_v40 }
 0x469   :  { %6371 = vmatpush2.bf16.msra.mxu1 %v7245_v42  ;;  %6331 = vmatprep.subr.bf16.mxu0 %v7212_v53  ;;  %v3004_v53 = vld [vmem:[%s9799_s6 + $0x18] sm:$0xff] }
 0x46a   :  { %6372 = vmatprep.subr.bf16.mxu1 %v7214_v54  ;;  %v3108_v54 = vrot.slane %v3004_v53, %v8049_v37  ;;  %v3112_v55 = vrot.slane %v3004_v53, %v8057_v39  ;;  %v3116_v41 = vrot.slane %v3004_v53, %v8148_v57  ;;  %v3120_v45 = vrot.slane %v3004_v53, %v8157_v59 }
 0x46b   :  { %v3124_v59 = vrot.slane %v3004_v53, %v9118_v48 }
 0x46c   :  { %6332 = vmatpush2.bf16.msra.mxu0 %v7211_v43 }
 0x46d   :  { %6373 = vmatpush2.bf16.msra.mxu1 %v7213_v60  ;;  %6333 = vmatprep.subr.bf16.mxu0 %v7180_v22 }
 0x46e   :  { %6374 = vmatprep.subr.bf16.mxu1 %v7182_v61 }
 0x470   :  { %6334 = vmatpush2.bf16.msra.mxu0 %v7179_v0 }
 0x471   :  { %6375 = vmatpush2.bf16.msra.mxu1 %v7181_v1 }
 0x473   :  { %v6091_v8 = vpop.f32.mrf.mxu0  ;;  %6336 = vmatmul.mubr.bf16.vlgmr.msra.gmra.mxu0 %v8320_v23 }
 0x474   :  { %v6132_v11 = vpop.f32.mrf.mxu1  ;;  %6377 = vmatmul.mubr.bf16.vlgmr.msra.gmra.mxu1 %v8320_v23  ;;  %v6092_v13 = vadd.f32 %v6091_v8, %v3076_v58  ;;  %v3092_v23 = vrot.slane %v3003_v46, %v9118_v48 }
 0x475   :  { %v6093_v12 = vpop.f32.mrf.mxu0  ;;  %v6133_v17 = vadd.f32 %v6132_v11, %v3084_v9 }
 0x476   :  { %v6094_v16 = vadd.f32 %v6093_v12, %v3080_v2  ;;  %v6134_v38 = vpop.f32.mrf.mxu1  ;;  %v3128_v12 = vrot.slane %v3004_v53, %v9124_v18 }
 0x477   :  { %v6135_v21 = vadd.f32 %v6134_v38, %v3088_v10  ;;  %v6095_v4 = vpop.f32.mrf.mxu0  ;;  %v3136_v38 = vrot.slane %v3004_v53, %v9127_v15 }
 0x478   :  { %v6485_v25 = vcombine.low %v6092_v13, %v6094_v16  ;;  %v6136_v6 = vpop.f32.mrf.mxu1  ;;  %v3132_v16 = vrot.slane %v3004_v53, %v9121_v50 }
 0x479   :  { %v6486_v27 = vcombine.low %v6133_v17, %v6135_v21  ;;  %v6096_v28 = vpop.f32.mrf.mxu0 }
 0x47a   :  { %v6493_v5 = vrot.slane %v6485_v25, %v8940_v26  ;;  %v6137_v30 = vpop.f32.mrf.mxu1 }
 0x47b   :  { %v6500_v31 = vrot.slane %v6486_v27, %v8940_v26 }
 0x47d   :  { %v6501_v32 = vcombine.low %v6493_v5, %v6500_v31 }
 0x47f   :  { %6565 = vst [vmem:[%s9800_s7 + $0x20] sm:$0xff] %v6501_v32 }
 0x4b3   :  { %v6173_v34 = vpop.f32.mrf.mxu0 }
 0x4b4   :  { %v6214_v44 = vpop.f32.mrf.mxu1  ;;  %v6174_v7 = vadd.f32 %v6173_v34, %v3092_v23 }
 0x4b5   :  { %v6175_v47 = vpop.f32.mrf.mxu0  ;;  %v6215_v19 = vadd.f32 %v6214_v44, %v3100_v35 }
 0x4b6   :  { %v6176_v62 = vadd.f32 %v6175_v47, %v3096_v33  ;;  %v6216_v14 = vpop.f32.mrf.mxu1 }
 0x4b7   :  { %v6217_v3 = vadd.f32 %v6216_v14, %v3104_v36  ;;  %v6177_v49 = vpop.f32.mrf.mxu0 }
 0x4b8   :  { %v6502_v63 = vcombine.low %v6174_v7, %v6176_v62  ;;  %v6218_v20 = vpop.f32.mrf.mxu1 }
 0x4b9   :  { %v6503_v29 = vcombine.low %v6215_v19, %v6217_v3  ;;  %v6178_v24 = vpop.f32.mrf.mxu0 }
 0x4ba   :  { %v6510_v51 = vrot.slane %v6502_v63, %v8940_v26  ;;  %v6219_v52 = vpop.f32.mrf.mxu1 }
 0x4bb   :  { %v6517_v40 = vrot.slane %v6503_v29, %v8940_v26 }
 0x4bd   :  { %v6518_v42 = vcombine.low %v6510_v51, %v6517_v40 }
 0x4bf   :  { %6566 = vst [vmem:[%s9800_s7 + $0x28] sm:$0xff] %v6518_v42 }
 0x4f3   :  { %v6255_v56 = vpop.f32.mrf.mxu0 }
 0x4f4   :  { %v6296_v43 = vpop.f32.mrf.mxu1  ;;  %v6256_v22 = vadd.f32 %v6255_v56, %v3108_v54 }
 0x4f5   :  { %v6257_v60 = vpop.f32.mrf.mxu0  ;;  %v6297_v1 = vadd.f32 %v6296_v43, %v3116_v41 }
 0x4f6   :  { %v6258_v61 = vadd.f32 %v6257_v60, %v3112_v55  ;;  %v6298_v0 = vpop.f32.mrf.mxu1 }
 0x4f7   :  { %v6299_v46 = vadd.f32 %v6298_v0, %v3120_v45  ;;  %v6259_v58 = vpop.f32.mrf.mxu0 }
 0x4f8   :  { %v6519_v2 = vcombine.low %v6256_v22, %v6258_v61  ;;  %v6300_v8 = vpop.f32.mrf.mxu1 }
 0x4f9   :  { %v6520_v9 = vcombine.low %v6297_v1, %v6299_v46  ;;  %v6260_v10 = vpop.f32.mrf.mxu0 }
 0x4fa   :  { %v6527_v37 = vrot.slane %v6519_v2, %v8940_v26  ;;  %v6301_v39 = vpop.f32.mrf.mxu1 }
 0x4fb   :  { %v6534_v11 = vrot.slane %v6520_v9, %v8940_v26 }
 0x4fd   :  { %v6535_v57 = vcombine.low %v6527_v37, %v6534_v11 }
 0x4ff   :  { %6567 = vst [vmem:[%s9800_s7 + $0x30] sm:$0xff] %v6535_v57 }
 0x533   :  { %v6337_v13 = vpop.f32.mrf.mxu0 }
 0x534   :  { %v6378_v17 = vpop.f32.mrf.mxu1  ;;  %v6338_v4 = vadd.f32 %v6337_v13, %v3124_v59 }
 0x535   :  { %v6339_v21 = vpop.f32.mrf.mxu0  ;;  %v6379_v27 = vadd.f32 %v6378_v17, %v3132_v16 }
 0x536   :  { %v6340_v25 = vadd.f32 %v6339_v21, %v3128_v12  ;;  %v6380_v6 = vpop.f32.mrf.mxu1 }
 0x537   :  { %v6381_v28 = vadd.f32 %v6380_v6, %v3136_v38  ;;  %v6341_v5 = vpop.f32.mrf.mxu0 }
 0x538   :  { %v6536_v30 = vcombine.low %v6338_v4, %v6340_v25  ;;  %v6382_v31 = vpop.f32.mrf.mxu1 }
 0x539   :  { %v6537_v32 = vcombine.low %v6379_v27, %v6381_v28  ;;  %v6342_v23 = vpop.f32.mrf.mxu0 }
 0x53a   :  { %v6544_v48 = vrot.slane %v6536_v30, %v8940_v26  ;;  %v6383_v18 = vpop.f32.mrf.mxu1 }
 0x53b   :  { %v6551_v33 = vrot.slane %v6537_v32, %v8940_v26 }
 0x53d   :  { %v6552_v50 = vcombine.low %v6544_v48, %v6551_v33 }
 0x53f   :  { %6568 = vst [vmem:[%s9800_s7 + $0x38] sm:$0xff] %v6552_v50 }
 0x540   :  { %6573 = vsyncpa [#allocation3], 1 }
 0x541   :  { %6574 = vsyncpa [#allocation5], 1 }

</bundles_post_ra>
